<compile_context>
chip_gen: v6e
topology: v6e:2x2x1
jax: 0.10.0
libtpu: 0.0.40
codegen_flags: <defaults>
</compile_context>

<pallas_src>
import functools

import jax
import jax.numpy as jnp
from jax import lax
from jax.experimental import pallas as pl
from jax.experimental.pallas import tpu as pltpu


# ----------------------------------------------------------------------------
# Pallas kernels
# ----------------------------------------------------------------------------
def _conv3x3s2_kernel(x_ref, w_ref, b_ref, o_ref, *, oh, ow):
    """Fused 3x3 / stride-2 / pad-1 conv + bias + ReLU on a space-to-depth image.

    x_ref: [1, oh+1, ow+1, 4*Cin]  f32  (2x2 space-to-depth of one padded image)
    w_ref: [2, 2, 4*Cin, Cout]     f32  (space-to-depth-transformed conv weight)
    b_ref: [1, Cout]               f32
    o_ref: [1, oh*ow, Cout]        f32
    """
    c4 = x_ref.shape[-1]
    cout = w_ref.shape[-1]
    m = oh * ow

    x = x_ref[0]                                   # [oh+1, ow+1, 4*Cin]
    acc = jnp.zeros((m, cout), jnp.float32)
    # 4 contiguous taps, fully unrolled: the whole reduction is VMEM resident,
    # so there is no K grid axis, accumulator scratch, or pl.when phase.
    for dh in range(2):
        for dw in range(2):
            tap = x[dh:dh + oh, dw:dw + ow, :].reshape(m, c4)
            acc = acc + jnp.dot(tap, w_ref[dh, dw, :, :],
                                preferred_element_type=jnp.float32)
    o_ref[0] = jnp.maximum(acc + b_ref[...], 0.0)


def _fc_kernel(x_ref, w_ref, b_ref, o_ref, acc_ref):
    """y = x @ w + b, N-tiled, with optional K tiling (f32 accumulator)."""
    k = pl.program_id(1)

    @pl.when(k == 0)
    def _():
        acc_ref[...] = jnp.zeros_like(acc_ref)

    acc_ref[...] += jnp.dot(x_ref[...], w_ref[...],
                            preferred_element_type=jnp.float32)

    @pl.when(k == pl.num_programs(1) - 1)
    def _():
        o_ref[...] = (acc_ref[...] + b_ref[...]).astype(o_ref.dtype)


# ----------------------------------------------------------------------------
# Conv2d(k=3, s=2, p=1) + ReLU via space-to-depth + fused Pallas kernel
# ----------------------------------------------------------------------------
def _s2d_weight(w_hwio):
    """[3,3,Cin,Cout] conv weight -> [2,2,4*Cin,Cout] space-to-depth weight."""
    kh, kw, cin, cout = w_hwio.shape
    w4 = jnp.zeros((4, 4, cin, cout), w_hwio.dtype).at[:kh, :kw].set(w_hwio)
    w4 = w4.reshape(2, 2, 2, 2, cin, cout)      # [dh, rh, dw, rw, ci, co]
    w4 = w4.transpose(0, 2, 1, 3, 4, 5)          # [dh, dw, rh, rw, ci, co]
    return w4.reshape(2, 2, 4 * cin, cout)


def conv2d_s2d_relu(x_nhwc, w_hwio, b):
    B, H, W, C = x_nhwc.shape
    assert H % 2 == 0 and W % 2 == 0
    cout = w_hwio.shape[-1]
    OH, OW = H // 2, W // 2
    # Round the output width up to a multiple of 8 so the in-kernel
    # (oh, OWp, 4C)->(oh*OWp, 4C) collapse is whole-sublane-tile aligned.
    OWp = max(8, ((OW + 7) // 8) * 8)

    pad_w_right = 1 + 2 * (OWp - OW)
    xp = jnp.pad(x_nhwc, ((0, 0), (1, 1), (1, pad_w_right), (0, 0)))
    # 2x2 space-to-depth: [B, 2*(OH+1), 2*(OWp+1), C] -> [B, OH+1, OWp+1, 4C]
    xs = xp.reshape(B, OH + 1, 2, OWp + 1, 2, C)
    xs = xs.transpose(0, 1, 3, 2, 4, 5).reshape(B, OH + 1, OWp + 1, 4 * C)

    w2 = _s2d_weight(w_hwio)

    y = pl.pallas_call(
        functools.partial(_conv3x3s2_kernel, oh=OH, ow=OWp),
        out_shape=jax.ShapeDtypeStruct((B, OH * OWp, cout), jnp.float32),
        grid=(B,),
        in_specs=[
            pl.BlockSpec((1, OH + 1, OWp + 1, 4 * C), lambda bb: (bb, 0, 0, 0)),
            pl.BlockSpec((2, 2, 4 * C, cout), lambda bb: (0, 0, 0, 0)),
            pl.BlockSpec((1, cout), lambda bb: (0, 0)),
        ],
        out_specs=pl.BlockSpec((1, OH * OWp, cout), lambda bb: (bb, 0, 0)),
        compiler_params=pltpu.CompilerParams(
            dimension_semantics=("parallel",),
            vmem_limit_bytes=32 * 1024 * 1024),
    )(xs, w2, b.reshape(1, cout))

    y = y.reshape(B, OH, OWp, cout)
    if OWp != OW:
        y = y[:, :, :OW, :]
    return y


# ----------------------------------------------------------------------------
# Linear: N-tiled, K tiled only when it will not fit VMEM, bf16 weight
# ----------------------------------------------------------------------------
def linear(x, w_bf16, b, *, tn=512, vmem_budget=24 * 1024 * 1024):
    M, K = x.shape
    K2, N = w_bf16.shape
    assert K == K2
    x = x.astype(jnp.bfloat16)                 # cast once (halves act DMA)

    if N % tn != 0:
        tn = N
    nt_n = N // tn

    # Pick the largest K tile whose double-buffered tiles fit the VMEM budget
    # (single full-K block whenever possible -> K grid axis of size 1).
    tk = None
    for cand in (K, 16384, 8192, 4096, 2048, 1024, 512, 256, 128):
        if cand <= K and K % cand == 0:
            need = 2 * (cand * tn * 2 + M * cand * 2) + 3 * M * tn * 4
            if need <= vmem_budget:
                tk = cand
                break
    if tk is None:
        tk = K
    nt_k = K // tk

    return pl.pallas_call(
        _fc_kernel,
        out_shape=jax.ShapeDtypeStruct((M, N), jnp.float32),
        grid=(nt_n, nt_k),
        in_specs=[
            pl.BlockSpec((M, tk), lambda j, k: (0, k)),    # bf16 activations
            pl.BlockSpec((tk, tn), lambda j, k: (k, j)),   # bf16 weight tile
            pl.BlockSpec((1, tn), lambda j, k: (0, j)),    # bias
        ],
        out_specs=pl.BlockSpec((M, tn), lambda j, k: (0, j)),
        scratch_shapes=[pltpu.VMEM((M, tn), jnp.float32)],
        compiler_params=pltpu.CompilerParams(
            dimension_semantics=("parallel", "arbitrary"),
            vmem_limit_bytes=32 * 1024 * 1024),
        cost_estimate=pl.CostEstimate(
            flops=2 * M * K * N,
            transcendentals=0,
            bytes_accessed=M * K * 2 + K * N * 2 + M * N * 4),
    )(x, w_bf16, b.reshape(1, N))


# ----------------------------------------------------------------------------
# FeatureExtractor1 forward
# ----------------------------------------------------------------------------
@jax.jit
def feature_extractor_forward(x_nchw, params):
    x = jnp.transpose(x_nchw, (0, 2, 3, 1)).astype(jnp.float32)   # NCHW -> NHWC
    for w, b in params["convs"]:
        x = conv2d_s2d_relu(x, w, b)
    n = x.shape[0]
    flat = x.reshape(n, -1)                                       # (h, w, c)
    return linear(flat, params["fc_w"], params["fc_b"])


def init_params(key, h, w):
    """Conv stack 3->32->64->128->256 (k=3, s=2, p=1) + Linear(->2048).

    Conv weights are HWIO f32; the FC weight is stored in bf16 and defined
    over the (h, w, c)-ordered flatten used by this NHWC implementation
    (permute PyTorch weights accordingly when loading real checkpoints).
    """
    chans = [(3, 32), (32, 64), (64, 128), (128, 256)]
    keys = jax.random.split(key, 2 * len(chans) + 2)
    convs = []
    for i, (cin, cout) in enumerate(chans):
        wk, bk = keys[2 * i], keys[2 * i + 1]
        convs.append((
            0.05 * jax.random.normal(wk, (3, 3, cin, cout), jnp.float32),
            0.05 * jax.random.normal(bk, (cout,), jnp.float32),
        ))
    flattened_size = 256 * (h // 16) * (w // 16)
    fc_w = (0.01 * jax.random.normal(keys[-2], (flattened_size, 2048),
                                     jnp.float32)).astype(jnp.bfloat16)
    fc_b = 0.01 * jax.random.normal(keys[-1], (2048,), jnp.float32)
    return {"convs": convs, "fc_w": fc_w, "fc_b": fc_b}


# Pure-JAX reference (correctness sanity check)
def _reference_forward(x_nchw, params):
    x = jnp.transpose(x_nchw, (0, 2, 3, 1)).astype(jnp.float32)
    for w, b in params["convs"]:
        y = lax.conv_general_dilated(
            x, w, window_strides=(2, 2), padding=((1, 1), (1, 1)),
            dimension_numbers=("NHWC", "HWIO", "NHWC"))
        x = jnp.maximum(y + b, 0.0)
    flat = x.reshape(x.shape[0], -1)
    y = jnp.dot(flat.astype(jnp.bfloat16), params["fc_w"],
                preferred_element_type=jnp.float32)
    return y + params["fc_b"]


if __name__ == "__main__":
    # Small shapes consistent with the module: 4 stride-2 convs take 32x32
    # spatial to 2x2, so flattened_size = 256 * (32//16) * (32//16) = 1024.
    B, C, H, W = 2, 3, 32, 32
    key = jax.random.PRNGKey(0)
    kx, kp = jax.random.split(key)
    x = jax.random.normal(kx, (B, C, H, W), jnp.float32)
    params = init_params(kp, H, W)

    out = jax.block_until_ready(feature_extractor_forward(x, params))
    assert out.shape == (B, 2048), out.shape

    ref = jax.block_until_ready(_reference_forward(x, params))
    max_err = float(jnp.max(jnp.abs(out - ref)))
    assert jnp.allclose(out, ref, rtol=1e-2, atol=1e-3), max_err

    print("KERNEL_OK")
</pallas_src>

<mosaic_0001>
module attributes {stable_mosaic.version = 11 : i64} {
  func.func @_conv3x3s2_kernel(%arg0: i32, %arg1: memref<1x17x17x12xf32, #tpu.memory_space<vmem>>, %arg2: memref<2x2x12x32xf32, #tpu.memory_space<vmem>>, %arg3: memref<1x32xf32, #tpu.memory_space<vmem>>, %arg4: memref<1x256x32xf32, #tpu.memory_space<vmem>>) attributes {dimension_semantics = [#tpu.dimension_semantics<parallel>], iteration_bounds = array<i64: 2>, scalar_prefetch = 0 : i64, scratch_operands = 0 : i64, tpu.core_type = #tpu.core_type<tc>, window_params = [{transform_indices = @transform_0, window_bounds = array<i64: 1, 17, 17, 12>}, {pipeline_mode = #tpu.pipeline_mode<synchronous>, transform_indices = @transform_1, window_bounds = array<i64: 2, 2, 12, 32>}, {pipeline_mode = #tpu.pipeline_mode<synchronous>, transform_indices = @transform_2, window_bounds = array<i64: 1, 32>}, {transform_indices = @transform_3, window_bounds = array<i64: 1, 256, 32>}]} {
    %c0 = arith.constant 0 : index
    %c0_0 = arith.constant 0 : index
    %c0_1 = arith.constant 0 : index
    %c0_2 = arith.constant 0 : index
    %0 = vector.load %arg1[%c0, %c0_0, %c0_1, %c0_2] : memref<1x17x17x12xf32, #tpu.memory_space<vmem>>, vector<1x17x17x12xf32>
    %1 = vector.shape_cast %0 : vector<1x17x17x12xf32> to vector<17x17x12xf32>
    %cst = arith.constant 0.000000e+00 : f32
    %2 = vector.broadcast %cst : f32 to vector<256x32xf32>
    %3 = vector.extract_strided_slice %1 {offsets = [0, 0, 0], sizes = [16, 16, 12], strides = [1, 1, 1]} : vector<17x17x12xf32> to vector<16x16x12xf32>
    %4 = vector.shape_cast %3 : vector<16x16x12xf32> to vector<256x12xf32>
    %c0_3 = arith.constant 0 : index
    %c0_4 = arith.constant 0 : index
    %c0_5 = arith.constant 0 : index
    %c0_6 = arith.constant 0 : index
    %5 = vector.load %arg2[%c0_3, %c0_4, %c0_5, %c0_6] : memref<2x2x12x32xf32, #tpu.memory_space<vmem>>, vector<1x1x12x32xf32>
    %6 = vector.shape_cast %5 : vector<1x1x12x32xf32> to vector<12x32xf32>
    %cst_7 = arith.constant dense<0.000000e+00> : vector<256x32xf32>
    %7 = tpu.matmul %4, %6, %cst_7 {dimension_numbers = #tpu.dot_dimension_numbers<[1], [0], [0], [1], [0, 0, 1, 1], [], []>} : vector<256x12xf32>, vector<12x32xf32>, vector<256x32xf32> -> vector<256x32xf32>
    %8 = arith.addf %2, %7 : vector<256x32xf32>
    %9 = vector.extract_strided_slice %1 {offsets = [0, 1, 0], sizes = [16, 16, 12], strides = [1, 1, 1]} : vector<17x17x12xf32> to vector<16x16x12xf32>
    %10 = vector.shape_cast %9 : vector<16x16x12xf32> to vector<256x12xf32>
    %c0_8 = arith.constant 0 : index
    %c1 = arith.constant 1 : index
    %c0_9 = arith.constant 0 : index
    %c0_10 = arith.constant 0 : index
    %11 = vector.load %arg2[%c0_8, %c1, %c0_9, %c0_10] : memref<2x2x12x32xf32, #tpu.memory_space<vmem>>, vector<1x1x12x32xf32>
    %12 = vector.shape_cast %11 : vector<1x1x12x32xf32> to vector<12x32xf32>
    %cst_11 = arith.constant dense<0.000000e+00> : vector<256x32xf32>
    %13 = tpu.matmul %10, %12, %cst_11 {dimension_numbers = #tpu.dot_dimension_numbers<[1], [0], [0], [1], [0, 0, 1, 1], [], []>} : vector<256x12xf32>, vector<12x32xf32>, vector<256x32xf32> -> vector<256x32xf32>
    %14 = arith.addf %8, %13 : vector<256x32xf32>
    %15 = vector.extract_strided_slice %1 {offsets = [1, 0, 0], sizes = [16, 16, 12], strides = [1, 1, 1]} : vector<17x17x12xf32> to vector<16x16x12xf32>
    %16 = vector.shape_cast %15 : vector<16x16x12xf32> to vector<256x12xf32>
    %c1_12 = arith.constant 1 : index
    %c0_13 = arith.constant 0 : index
    %c0_14 = arith.constant 0 : index
    %c0_15 = arith.constant 0 : index
    %17 = vector.load %arg2[%c1_12, %c0_13, %c0_14, %c0_15] : memref<2x2x12x32xf32, #tpu.memory_space<vmem>>, vector<1x1x12x32xf32>
    %18 = vector.shape_cast %17 : vector<1x1x12x32xf32> to vector<12x32xf32>
    %cst_16 = arith.constant dense<0.000000e+00> : vector<256x32xf32>
    %19 = tpu.matmul %16, %18, %cst_16 {dimension_numbers = #tpu.dot_dimension_numbers<[1], [0], [0], [1], [0, 0, 1, 1], [], []>} : vector<256x12xf32>, vector<12x32xf32>, vector<256x32xf32> -> vector<256x32xf32>
    %20 = arith.addf %14, %19 : vector<256x32xf32>
    %21 = vector.extract_strided_slice %1 {offsets = [1, 1, 0], sizes = [16, 16, 12], strides = [1, 1, 1]} : vector<17x17x12xf32> to vector<16x16x12xf32>
    %22 = vector.shape_cast %21 : vector<16x16x12xf32> to vector<256x12xf32>
    %c1_17 = arith.constant 1 : index
    %c1_18 = arith.constant 1 : index
    %c0_19 = arith.constant 0 : index
    %c0_20 = arith.constant 0 : index
    %23 = vector.load %arg2[%c1_17, %c1_18, %c0_19, %c0_20] : memref<2x2x12x32xf32, #tpu.memory_space<vmem>>, vector<1x1x12x32xf32>
    %24 = vector.shape_cast %23 : vector<1x1x12x32xf32> to vector<12x32xf32>
    %cst_21 = arith.constant dense<0.000000e+00> : vector<256x32xf32>
    %25 = tpu.matmul %22, %24, %cst_21 {dimension_numbers = #tpu.dot_dimension_numbers<[1], [0], [0], [1], [0, 0, 1, 1], [], []>} : vector<256x12xf32>, vector<12x32xf32>, vector<256x32xf32> -> vector<256x32xf32>
    %26 = arith.addf %20, %25 : vector<256x32xf32>
    %c0_22 = arith.constant 0 : index
    %c0_23 = arith.constant 0 : index
    %27 = vector.load %arg3[%c0_22, %c0_23] : memref<1x32xf32, #tpu.memory_space<vmem>>, vector<1x32xf32>
    %28 = vector.broadcast %27 : vector<1x32xf32> to vector<256x32xf32>
    %29 = arith.addf %26, %28 : vector<256x32xf32>
    %cst_24 = arith.constant 0.000000e+00 : f32
    %30 = vector.broadcast %cst_24 : f32 to vector<256x32xf32>
    %31 = arith.maximumf %29, %30 : vector<256x32xf32>
    %c0_25 = arith.constant 0 : index
    %c0_26 = arith.constant 0 : index
    %c0_27 = arith.constant 0 : index
    %32 = vector.load %arg4[%c0_25, %c0_26, %c0_27] : memref<1x256x32xf32, #tpu.memory_space<vmem>>, vector<1x256x32xf32>
    %33 = vector.shape_cast %32 : vector<1x256x32xf32> to vector<256x32xf32>
    %34 = vector.shape_cast %31 : vector<256x32xf32> to vector<1x256x32xf32>
    tpu.vector_store %arg4[%c0_25, %c0_26, %c0_27], %34 {strides = array<i32>} : memref<1x256x32xf32, #tpu.memory_space<vmem>>, vector<1x256x32xf32>,
    return
  }
  func.func @transform_0(%arg0: i32) -> (i32, i32, i32, i32) {
    %c0_i32 = arith.constant 0 : i32
    %c0_i32_0 = arith.constant 0 : i32
    %c0_i32_1 = arith.constant 0 : i32
    %c0_i32_2 = arith.constant 0 : i32
    return %arg0, %c0_i32, %c0_i32_0, %c0_i32_1 : i32, i32, i32, i32
  }
  func.func @transform_1(%arg0: i32) -> (i32, i32, i32, i32) {
    %c0_i32 = arith.constant 0 : i32
    %c0_i32_0 = arith.constant 0 : i32
    %c0_i32_1 = arith.constant 0 : i32
    %c0_i32_2 = arith.constant 0 : i32
    %c0_i32_3 = arith.constant 0 : i32
    return %c0_i32, %c0_i32_0, %c0_i32_1, %c0_i32_2 : i32, i32, i32, i32
  }
  func.func @transform_2(%arg0: i32) -> (i32, i32) {
    %c0_i32 = arith.constant 0 : i32
    %c0_i32_0 = arith.constant 0 : i32
    %c0_i32_1 = arith.constant 0 : i32
    return %c0_i32, %c0_i32_0 : i32, i32
  }
  func.func @transform_3(%arg0: i32) -> (i32, i32, i32) {
    %c0_i32 = arith.constant 0 : i32
    %c0_i32_0 = arith.constant 0 : i32
    %c0_i32_1 = arith.constant 0 : i32
    return %arg0, %c0_i32, %c0_i32_0 : i32, i32, i32
  }
}

module attributes {stable_mosaic.version = 11 : i64} {
  func.func @_conv3x3s2_kernel(%arg0: i32, %arg1: memref<1x9x9x128xf32, #tpu.memory_space<vmem>>, %arg2: memref<2x2x128x64xf32, #tpu.memory_space<vmem>>, %arg3: memref<1x64xf32, #tpu.memory_space<vmem>>, %arg4: memref<1x64x64xf32, #tpu.memory_space<vmem>>) attributes {dimension_semantics = [#tpu.dimension_semantics<parallel>], iteration_bounds = array<i64: 2>, scalar_prefetch = 0 : i64, scratch_operands = 0 : i64, tpu.core_type = #tpu.core_type<tc>, window_params = [{transform_indices = @transform_0, window_bounds = array<i64: 1, 9, 9, 128>}, {pipeline_mode = #tpu.pipeline_mode<synchronous>, transform_indices = @transform_1, window_bounds = array<i64: 2, 2, 128, 64>}, {pipeline_mode = #tpu.pipeline_mode<synchronous>, transform_indices = @transform_2, window_bounds = array<i64: 1, 64>}, {transform_indices = @transform_3, window_bounds = array<i64: 1, 64, 64>}]} {
    %c0 = arith.constant 0 : index
    %c0_0 = arith.constant 0 : index
    %c0_1 = arith.constant 0 : index
    %c0_2 = arith.constant 0 : index
    %0 = vector.load %arg1[%c0, %c0_0, %c0_1, %c0_2] : memref<1x9x9x128xf32, #tpu.memory_space<vmem>>, vector<1x9x9x128xf32>
    %1 = vector.shape_cast %0 : vector<1x9x9x128xf32> to vector<9x9x128xf32>
    %cst = arith.constant 0.000000e+00 : f32
    %2 = vector.broadcast %cst : f32 to vector<64x64xf32>
    %3 = vector.extract_strided_slice %1 {offsets = [0, 0, 0], sizes = [8, 8, 128], strides = [1, 1, 1]} : vector<9x9x128xf32> to vector<8x8x128xf32>
    %4 = vector.shape_cast %3 : vector<8x8x128xf32> to vector<64x128xf32>
    %c0_3 = arith.constant 0 : index
    %c0_4 = arith.constant 0 : index
    %c0_5 = arith.constant 0 : index
    %c0_6 = arith.constant 0 : index
    %5 = vector.load %arg2[%c0_3, %c0_4, %c0_5, %c0_6] : memref<2x2x128x64xf32, #tpu.memory_space<vmem>>, vector<1x1x128x64xf32>
    %6 = vector.shape_cast %5 : vector<1x1x128x64xf32> to vector<128x64xf32>
    %cst_7 = arith.constant dense<0.000000e+00> : vector<64x64xf32>
    %7 = tpu.matmul %4, %6, %cst_7 {dimension_numbers = #tpu.dot_dimension_numbers<[1], [0], [0], [1], [0, 0, 1, 1], [], []>} : vector<64x128xf32>, vector<128x64xf32>, vector<64x64xf32> -> vector<64x64xf32>
    %8 = arith.addf %2, %7 : vector<64x64xf32>
    %9 = vector.extract_strided_slice %1 {offsets = [0, 1, 0], sizes = [8, 8, 128], strides = [1, 1, 1]} : vector<9x9x128xf32> to vector<8x8x128xf32>
    %10 = vector.shape_cast %9 : vector<8x8x128xf32> to vector<64x128xf32>
    %c0_8 = arith.constant 0 : index
    %c1 = arith.constant 1 : index
    %c0_9 = arith.constant 0 : index
    %c0_10 = arith.constant 0 : index
    %11 = vector.load %arg2[%c0_8, %c1, %c0_9, %c0_10] : memref<2x2x128x64xf32, #tpu.memory_space<vmem>>, vector<1x1x128x64xf32>
    %12 = vector.shape_cast %11 : vector<1x1x128x64xf32> to vector<128x64xf32>
    %cst_11 = arith.constant dense<0.000000e+00> : vector<64x64xf32>
    %13 = tpu.matmul %10, %12, %cst_11 {dimension_numbers = #tpu.dot_dimension_numbers<[1], [0], [0], [1], [0, 0, 1, 1], [], []>} : vector<64x128xf32>, vector<128x64xf32>, vector<64x64xf32> -> vector<64x64xf32>
    %14 = arith.addf %8, %13 : vector<64x64xf32>
    %15 = vector.extract_strided_slice %1 {offsets = [1, 0, 0], sizes = [8, 8, 128], strides = [1, 1, 1]} : vector<9x9x128xf32> to vector<8x8x128xf32>
    %16 = vector.shape_cast %15 : vector<8x8x128xf32> to vector<64x128xf32>
    %c1_12 = arith.constant 1 : index
    %c0_13 = arith.constant 0 : index
    %c0_14 = arith.constant 0 : index
    %c0_15 = arith.constant 0 : index
    %17 = vector.load %arg2[%c1_12, %c0_13, %c0_14, %c0_15] : memref<2x2x128x64xf32, #tpu.memory_space<vmem>>, vector<1x1x128x64xf32>
    %18 = vector.shape_cast %17 : vector<1x1x128x64xf32> to vector<128x64xf32>
    %cst_16 = arith.constant dense<0.000000e+00> : vector<64x64xf32>
    %19 = tpu.matmul %16, %18, %cst_16 {dimension_numbers = #tpu.dot_dimension_numbers<[1], [0], [0], [1], [0, 0, 1, 1], [], []>} : vector<64x128xf32>, vector<128x64xf32>, vector<64x64xf32> -> vector<64x64xf32>
    %20 = arith.addf %14, %19 : vector<64x64xf32>
    %21 = vector.extract_strided_slice %1 {offsets = [1, 1, 0], sizes = [8, 8, 128], strides = [1, 1, 1]} : vector<9x9x128xf32> to vector<8x8x128xf32>
    %22 = vector.shape_cast %21 : vector<8x8x128xf32> to vector<64x128xf32>
    %c1_17 = arith.constant 1 : index
    %c1_18 = arith.constant 1 : index
    %c0_19 = arith.constant 0 : index
    %c0_20 = arith.constant 0 : index
    %23 = vector.load %arg2[%c1_17, %c1_18, %c0_19, %c0_20] : memref<2x2x128x64xf32, #tpu.memory_space<vmem>>, vector<1x1x128x64xf32>
    %24 = vector.shape_cast %23 : vector<1x1x128x64xf32> to vector<128x64xf32>
    %cst_21 = arith.constant dense<0.000000e+00> : vector<64x64xf32>
    %25 = tpu.matmul %22, %24, %cst_21 {dimension_numbers = #tpu.dot_dimension_numbers<[1], [0], [0], [1], [0, 0, 1, 1], [], []>} : vector<64x128xf32>, vector<128x64xf32>, vector<64x64xf32> -> vector<64x64xf32>
    %26 = arith.addf %20, %25 : vector<64x64xf32>
    %c0_22 = arith.constant 0 : index
    %c0_23 = arith.constant 0 : index
    %27 = vector.load %arg3[%c0_22, %c0_23] : memref<1x64xf32, #tpu.memory_space<vmem>>, vector<1x64xf32>
    %28 = vector.broadcast %27 : vector<1x64xf32> to vector<64x64xf32>
    %29 = arith.addf %26, %28 : vector<64x64xf32>
    %cst_24 = arith.constant 0.000000e+00 : f32
    %30 = vector.broadcast %cst_24 : f32 to vector<64x64xf32>
    %31 = arith.maximumf %29, %30 : vector<64x64xf32>
    %c0_25 = arith.constant 0 : index
    %c0_26 = arith.constant 0 : index
    %c0_27 = arith.constant 0 : index
    %32 = vector.load %arg4[%c0_25, %c0_26, %c0_27] : memref<1x64x64xf32, #tpu.memory_space<vmem>>, vector<1x64x64xf32>
    %33 = vector.shape_cast %32 : vector<1x64x64xf32> to vector<64x64xf32>
    %34 = vector.shape_cast %31 : vector<64x64xf32> to vector<1x64x64xf32>
    tpu.vector_store %arg4[%c0_25, %c0_26, %c0_27], %34 {strides = array<i32>} : memref<1x64x64xf32, #tpu.memory_space<vmem>>, vector<1x64x64xf32>,
    return
  }
  func.func @transform_0(%arg0: i32) -> (i32, i32, i32, i32) {
    %c0_i32 = arith.constant 0 : i32
    %c0_i32_0 = arith.constant 0 : i32
    %c0_i32_1 = arith.constant 0 : i32
    %c0_i32_2 = arith.constant 0 : i32
    return %arg0, %c0_i32, %c0_i32_0, %c0_i32_1 : i32, i32, i32, i32
  }
  func.func @transform_1(%arg0: i32) -> (i32, i32, i32, i32) {
    %c0_i32 = arith.constant 0 : i32
    %c0_i32_0 = arith.constant 0 : i32
    %c0_i32_1 = arith.constant 0 : i32
    %c0_i32_2 = arith.constant 0 : i32
    %c0_i32_3 = arith.constant 0 : i32
    return %c0_i32, %c0_i32_0, %c0_i32_1, %c0_i32_2 : i32, i32, i32, i32
  }
  func.func @transform_2(%arg0: i32) -> (i32, i32) {
    %c0_i32 = arith.constant 0 : i32
    %c0_i32_0 = arith.constant 0 : i32
    %c0_i32_1 = arith.constant 0 : i32
    return %c0_i32, %c0_i32_0 : i32, i32
  }
  func.func @transform_3(%arg0: i32) -> (i32, i32, i32) {
    %c0_i32 = arith.constant 0 : i32
    %c0_i32_0 = arith.constant 0 : i32
    %c0_i32_1 = arith.constant 0 : i32
    return %arg0, %c0_i32, %c0_i32_0 : i32, i32, i32
  }
}

module attributes {stable_mosaic.version = 11 : i64} {
  func.func @_conv3x3s2_kernel(%arg0: i32, %arg1: memref<1x5x9x256xf32, #tpu.memory_space<vmem>>, %arg2: memref<2x2x256x128xf32, #tpu.memory_space<vmem>>, %arg3: memref<1x128xf32, #tpu.memory_space<vmem>>, %arg4: memref<1x32x128xf32, #tpu.memory_space<vmem>>) attributes {dimension_semantics = [#tpu.dimension_semantics<parallel>], iteration_bounds = array<i64: 2>, scalar_prefetch = 0 : i64, scratch_operands = 0 : i64, tpu.core_type = #tpu.core_type<tc>, window_params = [{transform_indices = @transform_0, window_bounds = array<i64: 1, 5, 9, 256>}, {pipeline_mode = #tpu.pipeline_mode<synchronous>, transform_indices = @transform_1, window_bounds = array<i64: 2, 2, 256, 128>}, {pipeline_mode = #tpu.pipeline_mode<synchronous>, transform_indices = @transform_2, window_bounds = array<i64: 1, 128>}, {transform_indices = @transform_3, window_bounds = array<i64: 1, 32, 128>}]} {
    %c0 = arith.constant 0 : index
    %c0_0 = arith.constant 0 : index
    %c0_1 = arith.constant 0 : index
    %c0_2 = arith.constant 0 : index
    %0 = vector.load %arg1[%c0, %c0_0, %c0_1, %c0_2] : memref<1x5x9x256xf32, #tpu.memory_space<vmem>>, vector<1x5x9x256xf32>
    %1 = vector.shape_cast %0 : vector<1x5x9x256xf32> to vector<5x9x256xf32>
    %cst = arith.constant 0.000000e+00 : f32
    %2 = vector.broadcast %cst : f32 to vector<32x128xf32>
    %3 = vector.extract_strided_slice %1 {offsets = [0, 0, 0], sizes = [4, 8, 256], strides = [1, 1, 1]} : vector<5x9x256xf32> to vector<4x8x256xf32>
    %4 = vector.shape_cast %3 : vector<4x8x256xf32> to vector<32x256xf32>
    %c0_3 = arith.constant 0 : index
    %c0_4 = arith.constant 0 : index
    %c0_5 = arith.constant 0 : index
    %c0_6 = arith.constant 0 : index
    %5 = vector.load %arg2[%c0_3, %c0_4, %c0_5, %c0_6] : memref<2x2x256x128xf32, #tpu.memory_space<vmem>>, vector<1x1x256x128xf32>
    %6 = vector.shape_cast %5 : vector<1x1x256x128xf32> to vector<256x128xf32>
    %cst_7 = arith.constant dense<0.000000e+00> : vector<32x128xf32>
    %7 = tpu.matmul %4, %6, %cst_7 {dimension_numbers = #tpu.dot_dimension_numbers<[1], [0], [0], [1], [0, 0, 1, 1], [], []>} : vector<32x256xf32>, vector<256x128xf32>, vector<32x128xf32> -> vector<32x128xf32>
    %8 = arith.addf %2, %7 : vector<32x128xf32>
    %9 = vector.extract_strided_slice %1 {offsets = [0, 1, 0], sizes = [4, 8, 256], strides = [1, 1, 1]} : vector<5x9x256xf32> to vector<4x8x256xf32>
    %10 = vector.shape_cast %9 : vector<4x8x256xf32> to vector<32x256xf32>
    %c0_8 = arith.constant 0 : index
    %c1 = arith.constant 1 : index
    %c0_9 = arith.constant 0 : index
    %c0_10 = arith.constant 0 : index
    %11 = vector.load %arg2[%c0_8, %c1, %c0_9, %c0_10] : memref<2x2x256x128xf32, #tpu.memory_space<vmem>>, vector<1x1x256x128xf32>
    %12 = vector.shape_cast %11 : vector<1x1x256x128xf32> to vector<256x128xf32>
    %cst_11 = arith.constant dense<0.000000e+00> : vector<32x128xf32>
    %13 = tpu.matmul %10, %12, %cst_11 {dimension_numbers = #tpu.dot_dimension_numbers<[1], [0], [0], [1], [0, 0, 1, 1], [], []>} : vector<32x256xf32>, vector<256x128xf32>, vector<32x128xf32> -> vector<32x128xf32>
    %14 = arith.addf %8, %13 : vector<32x128xf32>
    %15 = vector.extract_strided_slice %1 {offsets = [1, 0, 0], sizes = [4, 8, 256], strides = [1, 1, 1]} : vector<5x9x256xf32> to vector<4x8x256xf32>
    %16 = vector.shape_cast %15 : vector<4x8x256xf32> to vector<32x256xf32>
    %c1_12 = arith.constant 1 : index
    %c0_13 = arith.constant 0 : index
    %c0_14 = arith.constant 0 : index
    %c0_15 = arith.constant 0 : index
    %17 = vector.load %arg2[%c1_12, %c0_13, %c0_14, %c0_15] : memref<2x2x256x128xf32, #tpu.memory_space<vmem>>, vector<1x1x256x128xf32>
    %18 = vector.shape_cast %17 : vector<1x1x256x128xf32> to vector<256x128xf32>
    %cst_16 = arith.constant dense<0.000000e+00> : vector<32x128xf32>
    %19 = tpu.matmul %16, %18, %cst_16 {dimension_numbers = #tpu.dot_dimension_numbers<[1], [0], [0], [1], [0, 0, 1, 1], [], []>} : vector<32x256xf32>, vector<256x128xf32>, vector<32x128xf32> -> vector<32x128xf32>
    %20 = arith.addf %14, %19 : vector<32x128xf32>
    %21 = vector.extract_strided_slice %1 {offsets = [1, 1, 0], sizes = [4, 8, 256], strides = [1, 1, 1]} : vector<5x9x256xf32> to vector<4x8x256xf32>
    %22 = vector.shape_cast %21 : vector<4x8x256xf32> to vector<32x256xf32>
    %c1_17 = arith.constant 1 : index
    %c1_18 = arith.constant 1 : index
    %c0_19 = arith.constant 0 : index
    %c0_20 = arith.constant 0 : index
    %23 = vector.load %arg2[%c1_17, %c1_18, %c0_19, %c0_20] : memref<2x2x256x128xf32, #tpu.memory_space<vmem>>, vector<1x1x256x128xf32>
    %24 = vector.shape_cast %23 : vector<1x1x256x128xf32> to vector<256x128xf32>
    %cst_21 = arith.constant dense<0.000000e+00> : vector<32x128xf32>
    %25 = tpu.matmul %22, %24, %cst_21 {dimension_numbers = #tpu.dot_dimension_numbers<[1], [0], [0], [1], [0, 0, 1, 1], [], []>} : vector<32x256xf32>, vector<256x128xf32>, vector<32x128xf32> -> vector<32x128xf32>
    %26 = arith.addf %20, %25 : vector<32x128xf32>
    %c0_22 = arith.constant 0 : index
    %c0_23 = arith.constant 0 : index
    %27 = vector.load %arg3[%c0_22, %c0_23] : memref<1x128xf32, #tpu.memory_space<vmem>>, vector<1x128xf32>
    %28 = vector.broadcast %27 : vector<1x128xf32> to vector<32x128xf32>
    %29 = arith.addf %26, %28 : vector<32x128xf32>
    %cst_24 = arith.constant 0.000000e+00 : f32
    %30 = vector.broadcast %cst_24 : f32 to vector<32x128xf32>
    %31 = arith.maximumf %29, %30 : vector<32x128xf32>
    %c0_25 = arith.constant 0 : index
    %c0_26 = arith.constant 0 : index
    %c0_27 = arith.constant 0 : index
    %32 = vector.load %arg4[%c0_25, %c0_26, %c0_27] : memref<1x32x128xf32, #tpu.memory_space<vmem>>, vector<1x32x128xf32>
    %33 = vector.shape_cast %32 : vector<1x32x128xf32> to vector<32x128xf32>
    %34 = vector.shape_cast %31 : vector<32x128xf32> to vector<1x32x128xf32>
    tpu.vector_store %arg4[%c0_25, %c0_26, %c0_27], %34 {strides = array<i32>} : memref<1x32x128xf32, #tpu.memory_space<vmem>>, vector<1x32x128xf32>,
    return
  }
  func.func @transform_0(%arg0: i32) -> (i32, i32, i32, i32) {
    %c0_i32 = arith.constant 0 : i32
    %c0_i32_0 = arith.constant 0 : i32
    %c0_i32_1 = arith.constant 0 : i32
    %c0_i32_2 = arith.constant 0 : i32
    return %arg0, %c0_i32, %c0_i32_0, %c0_i32_1 : i32, i32, i32, i32
  }
  func.func @transform_1(%arg0: i32) -> (i32, i32, i32, i32) {
    %c0_i32 = arith.constant 0 : i32
    %c0_i32_0 = arith.constant 0 : i32
    %c0_i32_1 = arith.constant 0 : i32
    %c0_i32_2 = arith.constant 0 : i32
    %c0_i32_3 = arith.constant 0 : i32
    return %c0_i32, %c0_i32_0, %c0_i32_1, %c0_i32_2 : i32, i32, i32, i32
  }
  func.func @transform_2(%arg0: i32) -> (i32, i32) {
    %c0_i32 = arith.constant 0 : i32
    %c0_i32_0 = arith.constant 0 : i32
    %c0_i32_1 = arith.constant 0 : i32
    return %c0_i32, %c0_i32_0 : i32, i32
  }
  func.func @transform_3(%arg0: i32) -> (i32, i32, i32) {
    %c0_i32 = arith.constant 0 : i32
    %c0_i32_0 = arith.constant 0 : i32
    %c0_i32_1 = arith.constant 0 : i32
    return %arg0, %c0_i32, %c0_i32_0 : i32, i32, i32
  }
}

module attributes {stable_mosaic.version = 11 : i64} {
  func.func @_conv3x3s2_kernel(%arg0: i32, %arg1: memref<1x3x9x512xf32, #tpu.memory_space<vmem>>, %arg2: memref<2x2x512x256xf32, #tpu.memory_space<vmem>>, %arg3: memref<1x256xf32, #tpu.memory_space<vmem>>, %arg4: memref<1x16x256xf32, #tpu.memory_space<vmem>>) attributes {dimension_semantics = [#tpu.dimension_semantics<parallel>], iteration_bounds = array<i64: 2>, scalar_prefetch = 0 : i64, scratch_operands = 0 : i64, tpu.core_type = #tpu.core_type<tc>, window_params = [{transform_indices = @transform_0, window_bounds = array<i64: 1, 3, 9, 512>}, {pipeline_mode = #tpu.pipeline_mode<synchronous>, transform_indices = @transform_1, window_bounds = array<i64: 2, 2, 512, 256>}, {pipeline_mode = #tpu.pipeline_mode<synchronous>, transform_indices = @transform_2, window_bounds = array<i64: 1, 256>}, {transform_indices = @transform_3, window_bounds = array<i64: 1, 16, 256>}]} {
    %c0 = arith.constant 0 : index
    %c0_0 = arith.constant 0 : index
    %c0_1 = arith.constant 0 : index
    %c0_2 = arith.constant 0 : index
    %0 = vector.load %arg1[%c0, %c0_0, %c0_1, %c0_2] : memref<1x3x9x512xf32, #tpu.memory_space<vmem>>, vector<1x3x9x512xf32>
    %1 = vector.shape_cast %0 : vector<1x3x9x512xf32> to vector<3x9x512xf32>
    %cst = arith.constant 0.000000e+00 : f32
    %2 = vector.broadcast %cst : f32 to vector<16x256xf32>
    %3 = vector.extract_strided_slice %1 {offsets = [0, 0, 0], sizes = [2, 8, 512], strides = [1, 1, 1]} : vector<3x9x512xf32> to vector<2x8x512xf32>
    %4 = vector.shape_cast %3 : vector<2x8x512xf32> to vector<16x512xf32>
    %c0_3 = arith.constant 0 : index
    %c0_4 = arith.constant 0 : index
    %c0_5 = arith.constant 0 : index
    %c0_6 = arith.constant 0 : index
    %5 = vector.load %arg2[%c0_3, %c0_4, %c0_5, %c0_6] : memref<2x2x512x256xf32, #tpu.memory_space<vmem>>, vector<1x1x512x256xf32>
    %6 = vector.shape_cast %5 : vector<1x1x512x256xf32> to vector<512x256xf32>
    %cst_7 = arith.constant dense<0.000000e+00> : vector<16x256xf32>
    %7 = tpu.matmul %4, %6, %cst_7 {dimension_numbers = #tpu.dot_dimension_numbers<[1], [0], [0], [1], [0, 0, 1, 1], [], []>} : vector<16x512xf32>, vector<512x256xf32>, vector<16x256xf32> -> vector<16x256xf32>
    %8 = arith.addf %2, %7 : vector<16x256xf32>
    %9 = vector.extract_strided_slice %1 {offsets = [0, 1, 0], sizes = [2, 8, 512], strides = [1, 1, 1]} : vector<3x9x512xf32> to vector<2x8x512xf32>
    %10 = vector.shape_cast %9 : vector<2x8x512xf32> to vector<16x512xf32>
    %c0_8 = arith.constant 0 : index
    %c1 = arith.constant 1 : index
    %c0_9 = arith.constant 0 : index
    %c0_10 = arith.constant 0 : index
    %11 = vector.load %arg2[%c0_8, %c1, %c0_9, %c0_10] : memref<2x2x512x256xf32, #tpu.memory_space<vmem>>, vector<1x1x512x256xf32>
    %12 = vector.shape_cast %11 : vector<1x1x512x256xf32> to vector<512x256xf32>
    %cst_11 = arith.constant dense<0.000000e+00> : vector<16x256xf32>
    %13 = tpu.matmul %10, %12, %cst_11 {dimension_numbers = #tpu.dot_dimension_numbers<[1], [0], [0], [1], [0, 0, 1, 1], [], []>} : vector<16x512xf32>, vector<512x256xf32>, vector<16x256xf32> -> vector<16x256xf32>
    %14 = arith.addf %8, %13 : vector<16x256xf32>
    %15 = vector.extract_strided_slice %1 {offsets = [1, 0, 0], sizes = [2, 8, 512], strides = [1, 1, 1]} : vector<3x9x512xf32> to vector<2x8x512xf32>
    %16 = vector.shape_cast %15 : vector<2x8x512xf32> to vector<16x512xf32>
    %c1_12 = arith.constant 1 : index
    %c0_13 = arith.constant 0 : index
    %c0_14 = arith.constant 0 : index
    %c0_15 = arith.constant 0 : index
    %17 = vector.load %arg2[%c1_12, %c0_13, %c0_14, %c0_15] : memref<2x2x512x256xf32, #tpu.memory_space<vmem>>, vector<1x1x512x256xf32>
    %18 = vector.shape_cast %17 : vector<1x1x512x256xf32> to vector<512x256xf32>
    %cst_16 = arith.constant dense<0.000000e+00> : vector<16x256xf32>
    %19 = tpu.matmul %16, %18, %cst_16 {dimension_numbers = #tpu.dot_dimension_numbers<[1], [0], [0], [1], [0, 0, 1, 1], [], []>} : vector<16x512xf32>, vector<512x256xf32>, vector<16x256xf32> -> vector<16x256xf32>
    %20 = arith.addf %14, %19 : vector<16x256xf32>
    %21 = vector.extract_strided_slice %1 {offsets = [1, 1, 0], sizes = [2, 8, 512], strides = [1, 1, 1]} : vector<3x9x512xf32> to vector<2x8x512xf32>
    %22 = vector.shape_cast %21 : vector<2x8x512xf32> to vector<16x512xf32>
    %c1_17 = arith.constant 1 : index
    %c1_18 = arith.constant 1 : index
    %c0_19 = arith.constant 0 : index
    %c0_20 = arith.constant 0 : index
    %23 = vector.load %arg2[%c1_17, %c1_18, %c0_19, %c0_20] : memref<2x2x512x256xf32, #tpu.memory_space<vmem>>, vector<1x1x512x256xf32>
    %24 = vector.shape_cast %23 : vector<1x1x512x256xf32> to vector<512x256xf32>
    %cst_21 = arith.constant dense<0.000000e+00> : vector<16x256xf32>
    %25 = tpu.matmul %22, %24, %cst_21 {dimension_numbers = #tpu.dot_dimension_numbers<[1], [0], [0], [1], [0, 0, 1, 1], [], []>} : vector<16x512xf32>, vector<512x256xf32>, vector<16x256xf32> -> vector<16x256xf32>
    %26 = arith.addf %20, %25 : vector<16x256xf32>
    %c0_22 = arith.constant 0 : index
    %c0_23 = arith.constant 0 : index
    %27 = vector.load %arg3[%c0_22, %c0_23] : memref<1x256xf32, #tpu.memory_space<vmem>>, vector<1x256xf32>
    %28 = vector.broadcast %27 : vector<1x256xf32> to vector<16x256xf32>
    %29 = arith.addf %26, %28 : vector<16x256xf32>
    %cst_24 = arith.constant 0.000000e+00 : f32
    %30 = vector.broadcast %cst_24 : f32 to vector<16x256xf32>
    %31 = arith.maximumf %29, %30 : vector<16x256xf32>
    %c0_25 = arith.constant 0 : index
    %c0_26 = arith.constant 0 : index
    %c0_27 = arith.constant 0 : index
    %32 = vector.load %arg4[%c0_25, %c0_26, %c0_27] : memref<1x16x256xf32, #tpu.memory_space<vmem>>, vector<1x16x256xf32>
    %33 = vector.shape_cast %32 : vector<1x16x256xf32> to vector<16x256xf32>
    %34 = vector.shape_cast %31 : vector<16x256xf32> to vector<1x16x256xf32>
    tpu.vector_store %arg4[%c0_25, %c0_26, %c0_27], %34 {strides = array<i32>} : memref<1x16x256xf32, #tpu.memory_space<vmem>>, vector<1x16x256xf32>,
    return
  }
  func.func @transform_0(%arg0: i32) -> (i32, i32, i32, i32) {
    %c0_i32 = arith.constant 0 : i32
    %c0_i32_0 = arith.constant 0 : i32
    %c0_i32_1 = arith.constant 0 : i32
    %c0_i32_2 = arith.constant 0 : i32
    return %arg0, %c0_i32, %c0_i32_0, %c0_i32_1 : i32, i32, i32, i32
  }
  func.func @transform_1(%arg0: i32) -> (i32, i32, i32, i32) {
    %c0_i32 = arith.constant 0 : i32
    %c0_i32_0 = arith.constant 0 : i32
    %c0_i32_1 = arith.constant 0 : i32
    %c0_i32_2 = arith.constant 0 : i32
    %c0_i32_3 = arith.constant 0 : i32
    return %c0_i32, %c0_i32_0, %c0_i32_1, %c0_i32_2 : i32, i32, i32, i32
  }
  func.func @transform_2(%arg0: i32) -> (i32, i32) {
    %c0_i32 = arith.constant 0 : i32
    %c0_i32_0 = arith.constant 0 : i32
    %c0_i32_1 = arith.constant 0 : i32
    return %c0_i32, %c0_i32_0 : i32, i32
  }
  func.func @transform_3(%arg0: i32) -> (i32, i32, i32) {
    %c0_i32 = arith.constant 0 : i32
    %c0_i32_0 = arith.constant 0 : i32
    %c0_i32_1 = arith.constant 0 : i32
    return %arg0, %c0_i32, %c0_i32_0 : i32, i32, i32
  }
}

module attributes {stable_mosaic.version = 11 : i64} {
  func.func @_fc_kernel(%arg0: i32, %arg1: i32, %arg2: memref<2x1024xbf16, #tpu.memory_space<vmem>>, %arg3: memref<1024x512xbf16, #tpu.memory_space<vmem>>, %arg4: memref<1x512xf32, #tpu.memory_space<vmem>>, %arg5: memref<2x512xf32, #tpu.memory_space<vmem>>, %arg6: memref<2x512xf32, #tpu.memory_space<vmem>>) attributes {dimension_semantics = [#tpu.dimension_semantics<parallel>, #tpu.dimension_semantics<arbitrary>], iteration_bounds = array<i64: 4, 1>, scalar_prefetch = 0 : i64, scratch_operands = 1 : i64, tpu.core_type = #tpu.core_type<tc>, window_params = [{transform_indices = @transform_0, window_bounds = array<i64: 2, 1024>}, {transform_indices = @transform_1, window_bounds = array<i64: 1024, 512>}, {transform_indices = @transform_2, window_bounds = array<i64: 1, 512>}, {transform_indices = @transform_3, window_bounds = array<i64: 2, 512>}]} {
    %c0_i32 = arith.constant 0 : i32
    %0 = arith.cmpi eq, %arg1, %c0_i32 : i32
    %1 = arith.extui %0 : i1 to i32
    %c0_i32_0 = arith.constant 0 : i32
    %2 = arith.cmpi ne, %1, %c0_i32_0 : i32
    scf.if %2 {
      %cst_10 = arith.constant 0.000000e+00 : f32
      %12 = vector.broadcast %cst_10 : f32 to vector<2x512xf32>
      %c0_11 = arith.constant 0 : index
      %c0_12 = arith.constant 0 : index
      %13 = vector.load %arg6[%c0_11, %c0_12] : memref<2x512xf32, #tpu.memory_space<vmem>>, vector<2x512xf32>
      tpu.vector_store %arg6[%c0_11, %c0_12], %12 {strides = array<i32>} : memref<2x512xf32, #tpu.memory_space<vmem>>, vector<2x512xf32>,
    } else {
    }
    %c0 = arith.constant 0 : index
    %c0_1 = arith.constant 0 : index
    %3 = vector.load %arg6[%c0, %c0_1] : memref<2x512xf32, #tpu.memory_space<vmem>>, vector<2x512xf32>
    %c0_2 = arith.constant 0 : index
    %c0_3 = arith.constant 0 : index
    %4 = vector.load %arg2[%c0_2, %c0_3] : memref<2x1024xbf16, #tpu.memory_space<vmem>>, vector<2x1024xbf16>
    %c0_4 = arith.constant 0 : index
    %c0_5 = arith.constant 0 : index
    %5 = vector.load %arg3[%c0_4, %c0_5] : memref<1024x512xbf16, #tpu.memory_space<vmem>>, vector<1024x512xbf16>
    %cst = arith.constant dense<0.000000e+00> : vector<2x512xf32>
    %6 = tpu.matmul %4, %5, %cst {dimension_numbers = #tpu.dot_dimension_numbers<[1], [0], [0], [1], [0, 0, 1, 1], [], []>} : vector<2x1024xbf16>, vector<1024x512xbf16>, vector<2x512xf32> -> vector<2x512xf32>
    %7 = arith.addf %3, %6 : vector<2x512xf32>
    %c0_6 = arith.constant 0 : index
    %c0_7 = arith.constant 0 : index
    %8 = vector.load %arg6[%c0_6, %c0_7] : memref<2x512xf32, #tpu.memory_space<vmem>>, vector<2x512xf32>
    tpu.vector_store %arg6[%c0_6, %c0_7], %7 {strides = array<i32>} : memref<2x512xf32, #tpu.memory_space<vmem>>, vector<2x512xf32>,
    %c0_i32_8 = arith.constant 0 : i32
    %9 = arith.cmpi eq, %arg1, %c0_i32_8 : i32
    %10 = arith.extui %9 : i1 to i32
    %c0_i32_9 = arith.constant 0 : i32
    %11 = arith.cmpi ne, %10, %c0_i32_9 : i32
    scf.if %11 {
      %c0_10 = arith.constant 0 : index
      %c0_11 = arith.constant 0 : index
      %12 = vector.load %arg6[%c0_10, %c0_11] : memref<2x512xf32, #tpu.memory_space<vmem>>, vector<2x512xf32>
      %c0_12 = arith.constant 0 : index
      %c0_13 = arith.constant 0 : index
      %13 = vector.load %arg4[%c0_12, %c0_13] : memref<1x512xf32, #tpu.memory_space<vmem>>, vector<1x512xf32>
      %14 = vector.broadcast %13 : vector<1x512xf32> to vector<2x512xf32>
      %15 = arith.addf %12, %14 : vector<2x512xf32>
      %c0_14 = arith.constant 0 : index
      %c0_15 = arith.constant 0 : index
      %16 = vector.load %arg5[%c0_14, %c0_15] : memref<2x512xf32, #tpu.memory_space<vmem>>, vector<2x512xf32>
      tpu.vector_store %arg5[%c0_14, %c0_15], %15 {strides = array<i32>} : memref<2x512xf32, #tpu.memory_space<vmem>>, vector<2x512xf32>,
    } else {
    }
    return
  }
  func.func @transform_0(%arg0: i32, %arg1: i32) -> (i32, i32) {
    %c0_i32 = arith.constant 0 : i32
    %c0_i32_0 = arith.constant 0 : i32
    return %c0_i32, %arg1 : i32, i32
  }
  func.func @transform_1(%arg0: i32, %arg1: i32) -> (i32, i32) {
    %c0_i32 = arith.constant 0 : i32
    return %arg1, %arg0 : i32, i32
  }
  func.func @transform_2(%arg0: i32, %arg1: i32) -> (i32, i32) {
    %c0_i32 = arith.constant 0 : i32
    %c0_i32_0 = arith.constant 0 : i32
    return %c0_i32, %arg0 : i32, i32
  }
  func.func @transform_3(%arg0: i32, %arg1: i32) -> (i32, i32) {
    %c0_i32 = arith.constant 0 : i32
    %c0_i32_0 = arith.constant 0 : i32
    return %c0_i32, %arg0 : i32, i32
  }
}

</mosaic_0001>

<bundles_post_ra>
// kernel: feature_extractor_forward.5
= control target key start
LH: loop header
LB: loop body
LE: loop exit
PB: predicated region body
PF: predicated region fallthrough
CT: control target
= control target key end

     0   :  { %s2174_s12 = smov 0   ;;  %s3013_s0 = inlined_call_operand.vmem [shape: f32[2,17,17,12], index: 0, kind: input, shape index: {}]   ;;  %s3014_s1 = inlined_call_operand.vmem [shape: f32[2,2,12,32], index: 1, kind: input, shape index: {}]   ;;  %s3015_s2 = inlined_call_operand.vmem [shape: f32[1,32], index: 2, kind: input, shape index: {}]   ;;  %s3016_s3 = inlined_call_operand.vmem [shape: f32[2,256,32], index: 3, kind: output, shape index: {}]  }
   0x1 LB: > { %s1643_s13 = sadd.s32 4294967295, %s2152_s12   ;;  %p1647_p0 = scmp.ge.s32.totalorder %s2152_s12, 1  ;;  %s2152_s12 = sphi %s2174_s12, %s13_s12  }
   0x2   : > { %p137_p1 = scmp.lt.s32.totalorder %s2152_s12, 3 }
   0x4   : > { %p138_p2 = pnand %p1647_p0, %p137_p1 }
   0x6   : > { %141 = sbr.rel (%p138_p2) target bundleno = 351 (0x15f), region = 32 }
   0xb   : > { %v1652_v0 = vld [vmem:[%s3014_s1 + $0x18] sm:$0xf]  ;;  %vm421_vm0 = vcmask 1043456   ;;  %v223_v1 = vld [vmem:[%s3014_s1 + $0x8] sm:$0xf]  ;;  %v1651_v2 = vld [vmem:[%s3014_s1 + $0x10] sm:$0xff] }
   0xc   : > { %1929 = vmatprep.subr.msk.mxu0 %vm421_vm0, %v1652_v0  ;;  %1981 = vmatprep.subr.msk.mxu1 %vm421_vm0, %v223_v1  ;;  %v222_v3 = vld [vmem:[%s3014_s1] sm:$0xff]  ;;  %p161_p3 = scmp.lt.s32.totalorder %s1643_s13, 1  ;;  %v1720_v4 = vld [vmem:[%s3014_s1 + $0x28] sm:$0xf]  ;;  %v1755_v5 = vld [vmem:[%s3014_s1 + $0x38] sm:$0xf] }
   0xd   : > { %1930 = vmatpush3.msk.msra.mxu0 %vm421_vm0, %v1652_v0  ;;  %1982 = vmatpush3.msk.msra.mxu1 %vm421_vm0, %v223_v1  ;;  %vm356_vm1 = vcmask 97280   ;;  %v1754_v6 = vld [vmem:[%s3014_s1 + $0x30] sm:$0xff]  ;;  %vm272_vm2 = vcmask 1046528   ;;  %v1719_v29 = vld [vmem:[%s3014_s1 + $0x20] sm:$0xff]  ;;  %vm1555_vm3 = vcmask 261120  }
   0xe   : > { %1931 = vmatprep.subr.mxu0 %v1651_v2  ;;  %1983 = vmatprep.subr.mxu1 %v222_v3  ;;  %s3060_s13 = smov (!%p161_p3, %s1643_s13), 1 }
   0xf   : > { %1932 = vmatpush3.msra.mxu0 %v1651_v2  ;;  %1984 = vmatpush3.msra.mxu1 %v222_v3  ;;  %s2137_s26 = smul.u32 408, %s3060_s13  ;;  %s1792_s9 = sshll.u32 %s3060_s13, 8 }
  0x10   : > { %2033 = vmatprep.subr.msk.mxu0 %vm421_vm0, %v1720_v4  ;;  %2085 = vmatprep.subr.msk.mxu1 %vm421_vm0, %v1755_v5  ;;  %s2859_s14 = scalar_lea.vmem %s3016_s3, %s1792_s9 }
  0x11   : > { %s2212_s29 = scalar_lea.vmem %s3013_s0, %s2137_s26 }
  0x12   : > { %v171_v7 = vld [vmem:[%s2212_s29] sm:$0xff]  ;;  %v172_v8 = vld [vmem:[%s2212_s29 + $0x8] sm:$0xff]  ;;  %v173_v9 = vld [vmem:[%s2212_s29 + $0x10] sm:$0x1] }
  0x13   : > { %v273_v10 = vrot.slane %v171_v7, 1  ;;  %v274_v11 = vrot.slane %v172_v8, 1  ;;  %1985 = vmatprep.mubr.msk.f32.mxu1 %vm356_vm1, %v171_v7  ;;  %v276_v12 = vrot.slane %v173_v9, 1  ;;  %v2222_v13 = vld [vmem:[%s2212_s29 + $0x18] sm:$0xff]  ;;  %v2225_v14 = vld [vmem:[%s2212_s29 + $0x20] sm:$0xff]  ;;  %v2228_v15 = vld [vmem:[%s2212_s29 + $0x30] sm:$0xff] }
  0x14   : > { %1986 = vmatmul.mubr.msk.f32.vlgmr.msra.gmra.mxu1 %vm356_vm1, %v172_v8  ;;  %v278_v16 = vrot.slane %v2222_v13, 1  ;;  %v279_v17 = vrot.slane %v2225_v14, 1  ;;  %v176_v18 = vld [vmem:[%s2212_s29 + $0x28] sm:$0x1]  ;;  %v2235_v19 = vld [vmem:[%s2212_s29 + $0x38] sm:$0xff]  ;;  %v283_v20 = vrot.slane %v2228_v15, 1 }
  0x15   : > { %v275_v21 = vsel %vm272_vm2, %v273_v10, %v274_v11  ;;  %v277_v22 = vsel %vm272_vm2, %v274_v11, %v276_v12  ;;  %2086 = vmatpush3.msk.msra.mxu1 %vm421_vm0, %v1755_v5  ;;  %1988 = vmatprep.mubr.msk.f32.mxu1 %vm356_vm1, %v2222_v13  ;;  %v281_v23 = vrot.slane %v176_v18, 1  ;;  %v284_v24 = vrot.slane %v2235_v19, 1  ;;  %v179_v25 = vld [vmem:[%s2212_s29 + $0x40] sm:$0x1]  ;;  %v2250_v27 = vld [vmem:[%s2212_s29 + $0x48] sm:$0xff]  ;;  %v2253_v28 = vld [vmem:[%s2212_s29 + $0x50] sm:$0xff] }
  0x16   : > { %1933 = vmatprep.mubr.msk.f32.mxu0 %vm356_vm1, %v275_v21  ;;  %v2247_v26 = vsel %vm272_vm2, %v278_v16, %v279_v17  ;;  %2087 = vmatprep.subr.mxu1 %v1754_v6  ;;  %v286_v31 = vrot.slane %v179_v25, 1  ;;  %v288_v33 = vrot.slane %v2250_v27, 1  ;;  %v289_v34 = vrot.slane %v2253_v28, 1  ;;  %v182_v35 = vld [vmem:[%s2212_s29 + $0x58] sm:$0x1]  ;;  %v2276_v36 = vld [vmem:[%s2212_s29 + $0x60] sm:$0xff] }
  0x17   : > { %1934 = vmatmul.mubr.msk.f32.vlgmr.msra.gmra.mxu0 %vm356_vm1, %v277_v22  ;;  %2088 = vmatpush3.msra.mxu1 %v1754_v6  ;;  %v2263_v30 = vsel %vm272_vm2, %v279_v17, %v281_v23  ;;  %v2268_v32 = vsel %vm272_vm2, %v283_v20, %v284_v24  ;;  %v2279_v37 = vld [vmem:[%s2212_s29 + $0x68] sm:$0xff]  ;;  %v291_v39 = vrot.slane %v182_v35, 1  ;;  %v293_v41 = vrot.slane %v2276_v36, 1  ;;  %v185_v43 = vld [vmem:[%s2212_s29 + $0x70] sm:$0x1]  ;;  %v2299_v44 = vld [vmem:[%s2212_s29 + $0x78] sm:$0xff] }
  0x18   : > { %2034 = vmatpush3.msk.msra.mxu0 %vm421_vm0, %v1720_v4  ;;  %1936 = vmatprep.mubr.msk.f32.mxu0 %vm356_vm1, %v2247_v26  ;;  %v2286_v38 = vsel %vm272_vm2, %v284_v24, %v286_v31  ;;  %v2291_v40 = vsel %vm272_vm2, %v288_v33, %v289_v34  ;;  %v294_v42 = vrot.slane %v2279_v37, 1  ;;  %v2302_v45 = vld [vmem:[%s2212_s29 + $0x80] sm:$0xff]  ;;  %v296_v47 = vrot.slane %v185_v43, 1  ;;  %v188_v51 = vld [vmem:[%s2212_s29 + $0x88] sm:$0x1]  ;;  %v2322_v52 = vld [vmem:[%s2212_s29 + $0x90] sm:$0xff] }
  0x19   : > { %1989 = vmatmul.mubr.msk.f32.gmra.mxu1 %vm356_vm1, %v2225_v14  ;;  %2035 = vmatprep.subr.mxu0 %v1719_v29  ;;  %v2309_v46 = vsel %vm272_vm2, %v289_v34, %v291_v39  ;;  %v298_v49 = vrot.slane %v2299_v44, 1  ;;  %v299_v50 = vrot.slane %v2302_v45, 1  ;;  %v2325_v53 = vld [vmem:[%s2212_s29 + $0x98] sm:$0xff]  ;;  %v301_v55 = vrot.slane %v188_v51, 1  ;;  %v2335_v56 = vld [vmem:[%s2212_s29 + $0x180] sm:$0xff]  ;;  %v2338_v57 = vld [vmem:[%s2212_s29 + $0x188] sm:$0xff] }
  0x1a   : > { %1991 = vmatprep.mubr.msk.f32.mxu1 %vm356_vm1, %v2228_v15  ;;  %2036 = vmatpush3.msra.mxu0 %v1719_v29  ;;  %v2314_v48 = vsel %vm272_vm2, %v293_v41, %v294_v42  ;;  %v2332_v54 = vsel %vm272_vm2, %v294_v42, %v296_v47  ;;  %3021 = vst [vmem:[#allocation2_spill] sm:$0xff] %v2335_v56  ;;  %3022 = vst [vmem:[#allocation3_spill] sm:$0xff] %v2338_v57  ;;  %v221_v58 = vld [vmem:[%s2212_s29 + $0x190] sm:$0x1]  ;;  %v303_v60 = vrot.slane %v2322_v52, 1  ;;  %v2350_v63 = vld [vmem:[%s2212_s29 + $0xa8] sm:$0xff] }
  0x1b   : > { %1937 = vmatmul.mubr.msk.f32.gmra.mxu0 %vm356_vm1, %v2263_v30  ;;  %v2344_v59 = vsel %vm272_vm2, %v298_v49, %v299_v50  ;;  %v304_v61 = vrot.slane %v2325_v53, 1  ;;  %v191_v62 = vld [vmem:[%s2212_s29 + $0xa0] sm:$0x1]  ;;  %v2355_v0 = vld [vmem:[%s2212_s29 + $0xb0] sm:$0xff]  ;;  %v1212_v1 = vrot.slane %v2335_v56, 1  ;;  %v1213_v2 = vrot.slane %v2338_v57, 1 }
  0x1c   : > { %1939 = vmatprep.mubr.msk.f32.mxu0 %vm356_vm1, %v2268_v32  ;;  %v1215_v3 = vrot.slane %v221_v58, 1  ;;  %v2364_v4 = vsel %vm272_vm2, %v299_v50, %v301_v55  ;;  %v306_v5 = vrot.slane %v191_v62, 1  ;;  %v308_v6 = vrot.slane %v2350_v63, 1  ;;  %v194_v9 = vld [vmem:[%s2212_s29 + $0xb8] sm:$0x1]  ;;  %v2383_v12 = vld [vmem:[%s2212_s29 + $0xc0] sm:$0xff] }
  0x1d   : > { %1992 = vmatmul.mubr.msk.f32.gmra.mxu1 %vm356_vm1, %v2235_v19  ;;  %v2370_v7 = vsel %vm272_vm2, %v303_v60, %v304_v61  ;;  %v309_v8 = vrot.slane %v2355_v0, 1  ;;  %v2375_v10 = vsel %vm272_vm2, %v1212_v1, %v1213_v2  ;;  %v2386_v16 = vld [vmem:[%s2212_s29 + $0xc8] sm:$0xff]  ;;  %v311_v18 = vrot.slane %v194_v9, 1  ;;  %v197_v23 = vld [vmem:[%s2212_s29 + $0xd0] sm:$0x1]  ;;  %v2406_v24 = vld [vmem:[%s2212_s29 + $0xd8] sm:$0xff] }
  0x1e   : > { %1994 = vmatprep.mubr.msk.f32.mxu1 %vm356_vm1, %v2250_v27  ;;  %3023 = vst [vmem:[#allocation4_spill] sm:$0xff] %v2375_v10  ;;  %v2378_v11 = vsel %vm272_vm2, %v1213_v2, %v1215_v3  ;;  %v2393_v17 = vsel %vm272_vm2, %v304_v61, %v306_v5  ;;  %v313_v21 = vrot.slane %v2383_v12, 1  ;;  %v314_v22 = vrot.slane %v2386_v16, 1  ;;  %v2409_v25 = vld [vmem:[%s2212_s29 + $0xe0] sm:$0xff]  ;;  %v200_v39 = vld [vmem:[%s2212_s29 + $0xe8] sm:$0x1] }
  0x1f   : > { %1940 = vmatmul.mubr.msk.f32.gmra.mxu0 %vm356_vm1, %v2286_v38  ;;  %3024 = vst [vmem:[#allocation5_spill] sm:$0xff] %v2378_v11  ;;  %v2398_v20 = vsel %vm272_vm2, %v308_v6, %v309_v8  ;;  %v2416_v29 = vsel %vm272_vm2, %v309_v8, %v311_v18  ;;  %v316_v31 = vrot.slane %v197_v23, 1  ;;  %v318_v34 = vrot.slane %v2406_v24, 1  ;;  %v2429_v41 = vld [vmem:[%s2212_s29 + $0xf0] sm:$0xff]  ;;  %v2432_v42 = vld [vmem:[%s2212_s29 + $0xf8] sm:$0xff]  ;;  %v2452_v58 = vld [vmem:[%s2212_s29 + $0x108] sm:$0xff] }
  0x20   : > { %1942 = vmatprep.mubr.msk.f32.mxu0 %vm356_vm1, %v2291_v40  ;;  %v2421_v33 = vsel %vm272_vm2, %v313_v21, %v314_v22  ;;  %v319_v35 = vrot.slane %v2409_v25, 1  ;;  %v321_v47 = vrot.slane %v200_v39, 1  ;;  %v323_v50 = vrot.slane %v2429_v41, 1  ;;  %v203_v55 = vld [vmem:[%s2212_s29 + $0x100] sm:$0x1]  ;;  %v2455_v60 = vld [vmem:[%s2212_s29 + $0x110] sm:$0xff] }
  0x21   : > { %1995 = vmatmul.mubr.msk.f32.gmra.mxu1 %vm356_vm1, %v2253_v28  ;;  %v2439_v43 = vsel %vm272_vm2, %v314_v22, %v316_v31  ;;  %v324_v51 = vrot.slane %v2432_v42, 1  ;;  %v326_v62 = vrot.slane %v203_v55, 1  ;;  %v328_v2 = vrot.slane %v2452_v58, 1  ;;  %v206_v5 = vld [vmem:[%s2212_s29 + $0x118] sm:$0x1]  ;;  %v2475_v6 = vld [vmem:[%s2212_s29 + $0x120] sm:$0xff] }
  0x22   : > { %1997 = vmatprep.mubr.msk.f32.mxu1 %vm356_vm1, %v2276_v36  ;;  %v2444_v49 = vsel %vm272_vm2, %v318_v34, %v319_v35  ;;  %v2462_v61 = vsel %vm272_vm2, %v319_v35, %v321_v47  ;;  %v329_v3 = vrot.slane %v2455_v60, 1  ;;  %v2478_v8 = vld [vmem:[%s2212_s29 + $0x128] sm:$0xff]  ;;  %v331_v18 = vrot.slane %v206_v5, 1  ;;  %v209_v31 = vld [vmem:[%s2212_s29 + $0x130] sm:$0x1]  ;;  %v2498_v34 = vld [vmem:[%s2212_s29 + $0x138] sm:$0xff] }
  0x23   : > { %1943 = vmatmul.mubr.msk.f32.gmra.mxu0 %vm356_vm1, %v2309_v46  ;;  %v2467_v1 = vsel %vm272_vm2, %v323_v50, %v324_v51  ;;  %3025 = vst [vmem:[#allocation6_spill] sm:$0xff] %v2478_v8  ;;  %v2485_v9 = vsel %vm272_vm2, %v324_v51, %v326_v62  ;;  %v333_v22 = vrot.slane %v2475_v6, 1  ;;  %v334_v23 = vrot.slane %v2478_v8, 1  ;;  %3026 = vst [vmem:[#allocation7_spill] sm:$0xff] %v2498_v34  ;;  %v2501_v35 = vld [vmem:[%s2212_s29 + $0x140] sm:$0xff]  ;;  %v2544_v56 = vld [vmem:[%s2212_s29 + $0x168] sm:$0xff] }
  0x24   : > { %1945 = vmatprep.mubr.msk.f32.mxu0 %vm356_vm1, %v2314_v48  ;;  %v2490_v21 = vsel %vm272_vm2, %v328_v2, %v329_v3  ;;  %v2508_v39 = vsel %vm272_vm2, %v329_v3, %v331_v18  ;;  %v336_v47 = vrot.slane %v209_v31, 1  ;;  %v338_v51 = vrot.slane %v2498_v34, 1  ;;  %v212_v62 = vld [vmem:[%s2212_s29 + $0x148] sm:$0x1]  ;;  %v2521_v2 = vld [vmem:[%s2212_s29 + $0x150] sm:$0xff]  ;;  %v2524_v3 = vld [vmem:[%s2212_s29 + $0x158] sm:$0xff] }
  0x25   : > { %1998 = vmatmul.mubr.msk.f32.gmra.mxu1 %vm356_vm1, %v2279_v37  ;;  %v2513_v50 = vsel %vm272_vm2, %v333_v22, %v334_v23  ;;  %v339_v55 = vrot.slane %v2501_v35, 1  ;;  %v341_v18 = vrot.slane %v212_v62, 1  ;;  %v343_v31 = vrot.slane %v2521_v2, 1  ;;  %v215_v11 = vld [vmem:[%s2212_s29 + $0x160] sm:$0x1] }
  0x26   : > { %2000 = vmatprep.mubr.msk.f32.mxu1 %vm356_vm1, %v2299_v44  ;;  %v2531_v5 = vsel %vm272_vm2, %v334_v23, %v336_v47  ;;  %v344_v57 = vrot.slane %v2524_v3, 1  ;;  %v2547_v23 = vld [vmem:[%s2212_s29 + $0x170] sm:$0xff]  ;;  %v348_v10 = vrot.slane %v2544_v56, 1 }
  0x27   : > { %1946 = vmatmul.mubr.msk.f32.gmra.mxu0 %vm356_vm1, %v2332_v54  ;;  %v2536_v22 = vsel %vm272_vm2, %v338_v51, %v339_v55  ;;  %v2554_v47 = vsel %vm272_vm2, %v339_v55, %v341_v18  ;;  %v346_v51 = vrot.slane %v215_v11, 1 }
  0x28   : > { %1948 = vmatprep.mubr.msk.f32.mxu0 %vm356_vm1, %v2344_v59  ;;  %v2559_v62 = vsel %vm272_vm2, %v343_v31, %v344_v57 }
  0x29   : > { %2001 = vmatmul.mubr.msk.f32.gmra.mxu1 %vm356_vm1, %v2302_v45  ;;  %v2571_v11 = vsel %vm272_vm2, %v344_v57, %v346_v51 }
  0x2a   : > { %2003 = vmatprep.mubr.msk.f32.mxu1 %vm356_vm1, %v2322_v52 }
  0x2b   : > { %1949 = vmatmul.mubr.msk.f32.gmra.mxu0 %vm356_vm1, %v2364_v4 }
  0x2c   : > { %1951 = vmatprep.mubr.msk.f32.mxu0 %vm356_vm1, %v2370_v7 }
  0x2d   : > { %2004 = vmatmul.mubr.msk.f32.gmra.mxu1 %vm356_vm1, %v2325_v53 }
  0x2e   : > { %2006 = vmatprep.mubr.msk.f32.mxu1 %vm356_vm1, %v2350_v63 }
  0x2f   : > { %1952 = vmatmul.mubr.msk.f32.gmra.mxu0 %vm356_vm1, %v2393_v17 }
  0x30   : > { %1954 = vmatprep.mubr.msk.f32.mxu0 %vm356_vm1, %v2398_v20 }
  0x31   : > { %2007 = vmatmul.mubr.msk.f32.gmra.mxu1 %vm356_vm1, %v2355_v0 }
  0x32   : > { %2009 = vmatprep.mubr.msk.f32.mxu1 %vm356_vm1, %v2383_v12 }
  0x33   : > { %1955 = vmatmul.mubr.msk.f32.gmra.mxu0 %vm356_vm1, %v2416_v29 }
  0x34   : > { %1957 = vmatprep.mubr.msk.f32.mxu0 %vm356_vm1, %v2421_v33 }
  0x35   : > { %2010 = vmatmul.mubr.msk.f32.gmra.mxu1 %vm356_vm1, %v2386_v16 }
  0x36   : > { %2012 = vmatprep.mubr.msk.f32.mxu1 %vm356_vm1, %v2406_v24 }
  0x37   : > { %1958 = vmatmul.mubr.msk.f32.gmra.mxu0 %vm356_vm1, %v2439_v43 }
  0x38   : > { %1960 = vmatprep.mubr.msk.f32.mxu0 %vm356_vm1, %v2444_v49 }
  0x39   : > { %2013 = vmatmul.mubr.msk.f32.gmra.mxu1 %vm356_vm1, %v2409_v25 }
  0x3a   : > { %2015 = vmatprep.mubr.msk.f32.mxu1 %vm356_vm1, %v2429_v41 }
  0x3b   : > { %1961 = vmatmul.mubr.msk.f32.gmra.mxu0 %vm356_vm1, %v2462_v61 }
  0x3c   : > { %1963 = vmatprep.mubr.msk.f32.mxu0 %vm356_vm1, %v2467_v1 }
  0x3d   : > { %2016 = vmatmul.mubr.msk.f32.gmra.mxu1 %vm356_vm1, %v2432_v42 }
  0x3e   : > { %2018 = vmatprep.mubr.msk.f32.mxu1 %vm356_vm1, %v2452_v58 }
  0x3f   : > { %1964 = vmatmul.mubr.msk.f32.gmra.mxu0 %vm356_vm1, %v2485_v9 }
  0x40   : > { %1966 = vmatprep.mubr.msk.f32.mxu0 %vm356_vm1, %v2490_v21 }
  0x41   : > { %2019 = vmatmul.mubr.msk.f32.gmra.mxu1 %vm356_vm1, %v2455_v60 }
  0x42   : > { %2021 = vmatprep.mubr.msk.f32.mxu1 %vm356_vm1, %v2475_v6 }
  0x43   : > { %1967 = vmatmul.mubr.msk.f32.gmra.mxu0 %vm356_vm1, %v2508_v39 }
  0x44   : > { %1969 = vmatprep.mubr.msk.f32.mxu0 %vm356_vm1, %v2513_v50 }
  0x45   : > { %2022 = vmatmul.mubr.msk.f32.gmra.mxu1 %vm356_vm1, %v2478_v8  ;;  %v218_v8 = vld [vmem:[%s2212_s29 + $0x178] sm:$0x1] }
  0x46   : > { %2024 = vmatprep.mubr.msk.f32.mxu1 %vm356_vm1, %v2498_v34  ;;  %v349_v34 = vrot.slane %v2547_v23, 1  ;;  %v351_v55 = vrot.slane %v218_v8, 1 }
  0x47   : > { %1970 = vmatmul.mubr.msk.f32.gmra.mxu0 %vm356_vm1, %v2531_v5 }
  0x48   : > { %1972 = vmatprep.mubr.msk.f32.mxu0 %vm356_vm1, %v2536_v22  ;;  %v350_v18 = vsel %vm272_vm2, %v348_v10, %v349_v34  ;;  %v352_v31 = vsel %vm272_vm2, %v349_v34, %v351_v55 }
  0x49   : > { %2025 = vmatmul.mubr.msk.f32.gmra.mxu1 %vm356_vm1, %v2501_v35 }
  0x4a   : > { %2027 = vmatprep.mubr.msk.f32.mxu1 %vm356_vm1, %v2521_v2 }
  0x4b   : > { %1973 = vmatmul.mubr.msk.f32.gmra.mxu0 %vm356_vm1, %v2554_v47 }
  0x4c   : > { %1975 = vmatprep.mubr.msk.f32.mxu0 %vm356_vm1, %v2559_v62 }
  0x4d   : > { %2028 = vmatmul.mubr.msk.f32.gmra.mxu1 %vm356_vm1, %v2524_v3 }
  0x4e   : > { %2030 = vmatprep.mubr.msk.f32.mxu1 %vm356_vm1, %v2544_v56 }
  0x4f   : > { %1976 = vmatmul.mubr.msk.f32.gmra.mxu0 %vm356_vm1, %v2571_v11 }
  0x50   : > { %1978 = vmatprep.mubr.msk.f32.mxu0 %vm356_vm1, %v350_v18 }
  0x51   : > { %2031 = vmatmul.mubr.msk.f32.gmra.mxu1 %vm356_vm1, %v2547_v23 }
  0x52   : > { %2089 = vmatprep.mubr.msk.f32.mxu1 %vm356_vm1, %v2247_v26  ;;  %v3031_v26 = vld [vmem:[#allocation5_spill] sm:$0xff] }
  0x53   : > { %1979 = vmatmul.mubr.msk.f32.gmra.mxu0 %vm356_vm1, %v352_v31 }
  0x54   : > { %2037 = vmatprep.mubr.msk.f32.mxu0 %vm356_vm1, %v2222_v13  ;;  %v3027_v13 = vld [vmem:[#allocation6_spill] sm:$0xff] }
  0x55   : > { %2090 = vmatmul.mubr.msk.f32.vlgmr.msra.gmra.mxu1 %vm356_vm1, %v2263_v30 }
  0x56   : > { %2092 = vmatprep.mubr.msk.f32.mxu1 %vm356_vm1, %v2268_v32 }
  0x57   : > { %2038 = vmatmul.mubr.msk.f32.vlgmr.msra.gmra.mxu0 %vm356_vm1, %v2225_v14  ;;  %v3028_v14 = vld [vmem:[#allocation7_spill] sm:$0xff] }
  0x58   : > { %2040 = vmatprep.mubr.msk.f32.mxu0 %vm356_vm1, %v2228_v15  ;;  %v3029_v15 = vld [vmem:[#allocation4_spill] sm:$0xff] }
  0x59   : > { %2093 = vmatmul.mubr.msk.f32.gmra.mxu1 %vm356_vm1, %v2286_v38 }
  0x5a   : > { %2095 = vmatprep.mubr.msk.f32.mxu1 %vm356_vm1, %v2291_v40 }
  0x5b   : > { %2041 = vmatmul.mubr.msk.f32.gmra.mxu0 %vm356_vm1, %v2235_v19  ;;  %v3030_v19 = vld [vmem:[#allocation2_spill] sm:$0xff] }
  0x5c   : > { %2043 = vmatprep.mubr.msk.f32.mxu0 %vm356_vm1, %v2250_v27  ;;  %v3032_v27 = vld [vmem:[#allocation3_spill] sm:$0xff] }
  0x5d   : > { %2096 = vmatmul.mubr.msk.f32.gmra.mxu1 %vm356_vm1, %v2309_v46 }
  0x5e   : > { %2098 = vmatprep.mubr.msk.f32.mxu1 %vm356_vm1, %v2314_v48 }
  0x5f   : > { %2044 = vmatmul.mubr.msk.f32.gmra.mxu0 %vm356_vm1, %v2253_v28 }
  0x60   : > { %2046 = vmatprep.mubr.msk.f32.mxu0 %vm356_vm1, %v2276_v36 }
  0x61   : > { %2099 = vmatmul.mubr.msk.f32.gmra.mxu1 %vm356_vm1, %v2332_v54 }
  0x62   : > { %2101 = vmatprep.mubr.msk.f32.mxu1 %vm356_vm1, %v2344_v59 }
  0x63   : > { %2047 = vmatmul.mubr.msk.f32.gmra.mxu0 %vm356_vm1, %v2279_v37 }
  0x64   : > { %2049 = vmatprep.mubr.msk.f32.mxu0 %vm356_vm1, %v2299_v44 }
  0x65   : > { %2102 = vmatmul.mubr.msk.f32.gmra.mxu1 %vm356_vm1, %v2364_v4 }
  0x66   : > { %2104 = vmatprep.mubr.msk.f32.mxu1 %vm356_vm1, %v2370_v7 }
  0x67   : > { %2050 = vmatmul.mubr.msk.f32.gmra.mxu0 %vm356_vm1, %v2302_v45 }
  0x68   : > { %2052 = vmatprep.mubr.msk.f32.mxu0 %vm356_vm1, %v2322_v52 }
  0x69   : > { %2105 = vmatmul.mubr.msk.f32.gmra.mxu1 %vm356_vm1, %v2393_v17 }
  0x6a   : > { %2107 = vmatprep.mubr.msk.f32.mxu1 %vm356_vm1, %v2398_v20 }
  0x6b   : > { %2053 = vmatmul.mubr.msk.f32.gmra.mxu0 %vm356_vm1, %v2325_v53 }
  0x6c   : > { %2055 = vmatprep.mubr.msk.f32.mxu0 %vm356_vm1, %v2350_v63 }
  0x6d   : > { %2108 = vmatmul.mubr.msk.f32.gmra.mxu1 %vm356_vm1, %v2416_v29 }
  0x6e   : > { %2110 = vmatprep.mubr.msk.f32.mxu1 %vm356_vm1, %v2421_v33 }
  0x6f   : > { %2056 = vmatmul.mubr.msk.f32.gmra.mxu0 %vm356_vm1, %v2355_v0 }
  0x70   : > { %2058 = vmatprep.mubr.msk.f32.mxu0 %vm356_vm1, %v2383_v12 }
  0x71   : > { %2111 = vmatmul.mubr.msk.f32.gmra.mxu1 %vm356_vm1, %v2439_v43 }
  0x72   : > { %2113 = vmatprep.mubr.msk.f32.mxu1 %vm356_vm1, %v2444_v49 }
  0x73   : > { %2059 = vmatmul.mubr.msk.f32.gmra.mxu0 %vm356_vm1, %v2386_v16 }
  0x74   : > { %2061 = vmatprep.mubr.msk.f32.mxu0 %vm356_vm1, %v2406_v24 }
  0x75   : > { %2114 = vmatmul.mubr.msk.f32.gmra.mxu1 %vm356_vm1, %v2462_v61 }
  0x76   : > { %2116 = vmatprep.mubr.msk.f32.mxu1 %vm356_vm1, %v2467_v1 }
  0x77   : > { %2062 = vmatmul.mubr.msk.f32.gmra.mxu0 %vm356_vm1, %v2409_v25 }
  0x78   : > { %2064 = vmatprep.mubr.msk.f32.mxu0 %vm356_vm1, %v2429_v41 }
  0x79   : > { %2117 = vmatmul.mubr.msk.f32.gmra.mxu1 %vm356_vm1, %v2485_v9 }
  0x7a   : > { %2119 = vmatprep.mubr.msk.f32.mxu1 %vm356_vm1, %v2490_v21 }
  0x7b   : > { %2065 = vmatmul.mubr.msk.f32.gmra.mxu0 %vm356_vm1, %v2432_v42 }
  0x7c   : > { %2067 = vmatprep.mubr.msk.f32.mxu0 %vm356_vm1, %v2452_v58 }
  0x7d   : > { %2120 = vmatmul.mubr.msk.f32.gmra.mxu1 %vm356_vm1, %v2508_v39 }
  0x7e   : > { %2122 = vmatprep.mubr.msk.f32.mxu1 %vm356_vm1, %v2513_v50 }
  0x7f   : > { %2068 = vmatmul.mubr.msk.f32.gmra.mxu0 %vm356_vm1, %v2455_v60 }
  0x80   : > { %2070 = vmatprep.mubr.msk.f32.mxu0 %vm356_vm1, %v2475_v6 }
  0x81   : > { %2123 = vmatmul.mubr.msk.f32.gmra.mxu1 %vm356_vm1, %v2531_v5 }
  0x82   : > { %2125 = vmatprep.mubr.msk.f32.mxu1 %vm356_vm1, %v2536_v22 }
  0x83   : > { %2071 = vmatmul.mubr.msk.f32.gmra.mxu0 %vm356_vm1, %v3027_v13 }
  0x84   : > { %2073 = vmatprep.mubr.msk.f32.mxu0 %vm356_vm1, %v3028_v14 }
  0x85   : > { %2126 = vmatmul.mubr.msk.f32.gmra.mxu1 %vm356_vm1, %v2554_v47 }
  0x86   : > { %2128 = vmatprep.mubr.msk.f32.mxu1 %vm356_vm1, %v2559_v62 }
  0x87   : > { %2074 = vmatmul.mubr.msk.f32.gmra.mxu0 %vm356_vm1, %v2501_v35 }
  0x88   : > { %2076 = vmatprep.mubr.msk.f32.mxu0 %vm356_vm1, %v2521_v2 }
  0x89   : > { %2129 = vmatmul.mubr.msk.f32.gmra.mxu1 %vm356_vm1, %v2571_v11 }
  0x8a   : > { %2131 = vmatprep.mubr.msk.f32.mxu1 %vm356_vm1, %v350_v18 }
  0x8b   : > { %2077 = vmatmul.mubr.msk.f32.gmra.mxu0 %vm356_vm1, %v2524_v3 }
  0x8c   : > { %2079 = vmatprep.mubr.msk.f32.mxu0 %vm356_vm1, %v2544_v56 }
  0x8d   : > { %2132 = vmatmul.mubr.msk.f32.gmra.mxu1 %vm356_vm1, %v352_v31 }
  0x8e   : > { %2134 = vmatprep.mubr.msk.f32.mxu1 %vm356_vm1, %v3029_v15 }
  0x8f   : > { %2080 = vmatmul.mubr.msk.f32.gmra.mxu0 %vm356_vm1, %v2547_v23 }
  0x90   : > { %2082 = vmatprep.mubr.msk.f32.mxu0 %vm356_vm1, %v3030_v19 }
  0x91   : > { %2135 = vmatmul.mubr.msk.f32.gmra.mxu1 %vm356_vm1, %v3031_v26 }
  0x93   : > { %2083 = vmatmul.mubr.msk.f32.gmra.mxu0 %vm356_vm1, %v3032_v27 }
  0xd4   : > { %v2711_v28 = vpop.f32.mrf.mxu1 }
  0xd6   : > { %v2713_v30 = vpop.f32.mrf.mxu1 }
  0xd7   : > { %v2715_v32 = vpop.f32.mrf.mxu0 }
  0xd9   : > { %v2717_v36 = vpop.f32.mrf.mxu0  ;;  %v2719_v37 = vpop.f32.mrf.mxu1 }
  0xdb   : > { %v2721_v38 = vpop.f32.mrf.mxu0  ;;  %v2723_v40 = vpop.f32.mrf.mxu1 }
  0xdd   : > { %v2725_v44 = vpop.f32.mrf.mxu0  ;;  %v2727_v45 = vpop.f32.mrf.mxu1 }
  0xdf   : > { %v2729_v46 = vpop.f32.mrf.mxu0  ;;  %v2731_v48 = vpop.f32.mrf.mxu1 }
  0xe1   : > { %v2733_v52 = vpop.f32.mrf.mxu0  ;;  %v2735_v53 = vpop.f32.mrf.mxu1 }
  0xe3   : > { %v2737_v54 = vpop.f32.mrf.mxu0  ;;  %v2739_v56 = vpop.f32.mrf.mxu1 }
  0xe5   : > { %v2741_v57 = vpop.f32.mrf.mxu0  ;;  %v2743_v59 = vpop.f32.mrf.mxu1 }
  0xe7   : > { %v2745_v63 = vpop.f32.mrf.mxu0  ;;  %v2747_v0 = vpop.f32.mrf.mxu1 }
  0xe9   : > { %v2749_v4 = vpop.f32.mrf.mxu0  ;;  %v2751_v7 = vpop.f32.mrf.mxu1 }
  0xeb   : > { %v2753_v10 = vpop.f32.mrf.mxu0  ;;  %v2755_v12 = vpop.f32.mrf.mxu1 }
  0xed   : > { %v2757_v16 = vpop.f32.mrf.mxu0  ;;  %v2759_v17 = vpop.f32.mrf.mxu1 }
  0xef   : > { %v2761_v20 = vpop.f32.mrf.mxu0  ;;  %v2763_v24 = vpop.f32.mrf.mxu1 }
  0xf1   : > { %v2765_v25 = vpop.f32.mrf.mxu0  ;;  %v2767_v29 = vpop.f32.mrf.mxu1 }
  0xf3   : > { %v2769_v33 = vpop.f32.mrf.mxu0  ;;  %v2771_v41 = vpop.f32.mrf.mxu1 }
  0xf5   : > { %v2773_v42 = vpop.f32.mrf.mxu0  ;;  %v2775_v43 = vpop.f32.mrf.mxu1 }
  0xf7   : > { %v2777_v49 = vpop.f32.mrf.mxu0  ;;  %v2779_v58 = vpop.f32.mrf.mxu1 }
  0xf9   : > { %v2781_v60 = vpop.f32.mrf.mxu0  ;;  %v2783_v61 = vpop.f32.mrf.mxu1 }
  0xfb   : > { %v2785_v1 = vpop.f32.mrf.mxu0  ;;  %v2787_v6 = vpop.f32.mrf.mxu1 }
  0xfd   : > { %v2789_v8 = vpop.f32.mrf.mxu0  ;;  %v2791_v9 = vpop.f32.mrf.mxu1 }
  0xff   : > { %v2793_v21 = vpop.f32.mrf.mxu0  ;;  %v2795_v34 = vpop.f32.mrf.mxu1 }
 0x101   : > { %v2797_v35 = vpop.f32.mrf.mxu0  ;;  %v2799_v39 = vpop.f32.mrf.mxu1 }
 0x103   : > { %v2801_v50 = vpop.f32.mrf.mxu0  ;;  %v2803_v2 = vpop.f32.mrf.mxu1 }
 0x105   : > { %v2805_v3 = vpop.f32.mrf.mxu0  ;;  %v2807_v5 = vpop.f32.mrf.mxu1 }
 0x107   : > { %v2809_v22 = vpop.f32.mrf.mxu0  ;;  %v2811_v23 = vpop.f32.mrf.mxu1 }
 0x108   : > { %3033 = vst [vmem:[#allocation6_spill] sm:$0xff] %v2811_v23  ;;  %v794_v23 = vadd.f32 %v2723_v40, %v2725_v44 }
 0x109   : > { %v2813_v47 = vpop.f32.mrf.mxu0  ;;  %v2815_v51 = vpop.f32.mrf.mxu1 }
 0x10a   : > { %3034 = vst [vmem:[#allocation7_spill] sm:$0xff] %v2815_v51 }
 0x10b   : > { %v2817_v62 = vpop.f32.mrf.mxu0  ;;  %v2819_v11 = vpop.f32.mrf.mxu1 }
 0x10c   : > { %3035 = vst [vmem:[#allocation4_spill] sm:$0xff] %v2817_v62  ;;  %3036 = vst [vmem:[#allocation2_spill] sm:$0xff] %v2819_v11 }
 0x10d   : > { %v2821_v55 = vpop.f32.mrf.mxu0  ;;  %v2823_v18 = vpop.f32.mrf.mxu1 }
 0x10e   : > { %3037 = vst [vmem:[#allocation5_spill] sm:$0xff] %v2821_v55  ;;  %3038 = vst [vmem:[#allocation3_spill] sm:$0xff] %v2823_v18  ;;  %v789_v55 = vadd.f32 %v2711_v28, %v2715_v32 }
 0x10f   : > { %v2825_v31 = vpop.f32.mrf.mxu0  ;;  %v2827_v13 = vpop.f32.mrf.mxu1 }
 0x110   : > { %3039 = vst [vmem:[#allocation8_spill] sm:$0xff] %v2825_v31  ;;  %3040 = vst [vmem:[#allocation9_spill] sm:$0xff] %v2827_v13  ;;  %v784_v13 = vadd.f32 %v2713_v30, %v2717_v36 }
 0x111   : > { %v2829_v14 = vpop.f32.mrf.mxu0  ;;  %v2831_v15 = vpop.f32.mrf.mxu1 }
 0x112   : > { %3041 = vst [vmem:[#allocation10_spill] sm:$0xff] %v2829_v14  ;;  %3042 = vst [vmem:[#allocation11_spill] sm:$0xff] %v2831_v15  ;;  %v2846_v15 = vld [vmem:[%s3015_s2] ss:$0 sm:$0xff] }
 0x113   : > { %v2833_v19 = vpop.f32.mrf.mxu0  ;;  %v2835_v26 = vpop.f32.mrf.mxu1 }
 0x114   : > { %3043 = vst [vmem:[#allocation12_spill] sm:$0xff] %v2833_v19  ;;  %3044 = vst [vmem:[#allocation13_spill] sm:$0xff] %v2835_v26  ;;  %v799_v26 = vadd.f32 %v2719_v37, %v2721_v38 }
 0x115   : > { %v2837_v27 = vpop.f32.mrf.mxu0  ;;  %v2091_v11 = vpop.f32.mrf.mxu1 }
 0x116   : > { %3045 = vst [vmem:[#allocation14_spill] sm:$0xff] %v2837_v27 }
 0x117   : > { %v2039_v18 = vpop.f32.mrf.mxu0  ;;  %v1293_v51 = vpop.f32.mrf.mxu1 }
 0x118   : > { %v1180_v31 = vadd.f32 %v2039_v18, %v789_v55  ;;  %v809_v18 = vadd.f32 %v2727_v45, %v2729_v46 }
 0x119   : > { %v1020_v19 = vpop.f32.mrf.mxu0  ;;  %v2094_v14 = vpop.f32.mrf.mxu1 }
 0x11a   : > { %v1453_v27 = vadd.f32 %v2091_v11, %v1180_v31  ;;  %v1179_v62 = vadd.f32 %v1020_v19, %v784_v13 }
 0x11b   : > { %v2042_v28 = vpop.f32.mrf.mxu0  ;;  %v1303_v32 = vpop.f32.mrf.mxu1 }
 0x11c   : > { %v1492_v30 = vadd.f32 %v2846_v15, %v1453_v27  ;;  %v1452_v36 = vadd.f32 %v1293_v51, %v1179_v62  ;;  %v1182_v55 = vadd.f32 %v2042_v28, %v799_v26  ;;  %v804_v51 = vadd.f32 %v2731_v48, %v2733_v52 }
 0x11d   : > { %v1030_v37 = vpop.f32.mrf.mxu0  ;;  %v2097_v38 = vpop.f32.mrf.mxu1  ;;  %v819_v27 = vadd.f32 %v2735_v53, %v2737_v54 }
 0x11e   : > { %v1524_v11 = vmax.f32 %v1492_v30, 0.0  ;;  %v1491_v40 = vadd.f32 %v2846_v15, %v1452_v36  ;;  %v1455_v44 = vadd.f32 %v2094_v14, %v1182_v55  ;;  %v1181_v31 = vadd.f32 %v1030_v37, %v794_v23 }
 0x11f   : > { %v2045_v62 = vpop.f32.mrf.mxu0  ;;  %v1313_v45 = vpop.f32.mrf.mxu1  ;;  %v814_v36 = vadd.f32 %v2739_v56, %v2741_v57 }
 0x120   : > { %1557 = vst.msk [vmem:[%s2859_s14 + $0x8] sm:$0xff] %vm1555_vm3, %v1524_v11  ;;  %v1523_v46 = vmax.f32 %v1491_v40, 0.0  ;;  %v1494_v13 = vadd.f32 %v2846_v15, %v1455_v44  ;;  %v1454_v19 = vadd.f32 %v1303_v32, %v1181_v31  ;;  %v1184_v26 = vadd.f32 %v2045_v62, %v809_v18 }
 0x121   : > { %v1040_v28 = vpop.f32.mrf.mxu0  ;;  %v2100_v30 = vpop.f32.mrf.mxu1  ;;  %v829_v11 = vadd.f32 %v2743_v59, %v2745_v63 }
 0x122   : > { %1556 = vst.msk [vmem:[%s2859_s14] sm:$0xff] %vm1555_vm3, %v1523_v46  ;;  %v1526_v23 = vmax.f32 %v1494_v13, 0.0  ;;  %v1493_v48 = vadd.f32 %v2846_v15, %v1454_v19  ;;  %v1457_v52 = vadd.f32 %v2097_v38, %v1184_v26  ;;  %v1183_v14 = vadd.f32 %v1040_v28, %v804_v51 }
 0x123   : > { %v2048_v55 = vpop.f32.mrf.mxu0  ;;  %v1323_v37 = vpop.f32.mrf.mxu1  ;;  %v824_v51 = vadd.f32 %v2747_v0, %v2749_v4  ;;  %v839_v19 = vadd.f32 %v2751_v7, %v2753_v10 }
 0x124   : > { %1559 = vst.msk [vmem:[%s2859_s14 + $0x18] sm:$0xff] %vm1555_vm3, %v1526_v23  ;;  %v1525_v32 = vmax.f32 %v1493_v48, 0.0  ;;  %v1496_v53 = vadd.f32 %v2846_v15, %v1457_v52  ;;  %v1456_v54 = vadd.f32 %v1313_v45, %v1183_v14  ;;  %v1186_v18 = vadd.f32 %v2048_v55, %v819_v27 }
 0x125   : > { %v1050_v40 = vpop.f32.mrf.mxu0  ;;  %v2103_v44 = vpop.f32.mrf.mxu1  ;;  %v834_v23 = vadd.f32 %v2755_v12, %v2757_v16  ;;  %v849_v55 = vadd.f32 %v2759_v17, %v2761_v20 }
 0x126   : > { %1558 = vst.msk [vmem:[%s2859_s14 + $0x10] sm:$0xff] %vm1555_vm3, %v1525_v32  ;;  %v1528_v38 = vmax.f32 %v1496_v53, 0.0  ;;  %v1495_v56 = vadd.f32 %v2846_v15, %v1456_v54  ;;  %v1459_v57 = vadd.f32 %v2100_v30, %v1186_v18  ;;  %v1185_v31 = vadd.f32 %v1050_v40, %v814_v36 }
 0x127   : > { %v2051_v62 = vpop.f32.mrf.mxu0  ;;  %v1333_v46 = vpop.f32.mrf.mxu1  ;;  %v844_v18 = vadd.f32 %v2763_v24, %v2765_v25 }
 0x128   : > { %1561 = vst.msk [vmem:[%s2859_s14 + $0x28] sm:$0xff] %vm1555_vm3, %v1528_v38  ;;  %v1527_v45 = vmax.f32 %v1495_v56, 0.0  ;;  %v1498_v59 = vadd.f32 %v2846_v15, %v1459_v57  ;;  %v1458_v63 = vadd.f32 %v1323_v37, %v1185_v31  ;;  %v1188_v13 = vadd.f32 %v2051_v62, %v829_v11 }
 0x129   : > { %v1060_v26 = vpop.f32.mrf.mxu0  ;;  %v2106_v27 = vpop.f32.mrf.mxu1  ;;  %v859_v56 = vadd.f32 %v2767_v29, %v2769_v33 }
 0x12a   : > { %1560 = vst.msk [vmem:[%s2859_s14 + $0x20] sm:$0xff] %vm1555_vm3, %v1527_v45  ;;  %v1530_v28 = vmax.f32 %v1498_v59, 0.0  ;;  %v1497_v0 = vadd.f32 %v2846_v15, %v1458_v63  ;;  %v1461_v4 = vadd.f32 %v2103_v44, %v1188_v13  ;;  %v1187_v30 = vadd.f32 %v1060_v26, %v824_v51 }
 0x12b   : > { %v2054_v48 = vpop.f32.mrf.mxu0  ;;  %v1343_v52 = vpop.f32.mrf.mxu1 }
 0x12c   : > { %1563 = vst.msk [vmem:[%s2859_s14 + $0x38] sm:$0xff] %vm1555_vm3, %v1530_v28  ;;  %v1529_v14 = vmax.f32 %v1497_v0, 0.0  ;;  %v1500_v7 = vadd.f32 %v2846_v15, %v1461_v4  ;;  %v1460_v10 = vadd.f32 %v1333_v46, %v1187_v30  ;;  %v1190_v36 = vadd.f32 %v2054_v48, %v839_v19 }
 0x12d   : > { %v1070_v37 = vpop.f32.mrf.mxu0  ;;  %v2109_v32 = vpop.f32.mrf.mxu1  ;;  %v854_v46 = vadd.f32 %v2771_v41, %v2773_v42  ;;  %v869_v19 = vadd.f32 %v2775_v43, %v2777_v49  ;;  %v864_v4 = vadd.f32 %v2779_v58, %v2781_v60 }
 0x12e   : > { %1562 = vst.msk [vmem:[%s2859_s14 + $0x30] sm:$0xff] %vm1555_vm3, %v1529_v14  ;;  %v1532_v53 = vmax.f32 %v1500_v7, 0.0  ;;  %v1499_v12 = vadd.f32 %v2846_v15, %v1460_v10  ;;  %v1463_v16 = vadd.f32 %v2106_v27, %v1190_v36  ;;  %v1189_v54 = vadd.f32 %v1070_v37, %v834_v23 }
 0x12f   : > { %v2057_v11 = vpop.f32.mrf.mxu0  ;;  %v1353_v40 = vpop.f32.mrf.mxu1  ;;  %v879_v14 = vadd.f32 %v2783_v61, %v2785_v1  ;;  %v874_v37 = vadd.f32 %v2787_v6, %v2789_v8 }
 0x130   : > { %1565 = vst.msk [vmem:[%s2859_s14 + $0x48] sm:$0xff] %vm1555_vm3, %v1532_v53  ;;  %v1531_v44 = vmax.f32 %v1499_v12, 0.0  ;;  %v1502_v17 = vadd.f32 %v2846_v15, %v1463_v16  ;;  %v1462_v20 = vadd.f32 %v1343_v52, %v1189_v54  ;;  %v1192_v38 = vadd.f32 %v2057_v11, %v849_v55 }
 0x131   : > { %v1080_v57 = vpop.f32.mrf.mxu0  ;;  %v2112_v31 = vpop.f32.mrf.mxu1  ;;  %v889_v54 = vadd.f32 %v2791_v9, %v2793_v21 }
 0x132   : > { %1564 = vst.msk [vmem:[%s2859_s14 + $0x40] sm:$0xff] %vm1555_vm3, %v1531_v44  ;;  %v1534_v51 = vmax.f32 %v1502_v17, 0.0  ;;  %v1501_v24 = vadd.f32 %v2846_v15, %v1462_v20  ;;  %v1465_v25 = vadd.f32 %v2109_v32, %v1192_v38  ;;  %v1191_v62 = vadd.f32 %v1080_v57, %v844_v18 }
 0x133   : > { %v2060_v45 = vpop.f32.mrf.mxu0  ;;  %v1363_v59 = vpop.f32.mrf.mxu1  ;;  %v884_v17 = vadd.f32 %v2795_v34, %v2797_v35 }
 0x134   : > { %1567 = vst.msk [vmem:[%s2859_s14 + $0x58] sm:$0xff] %vm1555_vm3, %v1534_v51  ;;  %v1533_v63 = vmax.f32 %v1501_v24, 0.0  ;;  %v1504_v29 = vadd.f32 %v2846_v15, %v1465_v25  ;;  %v1464_v33 = vadd.f32 %v1353_v40, %v1191_v62  ;;  %v1194_v13 = vadd.f32 %v2060_v45, %v859_v56 }
 0x135   : > { %v1090_v26 = vpop.f32.mrf.mxu0  ;;  %v2115_v27 = vpop.f32.mrf.mxu1 }
 0x136   : > { %1566 = vst.msk [vmem:[%s2859_s14 + $0x50] sm:$0xff] %vm1555_vm3, %v1533_v63  ;;  %v1536_v28 = vmax.f32 %v1504_v29, 0.0  ;;  %v1503_v41 = vadd.f32 %v2846_v15, %v1464_v33  ;;  %v1467_v42 = vadd.f32 %v2112_v31, %v1194_v13  ;;  %v1193_v0 = vadd.f32 %v1090_v26, %v854_v46 }
 0x137   : > { %v2063_v30 = vpop.f32.mrf.mxu0  ;;  %v1373_v23 = vpop.f32.mrf.mxu1  ;;  %v899_v31 = vadd.f32 %v2799_v39, %v2801_v50  ;;  %v894_v46 = vadd.f32 %v2803_v2, %v2805_v3  ;;  %v909_v33 = vadd.f32 %v2807_v5, %v2809_v22 }
 0x138   : > { %1569 = vst.msk [vmem:[%s2859_s14 + $0x68] sm:$0xff] %vm1555_vm3, %v1536_v28  ;;  %v1535_v48 = vmax.f32 %v1503_v41, 0.0  ;;  %v1506_v43 = vadd.f32 %v2846_v15, %v1467_v42  ;;  %v1466_v49 = vadd.f32 %v1363_v59, %v1193_v0  ;;  %v1196_v52 = vadd.f32 %v2063_v30, %v869_v19  ;;  %v3046_v28 = vld [vmem:[#allocation6_spill] sm:$0xff] }
 0x139   : > { %v1100_v7 = vpop.f32.mrf.mxu0  ;;  %v2118_v10 = vpop.f32.mrf.mxu1  ;;  %v904_v41 = vadd.f32 %v3046_v28, %v2813_v47 }
 0x13a   : > { %1568 = vst.msk [vmem:[%s2859_s14 + $0x60] sm:$0xff] %vm1555_vm3, %v1535_v48  ;;  %v1538_v36 = vmax.f32 %v1506_v43, 0.0  ;;  %v1505_v58 = vadd.f32 %v2846_v15, %v1466_v49  ;;  %v1469_v60 = vadd.f32 %v2115_v27, %v1196_v52  ;;  %v1195_v55 = vadd.f32 %v1100_v7, %v864_v4  ;;  %v3048_v48 = vld [vmem:[#allocation7_spill] sm:$0xff] }
 0x13b   : > { %v2066_v32 = vpop.f32.mrf.mxu0  ;;  %v1383_v53 = vpop.f32.mrf.mxu1 }
 0x13c   : > { %1571 = vst.msk [vmem:[%s2859_s14 + $0x78] sm:$0xff] %vm1555_vm3, %v1538_v36  ;;  %v1537_v12 = vmax.f32 %v1505_v58, 0.0  ;;  %v1508_v61 = vadd.f32 %v2846_v15, %v1469_v60  ;;  %v1468_v1 = vadd.f32 %v1373_v23, %v1195_v55  ;;  %v1198_v16 = vadd.f32 %v2066_v32, %v879_v14  ;;  %v3047_v23 = vld [vmem:[#allocation4_spill] sm:$0xff]  ;;  %v3049_v36 = vld [vmem:[#allocation5_spill] sm:$0xff]  ;;  %v3050_v58 = vld [vmem:[#allocation2_spill] sm:$0xff] }
 0x13d   : > { %v1110_v18 = vpop.f32.mrf.mxu0  ;;  %v2121_v11 = vpop.f32.mrf.mxu1  ;;  %v919_v43 = vadd.f32 %v3048_v48, %v3047_v23  ;;  %v914_v60 = vadd.f32 %v3050_v58, %v3049_v36 }
 0x13e   : > { %1570 = vst.msk [vmem:[%s2859_s14 + $0x70] sm:$0xff] %vm1555_vm3, %v1537_v12  ;;  %v1540_v40 = vmax.f32 %v1508_v61, 0.0  ;;  %v1507_v6 = vadd.f32 %v2846_v15, %v1468_v1  ;;  %v1471_v8 = vadd.f32 %v2118_v10, %v1198_v16  ;;  %v1197_v44 = vadd.f32 %v1110_v18, %v874_v37  ;;  %v3051_v1 = vld [vmem:[#allocation8_spill] sm:$0xff]  ;;  %v3052_v16 = vld [vmem:[#allocation3_spill] sm:$0xff] }
 0x13f   : > { %v2069_v20 = vpop.f32.mrf.mxu0  ;;  %v1393_v38 = vpop.f32.mrf.mxu1 }
 0x140   : > { %1573 = vst.msk [vmem:[%s2859_s14 + $0x88] sm:$0xff] %vm1555_vm3, %v1540_v40  ;;  %v1539_v56 = vmax.f32 %v1507_v6, 0.0  ;;  %v1510_v9 = vadd.f32 %v2846_v15, %v1471_v8  ;;  %v1470_v21 = vadd.f32 %v1383_v53, %v1197_v44  ;;  %v1200_v57 = vadd.f32 %v2069_v20, %v889_v54  ;;  %v3054_v20 = vld [vmem:[#allocation9_spill] sm:$0xff] }
 0x141   : > { %v1120_v51 = vpop.f32.mrf.mxu0  ;;  %v2124_v24 = vpop.f32.mrf.mxu1  ;;  %v929_v54 = vadd.f32 %v3052_v16, %v3051_v1 }
 0x142   : > { %1572 = vst.msk [vmem:[%s2859_s14 + $0x80] sm:$0xff] %vm1555_vm3, %v1539_v56  ;;  %v1542_v25 = vmax.f32 %v1510_v9, 0.0  ;;  %v1509_v34 = vadd.f32 %v2846_v15, %v1470_v21  ;;  %v1473_v35 = vadd.f32 %v2121_v11, %v1200_v57  ;;  %v1199_v62 = vadd.f32 %v1120_v51, %v884_v17  ;;  %v3053_v17 = vld [vmem:[#allocation10_spill] sm:$0xff] }
 0x143   : > { %v2072_v45 = vpop.f32.mrf.mxu0  ;;  %v1403_v59 = vpop.f32.mrf.mxu1 }
 0x144   : > { %1575 = vst.msk [vmem:[%s2859_s14 + $0x98] sm:$0xff] %vm1555_vm3, %v1542_v25  ;;  %v1541_v63 = vmax.f32 %v1509_v34, 0.0  ;;  %v1512_v39 = vadd.f32 %v2846_v15, %v1473_v35  ;;  %v1472_v50 = vadd.f32 %v1393_v38, %v1199_v62  ;;  %v1202_v29 = vadd.f32 %v2072_v45, %v899_v31  ;;  %v3056_v25 = vld [vmem:[#allocation11_spill] sm:$0xff] }
 0x145   : > { %v1130_v13 = vpop.f32.mrf.mxu0  ;;  %v2127_v19 = vpop.f32.mrf.mxu1  ;;  %v924_v38 = vadd.f32 %v3054_v20, %v3053_v17 }
 0x146   : > { %1574 = vst.msk [vmem:[%s2859_s14 + $0x90] sm:$0xff] %vm1555_vm3, %v1541_v63  ;;  %v1544_v26 = vmax.f32 %v1512_v39, 0.0  ;;  %v1511_v2 = vadd.f32 %v2846_v15, %v1472_v50  ;;  %v1475_v3 = vadd.f32 %v2124_v24, %v1202_v29  ;;  %v1201_v27 = vadd.f32 %v1130_v13, %v894_v46  ;;  %v3055_v24 = vld [vmem:[#allocation12_spill] sm:$0xff]  ;;  %v3057_v63 = vld [vmem:[#allocation14_spill] sm:$0xff]  ;;  %v3058_v39 = vld [vmem:[#allocation13_spill] sm:$0xff] }
 0x147   : > { %v2075_v42 = vpop.f32.mrf.mxu0  ;;  %v1413_v0 = vpop.f32.mrf.mxu1  ;;  %v939_v34 = vadd.f32 %v3056_v25, %v3055_v24  ;;  %v934_v50 = vadd.f32 %v3058_v39, %v3057_v63 }
 0x148   : > { %1577 = vst.msk [vmem:[%s2859_s14 + $0xa8] sm:$0xff] %vm1555_vm3, %v1544_v26  ;;  %v1543_v4 = vmax.f32 %v1511_v2, 0.0  ;;  %v1514_v5 = vadd.f32 %v2846_v15, %v1475_v3  ;;  %v1474_v22 = vadd.f32 %v1403_v59, %v1201_v27  ;;  %v1204_v30 = vadd.f32 %v2075_v42, %v909_v33 }
 0x149   : > { %v1140_v49 = vpop.f32.mrf.mxu0  ;;  %v2130_v52 = vpop.f32.mrf.mxu1 }
 0x14a   : > { %1576 = vst.msk [vmem:[%s2859_s14 + $0xa0] sm:$0xff] %vm1555_vm3, %v1543_v4  ;;  %v1546_v14 = vmax.f32 %v1514_v5, 0.0  ;;  %v1513_v47 = vadd.f32 %v2846_v15, %v1474_v22  ;;  %v1477_v7 = vadd.f32 %v2127_v19, %v1204_v30  ;;  %v1203_v10 = vadd.f32 %v1140_v49, %v904_v41 }
 0x14b   : > { %v2078_v55 = vpop.f32.mrf.mxu0  ;;  %v1423_v37 = vpop.f32.mrf.mxu1 }
 0x14c   : > { %1579 = vst.msk [vmem:[%s2859_s14 + $0xb8] sm:$0xff] %vm1555_vm3, %v1546_v14  ;;  %v1545_v32 = vmax.f32 %v1513_v47, 0.0  ;;  %v1516_v53 = vadd.f32 %v2846_v15, %v1477_v7  ;;  %v1476_v12 = vadd.f32 %v1413_v0, %v1203_v10  ;;  %v1206_v61 = vadd.f32 %v2078_v55, %v919_v43 }
 0x14d   : > { %v1150_v18 = vpop.f32.mrf.mxu0  ;;  %v2133_v11 = vpop.f32.mrf.mxu1 }
 0x14e   : > { %1578 = vst.msk [vmem:[%s2859_s14 + $0xb0] sm:$0xff] %vm1555_vm3, %v1545_v32  ;;  %v1548_v40 = vmax.f32 %v1516_v53, 0.0  ;;  %v1515_v6 = vadd.f32 %v2846_v15, %v1476_v12  ;;  %v1479_v8 = vadd.f32 %v2130_v52, %v1206_v61  ;;  %v1205_v44 = vadd.f32 %v1150_v18, %v914_v60 }
 0x14f   : > { %v2081_v56 = vpop.f32.mrf.mxu0  ;;  %v1433_v9 = vpop.f32.mrf.mxu1 }
 0x150   : > { %1581 = vst.msk [vmem:[%s2859_s14 + $0xc8] sm:$0xff] %vm1555_vm3, %v1548_v40  ;;  %v1547_v21 = vmax.f32 %v1515_v6, 0.0  ;;  %v1518_v57 = vadd.f32 %v2846_v15, %v1479_v8  ;;  %v1478_v31 = vadd.f32 %v1423_v37, %v1205_v44  ;;  %v1208_v51 = vadd.f32 %v2081_v56, %v929_v54 }
 0x151   : > { %v1160_v35 = vpop.f32.mrf.mxu0  ;;  %v2136_v33 = vpop.f32.mrf.mxu1 }
 0x152   : > { %1580 = vst.msk [vmem:[%s2859_s14 + $0xc0] sm:$0xff] %vm1555_vm3, %v1547_v21  ;;  %v1550_v62 = vmax.f32 %v1518_v57, 0.0  ;;  %v1517_v46 = vadd.f32 %v2846_v15, %v1478_v31  ;;  %v1481_v45 = vadd.f32 %v2133_v11, %v1208_v51  ;;  %v1207_v59 = vadd.f32 %v1160_v35, %v924_v38 }
 0x153   : > { %v2084_v29 = vpop.f32.mrf.mxu0  ;;  %v1443_v0 = vpop.f32.mrf.mxu1 }
 0x154   : > { %1583 = vst.msk [vmem:[%s2859_s14 + $0xd8] sm:$0xff] %vm1555_vm3, %v1550_v62  ;;  %v1549_v13 = vmax.f32 %v1517_v46, 0.0  ;;  %v1520_v19 = vadd.f32 %v2846_v15, %v1481_v45  ;;  %v1480_v26 = vadd.f32 %v1433_v9, %v1207_v59  ;;  %v1210_v2 = vadd.f32 %v2084_v29, %v939_v34 }
 0x155   : > { %v1170_v3 = vpop.f32.mrf.mxu0 }
 0x156   : > { %1582 = vst.msk [vmem:[%s2859_s14 + $0xd0] sm:$0xff] %vm1555_vm3, %v1549_v13  ;;  %v1552_v27 = vmax.f32 %v1520_v19, 0.0  ;;  %v1519_v28 = vadd.f32 %v2846_v15, %v1480_v26  ;;  %v1483_v41 = vadd.f32 %v2136_v33, %v1210_v2  ;;  %v1209_v42 = vadd.f32 %v1170_v3, %v934_v50 }
 0x158   : > { %1585 = vst.msk [vmem:[%s2859_s14 + $0xe8] sm:$0xff] %vm1555_vm3, %v1552_v27  ;;  %v1551_v4 = vmax.f32 %v1519_v28, 0.0  ;;  %v1522_v5 = vadd.f32 %v2846_v15, %v1483_v41  ;;  %v1482_v22 = vadd.f32 %v1443_v0, %v1209_v42 }
 0x15a   : > { %1584 = vst.msk [vmem:[%s2859_s14 + $0xe0] sm:$0xff] %vm1555_vm3, %v1551_v4  ;;  %v1554_v30 = vmax.f32 %v1522_v5, 0.0  ;;  %v1521_v23 = vadd.f32 %v2846_v15, %v1482_v22 }
 0x15c   : > { %1587 = vst.msk [vmem:[%s2859_s14 + $0xf8] sm:$0xff] %vm1555_vm3, %v1554_v30  ;;  %v1553_v48 = vmax.f32 %v1521_v23, 0.0 }
 0x15e   : > { %1586 = vst.msk [vmem:[%s2859_s14 + $0xf0] sm:$0xff] %vm1555_vm3, %v1553_v48 }
 0x15f PF: > { %s13_s12 = sadd.s32 1, %s2152_s12  }
 0x160   : > { %p10_p4 = scmp.ge.s32.totalorder %s13_s12, 4  }
 0x162   :  { %12 = sbr.rel (!%p10_p4) target bundleno = 1 (0x1), region = 65 }

// kernel: feature_extractor_forward.6
= control target key start
LH: loop header
LB: loop body
LE: loop exit
PB: predicated region body
PF: predicated region fallthrough
CT: control target
= control target key end

     0   :  { %s1203_s12 = smov 0   ;;  %s1517_s0 = inlined_call_operand.vmem [shape: f32[2,9,9,128], index: 0, kind: input, shape index: {}]   ;;  %s1518_s1 = inlined_call_operand.vmem [shape: f32[2,2,128,64], index: 1, kind: input, shape index: {}]   ;;  %s1519_s2 = inlined_call_operand.vmem [shape: f32[1,64], index: 2, kind: input, shape index: {}]   ;;  %s1520_s3 = inlined_call_operand.vmem [shape: f32[2,64,64], index: 3, kind: output, shape index: {}]  }
   0x1 LB: > { %s834_s13 = sadd.s32 4294967295, %s1181_s12   ;;  %p838_p0 = scmp.ge.s32.totalorder %s1181_s12, 1  ;;  %s1181_s12 = sphi %s1203_s12, %s13_s12  }
   0x2   : > { %p137_p1 = scmp.lt.s32.totalorder %s1181_s12, 3 }
   0x4   : > { %p138_p2 = pnand %p838_p0, %p137_p1 }
   0x5   : > { %p161_p3 = scmp.lt.s32.totalorder (!%p138_p2), %s834_s13, 1 }
   0x6   : > { %141 = sbr.rel (%p138_p2) target bundleno = 301 (0x12d), region = 32 }
   0xb   : > { %v857_v0 = vld [vmem:[%s1518_s1 + $0xf8] sm:$0xff]  ;;  %v856_v2 = vld [vmem:[%s1518_s1 + $0xf0] sm:$0xff]  ;;  %v855_v4 = vld [vmem:[%s1518_s1 + $0xe8] sm:$0xff]  ;;  %s1522_s13 = smov (!%p161_p3, %s834_s13), 1  ;;  %vm221_vm0 = vcmask 1046528   ;;  %vm770_vm1 = vcmask 523264  }
   0xc   : > { %v204_v1 = vld [vmem:[%s1518_s1 + $0x78] sm:$0xff]  ;;  %990 = vmatprep.subr.mxu0 %v857_v0  ;;  %v203_v3 = vld [vmem:[%s1518_s1 + $0x70] sm:$0xff]  ;;  %v202_v5 = vld [vmem:[%s1518_s1 + $0x68] sm:$0xff]  ;;  %s1166_s25 = smul.u32 144, %s1522_s13 }
   0xd   : > { %1034 = vmatprep.subr.mxu1 %v204_v1  ;;  %991 = vmatpush3.msra.mxu0 %v857_v0  ;;  %v854_v6 = vld [vmem:[%s1518_s1 + $0xe0] sm:$0xff]  ;;  %v853_v8 = vld [vmem:[%s1518_s1 + $0xd8] sm:$0xff]  ;;  %v852_v10 = vld [vmem:[%s1518_s1 + $0xd0] sm:$0xff] }
   0xe   : > { %1035 = vmatpush3.msra.mxu1 %v204_v1  ;;  %992 = vmatprep.subr.mxu0 %v856_v2  ;;  %v201_v7 = vld [vmem:[%s1518_s1 + $0x60] sm:$0xff]  ;;  %v200_v9 = vld [vmem:[%s1518_s1 + $0x58] sm:$0xff]  ;;  %v199_v11 = vld [vmem:[%s1518_s1 + $0x50] sm:$0xff]  ;;  %s1287_s9 = scalar_lea.vmem %s1517_s0, %s1166_s25  ;;  %s893_s25 = sshll.u32 %s1522_s13, 6 }
   0xf   : > { %1036 = vmatprep.subr.mxu1 %v203_v3  ;;  %993 = vmatpush3.msra.mxu0 %v856_v2  ;;  %v851_v12 = vld [vmem:[%s1518_s1 + $0xc8] sm:$0xff]  ;;  %v850_v14 = vld [vmem:[%s1518_s1 + $0xc0] sm:$0xff]  ;;  %v849_v16 = vld [vmem:[%s1518_s1 + $0xb8] sm:$0xff]  ;;  %s1496_s28 = scalar_lea.vmem %s1520_s3, %s893_s25 }
  0x10   : > { %1037 = vmatpush3.msra.mxu1 %v203_v3  ;;  %994 = vmatprep.subr.mxu0 %v855_v4  ;;  %v198_v13 = vld [vmem:[%s1518_s1 + $0x48] sm:$0xff]  ;;  %v197_v15 = vld [vmem:[%s1518_s1 + $0x40] sm:$0xff]  ;;  %v196_v17 = vld [vmem:[%s1518_s1 + $0x38] sm:$0xff] }
  0x11   : > { %1038 = vmatprep.subr.mxu1 %v202_v5  ;;  %995 = vmatpush3.msra.mxu0 %v855_v4  ;;  %v848_v18 = vld [vmem:[%s1518_s1 + $0xb0] sm:$0xff]  ;;  %v847_v20 = vld [vmem:[%s1518_s1 + $0xa8] sm:$0xff]  ;;  %v846_v22 = vld [vmem:[%s1518_s1 + $0xa0] sm:$0xff] }
  0x12   : > { %1039 = vmatpush3.msra.mxu1 %v202_v5  ;;  %996 = vmatprep.subr.mxu0 %v854_v6  ;;  %v195_v19 = vld [vmem:[%s1518_s1 + $0x30] sm:$0xff]  ;;  %v194_v21 = vld [vmem:[%s1518_s1 + $0x28] sm:$0xff]  ;;  %v193_v23 = vld [vmem:[%s1518_s1 + $0x20] sm:$0xff] }
  0x13   : > { %1040 = vmatprep.subr.mxu1 %v201_v7  ;;  %997 = vmatpush3.msra.mxu0 %v854_v6  ;;  %v845_v24 = vld [vmem:[%s1518_s1 + $0x98] sm:$0xff]  ;;  %v171_v26 = vld [vmem:[%s1287_s9] sm:$0xff]  ;;  %v172_v27 = vld [vmem:[%s1287_s9 + $0x8] sm:$0x1] }
  0x14   : > { %1041 = vmatpush3.msra.mxu1 %v201_v7  ;;  %998 = vmatprep.subr.mxu0 %v853_v8  ;;  %v192_v25 = vld [vmem:[%s1518_s1 + $0x18] sm:$0xff]  ;;  %v844_v28 = vld [vmem:[%s1518_s1 + $0x90] sm:$0xff]  ;;  %v222_v32 = vrot.slane %v171_v26, 1  ;;  %v223_v33 = vrot.slane %v172_v27, 1  ;;  %v843_v34 = vld [vmem:[%s1518_s1 + $0x88] sm:$0xff] }
  0x15   : > { %1042 = vmatprep.subr.mxu1 %v200_v9  ;;  %999 = vmatpush3.msra.mxu0 %v853_v8  ;;  %v191_v29 = vld [vmem:[%s1518_s1 + $0x10] sm:$0xff]  ;;  %v174_v31 = vld [vmem:[%s1287_s9 + $0x18] sm:$0x1]  ;;  %v190_v35 = vld [vmem:[%s1518_s1 + $0x8] sm:$0xff] }
  0x16   : > { %1043 = vmatpush3.msra.mxu1 %v200_v9  ;;  %1000 = vmatprep.subr.mxu0 %v852_v10  ;;  %v1310_v30 = vld [vmem:[%s1287_s9 + $0x10] sm:$0xff]  ;;  %v226_v37 = vrot.slane %v174_v31, 1  ;;  %v842_v38 = vld [vmem:[%s1518_s1 + $0x80] sm:$0xff]  ;;  %v224_v40 = vsel %vm221_vm0, %v222_v32, %v223_v33  ;;  %v873_v42 = vld [vmem:[%s1518_s1 + $0x178] sm:$0xff] }
  0x17   : > { %1044 = vmatprep.subr.mxu1 %v199_v11  ;;  %1001 = vmatpush3.msra.mxu0 %v852_v10  ;;  %v225_v36 = vrot.slane %v1310_v30, 1  ;;  %v189_v39 = vld [vmem:[%s1518_s1] sm:$0xff]  ;;  %v889_v43 = vld [vmem:[%s1518_s1 + $0x1f8] sm:$0xff]  ;;  %v872_v44 = vld [vmem:[%s1518_s1 + $0x170] sm:$0xff] }
  0x18   : > { %1045 = vmatpush3.msra.mxu1 %v199_v11  ;;  %1002 = vmatprep.subr.mxu0 %v851_v12  ;;  %v888_v45 = vld [vmem:[%s1518_s1 + $0x1f0] sm:$0xff]  ;;  %v871_v46 = vld [vmem:[%s1518_s1 + $0x168] sm:$0xff]  ;;  %v870_v48 = vld [vmem:[%s1518_s1 + $0x160] sm:$0xff] }
  0x19   : > { %1046 = vmatprep.subr.mxu1 %v198_v13  ;;  %1003 = vmatpush3.msra.mxu0 %v851_v12  ;;  %v1328_v41 = vsel %vm221_vm0, %v225_v36, %v226_v37  ;;  %v887_v47 = vld [vmem:[%s1518_s1 + $0x1e8] sm:$0xff]  ;;  %v886_v49 = vld [vmem:[%s1518_s1 + $0x1e0] sm:$0xff]  ;;  %v869_v50 = vld [vmem:[%s1518_s1 + $0x158] sm:$0xff] }
  0x1a   : > { %1047 = vmatpush3.msra.mxu1 %v198_v13  ;;  %1004 = vmatprep.subr.mxu0 %v850_v14  ;;  %v885_v51 = vld [vmem:[%s1518_s1 + $0x1d8] sm:$0xff]  ;;  %v868_v52 = vld [vmem:[%s1518_s1 + $0x150] sm:$0xff]  ;;  %v1369_v54 = vld [vmem:[%s1287_s9 + $0x20] sm:$0xff] }
  0x1b   : > { %1048 = vmatprep.subr.mxu1 %v197_v15  ;;  %1005 = vmatpush3.msra.mxu0 %v850_v14  ;;  %v884_v53 = vld [vmem:[%s1518_s1 + $0x1d0] sm:$0xff]  ;;  %v176_v55 = vld [vmem:[%s1287_s9 + $0x28] sm:$0x1]  ;;  %v178_v59 = vld [vmem:[%s1287_s9 + $0x38] sm:$0x1]  ;;  %v228_v60 = vrot.slane %v1369_v54, 1 }
  0x1c   : > { %1049 = vmatpush3.msra.mxu1 %v197_v15  ;;  %1006 = vmatprep.subr.mxu0 %v849_v16  ;;  %v867_v56 = vld [vmem:[%s1518_s1 + $0x148] sm:$0xff]  ;;  %v1379_v58 = vld [vmem:[%s1287_s9 + $0x30] sm:$0xff]  ;;  %v229_v61 = vrot.slane %v176_v55, 1  ;;  %v866_v62 = vld [vmem:[%s1518_s1 + $0x140] sm:$0xff]  ;;  %v232_v2 = vrot.slane %v178_v59, 1 }
  0x1d   : > { %1050 = vmatprep.subr.mxu1 %v196_v17  ;;  %1007 = vmatpush3.msra.mxu0 %v849_v16  ;;  %v883_v57 = vld [vmem:[%s1518_s1 + $0x1c8] sm:$0xff]  ;;  %v882_v63 = vld [vmem:[%s1518_s1 + $0x1c0] sm:$0xff]  ;;  %v865_v0 = vld [vmem:[%s1518_s1 + $0x138] sm:$0xff]  ;;  %v231_v1 = vrot.slane %v1379_v58, 1 }
  0x1e   : > { %1051 = vmatpush3.msra.mxu1 %v196_v17  ;;  %1008 = vmatprep.subr.mxu0 %v848_v18  ;;  %v881_v3 = vld [vmem:[%s1518_s1 + $0x1b8] sm:$0xff]  ;;  %v1397_v4 = vld [vmem:[%s1287_s9 + $0x40] sm:$0xff]  ;;  %v180_v5 = vld [vmem:[%s1287_s9 + $0x48] sm:$0x1]  ;;  %v1401_v6 = vsel %vm221_vm0, %v228_v60, %v229_v61 }
  0x1f   : > { %1052 = vmatprep.subr.mxu1 %v195_v19  ;;  %1009 = vmatpush3.msra.mxu0 %v848_v18  ;;  %v1404_v7 = vld [vmem:[%s1287_s9 + $0x50] sm:$0xff]  ;;  %v182_v8 = vld [vmem:[%s1287_s9 + $0x58] sm:$0x1]  ;;  %v1408_v9 = vsel %vm221_vm0, %v231_v1, %v232_v2  ;;  %v234_v10 = vrot.slane %v1397_v4, 1  ;;  %v235_v11 = vrot.slane %v180_v5, 1  ;;  %v863_v14 = vld [vmem:[%s1518_s1 + $0x128] sm:$0xff] }
  0x20   : > { %1053 = vmatpush3.msra.mxu1 %v195_v19  ;;  %1010 = vmatprep.subr.mxu0 %v847_v20  ;;  %v864_v12 = vld [vmem:[%s1518_s1 + $0x130] sm:$0xff]  ;;  %v237_v15 = vrot.slane %v1404_v7, 1  ;;  %v238_v16 = vrot.slane %v182_v8, 1  ;;  %v879_v17 = vld [vmem:[%s1518_s1 + $0x1a8] sm:$0xff]  ;;  %v1429_v18 = vld [vmem:[%s1287_s9 + $0x60] sm:$0xff] }
  0x21   : > { %1054 = vmatprep.subr.mxu1 %v194_v21  ;;  %1011 = vmatpush3.msra.mxu0 %v847_v20  ;;  %v880_v13 = vld [vmem:[%s1518_s1 + $0x1b0] sm:$0xff]  ;;  %v184_v19 = vld [vmem:[%s1287_s9 + $0x68] sm:$0x1]  ;;  %v236_v20 = vsel %vm221_vm0, %v234_v10, %v235_v11  ;;  %v878_v27 = vld [vmem:[%s1518_s1 + $0x1a0] sm:$0xff] }
  0x22   : > { %1055 = vmatpush3.msra.mxu1 %v194_v21  ;;  %1012 = vmatprep.subr.mxu0 %v846_v22  ;;  %v1434_v21 = vld [vmem:[%s1287_s9 + $0x70] sm:$0xff]  ;;  %v861_v31 = vld [vmem:[%s1518_s1 + $0x118] sm:$0xff]  ;;  %v859_v37 = vld [vmem:[%s1518_s1 + $0x108] sm:$0xff] }
  0x23   : > { %1056 = vmatprep.subr.mxu1 %v193_v23  ;;  %1013 = vmatpush3.msra.mxu0 %v846_v22  ;;  %v186_v22 = vld [vmem:[%s1287_s9 + $0x78] sm:$0x1]  ;;  %v876_v36 = vld [vmem:[%s1518_s1 + $0x190] sm:$0xff]  ;;  %v890_v2 = vld [vmem:[%s1519_s2] ss:$0 sm:$0xff] }
  0x24   : > { %1057 = vmatpush3.msra.mxu1 %v193_v23  ;;  %1014 = vmatprep.subr.mxu0 %v845_v24  ;;  %v239_v23 = vsel %vm221_vm0, %v237_v15, %v238_v16  ;;  %v877_v32 = vld [vmem:[%s1518_s1 + $0x198] sm:$0xff] }
  0x25   : > { %1058 = vmatprep.subr.mxu1 %v192_v25  ;;  %1015 = vmatpush3.msra.mxu0 %v845_v24  ;;  %v240_v24 = vrot.slane %v1429_v18, 1 }
  0x26   : > { %1059 = vmatpush3.msra.mxu1 %v192_v25  ;;  %1016 = vmatprep.subr.mxu0 %v844_v28  ;;  %v241_v25 = vrot.slane %v184_v19, 1 }
  0x27   : > { %1060 = vmatprep.subr.mxu1 %v191_v29  ;;  %1017 = vmatpush3.msra.mxu0 %v844_v28  ;;  %v243_v28 = vrot.slane %v1434_v21, 1 }
  0x28   : > { %1061 = vmatpush3.msra.mxu1 %v191_v29  ;;  %1018 = vmatprep.subr.mxu0 %v843_v34  ;;  %v244_v29 = vrot.slane %v186_v22, 1  ;;  %v242_v33 = vsel %vm221_vm0, %v240_v24, %v241_v25 }
  0x29   : > { %1062 = vmatprep.subr.mxu1 %v190_v35  ;;  %1019 = vmatpush3.msra.mxu0 %v843_v34 }
  0x2a   : > { %1063 = vmatpush3.msra.mxu1 %v190_v35  ;;  %1020 = vmatprep.subr.mxu0 %v842_v38  ;;  %v245_v34 = vsel %vm221_vm0, %v243_v28, %v244_v29  ;;  %v860_v35 = vld [vmem:[%s1518_s1 + $0x110] sm:$0xff] }
  0x2b   : > { %1064 = vmatprep.subr.mxu1 %v189_v39  ;;  %1021 = vmatpush3.msra.mxu0 %v842_v38  ;;  %v875_v38 = vld [vmem:[%s1518_s1 + $0x188] sm:$0xff] }
  0x2c   : > { %1022 = vmatprep.mubr.f32.mxu0 %v224_v40  ;;  %1065 = vmatpush3.msra.mxu1 %v189_v39  ;;  %v858_v39 = vld [vmem:[%s1518_s1 + $0x100] sm:$0xff] }
  0x2d   : > { %1066 = vmatprep.mubr.f32.mxu1 %v171_v26  ;;  %1023 = vmatmul.mubr.f32.vlgmr.msra.gmra.mxu0 %v1328_v41  ;;  %v862_v26 = vld [vmem:[%s1518_s1 + $0x120] sm:$0xff] }
  0x2e   : > { %1067 = vmatmul.mubr.f32.vlgmr.msra.gmra.mxu1 %v1310_v30  ;;  %1078 = vmatprep.subr.mxu0 %v873_v42  ;;  %v874_v40 = vld [vmem:[%s1518_s1 + $0x180] sm:$0xff] }
  0x2f   : > { %1122 = vmatprep.subr.mxu1 %v889_v43  ;;  %1079 = vmatpush3.msra.mxu0 %v873_v42  ;;  %v187_v42 = vld [vmem:[%s1287_s9 + $0x80] sm:$0xff] }
  0x30   : > { %1123 = vmatpush3.msra.mxu1 %v889_v43  ;;  %1080 = vmatprep.subr.mxu0 %v872_v44  ;;  %v188_v43 = vld [vmem:[%s1287_s9 + $0x88] sm:$0x1] }
  0x31   : > { %1124 = vmatprep.subr.mxu1 %v888_v45  ;;  %1081 = vmatpush3.msra.mxu0 %v872_v44  ;;  %v614_v44 = vrot.slane %v188_v43, 1 }
  0x32   : > { %1125 = vmatpush3.msra.mxu1 %v888_v45  ;;  %1082 = vmatprep.subr.mxu0 %v871_v46 }
  0x33   : > { %1126 = vmatprep.subr.mxu1 %v887_v47  ;;  %1083 = vmatpush3.msra.mxu0 %v871_v46 }
  0x34   : > { %1127 = vmatpush3.msra.mxu1 %v887_v47  ;;  %1084 = vmatprep.subr.mxu0 %v870_v48 }
  0x35   : > { %1128 = vmatprep.subr.mxu1 %v886_v49  ;;  %1085 = vmatpush3.msra.mxu0 %v870_v48 }
  0x36   : > { %1129 = vmatpush3.msra.mxu1 %v886_v49  ;;  %1086 = vmatprep.subr.mxu0 %v869_v50 }
  0x37   : > { %1130 = vmatprep.subr.mxu1 %v885_v51  ;;  %1087 = vmatpush3.msra.mxu0 %v869_v50 }
  0x38   : > { %1131 = vmatpush3.msra.mxu1 %v885_v51  ;;  %1088 = vmatprep.subr.mxu0 %v868_v52 }
  0x39   : > { %1132 = vmatprep.subr.mxu1 %v884_v53  ;;  %1089 = vmatpush3.msra.mxu0 %v868_v52 }
  0x3a   : > { %1133 = vmatpush3.msra.mxu1 %v884_v53  ;;  %1090 = vmatprep.subr.mxu0 %v867_v56 }
  0x3b   : > { %1134 = vmatprep.subr.mxu1 %v883_v57  ;;  %1091 = vmatpush3.msra.mxu0 %v867_v56 }
  0x3c   : > { %1135 = vmatpush3.msra.mxu1 %v883_v57  ;;  %1092 = vmatprep.subr.mxu0 %v866_v62 }
  0x3d   : > { %1136 = vmatprep.subr.mxu1 %v882_v63  ;;  %1093 = vmatpush3.msra.mxu0 %v866_v62 }
  0x3e   : > { %1137 = vmatpush3.msra.mxu1 %v882_v63  ;;  %1094 = vmatprep.subr.mxu0 %v865_v0 }
  0x3f   : > { %1138 = vmatprep.subr.mxu1 %v881_v3  ;;  %1025 = vmatprep.mubr.f32.mxu0 %v1401_v6 }
  0x40   : > { %1069 = vmatprep.mubr.f32.mxu1 %v1369_v54  ;;  %1095 = vmatpush3.msra.mxu0 %v865_v0 }
  0x41   : > { %1139 = vmatpush3.msra.mxu1 %v881_v3  ;;  %1026 = vmatmul.mubr.f32.gmra.mxu0 %v1408_v9 }
  0x42   : > { %1070 = vmatmul.mubr.f32.gmra.mxu1 %v1379_v58  ;;  %1096 = vmatprep.subr.mxu0 %v864_v12 }
  0x43   : > { %1140 = vmatprep.subr.mxu1 %v880_v13  ;;  %1097 = vmatpush3.msra.mxu0 %v864_v12 }
  0x44   : > { %1141 = vmatpush3.msra.mxu1 %v880_v13  ;;  %1098 = vmatprep.subr.mxu0 %v863_v14 }
  0x45   : > { %1142 = vmatprep.subr.mxu1 %v879_v17  ;;  %1028 = vmatprep.mubr.f32.mxu0 %v236_v20 }
  0x46   : > { %1072 = vmatprep.mubr.f32.mxu1 %v1397_v4  ;;  %1099 = vmatpush3.msra.mxu0 %v863_v14 }
  0x47   : > { %1143 = vmatpush3.msra.mxu1 %v879_v17  ;;  %1029 = vmatmul.mubr.f32.gmra.mxu0 %v239_v23 }
  0x48   : > { %1073 = vmatmul.mubr.f32.gmra.mxu1 %v1404_v7  ;;  %1100 = vmatprep.subr.mxu0 %v862_v26 }
  0x49   : > { %1144 = vmatprep.subr.mxu1 %v878_v27  ;;  %1101 = vmatpush3.msra.mxu0 %v862_v26 }
  0x4a   : > { %1145 = vmatpush3.msra.mxu1 %v878_v27  ;;  %1102 = vmatprep.subr.mxu0 %v861_v31 }
  0x4b   : > { %1146 = vmatprep.subr.mxu1 %v877_v32  ;;  %1031 = vmatprep.mubr.f32.mxu0 %v242_v33 }
  0x4c   : > { %1075 = vmatprep.mubr.f32.mxu1 %v1429_v18  ;;  %1103 = vmatpush3.msra.mxu0 %v861_v31 }
  0x4d   : > { %1147 = vmatpush3.msra.mxu1 %v877_v32  ;;  %1032 = vmatmul.mubr.f32.gmra.mxu0 %v245_v34 }
  0x4e   : > { %1076 = vmatmul.mubr.f32.gmra.mxu1 %v1434_v21  ;;  %1104 = vmatprep.subr.mxu0 %v860_v35 }
  0x4f   : > { %1148 = vmatprep.subr.mxu1 %v876_v36  ;;  %1105 = vmatpush3.msra.mxu0 %v860_v35 }
  0x50   : > { %1149 = vmatpush3.msra.mxu1 %v876_v36  ;;  %1106 = vmatprep.subr.mxu0 %v859_v37 }
  0x51   : > { %1150 = vmatprep.subr.mxu1 %v875_v38  ;;  %1107 = vmatpush3.msra.mxu0 %v859_v37 }
  0x52   : > { %1151 = vmatpush3.msra.mxu1 %v875_v38  ;;  %1108 = vmatprep.subr.mxu0 %v858_v39 }
  0x53   : > { %1152 = vmatprep.subr.mxu1 %v874_v40  ;;  %1109 = vmatpush3.msra.mxu0 %v858_v39 }
  0x54   : > { %1110 = vmatprep.mubr.f32.mxu0 %v1310_v30  ;;  %1153 = vmatpush3.msra.mxu1 %v874_v40  ;;  %v613_v30 = vrot.slane %v187_v42, 1 }
  0x55   : > { %1154 = vmatprep.mubr.f32.mxu1 %v1328_v41  ;;  %1111 = vmatmul.mubr.f32.vlgmr.msra.gmra.mxu0 %v1369_v54 }
  0x56   : > { %1155 = vmatmul.mubr.f32.vlgmr.msra.gmra.mxu1 %v1401_v6  ;;  %1113 = vmatprep.mubr.f32.mxu0 %v1379_v58  ;;  %v615_v41 = vsel %vm221_vm0, %v613_v30, %v614_v44 }
  0x57   : > { %1157 = vmatprep.mubr.f32.mxu1 %v1408_v9 }
  0x59   : > { %1114 = vmatmul.mubr.f32.gmra.mxu0 %v1397_v4 }
  0x5a   : > { %1158 = vmatmul.mubr.f32.gmra.mxu1 %v236_v20  ;;  %1116 = vmatprep.mubr.f32.mxu0 %v1404_v7 }
  0x5b   : > { %1160 = vmatprep.mubr.f32.mxu1 %v239_v23 }
  0x5d   : > { %1117 = vmatmul.mubr.f32.gmra.mxu0 %v1429_v18 }
  0x5e   : > { %1161 = vmatmul.mubr.f32.gmra.mxu1 %v242_v33  ;;  %1119 = vmatprep.mubr.f32.mxu0 %v1434_v21 }
  0x5f   : > { %1163 = vmatprep.mubr.f32.mxu1 %v245_v34 }
  0x61   : > { %1120 = vmatmul.mubr.f32.gmra.mxu0 %v187_v42 }
  0x62   : > { %1164 = vmatmul.mubr.f32.gmra.mxu1 %v615_v41 }
  0xed   : > { %v1024_v45 = vpop.f32.mrf.mxu0 }
  0xee   : > { %v1068_v46 = vpop.f32.mrf.mxu1 }
  0xef   : > { %v337_v47 = vpop.f32.mrf.mxu0  ;;  %v448_v61 = vadd.f32 %v1068_v46, %v1024_v45 }
  0xf0   : > { %v442_v48 = vpop.f32.mrf.mxu1 }
  0xf1   : > { %v443_v0 = vadd.f32 %v442_v48, %v337_v47 }
 0x101   : > { %v1027_v49 = vpop.f32.mrf.mxu0 }
 0x102   : > { %v1071_v50 = vpop.f32.mrf.mxu1 }
 0x103   : > { %v347_v51 = vpop.f32.mrf.mxu0  ;;  %v458_v5 = vadd.f32 %v1071_v50, %v1027_v49 }
 0x104   : > { %v452_v52 = vpop.f32.mrf.mxu1 }
 0x105   : > { %v453_v10 = vadd.f32 %v452_v52, %v347_v51 }
 0x107   : > { %v1030_v53 = vpop.f32.mrf.mxu0 }
 0x108   : > { %v1074_v54 = vpop.f32.mrf.mxu1 }
 0x109   : > { %v357_v55 = vpop.f32.mrf.mxu0  ;;  %v468_v14 = vadd.f32 %v1074_v54, %v1030_v53 }
 0x10a   : > { %v462_v56 = vpop.f32.mrf.mxu1 }
 0x10b   : > { %v463_v21 = vadd.f32 %v462_v56, %v357_v55 }
 0x10d   : > { %v1033_v57 = vpop.f32.mrf.mxu0 }
 0x10e   : > { %v1077_v58 = vpop.f32.mrf.mxu1 }
 0x10f   : > { %v367_v59 = vpop.f32.mrf.mxu0  ;;  %v478_v28 = vadd.f32 %v1077_v58, %v1033_v57 }
 0x110   : > { %v472_v60 = vpop.f32.mrf.mxu1 }
 0x111   : > { %v473_v36 = vadd.f32 %v472_v60, %v367_v59 }
 0x115   : > { %v1112_v62 = vpop.f32.mrf.mxu0 }
 0x116   : > { %v1156_v63 = vpop.f32.mrf.mxu1  ;;  %v604_v1 = vadd.f32 %v1112_v62, %v448_v61 }
 0x117   : > { %v564_v3 = vpop.f32.mrf.mxu0 }
 0x118   : > { %v700_v4 = vpop.f32.mrf.mxu1  ;;  %v740_v6 = vadd.f32 %v1156_v63, %v604_v1  ;;  %v603_v7 = vadd.f32 %v564_v3, %v443_v0 }
 0x119   : > { %v1115_v8 = vpop.f32.mrf.mxu0 }
 0x11a   : > { %v1159_v9 = vpop.f32.mrf.mxu1  ;;  %v755_v11 = vadd.f32 %v890_v2, %v740_v6  ;;  %v739_v12 = vadd.f32 %v700_v4, %v603_v7  ;;  %v606_v13 = vadd.f32 %v1115_v8, %v458_v5 }
 0x11b   : > { %v574_v15 = vpop.f32.mrf.mxu0 }
 0x11c   : > { %v710_v16 = vpop.f32.mrf.mxu1  ;;  %v763_v17 = vmax.f32 %v755_v11, 0.0  ;;  %v754_v18 = vadd.f32 %v890_v2, %v739_v12  ;;  %v742_v19 = vadd.f32 %v1159_v9, %v606_v13  ;;  %v605_v20 = vadd.f32 %v574_v15, %v453_v10 }
 0x11d   : > { %v1118_v22 = vpop.f32.mrf.mxu0 }
 0x11e   : > { %v1162_v23 = vpop.f32.mrf.mxu1  ;;  %772 = vst.msk [vmem:[%s1496_s28 + $0x8] sm:$0xff] %vm770_vm1, %v763_v17  ;;  %v762_v24 = vmax.f32 %v754_v18, 0.0  ;;  %v757_v25 = vadd.f32 %v890_v2, %v742_v19  ;;  %v741_v26 = vadd.f32 %v710_v16, %v605_v20  ;;  %v608_v27 = vadd.f32 %v1118_v22, %v468_v14 }
 0x11f   : > { %v584_v29 = vpop.f32.mrf.mxu0 }
 0x120   : > { %v720_v31 = vpop.f32.mrf.mxu1  ;;  %771 = vst.msk [vmem:[%s1496_s28] sm:$0xff] %vm770_vm1, %v762_v24  ;;  %v765_v32 = vmax.f32 %v757_v25, 0.0  ;;  %v756_v33 = vadd.f32 %v890_v2, %v741_v26  ;;  %v744_v34 = vadd.f32 %v1162_v23, %v608_v27  ;;  %v607_v35 = vadd.f32 %v584_v29, %v463_v21 }
 0x121   : > { %v1121_v37 = vpop.f32.mrf.mxu0 }
 0x122   : > { %v1165_v38 = vpop.f32.mrf.mxu1  ;;  %774 = vst.msk [vmem:[%s1496_s28 + $0x18] sm:$0xff] %vm770_vm1, %v765_v32  ;;  %v764_v39 = vmax.f32 %v756_v33, 0.0  ;;  %v759_v40 = vadd.f32 %v890_v2, %v744_v34  ;;  %v743_v42 = vadd.f32 %v720_v31, %v607_v35  ;;  %v610_v43 = vadd.f32 %v1121_v37, %v478_v28 }
 0x123   : > { %v594_v30 = vpop.f32.mrf.mxu0 }
 0x124   : > { %773 = vst.msk [vmem:[%s1496_s28 + $0x10] sm:$0xff] %vm770_vm1, %v764_v39  ;;  %v767_v44 = vmax.f32 %v759_v40, 0.0  ;;  %v758_v41 = vadd.f32 %v890_v2, %v743_v42  ;;  %v746_v45 = vadd.f32 %v1165_v38, %v610_v43  ;;  %v609_v46 = vadd.f32 %v594_v30, %v473_v36  ;;  %v730_v47 = vpop.f32.mrf.mxu1 }
 0x126   : > { %776 = vst.msk [vmem:[%s1496_s28 + $0x28] sm:$0xff] %vm770_vm1, %v767_v44  ;;  %v766_v48 = vmax.f32 %v758_v41, 0.0  ;;  %v761_v49 = vadd.f32 %v890_v2, %v746_v45  ;;  %v745_v50 = vadd.f32 %v730_v47, %v609_v46 }
 0x128   : > { %775 = vst.msk [vmem:[%s1496_s28 + $0x20] sm:$0xff] %vm770_vm1, %v766_v48  ;;  %v769_v51 = vmax.f32 %v761_v49, 0.0  ;;  %v760_v52 = vadd.f32 %v890_v2, %v745_v50 }
 0x12a   : > { %778 = vst.msk [vmem:[%s1496_s28 + $0x38] sm:$0xff] %vm770_vm1, %v769_v51  ;;  %v768_v53 = vmax.f32 %v760_v52, 0.0 }
 0x12c   : > { %777 = vst.msk [vmem:[%s1496_s28 + $0x30] sm:$0xff] %vm770_vm1, %v768_v53 }
 0x12d PF: > { %s13_s12 = sadd.s32 1, %s1181_s12  }
 0x12e   : > { %p10_p4 = scmp.ge.s32.totalorder %s13_s12, 4  }
 0x130   :  { %12 = sbr.rel (!%p10_p4) target bundleno = 1 (0x1), region = 65 }

// kernel: feature_extractor_forward.7
= control target key start
LH: loop header
LB: loop body
LE: loop exit
PB: predicated region body
PF: predicated region fallthrough
CT: control target
= control target key end

     0   :  { %s1126_s12 = smov 0   ;;  %s1622_s0 = inlined_call_operand.vmem [shape: f32[2,5,9,256], index: 0, kind: input, shape index: {}]   ;;  %s1623_s1 = inlined_call_operand.vmem [shape: f32[2,2,256,128], index: 1, kind: input, shape index: {}]   ;;  %s1624_s2 = inlined_call_operand.vmem [shape: f32[1,128], index: 2, kind: input, shape index: {}]   ;;  %s1625_s3 = inlined_call_operand.vmem [shape: f32[2,32,128], index: 3, kind: output, shape index: {}]  }
   0x1 LB: > { %s805_s13 = sadd.s32 4294967295, %s1104_s12   ;;  %p809_p0 = scmp.ge.s32.totalorder %s1104_s12, 1  ;;  %s1104_s12 = sphi %s1126_s12, %s13_s12  }
   0x2   : > { %p137_p1 = scmp.lt.s32.totalorder %s1104_s12, 3 }
   0x4   : > { %p138_p2 = pnand %p809_p0, %p137_p1 }
   0x5   : > { %p1196_p3 = scmp.lt.s32.totalorder (!%p138_p2), %s805_s13, 1 }
   0x6   : > { %141 = sbr.rel (%p138_p2) target bundleno = 304 (0x130), region = 32 }
   0xb   : > { %v844_v0 = vld [vmem:[%s1623_s1 + $0x1f8] sm:$0xff]  ;;  %v843_v4 = vld [vmem:[%s1623_s1 + $0x1f0] sm:$0xff]  ;;  %v842_v8 = vld [vmem:[%s1623_s1 + $0x1e8] sm:$0xff]  ;;  %s1628_s13 = smov (!%p1196_p3, %s805_s13), 1  ;;  %vm239_vm0 = vcmask 1046528  }
   0xc   : > { %v222_v1 = vld [vmem:[%s1623_s1 + $0xf8] sm:$0xff]  ;;  %913 = vmatprep.subr.mxu0 %v844_v0  ;;  %v221_v5 = vld [vmem:[%s1623_s1 + $0xf0] sm:$0xff]  ;;  %v220_v9 = vld [vmem:[%s1623_s1 + $0xe8] sm:$0xff]  ;;  %s1089_s10 = smul.u32 160, %s1628_s13  ;;  %s912_s6 = sshll.u32 %s1628_s13, 5 }
   0xd   : > { %v828_v2 = vld [vmem:[%s1623_s1 + $0x178] sm:$0xff]  ;;  %957 = vmatprep.subr.mxu1 %v222_v1  ;;  %v827_v6 = vld [vmem:[%s1623_s1 + $0x170] sm:$0xff]  ;;  %v826_v10 = vld [vmem:[%s1623_s1 + $0x168] sm:$0xff]  ;;  %s170_s9 = scalar_lea.vmem %s1625_s3, %s912_s6 }
   0xe   : > { %v206_v3 = vld [vmem:[%s1623_s1 + $0x78] sm:$0xff]  ;;  %914 = vmatpush3.msra.mxu0 %v828_v2  ;;  %v205_v7 = vld [vmem:[%s1623_s1 + $0x70] sm:$0xff]  ;;  %v204_v11 = vld [vmem:[%s1623_s1 + $0x68] sm:$0xff]  ;;  %s1282_s4 = scalar_lea.vmem %s1622_s0, %s1089_s10 }
   0xf   : > { %958 = vmatpush3.msra.mxu1 %v206_v3  ;;  %915 = vmatprep.subr.mxu0 %v843_v4  ;;  %v841_v12 = vld [vmem:[%s1623_s1 + $0x1e0] sm:$0xff]  ;;  %v840_v16 = vld [vmem:[%s1623_s1 + $0x1d8] sm:$0xff]  ;;  %v839_v20 = vld [vmem:[%s1623_s1 + $0x1d0] sm:$0xff] }
  0x10   : > { %959 = vmatprep.subr.mxu1 %v221_v5  ;;  %916 = vmatpush3.msra.mxu0 %v827_v6  ;;  %v219_v13 = vld [vmem:[%s1623_s1 + $0xe0] sm:$0xff]  ;;  %v218_v17 = vld [vmem:[%s1623_s1 + $0xd8] sm:$0xff]  ;;  %v217_v21 = vld [vmem:[%s1623_s1 + $0xd0] sm:$0xff] }
  0x11   : > { %960 = vmatpush3.msra.mxu1 %v205_v7  ;;  %917 = vmatprep.subr.mxu0 %v842_v8  ;;  %v825_v14 = vld [vmem:[%s1623_s1 + $0x160] sm:$0xff]  ;;  %v824_v18 = vld [vmem:[%s1623_s1 + $0x158] sm:$0xff]  ;;  %v823_v22 = vld [vmem:[%s1623_s1 + $0x150] sm:$0xff] }
  0x12   : > { %961 = vmatprep.subr.mxu1 %v220_v9  ;;  %v203_v15 = vld [vmem:[%s1623_s1 + $0x60] sm:$0xff]  ;;  %918 = vmatpush3.msra.mxu0 %v826_v10  ;;  %v202_v19 = vld [vmem:[%s1623_s1 + $0x58] sm:$0xff]  ;;  %v201_v23 = vld [vmem:[%s1623_s1 + $0x50] sm:$0xff] }
  0x13   : > { %962 = vmatpush3.msra.mxu1 %v204_v11  ;;  %919 = vmatprep.subr.mxu0 %v841_v12  ;;  %v838_v24 = vld [vmem:[%s1623_s1 + $0x1c8] sm:$0xff]  ;;  %v837_v28 = vld [vmem:[%s1623_s1 + $0x1c0] sm:$0xff]  ;;  %v836_v32 = vld [vmem:[%s1623_s1 + $0x1b8] sm:$0xff] }
  0x14   : > { %963 = vmatprep.subr.mxu1 %v219_v13  ;;  %920 = vmatpush3.msra.mxu0 %v825_v14  ;;  %v216_v25 = vld [vmem:[%s1623_s1 + $0xc8] sm:$0xff]  ;;  %v215_v29 = vld [vmem:[%s1623_s1 + $0xc0] sm:$0xff]  ;;  %v214_v33 = vld [vmem:[%s1623_s1 + $0xb8] sm:$0xff] }
  0x15   : > { %964 = vmatpush3.msra.mxu1 %v203_v15  ;;  %921 = vmatprep.subr.mxu0 %v840_v16  ;;  %v822_v26 = vld [vmem:[%s1623_s1 + $0x148] sm:$0xff]  ;;  %v821_v30 = vld [vmem:[%s1623_s1 + $0x140] sm:$0xff]  ;;  %v820_v34 = vld [vmem:[%s1623_s1 + $0x138] sm:$0xff] }
  0x16   : > { %965 = vmatprep.subr.mxu1 %v218_v17  ;;  %922 = vmatpush3.msra.mxu0 %v824_v18  ;;  %v200_v27 = vld [vmem:[%s1623_s1 + $0x48] sm:$0xff]  ;;  %v199_v31 = vld [vmem:[%s1623_s1 + $0x40] sm:$0xff]  ;;  %v198_v35 = vld [vmem:[%s1623_s1 + $0x38] sm:$0xff] }
  0x17   : > { %966 = vmatpush3.msra.mxu1 %v202_v19  ;;  %923 = vmatprep.subr.mxu0 %v839_v20  ;;  %v835_v36 = vld [vmem:[%s1623_s1 + $0x1b0] sm:$0xff]  ;;  %v834_v40 = vld [vmem:[%s1623_s1 + $0x1a8] sm:$0xff]  ;;  %v833_v44 = vld [vmem:[%s1623_s1 + $0x1a0] sm:$0xff] }
  0x18   : > { %967 = vmatprep.subr.mxu1 %v217_v21  ;;  %924 = vmatpush3.msra.mxu0 %v823_v22  ;;  %v213_v37 = vld [vmem:[%s1623_s1 + $0xb0] sm:$0xff]  ;;  %v212_v41 = vld [vmem:[%s1623_s1 + $0xa8] sm:$0xff]  ;;  %v211_v45 = vld [vmem:[%s1623_s1 + $0xa0] sm:$0xff] }
  0x19   : > { %968 = vmatpush3.msra.mxu1 %v201_v23  ;;  %925 = vmatprep.subr.mxu0 %v838_v24  ;;  %v819_v38 = vld [vmem:[%s1623_s1 + $0x130] sm:$0xff]  ;;  %v818_v42 = vld [vmem:[%s1623_s1 + $0x128] sm:$0xff]  ;;  %v817_v46 = vld [vmem:[%s1623_s1 + $0x120] sm:$0xff] }
  0x1a   : > { %969 = vmatprep.subr.mxu1 %v216_v25  ;;  %926 = vmatpush3.msra.mxu0 %v822_v26  ;;  %v197_v39 = vld [vmem:[%s1623_s1 + $0x30] sm:$0xff]  ;;  %v196_v43 = vld [vmem:[%s1623_s1 + $0x28] sm:$0xff]  ;;  %v195_v47 = vld [vmem:[%s1623_s1 + $0x20] sm:$0xff] }
  0x1b   : > { %970 = vmatpush3.msra.mxu1 %v200_v27  ;;  %927 = vmatprep.subr.mxu0 %v837_v28  ;;  %v832_v48 = vld [vmem:[%s1623_s1 + $0x198] sm:$0xff]  ;;  %v172_v50 = vld [vmem:[%s1282_s4 + $0x8] sm:$0xff]  ;;  %v831_v54 = vld [vmem:[%s1623_s1 + $0x190] sm:$0xff] }
  0x1c   : > { %971 = vmatprep.subr.mxu1 %v215_v29  ;;  %928 = vmatpush3.msra.mxu0 %v821_v30  ;;  %v210_v49 = vld [vmem:[%s1623_s1 + $0x98] sm:$0xff]  ;;  %v209_v55 = vld [vmem:[%s1623_s1 + $0x90] sm:$0xff]  ;;  %v171_v56 = vld [vmem:[%s1282_s4] sm:$0xff]  ;;  %v243_v60 = vrot.slane %v172_v50, 1 }
  0x1d   : > { %972 = vmatpush3.msra.mxu1 %v199_v31  ;;  %929 = vmatprep.subr.mxu0 %v836_v32  ;;  %v174_v51 = vld [vmem:[%s1282_s4 + $0x18] sm:$0x1]  ;;  %v173_v57 = vld [vmem:[%s1282_s4 + $0x10] sm:$0x1]  ;;  %v830_v62 = vld [vmem:[%s1623_s1 + $0x188] sm:$0xff]  ;;  %v240_v2 = vrot.slane %v171_v56, 1 }
  0x1e   : > { %973 = vmatprep.subr.mxu1 %v214_v33  ;;  %930 = vmatpush3.msra.mxu0 %v820_v34  ;;  %v816_v52 = vld [vmem:[%s1623_s1 + $0x118] sm:$0xff]  ;;  %v815_v58 = vld [vmem:[%s1623_s1 + $0x110] sm:$0xff]  ;;  %v244_v61 = vrot.slane %v174_v51, 1  ;;  %v208_v63 = vld [vmem:[%s1623_s1 + $0x88] sm:$0xff]  ;;  %v241_v3 = vrot.slane %v173_v57, 1 }
  0x1f   : > { %974 = vmatpush3.msra.mxu1 %v198_v35  ;;  %931 = vmatprep.subr.mxu0 %v835_v36  ;;  %v194_v53 = vld [vmem:[%s1623_s1 + $0x18] sm:$0xff]  ;;  %v193_v59 = vld [vmem:[%s1623_s1 + $0x10] sm:$0xff]  ;;  %v814_v0 = vld [vmem:[%s1623_s1 + $0x108] sm:$0xff] }
  0x20   : > { %975 = vmatprep.subr.mxu1 %v213_v37  ;;  %932 = vmatpush3.msra.mxu0 %v819_v38  ;;  %v192_v1 = vld [vmem:[%s1623_s1 + $0x8] sm:$0xff]  ;;  %v829_v4 = vld [vmem:[%s1623_s1 + $0x180] sm:$0xff]  ;;  %v245_v7 = vsel %vm239_vm0, %v243_v60, %v244_v61  ;;  %v242_v9 = vsel %vm239_vm0, %v240_v2, %v241_v3  ;;  %v876_v10 = vld [vmem:[%s1623_s1 + $0x2f8] sm:$0xff] }
  0x21   : > { %976 = vmatpush3.msra.mxu1 %v197_v39  ;;  %933 = vmatprep.subr.mxu0 %v834_v40  ;;  %v207_v5 = vld [vmem:[%s1623_s1 + $0x80] sm:$0xff]  ;;  %v908_v11 = vld [vmem:[%s1623_s1 + $0x3f8] sm:$0xff]  ;;  %v875_v14 = vld [vmem:[%s1623_s1 + $0x2f0] sm:$0xff] }
  0x22   : > { %977 = vmatprep.subr.mxu1 %v212_v41  ;;  %934 = vmatpush3.msra.mxu0 %v818_v42  ;;  %v813_v6 = vld [vmem:[%s1623_s1 + $0x100] sm:$0xff]  ;;  %v860_v12 = vld [vmem:[%s1623_s1 + $0x278] sm:$0xff]  ;;  %v907_v15 = vld [vmem:[%s1623_s1 + $0x3f0] sm:$0xff] }
  0x23   : > { %978 = vmatpush3.msra.mxu1 %v196_v43  ;;  %935 = vmatprep.subr.mxu0 %v833_v44  ;;  %v191_v8 = vld [vmem:[%s1623_s1] sm:$0xff]  ;;  %v892_v13 = vld [vmem:[%s1623_s1 + $0x378] sm:$0xff]  ;;  %v859_v16 = vld [vmem:[%s1623_s1 + $0x270] sm:$0xff] }
  0x24   : > { %979 = vmatprep.subr.mxu1 %v211_v45  ;;  %936 = vmatpush3.msra.mxu0 %v817_v46  ;;  %v891_v17 = vld [vmem:[%s1623_s1 + $0x370] sm:$0xff]  ;;  %v874_v18 = vld [vmem:[%s1623_s1 + $0x2e8] sm:$0xff]  ;;  %v873_v22 = vld [vmem:[%s1623_s1 + $0x2e0] sm:$0xff] }
  0x25   : > { %980 = vmatpush3.msra.mxu1 %v195_v47  ;;  %937 = vmatprep.subr.mxu0 %v832_v48  ;;  %v906_v19 = vld [vmem:[%s1623_s1 + $0x3e8] sm:$0xff]  ;;  %v905_v23 = vld [vmem:[%s1623_s1 + $0x3e0] sm:$0xff]  ;;  %v872_v26 = vld [vmem:[%s1623_s1 + $0x2d8] sm:$0xff] }
  0x26   : > { %981 = vmatprep.subr.mxu1 %v210_v49  ;;  %938 = vmatpush3.msra.mxu0 %v816_v52  ;;  %v858_v20 = vld [vmem:[%s1623_s1 + $0x268] sm:$0xff]  ;;  %v857_v24 = vld [vmem:[%s1623_s1 + $0x260] sm:$0xff]  ;;  %v904_v27 = vld [vmem:[%s1623_s1 + $0x3d8] sm:$0xff] }
  0x27   : > { %982 = vmatpush3.msra.mxu1 %v194_v53  ;;  %939 = vmatprep.subr.mxu0 %v831_v54  ;;  %v890_v21 = vld [vmem:[%s1623_s1 + $0x368] sm:$0xff]  ;;  %v889_v25 = vld [vmem:[%s1623_s1 + $0x360] sm:$0xff]  ;;  %v856_v28 = vld [vmem:[%s1623_s1 + $0x258] sm:$0xff] }
  0x28   : > { %983 = vmatprep.subr.mxu1 %v209_v55  ;;  %940 = vmatpush3.msra.mxu0 %v815_v58  ;;  %v888_v29 = vld [vmem:[%s1623_s1 + $0x358] sm:$0xff]  ;;  %v871_v30 = vld [vmem:[%s1623_s1 + $0x2d0] sm:$0xff]  ;;  %v1417_v32 = vld [vmem:[%s1282_s4 + $0x28] sm:$0xff] }
  0x29   : > { %984 = vmatpush3.msra.mxu1 %v193_v59  ;;  %941 = vmatprep.subr.mxu0 %v830_v62  ;;  %v903_v31 = vld [vmem:[%s1623_s1 + $0x3d0] sm:$0xff]  ;;  %v178_v33 = vld [vmem:[%s1282_s4 + $0x38] sm:$0x1]  ;;  %v870_v36 = vld [vmem:[%s1623_s1 + $0x2c8] sm:$0xff]  ;;  %v249_v42 = vrot.slane %v1417_v32, 1 }
  0x2a   : > { %985 = vmatprep.subr.mxu1 %v208_v63  ;;  %942 = vmatpush3.msra.mxu0 %v814_v0  ;;  %v855_v34 = vld [vmem:[%s1623_s1 + $0x250] sm:$0xff]  ;;  %v902_v37 = vld [vmem:[%s1623_s1 + $0x3c8] sm:$0xff]  ;;  %v1433_v38 = vld [vmem:[%s1282_s4 + $0x20] sm:$0xff]  ;;  %v250_v43 = vrot.slane %v178_v33, 1 }
  0x2b   : > { %986 = vmatpush3.msra.mxu1 %v192_v1  ;;  %943 = vmatprep.subr.mxu0 %v829_v4  ;;  %v887_v35 = vld [vmem:[%s1623_s1 + $0x350] sm:$0xff]  ;;  %v854_v40 = vld [vmem:[%s1623_s1 + $0x248] sm:$0xff]  ;;  %v869_v44 = vld [vmem:[%s1623_s1 + $0x2c0] sm:$0xff]  ;;  %v246_v49 = vrot.slane %v1433_v38, 1 }
  0x2c   : > { %987 = vmatprep.subr.mxu1 %v207_v5  ;;  %944 = vmatpush3.msra.mxu0 %v813_v6  ;;  %v177_v39 = vld [vmem:[%s1282_s4 + $0x30] sm:$0x1]  ;;  %v886_v41 = vld [vmem:[%s1623_s1 + $0x348] sm:$0xff]  ;;  %v901_v45 = vld [vmem:[%s1623_s1 + $0x3c0] sm:$0xff]  ;;  %v1467_v54 = vsel %vm239_vm0, %v249_v42, %v250_v43 }
  0x2d   : > { %369 = vmatprep.mubr.f32.mxu0 %v245_v7  ;;  %988 = vmatpush3.msra.mxu1 %v191_v8  ;;  %v853_v46 = vld [vmem:[%s1623_s1 + $0x240] sm:$0xff]  ;;  %v868_v48 = vld [vmem:[%s1623_s1 + $0x2b8] sm:$0xff]  ;;  %v1463_v52 = vld [vmem:[%s1282_s4 + $0x48] sm:$0xff] }
  0x2e   : > { %454 = vmatprep.mubr.f32.mxu1 %v172_v50  ;;  %370 = vmatmul.mubr.f32.vlgmr.msra.gmra.mxu0 %v242_v9  ;;  %v885_v47 = vld [vmem:[%s1623_s1 + $0x340] sm:$0xff]  ;;  %v247_v50 = vrot.slane %v177_v39, 1  ;;  %v900_v51 = vld [vmem:[%s1623_s1 + $0x3b8] sm:$0xff]  ;;  %v181_v58 = vld [vmem:[%s1282_s4 + $0x50] sm:$0x1]  ;;  %v255_v60 = vrot.slane %v1463_v52, 1 }
  0x2f   : > { %455 = vmatmul.mubr.f32.vlgmr.msra.gmra.mxu1 %v171_v56  ;;  %1001 = vmatprep.subr.mxu0 %v876_v10  ;;  %v182_v53 = vld [vmem:[%s1282_s4 + $0x58] sm:$0x1]  ;;  %v1476_v57 = vld [vmem:[%s1282_s4 + $0x40] sm:$0xff]  ;;  %v867_v62 = vld [vmem:[%s1623_s1 + $0x2b0] sm:$0xff]  ;;  %v253_v4 = vrot.slane %v181_v58, 1 }
  0x30   : > { %1045 = vmatprep.subr.mxu1 %v908_v11  ;;  %1002 = vmatpush3.msra.mxu0 %v860_v12  ;;  %v852_v55 = vld [vmem:[%s1623_s1 + $0x238] sm:$0xff]  ;;  %v1480_v59 = vsel %vm239_vm0, %v246_v49, %v247_v50  ;;  %v256_v61 = vrot.slane %v182_v53, 1  ;;  %v899_v63 = vld [vmem:[%s1623_s1 + $0x3b0] sm:$0xff]  ;;  %v866_v2 = vld [vmem:[%s1623_s1 + $0x2a8] sm:$0xff]  ;;  %v252_v3 = vrot.slane %v1476_v57, 1 }
  0x31   : > { %1046 = vmatpush3.msra.mxu1 %v892_v13  ;;  %1003 = vmatprep.subr.mxu0 %v875_v14  ;;  %v884_v56 = vld [vmem:[%s1623_s1 + $0x338] sm:$0xff]  ;;  %v851_v0 = vld [vmem:[%s1623_s1 + $0x230] sm:$0xff]  ;;  %v898_v5 = vld [vmem:[%s1623_s1 + $0x3a8] sm:$0xff] }
  0x32   : > { %1047 = vmatprep.subr.mxu1 %v907_v15  ;;  %1004 = vmatpush3.msra.mxu0 %v859_v16  ;;  %v883_v1 = vld [vmem:[%s1623_s1 + $0x330] sm:$0xff]  ;;  %v1507_v6 = vld [vmem:[%s1282_s4 + $0x68] sm:$0xff]  ;;  %v186_v7 = vld [vmem:[%s1282_s4 + $0x78] sm:$0x1]  ;;  %v1511_v8 = vsel %vm239_vm0, %v255_v60, %v256_v61  ;;  %v1524_v13 = vsel %vm239_vm0, %v252_v3, %v253_v4 }
  0x33   : > { %1048 = vmatpush3.msra.mxu1 %v891_v17  ;;  %1005 = vmatprep.subr.mxu0 %v874_v18  ;;  %v850_v9 = vld [vmem:[%s1623_s1 + $0x228] sm:$0xff]  ;;  %v1520_v11 = vld [vmem:[%s1282_s4 + $0x60] sm:$0xff]  ;;  %v185_v12 = vld [vmem:[%s1282_s4 + $0x70] sm:$0x1]  ;;  %v261_v14 = vrot.slane %v1507_v6, 1  ;;  %v262_v15 = vrot.slane %v186_v7, 1 }
  0x34   : > { %1049 = vmatprep.subr.mxu1 %v906_v19  ;;  %1006 = vmatpush3.msra.mxu0 %v858_v20  ;;  %v882_v10 = vld [vmem:[%s1623_s1 + $0x328] sm:$0xff]  ;;  %v865_v16 = vld [vmem:[%s1623_s1 + $0x2a0] sm:$0xff]  ;;  %v258_v20 = vrot.slane %v1520_v11, 1  ;;  %v190_v43 = vld [vmem:[%s1282_s4 + $0x98] sm:$0x1] }
  0x35   : > { %1050 = vmatpush3.msra.mxu1 %v890_v21  ;;  %1007 = vmatprep.subr.mxu0 %v873_v22  ;;  %v897_v17 = vld [vmem:[%s1623_s1 + $0x3a0] sm:$0xff]  ;;  %v259_v21 = vrot.slane %v185_v12, 1  ;;  %v864_v22 = vld [vmem:[%s1623_s1 + $0x298] sm:$0xff]  ;;  %v862_v33 = vld [vmem:[%s1623_s1 + $0x288] sm:$0xff] }
  0x36   : > { %1051 = vmatprep.subr.mxu1 %v905_v23  ;;  %1008 = vmatpush3.msra.mxu0 %v857_v24  ;;  %v849_v18 = vld [vmem:[%s1623_s1 + $0x220] sm:$0xff]  ;;  %v896_v23 = vld [vmem:[%s1623_s1 + $0x398] sm:$0xff]  ;;  %v263_v24 = vsel %vm239_vm0, %v261_v14, %v262_v15  ;;  %v188_v42 = vld [vmem:[%s1282_s4 + $0x88] sm:$0xff] }
  0x37   : > { %1052 = vmatpush3.msra.mxu1 %v889_v25  ;;  %1009 = vmatprep.subr.mxu0 %v872_v26  ;;  %v881_v19 = vld [vmem:[%s1623_s1 + $0x320] sm:$0xff]  ;;  %v848_v25 = vld [vmem:[%s1623_s1 + $0x218] sm:$0xff] }
  0x38   : > { %1053 = vmatprep.subr.mxu1 %v904_v27  ;;  %1010 = vmatpush3.msra.mxu0 %v856_v28  ;;  %v880_v26 = vld [vmem:[%s1623_s1 + $0x318] sm:$0xff]  ;;  %v260_v27 = vsel %vm239_vm0, %v258_v20, %v259_v21  ;;  %v863_v28 = vld [vmem:[%s1623_s1 + $0x290] sm:$0xff]  ;;  %v893_v39 = vld [vmem:[%s1623_s1 + $0x380] sm:$0xff] }
  0x39   : > { %1054 = vmatpush3.msra.mxu1 %v888_v29  ;;  %1011 = vmatprep.subr.mxu0 %v871_v30  ;;  %v895_v29 = vld [vmem:[%s1623_s1 + $0x390] sm:$0xff] }
  0x3a   : > { %1055 = vmatprep.subr.mxu1 %v903_v31  ;;  %1012 = vmatpush3.msra.mxu0 %v855_v34  ;;  %v847_v30 = vld [vmem:[%s1623_s1 + $0x210] sm:$0xff]  ;;  %v894_v34 = vld [vmem:[%s1623_s1 + $0x388] sm:$0xff] }
  0x3b   : > { %1056 = vmatpush3.msra.mxu1 %v887_v35  ;;  %1013 = vmatprep.subr.mxu0 %v870_v36  ;;  %v879_v31 = vld [vmem:[%s1623_s1 + $0x310] sm:$0xff]  ;;  %v846_v35 = vld [vmem:[%s1623_s1 + $0x208] sm:$0xff] }
  0x3c   : > { %1057 = vmatprep.subr.mxu1 %v902_v37  ;;  %1014 = vmatpush3.msra.mxu0 %v854_v40  ;;  %v878_v36 = vld [vmem:[%s1623_s1 + $0x308] sm:$0xff]  ;;  %v861_v37 = vld [vmem:[%s1623_s1 + $0x280] sm:$0xff] }
  0x3d   : > { %1058 = vmatpush3.msra.mxu1 %v886_v41  ;;  %1015 = vmatprep.subr.mxu0 %v869_v44  ;;  %v845_v40 = vld [vmem:[%s1623_s1 + $0x200] sm:$0xff]  ;;  %v604_v44 = vrot.slane %v188_v42, 1 }
  0x3e   : > { %1059 = vmatprep.subr.mxu1 %v901_v45  ;;  %1016 = vmatpush3.msra.mxu0 %v853_v46  ;;  %v877_v41 = vld [vmem:[%s1623_s1 + $0x300] sm:$0xff]  ;;  %v605_v45 = vrot.slane %v190_v43, 1 }
  0x3f   : > { %1060 = vmatpush3.msra.mxu1 %v885_v47  ;;  %1017 = vmatprep.subr.mxu0 %v868_v48  ;;  %v187_v46 = vld [vmem:[%s1282_s4 + $0x80] sm:$0xff]  ;;  %v189_v47 = vld [vmem:[%s1282_s4 + $0x90] sm:$0x1] }
  0x40   : > { %1061 = vmatprep.subr.mxu1 %v900_v51  ;;  %374 = vmatprep.mubr.f32.mxu0 %v1467_v54  ;;  %v602_v48 = vrot.slane %v189_v47, 1 }
  0x41   : > { %459 = vmatprep.mubr.f32.mxu1 %v1417_v32  ;;  %1018 = vmatpush3.msra.mxu0 %v852_v55 }
  0x42   : > { %1062 = vmatpush3.msra.mxu1 %v884_v56  ;;  %375 = vmatmul.mubr.f32.gmra.mxu0 %v1480_v59 }
  0x43   : > { %460 = vmatmul.mubr.f32.gmra.mxu1 %v1433_v38  ;;  %1019 = vmatprep.subr.mxu0 %v867_v62 }
  0x44   : > { %1063 = vmatprep.subr.mxu1 %v899_v63  ;;  %1020 = vmatpush3.msra.mxu0 %v851_v0 }
  0x45   : > { %1064 = vmatpush3.msra.mxu1 %v883_v1  ;;  %1021 = vmatprep.subr.mxu0 %v866_v2 }
  0x46   : > { %1065 = vmatprep.subr.mxu1 %v898_v5  ;;  %379 = vmatprep.mubr.f32.mxu0 %v1511_v8 }
  0x47   : > { %464 = vmatprep.mubr.f32.mxu1 %v1463_v52  ;;  %1022 = vmatpush3.msra.mxu0 %v850_v9 }
  0x48   : > { %1066 = vmatpush3.msra.mxu1 %v882_v10  ;;  %380 = vmatmul.mubr.f32.gmra.mxu0 %v1524_v13 }
  0x49   : > { %465 = vmatmul.mubr.f32.gmra.mxu1 %v1476_v57  ;;  %1023 = vmatprep.subr.mxu0 %v865_v16 }
  0x4a   : > { %1067 = vmatprep.subr.mxu1 %v897_v17  ;;  %1024 = vmatpush3.msra.mxu0 %v849_v18  ;;  %v909_v18 = vld [vmem:[%s1624_s2] ss:$0 sm:$0xff] }
  0x4b   : > { %1068 = vmatpush3.msra.mxu1 %v881_v19  ;;  %1025 = vmatprep.subr.mxu0 %v864_v22 }
  0x4c   : > { %1069 = vmatprep.subr.mxu1 %v896_v23  ;;  %384 = vmatprep.mubr.f32.mxu0 %v263_v24 }
  0x4d   : > { %469 = vmatprep.mubr.f32.mxu1 %v1507_v6  ;;  %1026 = vmatpush3.msra.mxu0 %v848_v25 }
  0x4e   : > { %1070 = vmatpush3.msra.mxu1 %v880_v26  ;;  %385 = vmatmul.mubr.f32.gmra.mxu0 %v260_v27 }
  0x4f   : > { %470 = vmatmul.mubr.f32.gmra.mxu1 %v1520_v11  ;;  %1027 = vmatprep.subr.mxu0 %v863_v28 }
  0x50   : > { %1071 = vmatprep.subr.mxu1 %v895_v29  ;;  %1028 = vmatpush3.msra.mxu0 %v847_v30 }
  0x51   : > { %1072 = vmatpush3.msra.mxu1 %v879_v31  ;;  %1029 = vmatprep.subr.mxu0 %v862_v33 }
  0x52   : > { %1073 = vmatprep.subr.mxu1 %v894_v34  ;;  %1030 = vmatpush3.msra.mxu0 %v846_v35 }
  0x53   : > { %1074 = vmatpush3.msra.mxu1 %v878_v36  ;;  %1031 = vmatprep.subr.mxu0 %v861_v37 }
  0x54   : > { %1075 = vmatprep.subr.mxu1 %v893_v39  ;;  %1032 = vmatpush3.msra.mxu0 %v845_v40 }
  0x55   : > { %572 = vmatprep.mubr.f32.mxu0 %v1417_v32  ;;  %1076 = vmatpush3.msra.mxu1 %v877_v41  ;;  %v601_v32 = vrot.slane %v187_v46, 1 }
  0x56   : > { %706 = vmatprep.mubr.f32.mxu1 %v1467_v54  ;;  %573 = vmatmul.mubr.f32.vlgmr.msra.gmra.mxu0 %v1433_v38  ;;  %v606_v38 = vsel %vm239_vm0, %v604_v44, %v605_v45 }
  0x57   : > { %707 = vmatmul.mubr.f32.vlgmr.msra.gmra.mxu1 %v1480_v59  ;;  %577 = vmatprep.mubr.f32.mxu0 %v1463_v52  ;;  %v603_v49 = vsel %vm239_vm0, %v601_v32, %v602_v48 }
  0x58   : > { %711 = vmatprep.mubr.f32.mxu1 %v1511_v8 }
  0x5a   : > { %578 = vmatmul.mubr.f32.gmra.mxu0 %v1476_v57 }
  0x5b   : > { %712 = vmatmul.mubr.f32.gmra.mxu1 %v1524_v13  ;;  %582 = vmatprep.mubr.f32.mxu0 %v1507_v6 }
  0x5c   : > { %716 = vmatprep.mubr.f32.mxu1 %v263_v24 }
  0x5e   : > { %583 = vmatmul.mubr.f32.gmra.mxu0 %v1520_v11 }
  0x5f   : > { %717 = vmatmul.mubr.f32.gmra.mxu1 %v260_v27  ;;  %587 = vmatprep.mubr.f32.mxu0 %v188_v42 }
  0x60   : > { %721 = vmatprep.mubr.f32.mxu1 %v606_v38 }
  0x62   : > { %588 = vmatmul.mubr.f32.gmra.mxu0 %v187_v46 }
  0x63   : > { %722 = vmatmul.mubr.f32.gmra.mxu1 %v603_v49 }
  0xee   : > { %v945_v50 = vpop.f32.mrf.mxu0 }
  0xef   : > { %v989_v51 = vpop.f32.mrf.mxu1 }
  0xf0   : > { %v946_v52 = vpop.f32.mrf.mxu0 }
  0xf1   : > { %v990_v53 = vpop.f32.mrf.mxu1  ;;  %v947_v2 = vadd.f32 %v946_v52, %v945_v50 }
  0xf2   : > { %v991_v3 = vadd.f32 %v990_v53, %v989_v51 }
  0xf4   : > { %v457_v8 = vadd.f32 %v991_v3, %v947_v2 }
 0x102   : > { %v948_v54 = vpop.f32.mrf.mxu0 }
 0x103   : > { %v992_v55 = vpop.f32.mrf.mxu1 }
 0x104   : > { %v949_v56 = vpop.f32.mrf.mxu0 }
 0x105   : > { %v993_v57 = vpop.f32.mrf.mxu1  ;;  %v950_v9 = vadd.f32 %v949_v56, %v948_v54 }
 0x106   : > { %v994_v10 = vadd.f32 %v993_v57, %v992_v55 }
 0x108   : > { %v951_v58 = vpop.f32.mrf.mxu0  ;;  %v462_v21 = vadd.f32 %v994_v10, %v950_v9 }
 0x109   : > { %v995_v59 = vpop.f32.mrf.mxu1 }
 0x10a   : > { %v952_v60 = vpop.f32.mrf.mxu0 }
 0x10b   : > { %v996_v61 = vpop.f32.mrf.mxu1  ;;  %v953_v16 = vadd.f32 %v952_v60, %v951_v58 }
 0x10c   : > { %v997_v17 = vadd.f32 %v996_v61, %v995_v59 }
 0x10e   : > { %v954_v62 = vpop.f32.mrf.mxu0  ;;  %v467_v29 = vadd.f32 %v997_v17, %v953_v16 }
 0x10f   : > { %v998_v63 = vpop.f32.mrf.mxu1 }
 0x110   : > { %v955_v0 = vpop.f32.mrf.mxu0 }
 0x111   : > { %v999_v1 = vpop.f32.mrf.mxu1  ;;  %v956_v30 = vadd.f32 %v955_v0, %v954_v62 }
 0x112   : > { %v1000_v34 = vadd.f32 %v999_v1, %v998_v63 }
 0x114   : > { %v472_v46 = vadd.f32 %v1000_v34, %v956_v30 }
 0x116   : > { %v1033_v4 = vpop.f32.mrf.mxu0 }
 0x117   : > { %v1077_v5 = vpop.f32.mrf.mxu1 }
 0x118   : > { %v1034_v6 = vpop.f32.mrf.mxu0 }
 0x119   : > { %v1078_v7 = vpop.f32.mrf.mxu1  ;;  %v1035_v11 = vadd.f32 %v1034_v6, %v1033_v4 }
 0x11a   : > { %v1036_v12 = vpop.f32.mrf.mxu0  ;;  %v1079_v15 = vadd.f32 %v1078_v7, %v1077_v5 }
 0x11b   : > { %v1080_v13 = vpop.f32.mrf.mxu1  ;;  %v593_v14 = vadd.f32 %v1035_v11, %v457_v8 }
 0x11c   : > { %v1037_v19 = vpop.f32.mrf.mxu0 }
 0x11d   : > { %v1081_v20 = vpop.f32.mrf.mxu1  ;;  %v727_v22 = vadd.f32 %v1079_v15, %v593_v14  ;;  %v1038_v23 = vadd.f32 %v1037_v19, %v1036_v12 }
 0x11e   : > { %v1039_v24 = vpop.f32.mrf.mxu0  ;;  %v1082_v28 = vadd.f32 %v1081_v20, %v1080_v13 }
 0x11f   : > { %v1083_v25 = vpop.f32.mrf.mxu1  ;;  %v738_v26 = vadd.f32 %v909_v18, %v727_v22  ;;  %v594_v27 = vadd.f32 %v1038_v23, %v462_v21 }
 0x120   : > { %v1040_v31 = vpop.f32.mrf.mxu0 }
 0x121   : > { %v1084_v33 = vpop.f32.mrf.mxu1  ;;  %v742_v35 = vmax.f32 %v738_v26, 0.0  ;;  %v728_v36 = vadd.f32 %v1082_v28, %v594_v27  ;;  %v1041_v37 = vadd.f32 %v1040_v31, %v1039_v24 }
 0x122   : > { %v1042_v39 = vpop.f32.mrf.mxu0  ;;  %v1085_v43 = vadd.f32 %v1084_v33, %v1083_v25 }
 0x123   : > { %v1086_v40 = vpop.f32.mrf.mxu1  ;;  %746 = vst [vmem:[%s170_s9] sm:$0xff] %v742_v35  ;;  %v739_v41 = vadd.f32 %v909_v18, %v728_v36  ;;  %v595_v42 = vadd.f32 %v1041_v37, %v467_v29 }
 0x124   : > { %v1043_v44 = vpop.f32.mrf.mxu0 }
 0x125   : > { %v1087_v45 = vpop.f32.mrf.mxu1  ;;  %v743_v47 = vmax.f32 %v739_v41, 0.0  ;;  %v729_v32 = vadd.f32 %v1085_v43, %v595_v42  ;;  %v1044_v48 = vadd.f32 %v1043_v44, %v1042_v39 }
 0x126   : > { %v1088_v50 = vadd.f32 %v1087_v45, %v1086_v40 }
 0x127   : > { %747 = vst [vmem:[%s170_s9 + $0x8] sm:$0xff] %v743_v47  ;;  %v740_v38 = vadd.f32 %v909_v18, %v729_v32  ;;  %v596_v49 = vadd.f32 %v1044_v48, %v472_v46 }
 0x129   : > { %v744_v51 = vmax.f32 %v740_v38, 0.0  ;;  %v730_v52 = vadd.f32 %v1088_v50, %v596_v49 }
 0x12b   : > { %748 = vst [vmem:[%s170_s9 + $0x10] sm:$0xff] %v744_v51  ;;  %v741_v53 = vadd.f32 %v909_v18, %v730_v52 }
 0x12d   : > { %v745_v54 = vmax.f32 %v741_v53, 0.0 }
 0x12f   : > { %749 = vst [vmem:[%s170_s9 + $0x18] sm:$0xff] %v745_v54 }
 0x130 PF: > { %s13_s12 = sadd.s32 1, %s1104_s12  }
 0x131   : > { %p10_p4 = scmp.ge.s32.totalorder %s13_s12, 4  }
 0x133   :  { %12 = sbr.rel (!%p10_p4) target bundleno = 1 (0x1), region = 65 }

// kernel: feature_extractor_forward.8
= control target key start
LH: loop header
LB: loop body
LE: loop exit
PB: predicated region body
PF: predicated region fallthrough
CT: control target
= control target key end

     0   :  { %s1918_s12 = smov 0   ;;  %s3594_s0 = inlined_call_operand.vmem [shape: f32[2,3,9,512], index: 0, kind: input, shape index: {}]   ;;  %s3595_s1 = inlined_call_operand.vmem [shape: f32[2,2,512,256], index: 1, kind: input, shape index: {}]   ;;  %s3596_s2 = inlined_call_operand.vmem [shape: f32[1,256], index: 2, kind: input, shape index: {}]   ;;  %s3597_s3 = inlined_call_operand.vmem [shape: f32[2,16,256], index: 3, kind: output, shape index: {}]  }
   0x1 LB: > { %s1486_s13 = sadd.s32 4294967295, %s1896_s12   ;;  %p1490_p0 = scmp.ge.s32.totalorder %s1896_s12, 1  ;;  %s1896_s12 = sphi %s1918_s12, %s13_s12  }
   0x2   : > { %p137_p1 = scmp.lt.s32.totalorder %s1896_s12, 3 }
   0x4   : > { %p138_p2 = pnand %p1490_p0, %p137_p1 }
   0x5   : > { %p2180_p3 = scmp.lt.s32.totalorder (!%p138_p2), %s1486_s13, 1 }
   0x6   : > { %141 = sbr.rel (%p138_p2) target bundleno = 490 (0x1ea), region = 32 }
   0xb   : > { %v1525_v0 = vld [vmem:[%s3595_s1 + $0x4f8] sm:$0xff]  ;;  %v1524_v2 = vld [vmem:[%s3595_s1 + $0x4f0] sm:$0xff]  ;;  %v1523_v4 = vld [vmem:[%s3595_s1 + $0x4e8] sm:$0xff]  ;;  %s3600_s13 = smov (!%p2180_p3, %s1486_s13), 1  ;;  %vm339_vm0 = vcmask 1046528  }
   0xc   : > { %v1589_v1 = vld [vmem:[%s3595_s1 + $0x6f8] sm:$0xff]  ;;  %501 = vmatprep.subr.mxu0 %v1525_v0  ;;  %v1588_v3 = vld [vmem:[%s3595_s1 + $0x6f0] sm:$0xff]  ;;  %v1587_v5 = vld [vmem:[%s3595_s1 + $0x6e8] sm:$0xff]  ;;  %s1881_s15 = smul.u32 192, %s3600_s13  ;;  %s1880_s27 = sshll.u32 %s3600_s13, 5 }
   0xd   : > { %578 = vmatprep.subr.mxu1 %v1589_v1  ;;  %502 = vmatpush1.msra.mxu0 %v1524_v2  ;;  %v1522_v6 = vld [vmem:[%s3595_s1 + $0x4e0] sm:$0xff]  ;;  %v1521_v8 = vld [vmem:[%s3595_s1 + $0x4d8] sm:$0xff]  ;;  %v1520_v10 = vld [vmem:[%s3595_s1 + $0x4d0] sm:$0xff]  ;;  %s170_s30 = scalar_lea.vmem %s3597_s3, %s1880_s27 }
   0xe   : > { %579 = vmatpush1.msra.mxu1 %v1588_v3  ;;  %v1586_v7 = vld [vmem:[%s3595_s1 + $0x6e0] sm:$0xff]  ;;  %503 = vmatprep.subr.mxu0 %v1523_v4  ;;  %v1585_v9 = vld [vmem:[%s3595_s1 + $0x6d8] sm:$0xff]  ;;  %v1584_v11 = vld [vmem:[%s3595_s1 + $0x6d0] sm:$0xff]  ;;  %s2272_s11 = scalar_lea.vmem %s3594_s0, %s1881_s15 }
   0xf   : > { %580 = vmatprep.subr.mxu1 %v1587_v5  ;;  %504 = vmatpush1.msra.mxu0 %v1522_v6  ;;  %v1519_v12 = vld [vmem:[%s3595_s1 + $0x4c8] sm:$0xff]  ;;  %v1518_v14 = vld [vmem:[%s3595_s1 + $0x4c0] sm:$0xff]  ;;  %v1517_v16 = vld [vmem:[%s3595_s1 + $0x4b8] sm:$0xff] }
  0x10   : > { %581 = vmatpush1.msra.mxu1 %v1586_v7  ;;  %v1583_v13 = vld [vmem:[%s3595_s1 + $0x6c8] sm:$0xff]  ;;  %505 = vmatprep.subr.mxu0 %v1521_v8  ;;  %v1582_v15 = vld [vmem:[%s3595_s1 + $0x6c0] sm:$0xff]  ;;  %v1581_v17 = vld [vmem:[%s3595_s1 + $0x6b8] sm:$0xff] }
  0x11   : > { %582 = vmatprep.subr.mxu1 %v1585_v9  ;;  %506 = vmatpush1.msra.mxu0 %v1520_v10  ;;  %v1516_v18 = vld [vmem:[%s3595_s1 + $0x4b0] sm:$0xff]  ;;  %v1515_v20 = vld [vmem:[%s3595_s1 + $0x4a8] sm:$0xff]  ;;  %v1514_v22 = vld [vmem:[%s3595_s1 + $0x4a0] sm:$0xff] }
  0x12   : > { %583 = vmatpush1.msra.mxu1 %v1584_v11  ;;  %507 = vmatprep.subr.mxu0 %v1519_v12  ;;  %v1580_v19 = vld [vmem:[%s3595_s1 + $0x6b0] sm:$0xff]  ;;  %v1579_v21 = vld [vmem:[%s3595_s1 + $0x6a8] sm:$0xff]  ;;  %v1578_v23 = vld [vmem:[%s3595_s1 + $0x6a0] sm:$0xff] }
  0x13   : > { %584 = vmatprep.subr.mxu1 %v1583_v13  ;;  %508 = vmatpush1.msra.mxu0 %v1518_v14  ;;  %v1513_v24 = vld [vmem:[%s3595_s1 + $0x498] sm:$0xff]  ;;  %v1512_v26 = vld [vmem:[%s3595_s1 + $0x490] sm:$0xff]  ;;  %v1511_v28 = vld [vmem:[%s3595_s1 + $0x488] sm:$0xff] }
  0x14   : > { %585 = vmatpush1.msra.mxu1 %v1582_v15  ;;  %509 = vmatprep.subr.mxu0 %v1517_v16  ;;  %v1577_v25 = vld [vmem:[%s3595_s1 + $0x698] sm:$0xff]  ;;  %v1576_v27 = vld [vmem:[%s3595_s1 + $0x690] sm:$0xff]  ;;  %v1575_v29 = vld [vmem:[%s3595_s1 + $0x688] sm:$0xff] }
  0x15   : > { %586 = vmatprep.subr.mxu1 %v1581_v17  ;;  %510 = vmatpush1.msra.mxu0 %v1516_v18  ;;  %v1510_v30 = vld [vmem:[%s3595_s1 + $0x480] sm:$0xff]  ;;  %v1509_v32 = vld [vmem:[%s3595_s1 + $0x478] sm:$0xff]  ;;  %v1508_v34 = vld [vmem:[%s3595_s1 + $0x470] sm:$0xff] }
  0x16   : > { %587 = vmatpush1.msra.mxu1 %v1580_v19  ;;  %511 = vmatprep.subr.mxu0 %v1515_v20  ;;  %v1574_v31 = vld [vmem:[%s3595_s1 + $0x680] sm:$0xff]  ;;  %v1573_v33 = vld [vmem:[%s3595_s1 + $0x678] sm:$0xff]  ;;  %v1572_v35 = vld [vmem:[%s3595_s1 + $0x670] sm:$0xff] }
  0x17   : > { %588 = vmatprep.subr.mxu1 %v1579_v21  ;;  %512 = vmatpush1.msra.mxu0 %v1514_v22  ;;  %v1507_v36 = vld [vmem:[%s3595_s1 + $0x468] sm:$0xff]  ;;  %v1506_v38 = vld [vmem:[%s3595_s1 + $0x460] sm:$0xff]  ;;  %v1505_v40 = vld [vmem:[%s3595_s1 + $0x458] sm:$0xff] }
  0x18   : > { %589 = vmatpush1.msra.mxu1 %v1578_v23  ;;  %513 = vmatprep.subr.mxu0 %v1513_v24  ;;  %v1571_v37 = vld [vmem:[%s3595_s1 + $0x668] sm:$0xff]  ;;  %v1570_v39 = vld [vmem:[%s3595_s1 + $0x660] sm:$0xff]  ;;  %v1569_v41 = vld [vmem:[%s3595_s1 + $0x658] sm:$0xff] }
  0x19   : > { %590 = vmatprep.subr.mxu1 %v1577_v25  ;;  %514 = vmatpush1.msra.mxu0 %v1512_v26  ;;  %v1504_v42 = vld [vmem:[%s3595_s1 + $0x450] sm:$0xff]  ;;  %v1503_v44 = vld [vmem:[%s3595_s1 + $0x448] sm:$0xff]  ;;  %v1502_v46 = vld [vmem:[%s3595_s1 + $0x440] sm:$0xff] }
  0x1a   : > { %591 = vmatpush1.msra.mxu1 %v1576_v27  ;;  %515 = vmatprep.subr.mxu0 %v1511_v28  ;;  %v1568_v43 = vld [vmem:[%s3595_s1 + $0x650] sm:$0xff]  ;;  %v1567_v45 = vld [vmem:[%s3595_s1 + $0x648] sm:$0xff]  ;;  %v1566_v47 = vld [vmem:[%s3595_s1 + $0x640] sm:$0xff] }
  0x1b   : > { %592 = vmatprep.subr.mxu1 %v1575_v29  ;;  %516 = vmatpush1.msra.mxu0 %v1510_v30  ;;  %v1501_v48 = vld [vmem:[%s3595_s1 + $0x438] sm:$0xff]  ;;  %v1500_v50 = vld [vmem:[%s3595_s1 + $0x430] sm:$0xff]  ;;  %v1499_v52 = vld [vmem:[%s3595_s1 + $0x428] sm:$0xff] }
  0x1c   : > { %593 = vmatpush1.msra.mxu1 %v1574_v31  ;;  %517 = vmatprep.subr.mxu0 %v1509_v32  ;;  %v1565_v49 = vld [vmem:[%s3595_s1 + $0x638] sm:$0xff]  ;;  %v1564_v51 = vld [vmem:[%s3595_s1 + $0x630] sm:$0xff]  ;;  %v1563_v53 = vld [vmem:[%s3595_s1 + $0x628] sm:$0xff] }
  0x1d   : > { %594 = vmatprep.subr.mxu1 %v1573_v33  ;;  %518 = vmatpush1.msra.mxu0 %v1508_v34  ;;  %v1498_v54 = vld [vmem:[%s3595_s1 + $0x420] sm:$0xff]  ;;  %v1497_v56 = vld [vmem:[%s3595_s1 + $0x418] sm:$0xff]  ;;  %v1496_v58 = vld [vmem:[%s3595_s1 + $0x410] sm:$0xff] }
  0x1e   : > { %595 = vmatpush1.msra.mxu1 %v1572_v35  ;;  %519 = vmatprep.subr.mxu0 %v1507_v36  ;;  %v1562_v55 = vld [vmem:[%s3595_s1 + $0x620] sm:$0xff]  ;;  %v1561_v57 = vld [vmem:[%s3595_s1 + $0x618] sm:$0xff]  ;;  %v1560_v59 = vld [vmem:[%s3595_s1 + $0x610] sm:$0xff] }
  0x1f   : > { %596 = vmatprep.subr.mxu1 %v1571_v37  ;;  %520 = vmatpush1.msra.mxu0 %v1506_v38  ;;  %v1495_v60 = vld [vmem:[%s3595_s1 + $0x408] sm:$0xff]  ;;  %v1494_v62 = vld [vmem:[%s3595_s1 + $0x400] sm:$0xff]  ;;  %v1557_v0 = vld [vmem:[%s3595_s1 + $0x5f8] sm:$0xff] }
  0x20   : > { %597 = vmatpush1.msra.mxu1 %v1570_v39  ;;  %521 = vmatprep.subr.mxu0 %v1505_v40  ;;  %v1559_v61 = vld [vmem:[%s3595_s1 + $0x608] sm:$0xff]  ;;  %v1558_v63 = vld [vmem:[%s3595_s1 + $0x600] sm:$0xff]  ;;  %v1621_v1 = vld [vmem:[%s3595_s1 + $0x7f8] sm:$0xff] }
  0x21   : > { %598 = vmatprep.subr.mxu1 %v1569_v41  ;;  %522 = vmatpush1.msra.mxu0 %v1504_v42  ;;  %v1556_v2 = vld [vmem:[%s3595_s1 + $0x5f0] sm:$0xff]  ;;  %v1555_v4 = vld [vmem:[%s3595_s1 + $0x5e8] sm:$0xff]  ;;  %v1554_v6 = vld [vmem:[%s3595_s1 + $0x5e0] sm:$0xff] }
  0x22   : > { %599 = vmatpush1.msra.mxu1 %v1568_v43  ;;  %523 = vmatprep.subr.mxu0 %v1503_v44  ;;  %v1620_v3 = vld [vmem:[%s3595_s1 + $0x7f0] sm:$0xff]  ;;  %v1619_v5 = vld [vmem:[%s3595_s1 + $0x7e8] sm:$0xff]  ;;  %v1618_v7 = vld [vmem:[%s3595_s1 + $0x7e0] sm:$0xff] }
  0x23   : > { %600 = vmatprep.subr.mxu1 %v1567_v45  ;;  %524 = vmatpush1.msra.mxu0 %v1502_v46  ;;  %v1553_v8 = vld [vmem:[%s3595_s1 + $0x5d8] sm:$0xff]  ;;  %v1552_v10 = vld [vmem:[%s3595_s1 + $0x5d0] sm:$0xff]  ;;  %v1551_v12 = vld [vmem:[%s3595_s1 + $0x5c8] sm:$0xff] }
  0x24   : > { %601 = vmatpush1.msra.mxu1 %v1566_v47  ;;  %525 = vmatprep.subr.mxu0 %v1501_v48  ;;  %v1617_v9 = vld [vmem:[%s3595_s1 + $0x7d8] sm:$0xff]  ;;  %v1616_v11 = vld [vmem:[%s3595_s1 + $0x7d0] sm:$0xff]  ;;  %v1615_v13 = vld [vmem:[%s3595_s1 + $0x7c8] sm:$0xff] }
  0x25   : > { %602 = vmatprep.subr.mxu1 %v1565_v49  ;;  %526 = vmatpush1.msra.mxu0 %v1500_v50  ;;  %v1550_v14 = vld [vmem:[%s3595_s1 + $0x5c0] sm:$0xff]  ;;  %v1549_v16 = vld [vmem:[%s3595_s1 + $0x5b8] sm:$0xff]  ;;  %v1548_v18 = vld [vmem:[%s3595_s1 + $0x5b0] sm:$0xff] }
  0x26   : > { %603 = vmatpush1.msra.mxu1 %v1564_v51  ;;  %527 = vmatprep.subr.mxu0 %v1499_v52  ;;  %v1614_v15 = vld [vmem:[%s3595_s1 + $0x7c0] sm:$0xff]  ;;  %v1613_v17 = vld [vmem:[%s3595_s1 + $0x7b8] sm:$0xff]  ;;  %v1612_v19 = vld [vmem:[%s3595_s1 + $0x7b0] sm:$0xff] }
  0x27   : > { %604 = vmatprep.subr.mxu1 %v1563_v53  ;;  %528 = vmatpush1.msra.mxu0 %v1498_v54  ;;  %v1547_v20 = vld [vmem:[%s3595_s1 + $0x5a8] sm:$0xff]  ;;  %v1546_v22 = vld [vmem:[%s3595_s1 + $0x5a0] sm:$0xff]  ;;  %v1545_v24 = vld [vmem:[%s3595_s1 + $0x598] sm:$0xff] }
  0x28   : > { %605 = vmatpush1.msra.mxu1 %v1562_v55  ;;  %529 = vmatprep.subr.mxu0 %v1497_v56  ;;  %v1611_v21 = vld [vmem:[%s3595_s1 + $0x7a8] sm:$0xff]  ;;  %v1610_v23 = vld [vmem:[%s3595_s1 + $0x7a0] sm:$0xff]  ;;  %v1609_v25 = vld [vmem:[%s3595_s1 + $0x798] sm:$0xff] }
  0x29   : > { %606 = vmatprep.subr.mxu1 %v1561_v57  ;;  %530 = vmatpush1.msra.mxu0 %v1496_v58  ;;  %v1544_v26 = vld [vmem:[%s3595_s1 + $0x590] sm:$0xff]  ;;  %v1543_v28 = vld [vmem:[%s3595_s1 + $0x588] sm:$0xff]  ;;  %v1542_v30 = vld [vmem:[%s3595_s1 + $0x580] sm:$0xff] }
  0x2a   : > { %607 = vmatpush1.msra.mxu1 %v1560_v59  ;;  %531 = vmatprep.subr.mxu0 %v1495_v60  ;;  %v1608_v27 = vld [vmem:[%s3595_s1 + $0x790] sm:$0xff]  ;;  %v1607_v29 = vld [vmem:[%s3595_s1 + $0x788] sm:$0xff]  ;;  %v1606_v31 = vld [vmem:[%s3595_s1 + $0x780] sm:$0xff] }
  0x2b   : > { %608 = vmatprep.subr.mxu1 %v1559_v61  ;;  %532 = vmatpush1.msra.mxu0 %v1494_v62  ;;  %v1541_v32 = vld [vmem:[%s3595_s1 + $0x578] sm:$0xff]  ;;  %v1540_v34 = vld [vmem:[%s3595_s1 + $0x570] sm:$0xff]  ;;  %v1539_v36 = vld [vmem:[%s3595_s1 + $0x568] sm:$0xff] }
  0x2c   : > { %609 = vmatpush1.msra.mxu1 %v1558_v63  ;;  %533 = vmatprep.subr.mxu0 %v1557_v0  ;;  %v1605_v33 = vld [vmem:[%s3595_s1 + $0x778] sm:$0xff]  ;;  %v1604_v35 = vld [vmem:[%s3595_s1 + $0x770] sm:$0xff]  ;;  %v1603_v37 = vld [vmem:[%s3595_s1 + $0x768] sm:$0xff] }
  0x2d   : > { %610 = vmatprep.subr.mxu1 %v1621_v1  ;;  %534 = vmatpush2.msra.mxu0 %v1556_v2  ;;  %v1538_v38 = vld [vmem:[%s3595_s1 + $0x560] sm:$0xff]  ;;  %v1537_v40 = vld [vmem:[%s3595_s1 + $0x558] sm:$0xff]  ;;  %v1536_v42 = vld [vmem:[%s3595_s1 + $0x550] sm:$0xff] }
  0x2e   : > { %611 = vmatpush2.msra.mxu1 %v1620_v3  ;;  %535 = vmatprep.subr.mxu0 %v1555_v4  ;;  %v1602_v39 = vld [vmem:[%s3595_s1 + $0x760] sm:$0xff]  ;;  %v1601_v41 = vld [vmem:[%s3595_s1 + $0x758] sm:$0xff]  ;;  %v1600_v43 = vld [vmem:[%s3595_s1 + $0x750] sm:$0xff] }
  0x2f   : > { %612 = vmatprep.subr.mxu1 %v1619_v5  ;;  %536 = vmatpush2.msra.mxu0 %v1554_v6  ;;  %v1535_v44 = vld [vmem:[%s3595_s1 + $0x548] sm:$0xff]  ;;  %v1534_v46 = vld [vmem:[%s3595_s1 + $0x540] sm:$0xff]  ;;  %v1533_v48 = vld [vmem:[%s3595_s1 + $0x538] sm:$0xff] }
  0x30   : > { %613 = vmatpush2.msra.mxu1 %v1618_v7  ;;  %537 = vmatprep.subr.mxu0 %v1553_v8  ;;  %v1599_v45 = vld [vmem:[%s3595_s1 + $0x748] sm:$0xff]  ;;  %v1598_v47 = vld [vmem:[%s3595_s1 + $0x740] sm:$0xff]  ;;  %v1597_v49 = vld [vmem:[%s3595_s1 + $0x738] sm:$0xff] }
  0x31   : > { %614 = vmatprep.subr.mxu1 %v1617_v9  ;;  %538 = vmatpush2.msra.mxu0 %v1552_v10  ;;  %v1532_v50 = vld [vmem:[%s3595_s1 + $0x530] sm:$0xff]  ;;  %v1531_v52 = vld [vmem:[%s3595_s1 + $0x528] sm:$0xff]  ;;  %v2303_v56 = vld [vmem:[%s2272_s11 + $0x18] sm:$0xff] }
  0x32   : > { %615 = vmatpush2.msra.mxu1 %v1616_v11  ;;  %539 = vmatprep.subr.mxu0 %v1551_v12  ;;  %v1596_v51 = vld [vmem:[%s3595_s1 + $0x730] sm:$0xff]  ;;  %v1595_v53 = vld [vmem:[%s3595_s1 + $0x728] sm:$0xff]  ;;  %v178_v57 = vld [vmem:[%s2272_s11 + $0x38] sm:$0x1]  ;;  %v349_v4 = vrot.slane %v2303_v56, 1 }
  0x33   : > { %616 = vmatprep.subr.mxu1 %v1615_v13  ;;  %540 = vmatpush2.msra.mxu0 %v1550_v14  ;;  %v2299_v54 = vld [vmem:[%s2272_s11 + $0x8] sm:$0xff]  ;;  %v2307_v58 = vld [vmem:[%s2272_s11] sm:$0xff]  ;;  %v2311_v60 = vld [vmem:[%s2272_s11 + $0x10] sm:$0xff]  ;;  %v350_v5 = vrot.slane %v178_v57, 1 }
  0x34   : > { %617 = vmatpush2.msra.mxu1 %v1614_v15  ;;  %541 = vmatprep.subr.mxu0 %v1549_v16  ;;  %v176_v55 = vld [vmem:[%s2272_s11 + $0x28] sm:$0x1]  ;;  %v175_v59 = vld [vmem:[%s2272_s11 + $0x20] sm:$0x1]  ;;  %v177_v61 = vld [vmem:[%s2272_s11 + $0x30] sm:$0x1] }
  0x35   : > { %618 = vmatprep.subr.mxu1 %v1613_v17  ;;  %542 = vmatpush2.msra.mxu0 %v1548_v18  ;;  %v1530_v62 = vld [vmem:[%s3595_s1 + $0x520] sm:$0xff]  ;;  %v343_v0 = vrot.slane %v2299_v54, 1  ;;  %v344_v1 = vrot.slane %v176_v55, 1  ;;  %v1529_v2 = vld [vmem:[%s3595_s1 + $0x518] sm:$0xff]  ;;  %v1528_v6 = vld [vmem:[%s3595_s1 + $0x510] sm:$0xff]  ;;  %v340_v8 = vrot.slane %v2307_v58, 1  ;;  %v351_v17 = vsel %vm339_vm0, %v349_v4, %v350_v5 }
  0x36   : > { %619 = vmatpush2.msra.mxu1 %v1612_v19  ;;  %543 = vmatprep.subr.mxu0 %v1547_v20  ;;  %v1594_v63 = vld [vmem:[%s3595_s1 + $0x720] sm:$0xff]  ;;  %v1593_v3 = vld [vmem:[%s3595_s1 + $0x718] sm:$0xff]  ;;  %v1592_v7 = vld [vmem:[%s3595_s1 + $0x710] sm:$0xff]  ;;  %v341_v9 = vrot.slane %v175_v59, 1  ;;  %v346_v10 = vrot.slane %v2311_v60, 1  ;;  %v347_v11 = vrot.slane %v177_v61, 1 }
  0x37   : > { %620 = vmatprep.subr.mxu1 %v1611_v21  ;;  %544 = vmatpush2.msra.mxu0 %v1546_v22  ;;  %v1527_v12 = vld [vmem:[%s3595_s1 + $0x508] sm:$0xff]  ;;  %v1526_v14 = vld [vmem:[%s3595_s1 + $0x500] sm:$0xff]  ;;  %v345_v15 = vsel %vm339_vm0, %v343_v0, %v344_v1  ;;  %v226_v20 = vld [vmem:[%s3595_s1 + $0xf8] sm:$0xff] }
  0x38   : > { %621 = vmatpush2.msra.mxu1 %v1610_v23  ;;  %545 = vmatprep.subr.mxu0 %v1545_v24  ;;  %v1591_v13 = vld [vmem:[%s3595_s1 + $0x708] sm:$0xff]  ;;  %v1590_v16 = vld [vmem:[%s3595_s1 + $0x700] sm:$0xff]  ;;  %v342_v18 = vsel %vm339_vm0, %v340_v8, %v341_v9  ;;  %v348_v19 = vsel %vm339_vm0, %v346_v10, %v347_v11  ;;  %v290_v21 = vld [vmem:[%s3595_s1 + $0x2f8] sm:$0xff] }
  0x39   : > { %622 = vmatprep.subr.mxu1 %v1609_v25  ;;  %546 = vmatpush2.msra.mxu0 %v1544_v26  ;;  %v225_v22 = vld [vmem:[%s3595_s1 + $0xf0] sm:$0xff]  ;;  %v224_v24 = vld [vmem:[%s3595_s1 + $0xe8] sm:$0xff]  ;;  %v223_v26 = vld [vmem:[%s3595_s1 + $0xe0] sm:$0xff] }
  0x3a   : > { %623 = vmatpush2.msra.mxu1 %v1608_v27  ;;  %547 = vmatprep.subr.mxu0 %v1543_v28  ;;  %v289_v23 = vld [vmem:[%s3595_s1 + $0x2f0] sm:$0xff]  ;;  %v288_v25 = vld [vmem:[%s3595_s1 + $0x2e8] sm:$0xff]  ;;  %v287_v27 = vld [vmem:[%s3595_s1 + $0x2e0] sm:$0xff] }
  0x3b   : > { %624 = vmatprep.subr.mxu1 %v1607_v29  ;;  %548 = vmatpush2.msra.mxu0 %v1542_v30  ;;  %v222_v28 = vld [vmem:[%s3595_s1 + $0xd8] sm:$0xff]  ;;  %v221_v30 = vld [vmem:[%s3595_s1 + $0xd0] sm:$0xff]  ;;  %v208_v59 = vld [vmem:[%s3595_s1 + $0x68] sm:$0xff] }
  0x3c   : > { %625 = vmatpush2.msra.mxu1 %v1606_v31  ;;  %549 = vmatprep.subr.mxu0 %v1541_v32  ;;  %v286_v29 = vld [vmem:[%s3595_s1 + $0x2d8] sm:$0xff]  ;;  %v285_v31 = vld [vmem:[%s3595_s1 + $0x2d0] sm:$0xff]  ;;  %v220_v32 = vld [vmem:[%s3595_s1 + $0xc8] sm:$0xff] }
  0x3d   : > { %626 = vmatprep.subr.mxu1 %v1605_v33  ;;  %550 = vmatpush2.msra.mxu0 %v1540_v34  ;;  %v284_v33 = vld [vmem:[%s3595_s1 + $0x2c8] sm:$0xff]  ;;  %v219_v34 = vld [vmem:[%s3595_s1 + $0xc0] sm:$0xff]  ;;  %v209_v55 = vld [vmem:[%s3595_s1 + $0x70] sm:$0xff] }
  0x3e   : > { %627 = vmatpush2.msra.mxu1 %v1604_v35  ;;  %551 = vmatprep.subr.mxu0 %v1539_v36  ;;  %v283_v35 = vld [vmem:[%s3595_s1 + $0x2c0] sm:$0xff]  ;;  %v218_v36 = vld [vmem:[%s3595_s1 + $0xb8] sm:$0xff]  ;;  %v273_v57 = vld [vmem:[%s3595_s1 + $0x270] sm:$0xff] }
  0x3f   : > { %628 = vmatprep.subr.mxu1 %v1603_v37  ;;  %552 = vmatpush2.msra.mxu0 %v1538_v38  ;;  %v282_v37 = vld [vmem:[%s3595_s1 + $0x2b8] sm:$0xff]  ;;  %v217_v38 = vld [vmem:[%s3595_s1 + $0xb0] sm:$0xff]  ;;  %v272_v61 = vld [vmem:[%s3595_s1 + $0x268] sm:$0xff] }
  0x40   : > { %629 = vmatpush2.msra.mxu1 %v1602_v39  ;;  %553 = vmatprep.subr.mxu0 %v1537_v40  ;;  %v281_v39 = vld [vmem:[%s3595_s1 + $0x2b0] sm:$0xff]  ;;  %v216_v40 = vld [vmem:[%s3595_s1 + $0xa8] sm:$0xff]  ;;  %v206_v0 = vld [vmem:[%s3595_s1 + $0x58] sm:$0xff] }
  0x41   : > { %630 = vmatprep.subr.mxu1 %v1601_v41  ;;  %554 = vmatpush2.msra.mxu0 %v1536_v42  ;;  %v280_v41 = vld [vmem:[%s3595_s1 + $0x2a8] sm:$0xff]  ;;  %v215_v42 = vld [vmem:[%s3595_s1 + $0xa0] sm:$0xff]  ;;  %v270_v1 = vld [vmem:[%s3595_s1 + $0x258] sm:$0xff] }
  0x42   : > { %631 = vmatpush2.msra.mxu1 %v1600_v43  ;;  %555 = vmatprep.subr.mxu0 %v1535_v44  ;;  %v279_v43 = vld [vmem:[%s3595_s1 + $0x2a0] sm:$0xff]  ;;  %v214_v44 = vld [vmem:[%s3595_s1 + $0x98] sm:$0xff]  ;;  %v204_v4 = vld [vmem:[%s3595_s1 + $0x48] sm:$0xff] }
  0x43   : > { %632 = vmatprep.subr.mxu1 %v1599_v45  ;;  %556 = vmatpush2.msra.mxu0 %v1534_v46  ;;  %v278_v45 = vld [vmem:[%s3595_s1 + $0x298] sm:$0xff]  ;;  %v213_v46 = vld [vmem:[%s3595_s1 + $0x90] sm:$0xff]  ;;  %v268_v5 = vld [vmem:[%s3595_s1 + $0x248] sm:$0xff] }
  0x44   : > { %633 = vmatpush2.msra.mxu1 %v1598_v47  ;;  %557 = vmatprep.subr.mxu0 %v1533_v48  ;;  %v277_v47 = vld [vmem:[%s3595_s1 + $0x290] sm:$0xff]  ;;  %v212_v48 = vld [vmem:[%s3595_s1 + $0x88] sm:$0xff]  ;;  %v202_v8 = vld [vmem:[%s3595_s1 + $0x38] sm:$0xff] }
  0x45   : > { %634 = vmatprep.subr.mxu1 %v1597_v49  ;;  %558 = vmatpush2.msra.mxu0 %v1532_v50  ;;  %v276_v49 = vld [vmem:[%s3595_s1 + $0x288] sm:$0xff]  ;;  %v211_v50 = vld [vmem:[%s3595_s1 + $0x80] sm:$0xff]  ;;  %v266_v9 = vld [vmem:[%s3595_s1 + $0x238] sm:$0xff] }
  0x46   : > { %635 = vmatpush2.msra.mxu1 %v1596_v51  ;;  %559 = vmatprep.subr.mxu0 %v1531_v52  ;;  %v275_v51 = vld [vmem:[%s3595_s1 + $0x280] sm:$0xff]  ;;  %v210_v52 = vld [vmem:[%s3595_s1 + $0x78] sm:$0xff]  ;;  %v201_v10 = vld [vmem:[%s3595_s1 + $0x30] sm:$0xff] }
  0x47   : > { %636 = vmatprep.subr.mxu1 %v1595_v53  ;;  %560 = vmatpush2.msra.mxu0 %v1530_v62  ;;  %v274_v53 = vld [vmem:[%s3595_s1 + $0x278] sm:$0xff]  ;;  %v207_v62 = vld [vmem:[%s3595_s1 + $0x60] sm:$0xff]  ;;  %v265_v11 = vld [vmem:[%s3595_s1 + $0x230] sm:$0xff] }
  0x48   : > { %637 = vmatpush2.msra.mxu1 %v1594_v63  ;;  %561 = vmatprep.subr.mxu0 %v1529_v2  ;;  %v271_v63 = vld [vmem:[%s3595_s1 + $0x260] sm:$0xff]  ;;  %v205_v2 = vld [vmem:[%s3595_s1 + $0x50] sm:$0xff] }
  0x49   : > { %638 = vmatprep.subr.mxu1 %v1593_v3  ;;  %562 = vmatpush2.msra.mxu0 %v1528_v6  ;;  %v269_v3 = vld [vmem:[%s3595_s1 + $0x250] sm:$0xff]  ;;  %v203_v6 = vld [vmem:[%s3595_s1 + $0x40] sm:$0xff] }
  0x4a   : > { %639 = vmatpush2.msra.mxu1 %v1592_v7  ;;  %563 = vmatprep.subr.mxu0 %v1527_v12  ;;  %v267_v7 = vld [vmem:[%s3595_s1 + $0x240] sm:$0xff]  ;;  %v200_v12 = vld [vmem:[%s3595_s1 + $0x28] sm:$0xff] }
  0x4b   : > { %640 = vmatprep.subr.mxu1 %v1591_v13  ;;  %564 = vmatpush2.msra.mxu0 %v1526_v14  ;;  %v264_v13 = vld [vmem:[%s3595_s1 + $0x228] sm:$0xff]  ;;  %v199_v14 = vld [vmem:[%s3595_s1 + $0x20] sm:$0xff] }
  0x4c   : > { %565 = vmatprep.mubr.f32.mxu0 %v345_v15  ;;  %641 = vmatpush2.msra.mxu1 %v1590_v16  ;;  %v263_v15 = vld [vmem:[%s3595_s1 + $0x220] sm:$0xff]  ;;  %v198_v16 = vld [vmem:[%s3595_s1 + $0x18] sm:$0xff] }
  0x4d   : > { %642 = vmatprep.mubr.f32.mxu1 %v351_v17  ;;  %566 = vmatmul.mubr.f32.vlgmr.msra.gmra.mxu0 %v342_v18  ;;  %v262_v17 = vld [vmem:[%s3595_s1 + $0x218] sm:$0xff]  ;;  %v197_v18 = vld [vmem:[%s3595_s1 + $0x10] sm:$0xff] }
  0x4e   : > { %643 = vmatmul.mubr.f32.vlgmr.msra.gmra.mxu1 %v348_v19  ;;  %655 = vmatprep.subr.mxu0 %v226_v20  ;;  %v261_v19 = vld [vmem:[%s3595_s1 + $0x210] sm:$0xff]  ;;  %v196_v20 = vld [vmem:[%s3595_s1 + $0x8] sm:$0xff] }
  0x4f   : > { %732 = vmatprep.subr.mxu1 %v290_v21  ;;  %656 = vmatpush1.msra.mxu0 %v225_v22  ;;  %v260_v21 = vld [vmem:[%s3595_s1 + $0x208] sm:$0xff]  ;;  %v195_v22 = vld [vmem:[%s3595_s1] sm:$0xff] }
  0x50   : > { %733 = vmatpush1.msra.mxu1 %v289_v23  ;;  %657 = vmatprep.subr.mxu0 %v224_v24  ;;  %v259_v23 = vld [vmem:[%s3595_s1 + $0x200] sm:$0xff]  ;;  %v258_v24 = vld [vmem:[%s3595_s1 + $0x1f8] sm:$0xff] }
  0x51   : > { %734 = vmatprep.subr.mxu1 %v288_v25  ;;  %658 = vmatpush1.msra.mxu0 %v223_v26  ;;  %v322_v25 = vld [vmem:[%s3595_s1 + $0x3f8] sm:$0xff]  ;;  %v257_v26 = vld [vmem:[%s3595_s1 + $0x1f0] sm:$0xff] }
  0x52   : > { %735 = vmatpush1.msra.mxu1 %v287_v27  ;;  %659 = vmatprep.subr.mxu0 %v222_v28  ;;  %v321_v27 = vld [vmem:[%s3595_s1 + $0x3f0] sm:$0xff]  ;;  %v256_v28 = vld [vmem:[%s3595_s1 + $0x1e8] sm:$0xff] }
  0x53   : > { %736 = vmatprep.subr.mxu1 %v286_v29  ;;  %660 = vmatpush1.msra.mxu0 %v221_v30  ;;  %v320_v29 = vld [vmem:[%s3595_s1 + $0x3e8] sm:$0xff]  ;;  %v255_v30 = vld [vmem:[%s3595_s1 + $0x1e0] sm:$0xff] }
  0x54   : > { %737 = vmatpush1.msra.mxu1 %v285_v31  ;;  %661 = vmatprep.subr.mxu0 %v220_v32  ;;  %v319_v31 = vld [vmem:[%s3595_s1 + $0x3e0] sm:$0xff]  ;;  %v254_v32 = vld [vmem:[%s3595_s1 + $0x1d8] sm:$0xff] }
  0x55   : > { %738 = vmatprep.subr.mxu1 %v284_v33  ;;  %662 = vmatpush1.msra.mxu0 %v219_v34  ;;  %v318_v33 = vld [vmem:[%s3595_s1 + $0x3d8] sm:$0xff]  ;;  %v253_v34 = vld [vmem:[%s3595_s1 + $0x1d0] sm:$0xff] }
  0x56   : > { %739 = vmatpush1.msra.mxu1 %v283_v35  ;;  %663 = vmatprep.subr.mxu0 %v218_v36  ;;  %v317_v35 = vld [vmem:[%s3595_s1 + $0x3d0] sm:$0xff]  ;;  %v252_v36 = vld [vmem:[%s3595_s1 + $0x1c8] sm:$0xff] }
  0x57   : > { %740 = vmatprep.subr.mxu1 %v282_v37  ;;  %664 = vmatpush1.msra.mxu0 %v217_v38  ;;  %v316_v37 = vld [vmem:[%s3595_s1 + $0x3c8] sm:$0xff]  ;;  %v251_v38 = vld [vmem:[%s3595_s1 + $0x1c0] sm:$0xff] }
  0x58   : > { %741 = vmatpush1.msra.mxu1 %v281_v39  ;;  %665 = vmatprep.subr.mxu0 %v216_v40  ;;  %v315_v39 = vld [vmem:[%s3595_s1 + $0x3c0] sm:$0xff]  ;;  %v250_v40 = vld [vmem:[%s3595_s1 + $0x1b8] sm:$0xff] }
  0x59   : > { %742 = vmatprep.subr.mxu1 %v280_v41  ;;  %666 = vmatpush1.msra.mxu0 %v215_v42  ;;  %v314_v41 = vld [vmem:[%s3595_s1 + $0x3b8] sm:$0xff]  ;;  %v249_v42 = vld [vmem:[%s3595_s1 + $0x1b0] sm:$0xff] }
  0x5a   : > { %743 = vmatpush1.msra.mxu1 %v279_v43  ;;  %667 = vmatprep.subr.mxu0 %v214_v44  ;;  %v313_v43 = vld [vmem:[%s3595_s1 + $0x3b0] sm:$0xff]  ;;  %v248_v44 = vld [vmem:[%s3595_s1 + $0x1a8] sm:$0xff] }
  0x5b   : > { %744 = vmatprep.subr.mxu1 %v278_v45  ;;  %668 = vmatpush1.msra.mxu0 %v213_v46  ;;  %v312_v45 = vld [vmem:[%s3595_s1 + $0x3a8] sm:$0xff]  ;;  %v247_v46 = vld [vmem:[%s3595_s1 + $0x1a0] sm:$0xff] }
  0x5c   : > { %745 = vmatpush1.msra.mxu1 %v277_v47  ;;  %669 = vmatprep.subr.mxu0 %v212_v48  ;;  %v311_v47 = vld [vmem:[%s3595_s1 + $0x3a0] sm:$0xff]  ;;  %v246_v48 = vld [vmem:[%s3595_s1 + $0x198] sm:$0xff] }
  0x5d   : > { %746 = vmatprep.subr.mxu1 %v276_v49  ;;  %670 = vmatpush1.msra.mxu0 %v211_v50  ;;  %v310_v49 = vld [vmem:[%s3595_s1 + $0x398] sm:$0xff]  ;;  %v245_v50 = vld [vmem:[%s3595_s1 + $0x190] sm:$0xff] }
  0x5e   : > { %747 = vmatpush1.msra.mxu1 %v275_v51  ;;  %671 = vmatprep.subr.mxu0 %v210_v52  ;;  %v309_v51 = vld [vmem:[%s3595_s1 + $0x390] sm:$0xff]  ;;  %v244_v52 = vld [vmem:[%s3595_s1 + $0x188] sm:$0xff] }
  0x5f   : > { %748 = vmatprep.subr.mxu1 %v274_v53  ;;  %672 = vmatpush1.msra.mxu0 %v209_v55  ;;  %v308_v53 = vld [vmem:[%s3595_s1 + $0x388] sm:$0xff]  ;;  %v243_v55 = vld [vmem:[%s3595_s1 + $0x180] sm:$0xff] }
  0x60   : > { %749 = vmatpush1.msra.mxu1 %v273_v57  ;;  %673 = vmatprep.subr.mxu0 %v208_v59  ;;  %v307_v57 = vld [vmem:[%s3595_s1 + $0x380] sm:$0xff]  ;;  %v242_v59 = vld [vmem:[%s3595_s1 + $0x178] sm:$0xff] }
  0x61   : > { %750 = vmatprep.subr.mxu1 %v272_v61  ;;  %674 = vmatpush1.msra.mxu0 %v207_v62  ;;  %v306_v61 = vld [vmem:[%s3595_s1 + $0x378] sm:$0xff]  ;;  %v241_v62 = vld [vmem:[%s3595_s1 + $0x170] sm:$0xff] }
  0x62   : > { %751 = vmatpush1.msra.mxu1 %v271_v63  ;;  %675 = vmatprep.subr.mxu0 %v206_v0  ;;  %v305_v63 = vld [vmem:[%s3595_s1 + $0x370] sm:$0xff]  ;;  %v240_v0 = vld [vmem:[%s3595_s1 + $0x168] sm:$0xff] }
  0x63   : > { %752 = vmatprep.subr.mxu1 %v270_v1  ;;  %676 = vmatpush1.msra.mxu0 %v205_v2  ;;  %v304_v1 = vld [vmem:[%s3595_s1 + $0x368] sm:$0xff]  ;;  %v239_v2 = vld [vmem:[%s3595_s1 + $0x160] sm:$0xff] }
  0x64   : > { %753 = vmatpush1.msra.mxu1 %v269_v3  ;;  %677 = vmatprep.subr.mxu0 %v204_v4  ;;  %v303_v3 = vld [vmem:[%s3595_s1 + $0x360] sm:$0xff]  ;;  %v238_v4 = vld [vmem:[%s3595_s1 + $0x158] sm:$0xff] }
  0x65   : > { %754 = vmatprep.subr.mxu1 %v268_v5  ;;  %678 = vmatpush1.msra.mxu0 %v203_v6  ;;  %v302_v5 = vld [vmem:[%s3595_s1 + $0x358] sm:$0xff]  ;;  %v2671_v6 = vld [vmem:[%s2272_s11 + $0x48] sm:$0xff] }
  0x66   : > { %755 = vmatpush1.msra.mxu1 %v267_v7  ;;  %679 = vmatprep.subr.mxu0 %v202_v8  ;;  %v184_v7 = vld [vmem:[%s2272_s11 + $0x68] sm:$0x1]  ;;  %v2675_v8 = vld [vmem:[%s2272_s11 + $0x58] sm:$0xff] }
  0x67   : > { %756 = vmatprep.subr.mxu1 %v266_v9  ;;  %680 = vmatpush1.msra.mxu0 %v201_v10  ;;  %v186_v9 = vld [vmem:[%s2272_s11 + $0x78] sm:$0x1]  ;;  %v237_v10 = vld [vmem:[%s3595_s1 + $0x150] sm:$0xff] }
  0x68   : > { %757 = vmatpush1.msra.mxu1 %v265_v11  ;;  %681 = vmatprep.subr.mxu0 %v200_v12  ;;  %v301_v11 = vld [vmem:[%s3595_s1 + $0x350] sm:$0xff]  ;;  %v2685_v12 = vld [vmem:[%s2272_s11 + $0x40] sm:$0xff] }
  0x69   : > { %758 = vmatprep.subr.mxu1 %v264_v13  ;;  %682 = vmatpush1.msra.mxu0 %v199_v14  ;;  %v183_v13 = vld [vmem:[%s2272_s11 + $0x60] sm:$0x1]  ;;  %v2689_v14 = vld [vmem:[%s2272_s11 + $0x50] sm:$0xff] }
  0x6a   : > { %759 = vmatpush1.msra.mxu1 %v263_v15  ;;  %683 = vmatprep.subr.mxu0 %v198_v16  ;;  %v185_v15 = vld [vmem:[%s2272_s11 + $0x70] sm:$0x1]  ;;  %v236_v16 = vld [vmem:[%s3595_s1 + $0x148] sm:$0xff] }
  0x6b   : > { %760 = vmatprep.subr.mxu1 %v262_v17  ;;  %684 = vmatpush1.msra.mxu0 %v197_v18  ;;  %v300_v17 = vld [vmem:[%s3595_s1 + $0x348] sm:$0xff]  ;;  %v355_v18 = vrot.slane %v2671_v6, 1 }
  0x6c   : > { %761 = vmatpush1.msra.mxu1 %v261_v19  ;;  %685 = vmatprep.subr.mxu0 %v196_v20  ;;  %v356_v19 = vrot.slane %v184_v7, 1  ;;  %v361_v20 = vrot.slane %v2675_v8, 1  ;;  %v1642_v7 = vld [vmem:[%s3595_s1 + $0x8a0] sm:$0xff] }
  0x6d   : > { %762 = vmatprep.subr.mxu1 %v260_v21  ;;  %686 = vmatpush1.msra.mxu0 %v195_v22  ;;  %v362_v21 = vrot.slane %v186_v9, 1  ;;  %v235_v22 = vld [vmem:[%s3595_s1 + $0x140] sm:$0xff] }
  0x6e   : > { %763 = vmatpush1.msra.mxu1 %v259_v23  ;;  %687 = vmatprep.subr.mxu0 %v258_v24  ;;  %v299_v23 = vld [vmem:[%s3595_s1 + $0x340] sm:$0xff]  ;;  %v234_v24 = vld [vmem:[%s3595_s1 + $0x138] sm:$0xff] }
  0x6f   : > { %764 = vmatprep.subr.mxu1 %v322_v25  ;;  %688 = vmatpush2.msra.mxu0 %v257_v26  ;;  %v298_v25 = vld [vmem:[%s3595_s1 + $0x338] sm:$0xff]  ;;  %v352_v26 = vrot.slane %v2685_v12, 1  ;;  %v1706_v9 = vld [vmem:[%s3595_s1 + $0xaa0] sm:$0xff] }
  0x70   : > { %765 = vmatpush2.msra.mxu1 %v321_v27  ;;  %689 = vmatprep.subr.mxu0 %v256_v28  ;;  %v353_v27 = vrot.slane %v183_v13, 1  ;;  %v358_v28 = vrot.slane %v2689_v14, 1  ;;  %v1640_v13 = vld [vmem:[%s3595_s1 + $0x890] sm:$0xff] }
  0x71   : > { %766 = vmatprep.subr.mxu1 %v320_v29  ;;  %690 = vmatpush2.msra.mxu0 %v255_v30  ;;  %v359_v29 = vrot.slane %v185_v15, 1  ;;  %v233_v30 = vld [vmem:[%s3595_s1 + $0x130] sm:$0xff] }
  0x72   : > { %767 = vmatpush2.msra.mxu1 %v319_v31  ;;  %691 = vmatprep.subr.mxu0 %v254_v32  ;;  %v297_v31 = vld [vmem:[%s3595_s1 + $0x330] sm:$0xff]  ;;  %v2721_v32 = vsel %vm339_vm0, %v355_v18, %v356_v19  ;;  %v1638_v18 = vld [vmem:[%s3595_s1 + $0x880] sm:$0xff] }
  0x73   : > { %768 = vmatprep.subr.mxu1 %v318_v33  ;;  %692 = vmatpush2.msra.mxu0 %v253_v34  ;;  %v2724_v33 = vsel %vm339_vm0, %v361_v20, %v362_v21  ;;  %v232_v34 = vld [vmem:[%s3595_s1 + $0x128] sm:$0xff]  ;;  %v1704_v15 = vld [vmem:[%s3595_s1 + $0xa90] sm:$0xff]  ;;  %v1702_v19 = vld [vmem:[%s3595_s1 + $0xa80] sm:$0xff] }
  0x74   : > { %769 = vmatpush2.msra.mxu1 %v317_v35  ;;  %693 = vmatprep.subr.mxu0 %v252_v36  ;;  %v296_v35 = vld [vmem:[%s3595_s1 + $0x328] sm:$0xff]  ;;  %v2733_v36 = vsel %vm339_vm0, %v352_v26, %v353_v27  ;;  %v1637_v20 = vld [vmem:[%s3595_s1 + $0x878] sm:$0xff]  ;;  %v1634_v26 = vld [vmem:[%s3595_s1 + $0x860] sm:$0xff] }
  0x75   : > { %770 = vmatprep.subr.mxu1 %v316_v37  ;;  %694 = vmatpush2.msra.mxu0 %v251_v38  ;;  %v2736_v37 = vsel %vm339_vm0, %v358_v28, %v359_v29  ;;  %v231_v38 = vld [vmem:[%s3595_s1 + $0x120] sm:$0xff]  ;;  %v1701_v21 = vld [vmem:[%s3595_s1 + $0xa78] sm:$0xff] }
  0x76   : > { %771 = vmatpush2.msra.mxu1 %v315_v39  ;;  %695 = vmatprep.subr.mxu0 %v250_v40  ;;  %v295_v39 = vld [vmem:[%s3595_s1 + $0x320] sm:$0xff]  ;;  %v230_v40 = vld [vmem:[%s3595_s1 + $0x118] sm:$0xff] }
  0x77   : > { %772 = vmatprep.subr.mxu1 %v314_v41  ;;  %696 = vmatpush2.msra.mxu0 %v249_v42  ;;  %v294_v41 = vld [vmem:[%s3595_s1 + $0x318] sm:$0xff]  ;;  %v229_v42 = vld [vmem:[%s3595_s1 + $0x110] sm:$0xff]  ;;  %v1698_v27 = vld [vmem:[%s3595_s1 + $0xa60] sm:$0xff] }
  0x78   : > { %773 = vmatpush2.msra.mxu1 %v313_v43  ;;  %697 = vmatprep.subr.mxu0 %v248_v44  ;;  %v293_v43 = vld [vmem:[%s3595_s1 + $0x310] sm:$0xff]  ;;  %v228_v44 = vld [vmem:[%s3595_s1 + $0x108] sm:$0xff]  ;;  %v1633_v28 = vld [vmem:[%s3595_s1 + $0x858] sm:$0xff] }
  0x79   : > { %774 = vmatprep.subr.mxu1 %v312_v45  ;;  %698 = vmatpush2.msra.mxu0 %v247_v46  ;;  %v292_v45 = vld [vmem:[%s3595_s1 + $0x308] sm:$0xff]  ;;  %v227_v46 = vld [vmem:[%s3595_s1 + $0x100] sm:$0xff]  ;;  %v1697_v29 = vld [vmem:[%s3595_s1 + $0xa58] sm:$0xff] }
  0x7a   : > { %775 = vmatpush2.msra.mxu1 %v311_v47  ;;  %699 = vmatprep.subr.mxu0 %v246_v48  ;;  %v291_v47 = vld [vmem:[%s3595_s1 + $0x300] sm:$0xff]  ;;  %v1653_v48 = vld [vmem:[%s3595_s1 + $0x8f8] sm:$0xff] }
  0x7b   : > { %776 = vmatprep.subr.mxu1 %v310_v49  ;;  %700 = vmatpush2.msra.mxu0 %v245_v50  ;;  %v1717_v49 = vld [vmem:[%s3595_s1 + $0xaf8] sm:$0xff]  ;;  %v1652_v50 = vld [vmem:[%s3595_s1 + $0x8f0] sm:$0xff] }
  0x7c   : > { %777 = vmatpush2.msra.mxu1 %v309_v51  ;;  %701 = vmatprep.subr.mxu0 %v244_v52  ;;  %v1716_v51 = vld [vmem:[%s3595_s1 + $0xaf0] sm:$0xff]  ;;  %v1650_v52 = vld [vmem:[%s3595_s1 + $0x8e0] sm:$0xff] }
  0x7d   : > { %778 = vmatprep.subr.mxu1 %v308_v53  ;;  %702 = vmatpush2.msra.mxu0 %v243_v55  ;;  %v1713_v53 = vld [vmem:[%s3595_s1 + $0xad8] sm:$0xff]  ;;  %v1648_v55 = vld [vmem:[%s3595_s1 + $0x8d0] sm:$0xff] }
  0x7e   : > { %779 = vmatpush2.msra.mxu1 %v307_v57  ;;  %703 = vmatprep.subr.mxu0 %v242_v59  ;;  %v1712_v57 = vld [vmem:[%s3595_s1 + $0xad0] sm:$0xff]  ;;  %v1647_v59 = vld [vmem:[%s3595_s1 + $0x8c8] sm:$0xff] }
  0x7f   : > { %780 = vmatprep.subr.mxu1 %v306_v61  ;;  %704 = vmatpush2.msra.mxu0 %v241_v62  ;;  %v1711_v61 = vld [vmem:[%s3595_s1 + $0xac8] sm:$0xff]  ;;  %v1646_v62 = vld [vmem:[%s3595_s1 + $0x8c0] sm:$0xff] }
  0x80   : > { %781 = vmatpush2.msra.mxu1 %v305_v63  ;;  %705 = vmatprep.subr.mxu0 %v240_v0  ;;  %v1710_v63 = vld [vmem:[%s3595_s1 + $0xac0] sm:$0xff]  ;;  %v1645_v0 = vld [vmem:[%s3595_s1 + $0x8b8] sm:$0xff] }
  0x81   : > { %782 = vmatprep.subr.mxu1 %v304_v1  ;;  %706 = vmatpush2.msra.mxu0 %v239_v2  ;;  %v1709_v1 = vld [vmem:[%s3595_s1 + $0xab8] sm:$0xff]  ;;  %v1644_v2 = vld [vmem:[%s3595_s1 + $0x8b0] sm:$0xff] }
  0x82   : > { %783 = vmatpush2.msra.mxu1 %v303_v3  ;;  %707 = vmatprep.subr.mxu0 %v238_v4  ;;  %v1708_v3 = vld [vmem:[%s3595_s1 + $0xab0] sm:$0xff]  ;;  %v1643_v4 = vld [vmem:[%s3595_s1 + $0x8a8] sm:$0xff] }
  0x83   : > { %784 = vmatprep.subr.mxu1 %v302_v5  ;;  %708 = vmatpush2.msra.mxu0 %v237_v10  ;;  %v1707_v5 = vld [vmem:[%s3595_s1 + $0xaa8] sm:$0xff]  ;;  %v1641_v10 = vld [vmem:[%s3595_s1 + $0x898] sm:$0xff] }
  0x84   : > { %785 = vmatpush2.msra.mxu1 %v301_v11  ;;  %709 = vmatprep.subr.mxu0 %v236_v16  ;;  %v1705_v11 = vld [vmem:[%s3595_s1 + $0xa98] sm:$0xff]  ;;  %v1639_v16 = vld [vmem:[%s3595_s1 + $0x888] sm:$0xff] }
  0x85   : > { %786 = vmatprep.subr.mxu1 %v300_v17  ;;  %710 = vmatpush2.msra.mxu0 %v235_v22  ;;  %v1703_v17 = vld [vmem:[%s3595_s1 + $0xa88] sm:$0xff]  ;;  %v1636_v22 = vld [vmem:[%s3595_s1 + $0x870] sm:$0xff] }
  0x86   : > { %787 = vmatpush2.msra.mxu1 %v299_v23  ;;  %711 = vmatprep.subr.mxu0 %v234_v24  ;;  %v1700_v23 = vld [vmem:[%s3595_s1 + $0xa70] sm:$0xff]  ;;  %v1635_v24 = vld [vmem:[%s3595_s1 + $0x868] sm:$0xff] }
  0x87   : > { %788 = vmatprep.subr.mxu1 %v298_v25  ;;  %712 = vmatpush2.msra.mxu0 %v233_v30  ;;  %v1699_v25 = vld [vmem:[%s3595_s1 + $0xa68] sm:$0xff]  ;;  %v1632_v30 = vld [vmem:[%s3595_s1 + $0x850] sm:$0xff] }
  0x88   : > { %789 = vmatpush2.msra.mxu1 %v297_v31  ;;  %571 = vmatprep.mubr.f32.mxu0 %v2721_v32  ;;  %v1696_v31 = vld [vmem:[%s3595_s1 + $0xa50] sm:$0xff] }
  0x89   : > { %648 = vmatprep.mubr.f32.mxu1 %v2724_v33  ;;  %713 = vmatprep.subr.mxu0 %v232_v34  ;;  %v1631_v34 = vld [vmem:[%s3595_s1 + $0x848] sm:$0xff] }
  0x8a   : > { %790 = vmatprep.subr.mxu1 %v296_v35  ;;  %572 = vmatmul.mubr.f32.gmra.mxu0 %v2733_v36  ;;  %v1695_v35 = vld [vmem:[%s3595_s1 + $0xa48] sm:$0xff] }
  0x8b   : > { %649 = vmatmul.mubr.f32.gmra.mxu1 %v2736_v37  ;;  %714 = vmatpush2.msra.mxu0 %v231_v38  ;;  %v1630_v38 = vld [vmem:[%s3595_s1 + $0x840] sm:$0xff] }
  0x8c   : > { %791 = vmatpush2.msra.mxu1 %v295_v39  ;;  %715 = vmatprep.subr.mxu0 %v230_v40  ;;  %v1694_v39 = vld [vmem:[%s3595_s1 + $0xa40] sm:$0xff]  ;;  %v1629_v40 = vld [vmem:[%s3595_s1 + $0x838] sm:$0xff] }
  0x8d   : > { %792 = vmatprep.subr.mxu1 %v294_v41  ;;  %716 = vmatpush2.msra.mxu0 %v229_v42  ;;  %v1693_v41 = vld [vmem:[%s3595_s1 + $0xa38] sm:$0xff]  ;;  %v1628_v42 = vld [vmem:[%s3595_s1 + $0x830] sm:$0xff] }
  0x8e   : > { %793 = vmatpush2.msra.mxu1 %v293_v43  ;;  %717 = vmatprep.subr.mxu0 %v228_v44  ;;  %v1692_v43 = vld [vmem:[%s3595_s1 + $0xa30] sm:$0xff]  ;;  %v1627_v44 = vld [vmem:[%s3595_s1 + $0x828] sm:$0xff] }
  0x8f   : > { %794 = vmatprep.subr.mxu1 %v292_v45  ;;  %718 = vmatpush2.msra.mxu0 %v227_v46  ;;  %v1691_v45 = vld [vmem:[%s3595_s1 + $0xa28] sm:$0xff]  ;;  %v1626_v46 = vld [vmem:[%s3595_s1 + $0x820] sm:$0xff] }
  0x90   : > { %719 = vmatprep.mubr.f32.mxu0 %v2299_v54  ;;  %795 = vmatpush2.msra.mxu1 %v291_v47  ;;  %v1651_v54 = vld [vmem:[%s3595_s1 + $0x8e8] sm:$0xff]  ;;  %v1690_v47 = vld [vmem:[%s3595_s1 + $0xa20] sm:$0xff] }
  0x91   : > { %796 = vmatprep.mubr.f32.mxu1 %v2303_v56  ;;  %720 = vmatmul.mubr.f32.vlgmr.msra.gmra.mxu0 %v2307_v58  ;;  %v1715_v56 = vld [vmem:[%s3595_s1 + $0xae8] sm:$0xff]  ;;  %v1714_v58 = vld [vmem:[%s3595_s1 + $0xae0] sm:$0xff] }
  0x92   : > { %797 = vmatmul.mubr.f32.vlgmr.msra.gmra.mxu1 %v2311_v60  ;;  %938 = vmatprep.subr.mxu0 %v1653_v48  ;;  %v1649_v60 = vld [vmem:[%s3595_s1 + $0x8d8] sm:$0xff] }
  0x93   : > { %1015 = vmatprep.subr.mxu1 %v1717_v49  ;;  %939 = vmatpush1.msra.mxu0 %v1652_v50  ;;  %v1625_v48 = vld [vmem:[%s3595_s1 + $0x818] sm:$0xff]  ;;  %v1624_v50 = vld [vmem:[%s3595_s1 + $0x810] sm:$0xff] }
  0x94   : > { %1016 = vmatpush1.msra.mxu1 %v1716_v51  ;;  %940 = vmatprep.subr.mxu0 %v1651_v54  ;;  %v1689_v49 = vld [vmem:[%s3595_s1 + $0xa18] sm:$0xff]  ;;  %v1688_v51 = vld [vmem:[%s3595_s1 + $0xa10] sm:$0xff]  ;;  %v1623_v54 = vld [vmem:[%s3595_s1 + $0x808] sm:$0xff] }
  0x95   : > { %1017 = vmatprep.subr.mxu1 %v1715_v56  ;;  %725 = vmatprep.mubr.f32.mxu0 %v2671_v6  ;;  %v1687_v56 = vld [vmem:[%s3595_s1 + $0xa08] sm:$0xff] }
  0x96   : > { %941 = vmatpush1.msra.mxu0 %v1650_v52  ;;  %1018 = vmatpush1.msra.mxu1 %v1714_v58  ;;  %v1622_v52 = vld [vmem:[%s3595_s1 + $0x800] sm:$0xff] }
  0x97   : > { %726 = vmatmul.mubr.f32.gmra.mxu0 %v2685_v12  ;;  %942 = vmatprep.subr.mxu0 %v1649_v60  ;;  %v1686_v58 = vld [vmem:[%s3595_s1 + $0xa00] sm:$0xff]  ;;  %v1685_v60 = vld [vmem:[%s3595_s1 + $0x9f8] sm:$0xff] }
  0x98   : > { %1019 = vmatprep.subr.mxu1 %v1713_v53  ;;  %802 = vmatprep.mubr.f32.mxu1 %v2675_v8  ;;  %v1749_v53 = vld [vmem:[%s3595_s1 + $0xbf8] sm:$0xff] }
  0x99   : > { %943 = vmatpush1.msra.mxu0 %v1648_v55  ;;  %1020 = vmatpush1.msra.mxu1 %v1712_v57  ;;  %v1684_v55 = vld [vmem:[%s3595_s1 + $0x9f0] sm:$0xff] }
  0x9a   : > { %944 = vmatprep.subr.mxu0 %v1647_v59  ;;  %803 = vmatmul.mubr.f32.gmra.mxu1 %v2689_v14  ;;  %v1748_v57 = vld [vmem:[%s3595_s1 + $0xbf0] sm:$0xff]  ;;  %v1683_v59 = vld [vmem:[%s3595_s1 + $0x9e8] sm:$0xff] }
  0x9b   : > { %1021 = vmatprep.subr.mxu1 %v1711_v61  ;;  %945 = vmatpush1.msra.mxu0 %v1646_v62  ;;  %v1747_v61 = vld [vmem:[%s3595_s1 + $0xbe8] sm:$0xff]  ;;  %v1682_v62 = vld [vmem:[%s3595_s1 + $0x9e0] sm:$0xff] }
  0x9c   : > { %1022 = vmatpush1.msra.mxu1 %v1710_v63  ;;  %946 = vmatprep.subr.mxu0 %v1645_v0  ;;  %v1746_v63 = vld [vmem:[%s3595_s1 + $0xbe0] sm:$0xff]  ;;  %v1681_v0 = vld [vmem:[%s3595_s1 + $0x9d8] sm:$0xff] }
  0x9d   : > { %1023 = vmatprep.subr.mxu1 %v1709_v1  ;;  %947 = vmatpush1.msra.mxu0 %v1644_v2  ;;  %v1745_v1 = vld [vmem:[%s3595_s1 + $0xbd8] sm:$0xff]  ;;  %v1680_v2 = vld [vmem:[%s3595_s1 + $0x9d0] sm:$0xff] }
  0x9e   : > { %1024 = vmatpush1.msra.mxu1 %v1708_v3  ;;  %948 = vmatprep.subr.mxu0 %v1643_v4  ;;  %v1744_v3 = vld [vmem:[%s3595_s1 + $0xbd0] sm:$0xff]  ;;  %v1679_v4 = vld [vmem:[%s3595_s1 + $0x9c8] sm:$0xff] }
  0x9f   : > { %1025 = vmatprep.subr.mxu1 %v1707_v5  ;;  %949 = vmatpush1.msra.mxu0 %v1642_v7  ;;  %v1743_v5 = vld [vmem:[%s3595_s1 + $0xbc8] sm:$0xff]  ;;  %v1678_v7 = vld [vmem:[%s3595_s1 + $0x9c0] sm:$0xff] }
  0xa0   : > { %1026 = vmatpush1.msra.mxu1 %v1706_v9  ;;  %950 = vmatprep.subr.mxu0 %v1641_v10  ;;  %v1742_v9 = vld [vmem:[%s3595_s1 + $0xbc0] sm:$0xff]  ;;  %v1677_v10 = vld [vmem:[%s3595_s1 + $0x9b8] sm:$0xff] }
  0xa1   : > { %1027 = vmatprep.subr.mxu1 %v1705_v11  ;;  %951 = vmatpush1.msra.mxu0 %v1640_v13  ;;  %v1741_v11 = vld [vmem:[%s3595_s1 + $0xbb8] sm:$0xff]  ;;  %v1676_v13 = vld [vmem:[%s3595_s1 + $0x9b0] sm:$0xff] }
  0xa2   : > { %1028 = vmatpush1.msra.mxu1 %v1704_v15  ;;  %952 = vmatprep.subr.mxu0 %v1639_v16  ;;  %v1740_v15 = vld [vmem:[%s3595_s1 + $0xbb0] sm:$0xff]  ;;  %v1675_v16 = vld [vmem:[%s3595_s1 + $0x9a8] sm:$0xff] }
  0xa3   : > { %1029 = vmatprep.subr.mxu1 %v1703_v17  ;;  %953 = vmatpush1.msra.mxu0 %v1638_v18  ;;  %v1739_v17 = vld [vmem:[%s3595_s1 + $0xba8] sm:$0xff]  ;;  %v1674_v18 = vld [vmem:[%s3595_s1 + $0x9a0] sm:$0xff] }
  0xa4   : > { %1030 = vmatpush1.msra.mxu1 %v1702_v19  ;;  %954 = vmatprep.subr.mxu0 %v1637_v20  ;;  %v1738_v19 = vld [vmem:[%s3595_s1 + $0xba0] sm:$0xff]  ;;  %v1673_v20 = vld [vmem:[%s3595_s1 + $0x998] sm:$0xff] }
  0xa5   : > { %1031 = vmatprep.subr.mxu1 %v1701_v21  ;;  %955 = vmatpush1.msra.mxu0 %v1636_v22  ;;  %v1737_v21 = vld [vmem:[%s3595_s1 + $0xb98] sm:$0xff]  ;;  %v1672_v22 = vld [vmem:[%s3595_s1 + $0x990] sm:$0xff] }
  0xa6   : > { %1032 = vmatpush1.msra.mxu1 %v1700_v23  ;;  %956 = vmatprep.subr.mxu0 %v1635_v24  ;;  %v1736_v23 = vld [vmem:[%s3595_s1 + $0xb90] sm:$0xff]  ;;  %v1671_v24 = vld [vmem:[%s3595_s1 + $0x988] sm:$0xff] }
  0xa7   : > { %1033 = vmatprep.subr.mxu1 %v1699_v25  ;;  %957 = vmatpush1.msra.mxu0 %v1634_v26  ;;  %v1735_v25 = vld [vmem:[%s3595_s1 + $0xb88] sm:$0xff]  ;;  %v1670_v26 = vld [vmem:[%s3595_s1 + $0x980] sm:$0xff] }
  0xa8   : > { %1034 = vmatpush1.msra.mxu1 %v1698_v27  ;;  %958 = vmatprep.subr.mxu0 %v1633_v28  ;;  %v1734_v27 = vld [vmem:[%s3595_s1 + $0xb80] sm:$0xff]  ;;  %v1669_v28 = vld [vmem:[%s3595_s1 + $0x978] sm:$0xff] }
  0xa9   : > { %1035 = vmatprep.subr.mxu1 %v1697_v29  ;;  %959 = vmatpush1.msra.mxu0 %v1632_v30  ;;  %v1733_v29 = vld [vmem:[%s3595_s1 + $0xb78] sm:$0xff]  ;;  %v1668_v30 = vld [vmem:[%s3595_s1 + $0x970] sm:$0xff] }
  0xaa   : > { %1036 = vmatpush1.msra.mxu1 %v1696_v31  ;;  %960 = vmatprep.subr.mxu0 %v1631_v34  ;;  %v1732_v31 = vld [vmem:[%s3595_s1 + $0xb70] sm:$0xff]  ;;  %v1667_v34 = vld [vmem:[%s3595_s1 + $0x968] sm:$0xff] }
  0xab   : > { %1037 = vmatprep.subr.mxu1 %v1695_v35  ;;  %961 = vmatpush1.msra.mxu0 %v1630_v38  ;;  %v1731_v35 = vld [vmem:[%s3595_s1 + $0xb68] sm:$0xff]  ;;  %v1666_v38 = vld [vmem:[%s3595_s1 + $0x960] sm:$0xff] }
  0xac   : > { %1038 = vmatpush1.msra.mxu1 %v1694_v39  ;;  %962 = vmatprep.subr.mxu0 %v1629_v40  ;;  %v1730_v39 = vld [vmem:[%s3595_s1 + $0xb60] sm:$0xff]  ;;  %v1665_v40 = vld [vmem:[%s3595_s1 + $0x958] sm:$0xff] }
  0xad   : > { %1039 = vmatprep.subr.mxu1 %v1693_v41  ;;  %963 = vmatpush1.msra.mxu0 %v1628_v42  ;;  %v1729_v41 = vld [vmem:[%s3595_s1 + $0xb58] sm:$0xff]  ;;  %v1664_v42 = vld [vmem:[%s3595_s1 + $0x950] sm:$0xff] }
  0xae   : > { %1040 = vmatpush1.msra.mxu1 %v1692_v43  ;;  %964 = vmatprep.subr.mxu0 %v1627_v44  ;;  %v1728_v43 = vld [vmem:[%s3595_s1 + $0xb50] sm:$0xff]  ;;  %v1663_v44 = vld [vmem:[%s3595_s1 + $0x948] sm:$0xff] }
  0xaf   : > { %1041 = vmatprep.subr.mxu1 %v1691_v45  ;;  %965 = vmatpush1.msra.mxu0 %v1626_v46  ;;  %v1727_v45 = vld [vmem:[%s3595_s1 + $0xb48] sm:$0xff]  ;;  %v1662_v46 = vld [vmem:[%s3595_s1 + $0x940] sm:$0xff] }
  0xb0   : > { %1042 = vmatpush1.msra.mxu1 %v1690_v47  ;;  %966 = vmatprep.subr.mxu0 %v1625_v48  ;;  %v1726_v47 = vld [vmem:[%s3595_s1 + $0xb40] sm:$0xff]  ;;  %v1661_v48 = vld [vmem:[%s3595_s1 + $0x938] sm:$0xff] }
  0xb1   : > { %1043 = vmatprep.subr.mxu1 %v1689_v49  ;;  %967 = vmatpush1.msra.mxu0 %v1624_v50  ;;  %v1725_v49 = vld [vmem:[%s3595_s1 + $0xb38] sm:$0xff]  ;;  %v1660_v50 = vld [vmem:[%s3595_s1 + $0x930] sm:$0xff] }
  0xb2   : > { %1044 = vmatpush1.msra.mxu1 %v1688_v51  ;;  %968 = vmatprep.subr.mxu0 %v1623_v54  ;;  %v1724_v51 = vld [vmem:[%s3595_s1 + $0xb30] sm:$0xff]  ;;  %v1659_v54 = vld [vmem:[%s3595_s1 + $0x928] sm:$0xff] }
  0xb3   : > { %1045 = vmatprep.subr.mxu1 %v1687_v56  ;;  %969 = vmatpush1.msra.mxu0 %v1622_v52  ;;  %v1723_v56 = vld [vmem:[%s3595_s1 + $0xb28] sm:$0xff]  ;;  %v1658_v52 = vld [vmem:[%s3595_s1 + $0x920] sm:$0xff] }
  0xb4   : > { %1046 = vmatpush1.msra.mxu1 %v1686_v58  ;;  %970 = vmatprep.subr.mxu0 %v1685_v60  ;;  %v1722_v58 = vld [vmem:[%s3595_s1 + $0xb20] sm:$0xff]  ;;  %v1657_v60 = vld [vmem:[%s3595_s1 + $0x918] sm:$0xff] }
  0xb5   : > { %1047 = vmatprep.subr.mxu1 %v1749_v53  ;;  %971 = vmatpush2.msra.mxu0 %v1684_v55  ;;  %v1721_v53 = vld [vmem:[%s3595_s1 + $0xb18] sm:$0xff]  ;;  %v1656_v55 = vld [vmem:[%s3595_s1 + $0x910] sm:$0xff] }
  0xb6   : > { %1048 = vmatpush2.msra.mxu1 %v1748_v57  ;;  %972 = vmatprep.subr.mxu0 %v1683_v59  ;;  %v1720_v57 = vld [vmem:[%s3595_s1 + $0xb10] sm:$0xff]  ;;  %v1655_v59 = vld [vmem:[%s3595_s1 + $0x908] sm:$0xff] }
  0xb7   : > { %1049 = vmatprep.subr.mxu1 %v1747_v61  ;;  %973 = vmatpush2.msra.mxu0 %v1682_v62  ;;  %v1719_v61 = vld [vmem:[%s3595_s1 + $0xb08] sm:$0xff]  ;;  %v1654_v62 = vld [vmem:[%s3595_s1 + $0x900] sm:$0xff] }
  0xb8   : > { %1050 = vmatpush2.msra.mxu1 %v1746_v63  ;;  %974 = vmatprep.subr.mxu0 %v1681_v0  ;;  %v1718_v63 = vld [vmem:[%s3595_s1 + $0xb00] sm:$0xff]  ;;  %v1781_v0 = vld [vmem:[%s3595_s1 + $0xcf8] sm:$0xff] }
  0xb9   : > { %1051 = vmatprep.subr.mxu1 %v1745_v1  ;;  %975 = vmatpush2.msra.mxu0 %v1680_v2  ;;  %v1845_v1 = vld [vmem:[%s3595_s1 + $0xef8] sm:$0xff]  ;;  %v1780_v2 = vld [vmem:[%s3595_s1 + $0xcf0] sm:$0xff] }
  0xba   : > { %1052 = vmatpush2.msra.mxu1 %v1744_v3  ;;  %976 = vmatprep.subr.mxu0 %v1679_v4  ;;  %v1779_v3 = vld [vmem:[%s3595_s1 + $0xce8] sm:$0xff] }
  0xbb   : > { %1053 = vmatprep.subr.mxu1 %v1743_v5  ;;  %977 = vmatpush2.msra.mxu0 %v1678_v7  ;;  %v3187_v4 = vld [vmem:[%s2272_s11 + $0x88] sm:$0xff]  ;;  %v3190_v5 = vld [vmem:[%s2272_s11 + $0x98] sm:$0xff]  ;;  %v3199_v7 = vld [vmem:[%s2272_s11 + $0x80] sm:$0xff] }
  0xbc   : > { %1054 = vmatpush2.msra.mxu1 %v1742_v9  ;;  %978 = vmatprep.subr.mxu0 %v1677_v10  ;;  %v3202_v9 = vld [vmem:[%s2272_s11 + $0x90] sm:$0xff]  ;;  %v1777_v10 = vld [vmem:[%s3595_s1 + $0xcd8] sm:$0xff] }
  0xbd   : > { %1055 = vmatprep.subr.mxu1 %v1741_v11  ;;  %979 = vmatpush2.msra.mxu0 %v1676_v13  ;;  %v1841_v11 = vld [vmem:[%s3595_s1 + $0xed8] sm:$0xff]  ;;  %v1776_v13 = vld [vmem:[%s3595_s1 + $0xcd0] sm:$0xff] }
  0xbe   : > { %1056 = vmatpush2.msra.mxu1 %v1740_v15  ;;  %980 = vmatprep.subr.mxu0 %v1675_v16  ;;  %v1840_v15 = vld [vmem:[%s3595_s1 + $0xed0] sm:$0xff]  ;;  %v1775_v16 = vld [vmem:[%s3595_s1 + $0xcc8] sm:$0xff] }
  0xbf   : > { %1057 = vmatprep.subr.mxu1 %v1739_v17  ;;  %981 = vmatpush2.msra.mxu0 %v1674_v18  ;;  %v1839_v17 = vld [vmem:[%s3595_s1 + $0xec8] sm:$0xff]  ;;  %v1774_v18 = vld [vmem:[%s3595_s1 + $0xcc0] sm:$0xff] }
  0xc0   : > { %1058 = vmatpush2.msra.mxu1 %v1738_v19  ;;  %982 = vmatprep.subr.mxu0 %v1673_v20  ;;  %v1838_v19 = vld [vmem:[%s3595_s1 + $0xec0] sm:$0xff]  ;;  %v1773_v20 = vld [vmem:[%s3595_s1 + $0xcb8] sm:$0xff] }
  0xc1   : > { %1059 = vmatprep.subr.mxu1 %v1737_v21  ;;  %983 = vmatpush2.msra.mxu0 %v1672_v22  ;;  %v1837_v21 = vld [vmem:[%s3595_s1 + $0xeb8] sm:$0xff]  ;;  %v1772_v22 = vld [vmem:[%s3595_s1 + $0xcb0] sm:$0xff] }
  0xc2   : > { %1060 = vmatpush2.msra.mxu1 %v1736_v23  ;;  %984 = vmatprep.subr.mxu0 %v1671_v24  ;;  %v1836_v23 = vld [vmem:[%s3595_s1 + $0xeb0] sm:$0xff]  ;;  %v1771_v24 = vld [vmem:[%s3595_s1 + $0xca8] sm:$0xff] }
  0xc3   : > { %1061 = vmatprep.subr.mxu1 %v1735_v25  ;;  %985 = vmatpush2.msra.mxu0 %v1670_v26  ;;  %v1835_v25 = vld [vmem:[%s3595_s1 + $0xea8] sm:$0xff]  ;;  %v1770_v26 = vld [vmem:[%s3595_s1 + $0xca0] sm:$0xff] }
  0xc4   : > { %1062 = vmatpush2.msra.mxu1 %v1734_v27  ;;  %986 = vmatprep.subr.mxu0 %v1669_v28  ;;  %v1834_v27 = vld [vmem:[%s3595_s1 + $0xea0] sm:$0xff]  ;;  %v1769_v28 = vld [vmem:[%s3595_s1 + $0xc98] sm:$0xff] }
  0xc5   : > { %1063 = vmatprep.subr.mxu1 %v1733_v29  ;;  %987 = vmatpush2.msra.mxu0 %v1668_v30  ;;  %v1833_v29 = vld [vmem:[%s3595_s1 + $0xe98] sm:$0xff]  ;;  %v1768_v30 = vld [vmem:[%s3595_s1 + $0xc90] sm:$0xff] }
  0xc6   : > { %1064 = vmatpush2.msra.mxu1 %v1732_v31  ;;  %988 = vmatprep.subr.mxu0 %v1667_v34  ;;  %v1832_v31 = vld [vmem:[%s3595_s1 + $0xe90] sm:$0xff]  ;;  %v1767_v34 = vld [vmem:[%s3595_s1 + $0xc88] sm:$0xff] }
  0xc7   : > { %1065 = vmatprep.subr.mxu1 %v1731_v35  ;;  %989 = vmatpush2.msra.mxu0 %v1666_v38  ;;  %v1831_v35 = vld [vmem:[%s3595_s1 + $0xe88] sm:$0xff]  ;;  %v1766_v38 = vld [vmem:[%s3595_s1 + $0xc80] sm:$0xff] }
  0xc8   : > { %1066 = vmatpush2.msra.mxu1 %v1730_v39  ;;  %990 = vmatprep.subr.mxu0 %v1665_v40  ;;  %v1830_v39 = vld [vmem:[%s3595_s1 + $0xe80] sm:$0xff]  ;;  %v1765_v40 = vld [vmem:[%s3595_s1 + $0xc78] sm:$0xff] }
  0xc9   : > { %1067 = vmatprep.subr.mxu1 %v1729_v41  ;;  %991 = vmatpush2.msra.mxu0 %v1664_v42  ;;  %v1829_v41 = vld [vmem:[%s3595_s1 + $0xe78] sm:$0xff]  ;;  %v1764_v42 = vld [vmem:[%s3595_s1 + $0xc70] sm:$0xff] }
  0xca   : > { %1068 = vmatpush2.msra.mxu1 %v1728_v43  ;;  %992 = vmatprep.subr.mxu0 %v1663_v44  ;;  %v1828_v43 = vld [vmem:[%s3595_s1 + $0xe70] sm:$0xff]  ;;  %v1763_v44 = vld [vmem:[%s3595_s1 + $0xc68] sm:$0xff] }
  0xcb   : > { %1069 = vmatprep.subr.mxu1 %v1727_v45  ;;  %993 = vmatpush2.msra.mxu0 %v1662_v46  ;;  %v1827_v45 = vld [vmem:[%s3595_s1 + $0xe68] sm:$0xff]  ;;  %v1762_v46 = vld [vmem:[%s3595_s1 + $0xc60] sm:$0xff] }
  0xcc   : > { %1070 = vmatpush2.msra.mxu1 %v1726_v47  ;;  %994 = vmatprep.subr.mxu0 %v1661_v48  ;;  %v1826_v47 = vld [vmem:[%s3595_s1 + $0xe60] sm:$0xff]  ;;  %v1761_v48 = vld [vmem:[%s3595_s1 + $0xc58] sm:$0xff] }
  0xcd   : > { %1071 = vmatprep.subr.mxu1 %v1725_v49  ;;  %995 = vmatpush2.msra.mxu0 %v1660_v50  ;;  %v1825_v49 = vld [vmem:[%s3595_s1 + $0xe58] sm:$0xff]  ;;  %v1760_v50 = vld [vmem:[%s3595_s1 + $0xc50] sm:$0xff] }
  0xce   : > { %1072 = vmatpush2.msra.mxu1 %v1724_v51  ;;  %996 = vmatprep.subr.mxu0 %v1659_v54  ;;  %v1824_v51 = vld [vmem:[%s3595_s1 + $0xe50] sm:$0xff]  ;;  %v1759_v54 = vld [vmem:[%s3595_s1 + $0xc48] sm:$0xff] }
  0xcf   : > { %1073 = vmatprep.subr.mxu1 %v1723_v56  ;;  %997 = vmatpush2.msra.mxu0 %v1658_v52  ;;  %v1823_v56 = vld [vmem:[%s3595_s1 + $0xe48] sm:$0xff]  ;;  %v1758_v52 = vld [vmem:[%s3595_s1 + $0xc40] sm:$0xff] }
  0xd0   : > { %1074 = vmatpush2.msra.mxu1 %v1722_v58  ;;  %998 = vmatprep.subr.mxu0 %v1657_v60  ;;  %v1822_v58 = vld [vmem:[%s3595_s1 + $0xe40] sm:$0xff]  ;;  %v1757_v60 = vld [vmem:[%s3595_s1 + $0xc38] sm:$0xff] }
  0xd1   : > { %1075 = vmatprep.subr.mxu1 %v1721_v53  ;;  %999 = vmatpush2.msra.mxu0 %v1656_v55  ;;  %v1821_v53 = vld [vmem:[%s3595_s1 + $0xe38] sm:$0xff]  ;;  %v1756_v55 = vld [vmem:[%s3595_s1 + $0xc30] sm:$0xff] }
  0xd2   : > { %1076 = vmatpush2.msra.mxu1 %v1720_v57  ;;  %1000 = vmatprep.subr.mxu0 %v1655_v59  ;;  %v1820_v57 = vld [vmem:[%s3595_s1 + $0xe30] sm:$0xff]  ;;  %v1755_v59 = vld [vmem:[%s3595_s1 + $0xc28] sm:$0xff] }
  0xd3   : > { %1077 = vmatprep.subr.mxu1 %v1719_v61  ;;  %1001 = vmatpush2.msra.mxu0 %v1654_v62  ;;  %v1819_v61 = vld [vmem:[%s3595_s1 + $0xe28] sm:$0xff]  ;;  %v1754_v62 = vld [vmem:[%s3595_s1 + $0xc20] sm:$0xff] }
  0xd4   : > { %1002 = vmatprep.mubr.f32.mxu0 %v2671_v6  ;;  %1078 = vmatpush2.msra.mxu1 %v1718_v63  ;;  %v1844_v6 = vld [vmem:[%s3595_s1 + $0xef0] sm:$0xff]  ;;  %v1818_v63 = vld [vmem:[%s3595_s1 + $0xe20] sm:$0xff] }
  0xd5   : > { %1079 = vmatprep.mubr.f32.mxu1 %v2675_v8  ;;  %1003 = vmatmul.mubr.f32.vlgmr.msra.gmra.mxu0 %v2685_v12  ;;  %v1843_v8 = vld [vmem:[%s3595_s1 + $0xee8] sm:$0xff]  ;;  %v1778_v12 = vld [vmem:[%s3595_s1 + $0xce0] sm:$0xff] }
  0xd6   : > { %1080 = vmatmul.mubr.f32.vlgmr.msra.gmra.mxu1 %v2689_v14  ;;  %1249 = vmatprep.subr.mxu0 %v1781_v0  ;;  %v1842_v14 = vld [vmem:[%s3595_s1 + $0xee0] sm:$0xff]  ;;  %v1753_v0 = vld [vmem:[%s3595_s1 + $0xc18] sm:$0xff] }
  0xd7   : > { %1326 = vmatprep.subr.mxu1 %v1845_v1  ;;  %1250 = vmatpush1.msra.mxu0 %v1780_v2  ;;  %v1817_v1 = vld [vmem:[%s3595_s1 + $0xe18] sm:$0xff]  ;;  %v1752_v2 = vld [vmem:[%s3595_s1 + $0xc10] sm:$0xff] }
  0xd8   : > { %1327 = vmatpush1.msra.mxu1 %v1844_v6  ;;  %1251 = vmatprep.subr.mxu0 %v1779_v3  ;;  %v1816_v6 = vld [vmem:[%s3595_s1 + $0xe10] sm:$0xff]  ;;  %v1751_v3 = vld [vmem:[%s3595_s1 + $0xc08] sm:$0xff] }
  0xd9   : > { %1328 = vmatprep.subr.mxu1 %v1843_v8  ;;  %1008 = vmatprep.mubr.f32.mxu0 %v3187_v4  ;;  %v1815_v8 = vld [vmem:[%s3595_s1 + $0xe08] sm:$0xff] }
  0xda   : > { %1085 = vmatprep.mubr.f32.mxu1 %v3190_v5  ;;  %1252 = vmatpush1.msra.mxu0 %v1778_v12  ;;  %v1750_v12 = vld [vmem:[%s3595_s1 + $0xc00] sm:$0xff] }
  0xdb   : > { %1329 = vmatpush1.msra.mxu1 %v1842_v14  ;;  %1009 = vmatmul.mubr.f32.gmra.mxu0 %v3199_v7  ;;  %v1814_v14 = vld [vmem:[%s3595_s1 + $0xe00] sm:$0xff] }
  0xdc   : > { %1086 = vmatmul.mubr.f32.gmra.mxu1 %v3202_v9  ;;  %1253 = vmatprep.subr.mxu0 %v1777_v10  ;;  %v1813_v10 = vld [vmem:[%s3595_s1 + $0xdf8] sm:$0xff] }
  0xdd   : > { %1330 = vmatprep.subr.mxu1 %v1841_v11  ;;  %1254 = vmatpush1.msra.mxu0 %v1776_v13  ;;  %v1877_v11 = vld [vmem:[%s3595_s1 + $0xff8] sm:$0xff]  ;;  %v1812_v13 = vld [vmem:[%s3595_s1 + $0xdf0] sm:$0xff] }
  0xde   : > { %1331 = vmatpush1.msra.mxu1 %v1840_v15  ;;  %1255 = vmatprep.subr.mxu0 %v1775_v16  ;;  %v1876_v15 = vld [vmem:[%s3595_s1 + $0xff0] sm:$0xff]  ;;  %v1811_v16 = vld [vmem:[%s3595_s1 + $0xde8] sm:$0xff] }
  0xdf   : > { %1332 = vmatprep.subr.mxu1 %v1839_v17  ;;  %1256 = vmatpush1.msra.mxu0 %v1774_v18  ;;  %v1875_v17 = vld [vmem:[%s3595_s1 + $0xfe8] sm:$0xff]  ;;  %v1810_v18 = vld [vmem:[%s3595_s1 + $0xde0] sm:$0xff] }
  0xe0   : > { %1333 = vmatpush1.msra.mxu1 %v1838_v19  ;;  %1257 = vmatprep.subr.mxu0 %v1773_v20  ;;  %v1874_v19 = vld [vmem:[%s3595_s1 + $0xfe0] sm:$0xff]  ;;  %v1809_v20 = vld [vmem:[%s3595_s1 + $0xdd8] sm:$0xff] }
  0xe1   : > { %1334 = vmatprep.subr.mxu1 %v1837_v21  ;;  %1258 = vmatpush1.msra.mxu0 %v1772_v22  ;;  %v1873_v21 = vld [vmem:[%s3595_s1 + $0xfd8] sm:$0xff]  ;;  %v1808_v22 = vld [vmem:[%s3595_s1 + $0xdd0] sm:$0xff] }
  0xe2   : > { %1335 = vmatpush1.msra.mxu1 %v1836_v23  ;;  %1259 = vmatprep.subr.mxu0 %v1771_v24  ;;  %v1872_v23 = vld [vmem:[%s3595_s1 + $0xfd0] sm:$0xff]  ;;  %v1807_v24 = vld [vmem:[%s3595_s1 + $0xdc8] sm:$0xff] }
  0xe3   : > { %1336 = vmatprep.subr.mxu1 %v1835_v25  ;;  %1260 = vmatpush1.msra.mxu0 %v1770_v26  ;;  %v1871_v25 = vld [vmem:[%s3595_s1 + $0xfc8] sm:$0xff]  ;;  %v1806_v26 = vld [vmem:[%s3595_s1 + $0xdc0] sm:$0xff] }
  0xe4   : > { %1337 = vmatpush1.msra.mxu1 %v1834_v27  ;;  %1261 = vmatprep.subr.mxu0 %v1769_v28  ;;  %v1870_v27 = vld [vmem:[%s3595_s1 + $0xfc0] sm:$0xff]  ;;  %v1805_v28 = vld [vmem:[%s3595_s1 + $0xdb8] sm:$0xff] }
  0xe5   : > { %1338 = vmatprep.subr.mxu1 %v1833_v29  ;;  %1262 = vmatpush1.msra.mxu0 %v1768_v30  ;;  %v1869_v29 = vld [vmem:[%s3595_s1 + $0xfb8] sm:$0xff]  ;;  %v1804_v30 = vld [vmem:[%s3595_s1 + $0xdb0] sm:$0xff] }
  0xe6   : > { %1339 = vmatpush1.msra.mxu1 %v1832_v31  ;;  %1263 = vmatprep.subr.mxu0 %v1767_v34  ;;  %v1868_v31 = vld [vmem:[%s3595_s1 + $0xfb0] sm:$0xff]  ;;  %v1803_v34 = vld [vmem:[%s3595_s1 + $0xda8] sm:$0xff] }
  0xe7   : > { %1340 = vmatprep.subr.mxu1 %v1831_v35  ;;  %1264 = vmatpush1.msra.mxu0 %v1766_v38  ;;  %v1867_v35 = vld [vmem:[%s3595_s1 + $0xfa8] sm:$0xff]  ;;  %v1802_v38 = vld [vmem:[%s3595_s1 + $0xda0] sm:$0xff] }
  0xe8   : > { %1341 = vmatpush1.msra.mxu1 %v1830_v39  ;;  %1265 = vmatprep.subr.mxu0 %v1765_v40  ;;  %v1866_v39 = vld [vmem:[%s3595_s1 + $0xfa0] sm:$0xff]  ;;  %v1801_v40 = vld [vmem:[%s3595_s1 + $0xd98] sm:$0xff] }
  0xe9   : > { %1342 = vmatprep.subr.mxu1 %v1829_v41  ;;  %1266 = vmatpush1.msra.mxu0 %v1764_v42  ;;  %v1865_v41 = vld [vmem:[%s3595_s1 + $0xf98] sm:$0xff]  ;;  %v1800_v42 = vld [vmem:[%s3595_s1 + $0xd90] sm:$0xff] }
  0xea   : > { %1343 = vmatpush1.msra.mxu1 %v1828_v43  ;;  %1267 = vmatprep.subr.mxu0 %v1763_v44  ;;  %v1864_v43 = vld [vmem:[%s3595_s1 + $0xf90] sm:$0xff]  ;;  %v1799_v44 = vld [vmem:[%s3595_s1 + $0xd88] sm:$0xff] }
  0xeb   : > { %1344 = vmatprep.subr.mxu1 %v1827_v45  ;;  %1268 = vmatpush1.msra.mxu0 %v1762_v46  ;;  %v1863_v45 = vld [vmem:[%s3595_s1 + $0xf88] sm:$0xff]  ;;  %v1798_v46 = vld [vmem:[%s3595_s1 + $0xd80] sm:$0xff] }
  0xec   : > { %1345 = vmatpush1.msra.mxu1 %v1826_v47  ;;  %1269 = vmatprep.subr.mxu0 %v1761_v48  ;;  %v1862_v47 = vld [vmem:[%s3595_s1 + $0xf80] sm:$0xff]  ;;  %v1797_v48 = vld [vmem:[%s3595_s1 + $0xd78] sm:$0xff] }
  0xed   : > { %1346 = vmatprep.subr.mxu1 %v1825_v49  ;;  %1270 = vmatpush1.msra.mxu0 %v1760_v50  ;;  %v1861_v49 = vld [vmem:[%s3595_s1 + $0xf78] sm:$0xff]  ;;  %v1796_v50 = vld [vmem:[%s3595_s1 + $0xd70] sm:$0xff] }
  0xee   : > { %1347 = vmatpush1.msra.mxu1 %v1824_v51  ;;  %1271 = vmatprep.subr.mxu0 %v1759_v54  ;;  %v1860_v51 = vld [vmem:[%s3595_s1 + $0xf70] sm:$0xff]  ;;  %v1795_v54 = vld [vmem:[%s3595_s1 + $0xd68] sm:$0xff] }
  0xef   : > { %1348 = vmatprep.subr.mxu1 %v1823_v56  ;;  %1272 = vmatpush1.msra.mxu0 %v1758_v52  ;;  %v1859_v56 = vld [vmem:[%s3595_s1 + $0xf68] sm:$0xff]  ;;  %v1794_v52 = vld [vmem:[%s3595_s1 + $0xd60] sm:$0xff] }
  0xf0   : > { %1349 = vmatpush1.msra.mxu1 %v1822_v58  ;;  %1273 = vmatprep.subr.mxu0 %v1757_v60  ;;  %v1858_v58 = vld [vmem:[%s3595_s1 + $0xf60] sm:$0xff]  ;;  %v1793_v60 = vld [vmem:[%s3595_s1 + $0xd58] sm:$0xff] }
  0xf1   : > { %1350 = vmatprep.subr.mxu1 %v1821_v53  ;;  %1274 = vmatpush1.msra.mxu0 %v1756_v55  ;;  %v1857_v53 = vld [vmem:[%s3595_s1 + $0xf58] sm:$0xff]  ;;  %v1792_v55 = vld [vmem:[%s3595_s1 + $0xd50] sm:$0xff] }
  0xf2   : > { %1351 = vmatpush1.msra.mxu1 %v1820_v57  ;;  %1275 = vmatprep.subr.mxu0 %v1755_v59  ;;  %v1856_v57 = vld [vmem:[%s3595_s1 + $0xf50] sm:$0xff]  ;;  %v1791_v59 = vld [vmem:[%s3595_s1 + $0xd48] sm:$0xff] }
  0xf3   : > { %1352 = vmatprep.subr.mxu1 %v1819_v61  ;;  %1276 = vmatpush1.msra.mxu0 %v1754_v62  ;;  %v1855_v61 = vld [vmem:[%s3595_s1 + $0xf48] sm:$0xff]  ;;  %v1790_v62 = vld [vmem:[%s3595_s1 + $0xd40] sm:$0xff] }
  0xf4   : > { %1353 = vmatpush1.msra.mxu1 %v1818_v63  ;;  %1277 = vmatprep.subr.mxu0 %v1753_v0  ;;  %v1854_v63 = vld [vmem:[%s3595_s1 + $0xf40] sm:$0xff]  ;;  %v1789_v0 = vld [vmem:[%s3595_s1 + $0xd38] sm:$0xff] }
  0xf5   : > { %1354 = vmatprep.subr.mxu1 %v1817_v1  ;;  %1278 = vmatpush1.msra.mxu0 %v1752_v2  ;;  %v1853_v1 = vld [vmem:[%s3595_s1 + $0xf38] sm:$0xff]  ;;  %v1788_v2 = vld [vmem:[%s3595_s1 + $0xd30] sm:$0xff] }
  0xf6   : > { %1355 = vmatpush1.msra.mxu1 %v1816_v6  ;;  %1279 = vmatprep.subr.mxu0 %v1751_v3  ;;  %v1852_v6 = vld [vmem:[%s3595_s1 + $0xf30] sm:$0xff]  ;;  %v1787_v3 = vld [vmem:[%s3595_s1 + $0xd28] sm:$0xff] }
  0xf7   : > { %1356 = vmatprep.subr.mxu1 %v1815_v8  ;;  %1280 = vmatpush1.msra.mxu0 %v1750_v12  ;;  %v1851_v8 = vld [vmem:[%s3595_s1 + $0xf28] sm:$0xff]  ;;  %v1786_v12 = vld [vmem:[%s3595_s1 + $0xd20] sm:$0xff] }
  0xf8   : > { %1357 = vmatpush1.msra.mxu1 %v1814_v14  ;;  %1281 = vmatprep.subr.mxu0 %v1813_v10  ;;  %v1850_v14 = vld [vmem:[%s3595_s1 + $0xf20] sm:$0xff]  ;;  %v192_v10 = vld [vmem:[%s2272_s11 + $0xa8] sm:$0x1] }
  0xf9   : > { %1358 = vmatprep.subr.mxu1 %v1877_v11  ;;  %1282 = vmatpush2.msra.mxu0 %v1812_v13  ;;  %v194_v11 = vld [vmem:[%s2272_s11 + $0xb8] sm:$0x1] }
  0xfa   : > { %1359 = vmatpush2.msra.mxu1 %v1876_v15  ;;  %1283 = vmatprep.subr.mxu0 %v1811_v16  ;;  %v1785_v13 = vld [vmem:[%s3595_s1 + $0xd18] sm:$0xff]  ;;  %v1784_v16 = vld [vmem:[%s3595_s1 + $0xd10] sm:$0xff] }
  0xfb   : > { %1360 = vmatprep.subr.mxu1 %v1875_v17  ;;  %1284 = vmatpush2.msra.mxu0 %v1810_v18  ;;  %v1849_v15 = vld [vmem:[%s3595_s1 + $0xf18] sm:$0xff]  ;;  %v1107_v17 = vrot.slane %v3187_v4, 1  ;;  %v1113_v18 = vrot.slane %v3190_v5, 1  ;;  %v1114_v4 = vrot.slane %v194_v11, 1  ;;  %v193_v5 = vld [vmem:[%s2272_s11 + $0xb0] sm:$0x1] }
  0xfc   : > { %1361 = vmatpush2.msra.mxu1 %v1874_v19  ;;  %1285 = vmatprep.subr.mxu0 %v1809_v20  ;;  %v1848_v19 = vld [vmem:[%s3595_s1 + $0xf10] sm:$0xff]  ;;  %v1783_v20 = vld [vmem:[%s3595_s1 + $0xd08] sm:$0xff] }
  0xfd   : > { %1362 = vmatprep.subr.mxu1 %v1873_v21  ;;  %1286 = vmatpush2.msra.mxu0 %v1808_v22  ;;  %v1847_v21 = vld [vmem:[%s3595_s1 + $0xf08] sm:$0xff]  ;;  %v1108_v22 = vrot.slane %v192_v10, 1 }
  0xfe   : > { %1363 = vmatpush2.msra.mxu1 %v1872_v23  ;;  %1287 = vmatprep.subr.mxu0 %v1807_v24  ;;  %v191_v23 = vld [vmem:[%s2272_s11 + $0xa0] sm:$0x1] }
  0xff   : > { %1364 = vmatprep.subr.mxu1 %v1871_v25  ;;  %1288 = vmatpush2.msra.mxu0 %v1806_v26  ;;  %v1782_v24 = vld [vmem:[%s3595_s1 + $0xd00] sm:$0xff]  ;;  %v1104_v26 = vrot.slane %v3199_v7, 1 }
 0x100   : > { %1365 = vmatpush2.msra.mxu1 %v1870_v27  ;;  %1289 = vmatprep.subr.mxu0 %v1805_v28  ;;  %v1846_v25 = vld [vmem:[%s3595_s1 + $0xf00] sm:$0xff]  ;;  %v1110_v27 = vrot.slane %v3202_v9, 1  ;;  %v1105_v28 = vrot.slane %v191_v23, 1 }
 0x101   : > { %1366 = vmatprep.subr.mxu1 %v1869_v29  ;;  %1290 = vmatpush2.msra.mxu0 %v1804_v30  ;;  %v1111_v29 = vrot.slane %v193_v5, 1  ;;  %v1109_v30 = vsel %vm339_vm0, %v1107_v17, %v1108_v22 }
 0x102   : > { %1367 = vmatpush2.msra.mxu1 %v1868_v31  ;;  %1291 = vmatprep.subr.mxu0 %v1803_v34  ;;  %v1115_v31 = vsel %vm339_vm0, %v1113_v18, %v1114_v4  ;;  %v1106_v7 = vsel %vm339_vm0, %v1104_v26, %v1105_v28 }
 0x103   : > { %1368 = vmatprep.subr.mxu1 %v1867_v35  ;;  %1292 = vmatpush2.msra.mxu0 %v1802_v38  ;;  %v1112_v9 = vsel %vm339_vm0, %v1110_v27, %v1111_v29 }
 0x104   : > { %1369 = vmatpush2.msra.mxu1 %v1866_v39  ;;  %1293 = vmatprep.subr.mxu0 %v1801_v40 }
 0x105   : > { %1370 = vmatprep.subr.mxu1 %v1865_v41  ;;  %1294 = vmatpush2.msra.mxu0 %v1800_v42 }
 0x106   : > { %1371 = vmatpush2.msra.mxu1 %v1864_v43  ;;  %1295 = vmatprep.subr.mxu0 %v1799_v44 }
 0x107   : > { %1372 = vmatprep.subr.mxu1 %v1863_v45  ;;  %1296 = vmatpush2.msra.mxu0 %v1798_v46 }
 0x108   : > { %1373 = vmatpush2.msra.mxu1 %v1862_v47  ;;  %1297 = vmatprep.subr.mxu0 %v1797_v48 }
 0x109   : > { %1374 = vmatprep.subr.mxu1 %v1861_v49  ;;  %1298 = vmatpush2.msra.mxu0 %v1796_v50  ;;  %v1409_v50 = vlaneseq }
 0x10a   : > { %1375 = vmatpush2.msra.mxu1 %v1860_v51  ;;  %1299 = vmatprep.subr.mxu0 %v1795_v54 }
 0x10b   : > { %1376 = vmatprep.subr.mxu1 %v1859_v56  ;;  %1300 = vmatpush2.msra.mxu0 %v1794_v52  ;;  %v1410_v52 = vshrl.u32 %v1409_v50, 7 }
 0x10c   : > { %1377 = vmatpush2.msra.mxu1 %v1858_v58  ;;  %1301 = vmatprep.subr.mxu0 %v1793_v60 }
 0x10d   : > { %1378 = vmatprep.subr.mxu1 %v1857_v53  ;;  %1302 = vmatpush2.msra.mxu0 %v1792_v55 }
 0x10e   : > { %1379 = vmatpush2.msra.mxu1 %v1856_v57  ;;  %1303 = vmatprep.subr.mxu0 %v1791_v59  ;;  %v644_v34 = vpop.f32.mrf.mxu1 }
 0x10f   : > { %1380 = vmatprep.subr.mxu1 %v1855_v61  ;;  %1304 = vmatpush2.msra.mxu0 %v1790_v62  ;;  %v1411_v62 = vsub.s32 0, %v1410_v52 }
 0x110   : > { %1381 = vmatpush2.msra.mxu1 %v1854_v63  ;;  %1305 = vmatprep.subr.mxu0 %v1789_v0  ;;  %v646_v38 = vpop.f32.mrf.mxu1 }
 0x111   : > { %1382 = vmatprep.subr.mxu1 %v1853_v1  ;;  %1306 = vmatpush2.msra.mxu0 %v1788_v2 }
 0x112   : > { %1383 = vmatpush2.msra.mxu1 %v1852_v6  ;;  %1307 = vmatprep.subr.mxu0 %v1787_v3  ;;  %v1407_v6 = vld [vmem:[%s3596_s2] sm:$0x3] }
 0x113   : > { %1384 = vmatprep.subr.mxu1 %v1851_v8  ;;  %1308 = vmatpush2.msra.mxu0 %v1786_v12  ;;  %v1415_v12 = vsub.s32 1, %v1410_v52  ;;  %v1412_v18 = vrot.slane %v1407_v6, %v1411_v62 }
 0x114   : > { %1385 = vmatpush2.msra.mxu1 %v1850_v14  ;;  %1309 = vmatprep.subr.mxu0 %v1785_v13 }
 0x115   : > { %1386 = vmatprep.subr.mxu1 %v1849_v15  ;;  %1310 = vmatpush2.msra.mxu0 %v1784_v16 }
 0x116   : > { %1387 = vmatpush2.msra.mxu1 %v1848_v19  ;;  %1311 = vmatprep.subr.mxu0 %v1783_v20 }
 0x117   : > { %1388 = vmatprep.subr.mxu1 %v1847_v21  ;;  %1312 = vmatpush2.msra.mxu0 %v1782_v24  ;;  %v1416_v24 = vrot.slane %v1407_v6, %v1415_v12 }
 0x118   : > { %1313 = vmatprep.mubr.f32.mxu0 %v2721_v32  ;;  %1389 = vmatpush2.msra.mxu1 %v1846_v25  ;;  %v567_v32 = vpop.f32.mrf.mxu0 }
 0x119   : > { %1390 = vmatprep.mubr.f32.mxu1 %v2724_v33  ;;  %1314 = vmatmul.mubr.f32.vlgmr.msra.gmra.mxu0 %v2733_v36  ;;  %v645_v56 = vadd.f32 %v644_v34, %v567_v32 }
 0x11a   : > { %1391 = vmatmul.mubr.f32.vlgmr.msra.gmra.mxu1 %v2736_v37  ;;  %1319 = vmatprep.mubr.f32.mxu0 %v1109_v30  ;;  %v569_v35 = vpop.f32.mrf.mxu0 }
 0x11b   : > { %1396 = vmatprep.mubr.f32.mxu1 %v1115_v31  ;;  %v647_v58 = vadd.f32 %v646_v38, %v569_v35 }
 0x11d   : > { %1320 = vmatmul.mubr.f32.gmra.mxu0 %v1106_v7 }
 0x11e   : > { %1397 = vmatmul.mubr.f32.gmra.mxu1 %v1112_v9 }
 0x14a   : > { %v573_v39 = vpop.f32.mrf.mxu0 }
 0x14b   : > { %v650_v40 = vpop.f32.mrf.mxu1 }
 0x14c   : > { %v575_v41 = vpop.f32.mrf.mxu0  ;;  %v651_v57 = vadd.f32 %v650_v40, %v573_v39 }
 0x14d   : > { %v652_v33 = vpop.f32.mrf.mxu1 }
 0x14e   : > { %v653_v63 = vadd.f32 %v652_v33, %v575_v41 }
 0x151   : > { %v721_v42 = vpop.f32.mrf.mxu0 }
 0x152   : > { %v798_v36 = vpop.f32.mrf.mxu1  ;;  %v722_v55 = vadd.f32 %v721_v42, %v645_v56 }
 0x153   : > { %v723_v43 = vpop.f32.mrf.mxu0 }
 0x154   : > { %v800_v37 = vpop.f32.mrf.mxu1  ;;  %v724_v59 = vadd.f32 %v723_v43, %v647_v58  ;;  %v799_v3 = vadd.f32 %v798_v36, %v722_v55 }
 0x156   : > { %v801_v14 = vadd.f32 %v800_v37, %v724_v59 }
 0x157   : > { %v727_v44 = vpop.f32.mrf.mxu0 }
 0x158   : > { %v728_v0 = vadd.f32 %v727_v44, %v651_v57 }
 0x159   : > { %v729_v46 = vpop.f32.mrf.mxu0 }
 0x15a   : > { %v804_v45 = vpop.f32.mrf.mxu1  ;;  %v730_v10 = vadd.f32 %v729_v46, %v653_v63 }
 0x15b   : > { %v805_v19 = vadd.f32 %v804_v45, %v728_v0 }
 0x15c   : > { %v806_v47 = vpop.f32.mrf.mxu1 }
 0x15d   : > { %v807_v25 = vadd.f32 %v806_v47, %v730_v10 }
 0x195   : > { %v1004_v48 = vpop.f32.mrf.mxu0 }
 0x196   : > { %v1081_v49 = vpop.f32.mrf.mxu1 }
 0x197   : > { %v1006_v51 = vpop.f32.mrf.mxu0  ;;  %v1082_v61 = vadd.f32 %v1081_v49, %v1004_v48 }
 0x198   : > { %v1083_v54 = vpop.f32.mrf.mxu1 }
 0x199   : > { %v1084_v8 = vadd.f32 %v1083_v54, %v1006_v51  ;;  %v1092_v15 = vadd.f32 %v1082_v61, %v799_v3 }
 0x19b   : > { %v1010_v60 = vpop.f32.mrf.mxu0  ;;  %v1093_v4 = vadd.f32 %v1084_v8, %v801_v14 }
 0x19c   : > { %v1087_v53 = vpop.f32.mrf.mxu1 }
 0x19d   : > { %v1012_v1 = vpop.f32.mrf.mxu0  ;;  %v1088_v16 = vadd.f32 %v1087_v53, %v1010_v60 }
 0x19e   : > { %v1089_v2 = vpop.f32.mrf.mxu1 }
 0x19f   : > { %v1090_v20 = vadd.f32 %v1089_v2, %v1012_v1  ;;  %v1094_v28 = vadd.f32 %v1088_v16, %v805_v19 }
 0x1a1   : > { %v1095_v7 = vadd.f32 %v1090_v20, %v807_v25 }
 0x1d9   : > { %v1315_v11 = vpop.f32.mrf.mxu0 }
 0x1da   : > { %v1392_v13 = vpop.f32.mrf.mxu1 }
 0x1db   : > { %v1393_v17 = vadd.f32 %v1392_v13, %v1315_v11  ;;  %v1317_v21 = vpop.f32.mrf.mxu0 }
 0x1dc   : > { %v1394_v22 = vpop.f32.mrf.mxu1 }
 0x1dd   : > { %v1403_v23 = vadd.f32 %v1393_v17, %v1092_v15  ;;  %v1395_v5 = vadd.f32 %v1394_v22, %v1317_v21  ;;  %v1321_v26 = vpop.f32.mrf.mxu0 }
 0x1de   : > { %v1398_v27 = vpop.f32.mrf.mxu1 }
 0x1df   : > { %v1419_v29 = vadd.f32 %v1412_v18, %v1403_v23  ;;  %v1404_v30 = vadd.f32 %v1395_v5, %v1093_v4  ;;  %v1399_v31 = vadd.f32 %v1398_v27, %v1321_v26  ;;  %v1323_v9 = vpop.f32.mrf.mxu0 }
 0x1e0   : > { %v1400_v32 = vpop.f32.mrf.mxu1 }
 0x1e1   : > { %v1423_v34 = vmax.f32 %v1419_v29, 0.0  ;;  %v1420_v35 = vadd.f32 %v1416_v24, %v1404_v30  ;;  %v1405_v38 = vadd.f32 %v1399_v31, %v1094_v28  ;;  %v1401_v39 = vadd.f32 %v1400_v32, %v1323_v9 }
 0x1e3   : > { %1427 = vst [vmem:[%s170_s30] sm:$0xff] %v1423_v34  ;;  %v1424_v40 = vmax.f32 %v1420_v35, 0.0  ;;  %v1421_v41 = vadd.f32 %v1412_v18, %v1405_v38  ;;  %v1406_v33 = vadd.f32 %v1401_v39, %v1095_v7 }
 0x1e5   : > { %1428 = vst [vmem:[%s170_s30 + $0x8] sm:$0xff] %v1424_v40  ;;  %v1425_v42 = vmax.f32 %v1421_v41, 0.0  ;;  %v1422_v36 = vadd.f32 %v1416_v24, %v1406_v33 }
 0x1e7   : > { %1429 = vst [vmem:[%s170_s30 + $0x10] sm:$0xff] %v1425_v42  ;;  %v1426_v43 = vmax.f32 %v1422_v36, 0.0 }
 0x1e9   : > { %1430 = vst [vmem:[%s170_s30 + $0x18] sm:$0xff] %v1426_v43 }
 0x1ea PF: > { %s13_s12 = sadd.s32 1, %s1896_s12  }
 0x1eb   : > { %p10_p4 = scmp.ge.s32.totalorder %s13_s12, 4  }
 0x1ed   :  { %12 = sbr.rel (!%p10_p4) target bundleno = 1 (0x1), region = 65 }

// kernel: feature_extractor_forward.9
= control target key start
LH: loop header
LB: loop body
LE: loop exit
PB: predicated region body
PF: predicated region fallthrough
CT: control target
= control target key end

     0   :  { %8 = vsyncpa [#allocation5], 0  ;;  %s4635_s0 = inlined_call_operand.vmem [shape: bf16[2,1024], index: 0, kind: input, shape index: {}]   ;;  %s4636_s1 = inlined_call_operand.vmem [shape: bf16[1024,2048], index: 1, kind: input, shape index: {}]   ;;  %s4637_s2 = inlined_call_operand.vmem [shape: f32[1,2048], index: 2, kind: input, shape index: {}]   ;;  %s4638_s3 = inlined_call_operand.hbm [shape: f32[2,2048], index: 3, kind: output, shape index: {}]  }
   0x1   :  { %10 = vsyncpa [#allocation5 + $0x1], 0  ;;  %s3682_s12 = smov 0   ;;  %s3684_s13 = smov 0  }
   0x2   :  { %s3686_s14 = smov 0   ;;  %s3688_s15 = smov 0  }
   0x3   :  { %s3690_s16 = smov 0   ;;  %s3692_s17 = smov 0  }
   0x4 LB: > { %s2864_s18 = sadd.s32 4294967295, %s3657_s17   ;;  %s2865_s19 = sadd.s32 4294967294, %s3657_s17   ;;  %s3657_s17 = sphi %s3692_s17, %s16_s17   ;;  %s3653_s16 = sphi %s3690_s16, %s4645_s16   ;;  %s3649_s15 = sphi %s3688_s15, %s4644_s15   ;;  %s3645_s14 = sphi %s3686_s14, %s4643_s14   ;;  %s3641_s13 = sphi %s3684_s13, %s4642_s13   ;;  %s3637_s12 = sphi %s3682_s12, %s4641_s12  }
   0x5   : > { %s28_s20 = sadd.s32 1, %s3653_s16  ;;  %s63_s21 = sadd.s32 1, %s3645_s14 }
   0x6   : > { %p30_p0 = scmp.ge.s32.totalorder %s28_s20, 4  ;;  %p70_p1 = scmp.ne.s32.totalorder %s3645_s14, %s3641_s13 }
   0x7   : > { %p71_p2 = scmp.eq.s32.totalorder %s3657_s17, 0  ;;  %p126_p3 = scmp.eq.s32.totalorder %s2864_s18, 3 }
   0x8   : > { %s4647_s20 = smov (%p30_p0, %s28_s20), 0  ;;  %p131_p6 = scmp.ne.s32.totalorder %s3641_s13, %s3637_s12 }
   0x9   : > { %p72_p4 = por %p71_p2, %p70_p1  ;;  %p3721_p5 = por %p126_p3, %p70_p1 }
   0xa   : > { %s59_s23 = ssub.s32 %s3653_s16, %s4647_s20  ;;  %p132_p8 = scmp.eq.s32.totalorder %s2865_s19, 3 }
   0xb   : > { %p61_p7 = scmp.eq.s32.totalorder %s59_s23, 0  ;;  %p2868_p10 = scmp.ge.s32.totalorder %s3657_s17, 4 }
   0xc   : > { %p3732_p9 = por %p132_p8, %p131_p6 }
   0xd   : > { %s3730_s24 = scalar_select %p61_p7, %s3645_s14, %s63_s21  }
   0xe   : > { %156 = sbr.rel (%p2868_p10) target bundleno = 151 (0x97), region = 20 }
  0x13   : > { %159 = sbr.rel (!%p72_p4) target bundleno = 151 (0x97), region = 24  ;;  %s161_s26 = sand.u32 (%p72_p4), 1, %s3645_s14  }
  0x14   : > { %s3137_s27 = sshll.u32 (%p72_p4), %s3653_s16, 4  ;;  %s2869_s28 = sshll.u32 (%p72_p4), %s161_s26, 11 }
  0x15   : > { %s3742_s4 = scalar_lea.vmem (%p72_p4), %s4636_s1, %s3137_s27  ;;  %s3747_s5 = scalar_lea.vmem (%p72_p4), [#allocation3], %s2869_s28 }
  0x16   : > { %v182_v0 = vld [vmem:[%s3742_s4] sm:$0xff] (%p72_p4)  ;;  %v184_v1 = vld [vmem:[%s3742_s4 + $0x8] sm:$0xff] (%p72_p4) }
  0x17   : > { %v186_v2 = vld [vmem:[%s3742_s4 + $0x40] sm:$0xff] (%p72_p4)  ;;  %183 = vst [vmem:[%s3747_s5] sm:$0xff] (%p72_p4), %v182_v0  ;;  %185 = vst [vmem:[%s3747_s5 + $0x8] sm:$0xff] (%p72_p4), %v184_v1  ;;  %v188_v3 = vld [vmem:[%s3742_s4 + $0x48] sm:$0xff] (%p72_p4) }
  0x18   : > { %187 = vst [vmem:[%s3747_s5 + $0x10] sm:$0xff] %v186_v2  ;;  %v190_v4 = vld [vmem:[%s3742_s4 + $0x80] sm:$0xff]  ;;  %v192_v5 = vld [vmem:[%s3742_s4 + $0x88] sm:$0xff]  ;;  %189 = vst [vmem:[%s3747_s5 + $0x18] sm:$0xff] %v188_v3 }
  0x19   : > { %191 = vst [vmem:[%s3747_s5 + $0x20] sm:$0xff] %v190_v4  ;;  %193 = vst [vmem:[%s3747_s5 + $0x28] sm:$0xff] %v192_v5  ;;  %v194_v6 = vld [vmem:[%s3742_s4 + $0xc0] sm:$0xff]  ;;  %v196_v7 = vld [vmem:[%s3742_s4 + $0xc8] sm:$0xff] }
  0x1a   : > { %v198_v8 = vld [vmem:[%s3742_s4 + $0x100] sm:$0xff]  ;;  %195 = vst [vmem:[%s3747_s5 + $0x30] sm:$0xff] %v194_v6  ;;  %197 = vst [vmem:[%s3747_s5 + $0x38] sm:$0xff] %v196_v7  ;;  %v200_v9 = vld [vmem:[%s3742_s4 + $0x108] sm:$0xff] }
  0x1b   : > { %199 = vst [vmem:[%s3747_s5 + $0x40] sm:$0xff] %v198_v8  ;;  %v202_v10 = vld [vmem:[%s3742_s4 + $0x140] sm:$0xff]  ;;  %v204_v11 = vld [vmem:[%s3742_s4 + $0x148] sm:$0xff]  ;;  %201 = vst [vmem:[%s3747_s5 + $0x48] sm:$0xff] %v200_v9 }
  0x1c   : > { %203 = vst [vmem:[%s3747_s5 + $0x50] sm:$0xff] %v202_v10  ;;  %205 = vst [vmem:[%s3747_s5 + $0x58] sm:$0xff] %v204_v11  ;;  %v206_v12 = vld [vmem:[%s3742_s4 + $0x180] sm:$0xff]  ;;  %v208_v13 = vld [vmem:[%s3742_s4 + $0x188] sm:$0xff] }
  0x1d   : > { %v210_v14 = vld [vmem:[%s3742_s4 + $0x1c0] sm:$0xff]  ;;  %207 = vst [vmem:[%s3747_s5 + $0x60] sm:$0xff] %v206_v12  ;;  %209 = vst [vmem:[%s3747_s5 + $0x68] sm:$0xff] %v208_v13  ;;  %v212_v15 = vld [vmem:[%s3742_s4 + $0x1c8] sm:$0xff] }
  0x1e   : > { %211 = vst [vmem:[%s3747_s5 + $0x70] sm:$0xff] %v210_v14  ;;  %v214_v16 = vld [vmem:[%s3742_s4 + $0x200] sm:$0xff]  ;;  %v216_v17 = vld [vmem:[%s3742_s4 + $0x208] sm:$0xff]  ;;  %213 = vst [vmem:[%s3747_s5 + $0x78] sm:$0xff] %v212_v15 }
  0x1f   : > { %215 = vst [vmem:[%s3747_s5 + $0x80] sm:$0xff] %v214_v16  ;;  %217 = vst [vmem:[%s3747_s5 + $0x88] sm:$0xff] %v216_v17  ;;  %v218_v18 = vld [vmem:[%s3742_s4 + $0x240] sm:$0xff]  ;;  %v220_v19 = vld [vmem:[%s3742_s4 + $0x248] sm:$0xff] }
  0x20   : > { %v222_v20 = vld [vmem:[%s3742_s4 + $0x280] sm:$0xff]  ;;  %219 = vst [vmem:[%s3747_s5 + $0x90] sm:$0xff] %v218_v18  ;;  %221 = vst [vmem:[%s3747_s5 + $0x98] sm:$0xff] %v220_v19  ;;  %v224_v21 = vld [vmem:[%s3742_s4 + $0x288] sm:$0xff] }
  0x21   : > { %223 = vst [vmem:[%s3747_s5 + $0xa0] sm:$0xff] %v222_v20  ;;  %v226_v22 = vld [vmem:[%s3742_s4 + $0x2c0] sm:$0xff]  ;;  %v228_v23 = vld [vmem:[%s3742_s4 + $0x2c8] sm:$0xff]  ;;  %225 = vst [vmem:[%s3747_s5 + $0xa8] sm:$0xff] %v224_v21 }
  0x22   : > { %227 = vst [vmem:[%s3747_s5 + $0xb0] sm:$0xff] %v226_v22  ;;  %229 = vst [vmem:[%s3747_s5 + $0xb8] sm:$0xff] %v228_v23  ;;  %v230_v24 = vld [vmem:[%s3742_s4 + $0x300] sm:$0xff]  ;;  %v232_v25 = vld [vmem:[%s3742_s4 + $0x308] sm:$0xff] }
  0x23   : > { %v234_v26 = vld [vmem:[%s3742_s4 + $0x340] sm:$0xff]  ;;  %231 = vst [vmem:[%s3747_s5 + $0xc0] sm:$0xff] %v230_v24  ;;  %233 = vst [vmem:[%s3747_s5 + $0xc8] sm:$0xff] %v232_v25  ;;  %v236_v27 = vld [vmem:[%s3742_s4 + $0x348] sm:$0xff] }
  0x24   : > { %235 = vst [vmem:[%s3747_s5 + $0xd0] sm:$0xff] %v234_v26  ;;  %v238_v28 = vld [vmem:[%s3742_s4 + $0x380] sm:$0xff]  ;;  %v240_v29 = vld [vmem:[%s3742_s4 + $0x388] sm:$0xff]  ;;  %237 = vst [vmem:[%s3747_s5 + $0xd8] sm:$0xff] %v236_v27 }
  0x25   : > { %239 = vst [vmem:[%s3747_s5 + $0xe0] sm:$0xff] %v238_v28  ;;  %241 = vst [vmem:[%s3747_s5 + $0xe8] sm:$0xff] %v240_v29  ;;  %v242_v30 = vld [vmem:[%s3742_s4 + $0x3c0] sm:$0xff]  ;;  %v244_v31 = vld [vmem:[%s3742_s4 + $0x3c8] sm:$0xff] }
  0x26   : > { %v246_v32 = vld [vmem:[%s3742_s4 + $0x400] sm:$0xff]  ;;  %243 = vst [vmem:[%s3747_s5 + $0xf0] sm:$0xff] %v242_v30  ;;  %245 = vst [vmem:[%s3747_s5 + $0xf8] sm:$0xff] %v244_v31  ;;  %v248_v33 = vld [vmem:[%s3742_s4 + $0x408] sm:$0xff] }
  0x27   : > { %247 = vst [vmem:[%s3747_s5 + $0x100] sm:$0xff] %v246_v32  ;;  %v250_v34 = vld [vmem:[%s3742_s4 + $0x440] sm:$0xff]  ;;  %v252_v35 = vld [vmem:[%s3742_s4 + $0x448] sm:$0xff]  ;;  %249 = vst [vmem:[%s3747_s5 + $0x108] sm:$0xff] %v248_v33 }
  0x28   : > { %251 = vst [vmem:[%s3747_s5 + $0x110] sm:$0xff] %v250_v34  ;;  %253 = vst [vmem:[%s3747_s5 + $0x118] sm:$0xff] %v252_v35  ;;  %v254_v36 = vld [vmem:[%s3742_s4 + $0x480] sm:$0xff]  ;;  %v256_v37 = vld [vmem:[%s3742_s4 + $0x488] sm:$0xff] }
  0x29   : > { %v258_v38 = vld [vmem:[%s3742_s4 + $0x4c0] sm:$0xff]  ;;  %255 = vst [vmem:[%s3747_s5 + $0x120] sm:$0xff] %v254_v36  ;;  %257 = vst [vmem:[%s3747_s5 + $0x128] sm:$0xff] %v256_v37  ;;  %v260_v39 = vld [vmem:[%s3742_s4 + $0x4c8] sm:$0xff] }
  0x2a   : > { %259 = vst [vmem:[%s3747_s5 + $0x130] sm:$0xff] %v258_v38  ;;  %v262_v40 = vld [vmem:[%s3742_s4 + $0x500] sm:$0xff]  ;;  %v264_v41 = vld [vmem:[%s3742_s4 + $0x508] sm:$0xff]  ;;  %261 = vst [vmem:[%s3747_s5 + $0x138] sm:$0xff] %v260_v39 }
  0x2b   : > { %263 = vst [vmem:[%s3747_s5 + $0x140] sm:$0xff] %v262_v40  ;;  %265 = vst [vmem:[%s3747_s5 + $0x148] sm:$0xff] %v264_v41  ;;  %v266_v42 = vld [vmem:[%s3742_s4 + $0x540] sm:$0xff]  ;;  %v268_v43 = vld [vmem:[%s3742_s4 + $0x548] sm:$0xff] }
  0x2c   : > { %v270_v44 = vld [vmem:[%s3742_s4 + $0x580] sm:$0xff]  ;;  %267 = vst [vmem:[%s3747_s5 + $0x150] sm:$0xff] %v266_v42  ;;  %269 = vst [vmem:[%s3747_s5 + $0x158] sm:$0xff] %v268_v43  ;;  %v272_v45 = vld [vmem:[%s3742_s4 + $0x588] sm:$0xff] }
  0x2d   : > { %271 = vst [vmem:[%s3747_s5 + $0x160] sm:$0xff] %v270_v44  ;;  %v274_v46 = vld [vmem:[%s3742_s4 + $0x5c0] sm:$0xff]  ;;  %v276_v47 = vld [vmem:[%s3742_s4 + $0x5c8] sm:$0xff]  ;;  %273 = vst [vmem:[%s3747_s5 + $0x168] sm:$0xff] %v272_v45 }
  0x2e   : > { %275 = vst [vmem:[%s3747_s5 + $0x170] sm:$0xff] %v274_v46  ;;  %277 = vst [vmem:[%s3747_s5 + $0x178] sm:$0xff] %v276_v47  ;;  %v278_v48 = vld [vmem:[%s3742_s4 + $0x600] sm:$0xff]  ;;  %v280_v49 = vld [vmem:[%s3742_s4 + $0x608] sm:$0xff] }
  0x2f   : > { %v282_v50 = vld [vmem:[%s3742_s4 + $0x640] sm:$0xff]  ;;  %279 = vst [vmem:[%s3747_s5 + $0x180] sm:$0xff] %v278_v48  ;;  %281 = vst [vmem:[%s3747_s5 + $0x188] sm:$0xff] %v280_v49  ;;  %v284_v51 = vld [vmem:[%s3742_s4 + $0x648] sm:$0xff] }
  0x30   : > { %283 = vst [vmem:[%s3747_s5 + $0x190] sm:$0xff] %v282_v50  ;;  %v286_v52 = vld [vmem:[%s3742_s4 + $0x680] sm:$0xff]  ;;  %v288_v53 = vld [vmem:[%s3742_s4 + $0x688] sm:$0xff]  ;;  %285 = vst [vmem:[%s3747_s5 + $0x198] sm:$0xff] %v284_v51 }
  0x31   : > { %287 = vst [vmem:[%s3747_s5 + $0x1a0] sm:$0xff] %v286_v52  ;;  %289 = vst [vmem:[%s3747_s5 + $0x1a8] sm:$0xff] %v288_v53  ;;  %v290_v54 = vld [vmem:[%s3742_s4 + $0x6c0] sm:$0xff]  ;;  %v292_v55 = vld [vmem:[%s3742_s4 + $0x6c8] sm:$0xff] }
  0x32   : > { %v294_v56 = vld [vmem:[%s3742_s4 + $0x700] sm:$0xff]  ;;  %291 = vst [vmem:[%s3747_s5 + $0x1b0] sm:$0xff] %v290_v54  ;;  %293 = vst [vmem:[%s3747_s5 + $0x1b8] sm:$0xff] %v292_v55  ;;  %v296_v57 = vld [vmem:[%s3742_s4 + $0x708] sm:$0xff] }
  0x33   : > { %295 = vst [vmem:[%s3747_s5 + $0x1c0] sm:$0xff] %v294_v56  ;;  %v298_v58 = vld [vmem:[%s3742_s4 + $0x740] sm:$0xff]  ;;  %v300_v59 = vld [vmem:[%s3742_s4 + $0x748] sm:$0xff]  ;;  %297 = vst [vmem:[%s3747_s5 + $0x1c8] sm:$0xff] %v296_v57 }
  0x34   : > { %299 = vst [vmem:[%s3747_s5 + $0x1d0] sm:$0xff] %v298_v58  ;;  %301 = vst [vmem:[%s3747_s5 + $0x1d8] sm:$0xff] %v300_v59  ;;  %v302_v60 = vld [vmem:[%s3742_s4 + $0x780] sm:$0xff]  ;;  %v304_v61 = vld [vmem:[%s3742_s4 + $0x788] sm:$0xff] }
  0x35   : > { %v306_v62 = vld [vmem:[%s3742_s4 + $0x7c0] sm:$0xff]  ;;  %303 = vst [vmem:[%s3747_s5 + $0x1e0] sm:$0xff] %v302_v60  ;;  %305 = vst [vmem:[%s3747_s5 + $0x1e8] sm:$0xff] %v304_v61  ;;  %v308_v63 = vld [vmem:[%s3742_s4 + $0x7c8] sm:$0xff] }
  0x36   : > { %307 = vst [vmem:[%s3747_s5 + $0x1f0] sm:$0xff] %v306_v62  ;;  %v310_v0 = vld [vmem:[%s3742_s4 + $0x800] sm:$0xff]  ;;  %v312_v1 = vld [vmem:[%s3742_s4 + $0x808] sm:$0xff]  ;;  %309 = vst [vmem:[%s3747_s5 + $0x1f8] sm:$0xff] %v308_v63 }
  0x37   : > { %311 = vst [vmem:[%s3747_s5 + $0x200] sm:$0xff] %v310_v0  ;;  %313 = vst [vmem:[%s3747_s5 + $0x208] sm:$0xff] %v312_v1  ;;  %v314_v2 = vld [vmem:[%s3742_s4 + $0x840] sm:$0xff]  ;;  %v316_v3 = vld [vmem:[%s3742_s4 + $0x848] sm:$0xff] }
  0x38   : > { %v318_v4 = vld [vmem:[%s3742_s4 + $0x880] sm:$0xff]  ;;  %315 = vst [vmem:[%s3747_s5 + $0x210] sm:$0xff] %v314_v2  ;;  %317 = vst [vmem:[%s3747_s5 + $0x218] sm:$0xff] %v316_v3  ;;  %v320_v5 = vld [vmem:[%s3742_s4 + $0x888] sm:$0xff] }
  0x39   : > { %319 = vst [vmem:[%s3747_s5 + $0x220] sm:$0xff] %v318_v4  ;;  %v322_v6 = vld [vmem:[%s3742_s4 + $0x8c0] sm:$0xff]  ;;  %v324_v7 = vld [vmem:[%s3742_s4 + $0x8c8] sm:$0xff]  ;;  %321 = vst [vmem:[%s3747_s5 + $0x228] sm:$0xff] %v320_v5 }
  0x3a   : > { %323 = vst [vmem:[%s3747_s5 + $0x230] sm:$0xff] %v322_v6  ;;  %325 = vst [vmem:[%s3747_s5 + $0x238] sm:$0xff] %v324_v7  ;;  %v326_v8 = vld [vmem:[%s3742_s4 + $0x900] sm:$0xff]  ;;  %v328_v9 = vld [vmem:[%s3742_s4 + $0x908] sm:$0xff] }
  0x3b   : > { %v330_v10 = vld [vmem:[%s3742_s4 + $0x940] sm:$0xff]  ;;  %327 = vst [vmem:[%s3747_s5 + $0x240] sm:$0xff] %v326_v8  ;;  %329 = vst [vmem:[%s3747_s5 + $0x248] sm:$0xff] %v328_v9  ;;  %v332_v11 = vld [vmem:[%s3742_s4 + $0x948] sm:$0xff] }
  0x3c   : > { %331 = vst [vmem:[%s3747_s5 + $0x250] sm:$0xff] %v330_v10  ;;  %v334_v12 = vld [vmem:[%s3742_s4 + $0x980] sm:$0xff]  ;;  %v336_v13 = vld [vmem:[%s3742_s4 + $0x988] sm:$0xff]  ;;  %333 = vst [vmem:[%s3747_s5 + $0x258] sm:$0xff] %v332_v11 }
  0x3d   : > { %335 = vst [vmem:[%s3747_s5 + $0x260] sm:$0xff] %v334_v12  ;;  %337 = vst [vmem:[%s3747_s5 + $0x268] sm:$0xff] %v336_v13  ;;  %v338_v14 = vld [vmem:[%s3742_s4 + $0x9c0] sm:$0xff]  ;;  %v340_v15 = vld [vmem:[%s3742_s4 + $0x9c8] sm:$0xff] }
  0x3e   : > { %v342_v16 = vld [vmem:[%s3742_s4 + $0xa00] sm:$0xff]  ;;  %339 = vst [vmem:[%s3747_s5 + $0x270] sm:$0xff] %v338_v14  ;;  %341 = vst [vmem:[%s3747_s5 + $0x278] sm:$0xff] %v340_v15  ;;  %v344_v17 = vld [vmem:[%s3742_s4 + $0xa08] sm:$0xff] }
  0x3f   : > { %343 = vst [vmem:[%s3747_s5 + $0x280] sm:$0xff] %v342_v16  ;;  %v346_v18 = vld [vmem:[%s3742_s4 + $0xa40] sm:$0xff]  ;;  %v348_v19 = vld [vmem:[%s3742_s4 + $0xa48] sm:$0xff]  ;;  %345 = vst [vmem:[%s3747_s5 + $0x288] sm:$0xff] %v344_v17 }
  0x40   : > { %347 = vst [vmem:[%s3747_s5 + $0x290] sm:$0xff] %v346_v18  ;;  %349 = vst [vmem:[%s3747_s5 + $0x298] sm:$0xff] %v348_v19  ;;  %v350_v20 = vld [vmem:[%s3742_s4 + $0xa80] sm:$0xff]  ;;  %v352_v21 = vld [vmem:[%s3742_s4 + $0xa88] sm:$0xff] }
  0x41   : > { %v354_v22 = vld [vmem:[%s3742_s4 + $0xac0] sm:$0xff]  ;;  %351 = vst [vmem:[%s3747_s5 + $0x2a0] sm:$0xff] %v350_v20  ;;  %353 = vst [vmem:[%s3747_s5 + $0x2a8] sm:$0xff] %v352_v21  ;;  %v356_v23 = vld [vmem:[%s3742_s4 + $0xac8] sm:$0xff] }
  0x42   : > { %355 = vst [vmem:[%s3747_s5 + $0x2b0] sm:$0xff] %v354_v22  ;;  %v358_v24 = vld [vmem:[%s3742_s4 + $0xb00] sm:$0xff]  ;;  %v360_v25 = vld [vmem:[%s3742_s4 + $0xb08] sm:$0xff]  ;;  %357 = vst [vmem:[%s3747_s5 + $0x2b8] sm:$0xff] %v356_v23 }
  0x43   : > { %359 = vst [vmem:[%s3747_s5 + $0x2c0] sm:$0xff] %v358_v24  ;;  %361 = vst [vmem:[%s3747_s5 + $0x2c8] sm:$0xff] %v360_v25  ;;  %v362_v26 = vld [vmem:[%s3742_s4 + $0xb40] sm:$0xff]  ;;  %v364_v27 = vld [vmem:[%s3742_s4 + $0xb48] sm:$0xff] }
  0x44   : > { %v366_v28 = vld [vmem:[%s3742_s4 + $0xb80] sm:$0xff]  ;;  %363 = vst [vmem:[%s3747_s5 + $0x2d0] sm:$0xff] %v362_v26  ;;  %365 = vst [vmem:[%s3747_s5 + $0x2d8] sm:$0xff] %v364_v27  ;;  %v368_v29 = vld [vmem:[%s3742_s4 + $0xb88] sm:$0xff] }
  0x45   : > { %367 = vst [vmem:[%s3747_s5 + $0x2e0] sm:$0xff] %v366_v28  ;;  %v370_v30 = vld [vmem:[%s3742_s4 + $0xbc0] sm:$0xff]  ;;  %v372_v31 = vld [vmem:[%s3742_s4 + $0xbc8] sm:$0xff]  ;;  %369 = vst [vmem:[%s3747_s5 + $0x2e8] sm:$0xff] %v368_v29 }
  0x46   : > { %371 = vst [vmem:[%s3747_s5 + $0x2f0] sm:$0xff] %v370_v30  ;;  %373 = vst [vmem:[%s3747_s5 + $0x2f8] sm:$0xff] %v372_v31  ;;  %v374_v32 = vld [vmem:[%s3742_s4 + $0xc00] sm:$0xff]  ;;  %v376_v33 = vld [vmem:[%s3742_s4 + $0xc08] sm:$0xff] }
  0x47   : > { %v378_v34 = vld [vmem:[%s3742_s4 + $0xc40] sm:$0xff]  ;;  %375 = vst [vmem:[%s3747_s5 + $0x300] sm:$0xff] %v374_v32  ;;  %377 = vst [vmem:[%s3747_s5 + $0x308] sm:$0xff] %v376_v33  ;;  %v380_v35 = vld [vmem:[%s3742_s4 + $0xc48] sm:$0xff] }
  0x48   : > { %379 = vst [vmem:[%s3747_s5 + $0x310] sm:$0xff] %v378_v34  ;;  %v382_v36 = vld [vmem:[%s3742_s4 + $0xc80] sm:$0xff]  ;;  %v384_v37 = vld [vmem:[%s3742_s4 + $0xc88] sm:$0xff]  ;;  %381 = vst [vmem:[%s3747_s5 + $0x318] sm:$0xff] %v380_v35 }
  0x49   : > { %383 = vst [vmem:[%s3747_s5 + $0x320] sm:$0xff] %v382_v36  ;;  %385 = vst [vmem:[%s3747_s5 + $0x328] sm:$0xff] %v384_v37  ;;  %v386_v38 = vld [vmem:[%s3742_s4 + $0xcc0] sm:$0xff]  ;;  %v388_v39 = vld [vmem:[%s3742_s4 + $0xcc8] sm:$0xff] }
  0x4a   : > { %v390_v40 = vld [vmem:[%s3742_s4 + $0xd00] sm:$0xff]  ;;  %387 = vst [vmem:[%s3747_s5 + $0x330] sm:$0xff] %v386_v38  ;;  %389 = vst [vmem:[%s3747_s5 + $0x338] sm:$0xff] %v388_v39  ;;  %v392_v41 = vld [vmem:[%s3742_s4 + $0xd08] sm:$0xff] }
  0x4b   : > { %391 = vst [vmem:[%s3747_s5 + $0x340] sm:$0xff] %v390_v40  ;;  %v394_v42 = vld [vmem:[%s3742_s4 + $0xd40] sm:$0xff]  ;;  %v396_v43 = vld [vmem:[%s3742_s4 + $0xd48] sm:$0xff]  ;;  %393 = vst [vmem:[%s3747_s5 + $0x348] sm:$0xff] %v392_v41 }
  0x4c   : > { %395 = vst [vmem:[%s3747_s5 + $0x350] sm:$0xff] %v394_v42  ;;  %397 = vst [vmem:[%s3747_s5 + $0x358] sm:$0xff] %v396_v43  ;;  %v398_v44 = vld [vmem:[%s3742_s4 + $0xd80] sm:$0xff]  ;;  %v400_v45 = vld [vmem:[%s3742_s4 + $0xd88] sm:$0xff] }
  0x4d   : > { %v402_v46 = vld [vmem:[%s3742_s4 + $0xdc0] sm:$0xff]  ;;  %399 = vst [vmem:[%s3747_s5 + $0x360] sm:$0xff] %v398_v44  ;;  %401 = vst [vmem:[%s3747_s5 + $0x368] sm:$0xff] %v400_v45  ;;  %v404_v47 = vld [vmem:[%s3742_s4 + $0xdc8] sm:$0xff] }
  0x4e   : > { %403 = vst [vmem:[%s3747_s5 + $0x370] sm:$0xff] %v402_v46  ;;  %v406_v48 = vld [vmem:[%s3742_s4 + $0xe00] sm:$0xff]  ;;  %v408_v49 = vld [vmem:[%s3742_s4 + $0xe08] sm:$0xff]  ;;  %405 = vst [vmem:[%s3747_s5 + $0x378] sm:$0xff] %v404_v47 }
  0x4f   : > { %407 = vst [vmem:[%s3747_s5 + $0x380] sm:$0xff] %v406_v48  ;;  %409 = vst [vmem:[%s3747_s5 + $0x388] sm:$0xff] %v408_v49  ;;  %v410_v50 = vld [vmem:[%s3742_s4 + $0xe40] sm:$0xff]  ;;  %v412_v51 = vld [vmem:[%s3742_s4 + $0xe48] sm:$0xff] }
  0x50   : > { %v414_v52 = vld [vmem:[%s3742_s4 + $0xe80] sm:$0xff]  ;;  %411 = vst [vmem:[%s3747_s5 + $0x390] sm:$0xff] %v410_v50  ;;  %413 = vst [vmem:[%s3747_s5 + $0x398] sm:$0xff] %v412_v51  ;;  %v416_v53 = vld [vmem:[%s3742_s4 + $0xe88] sm:$0xff] }
  0x51   : > { %415 = vst [vmem:[%s3747_s5 + $0x3a0] sm:$0xff] %v414_v52  ;;  %v418_v54 = vld [vmem:[%s3742_s4 + $0xec0] sm:$0xff]  ;;  %v420_v55 = vld [vmem:[%s3742_s4 + $0xec8] sm:$0xff]  ;;  %417 = vst [vmem:[%s3747_s5 + $0x3a8] sm:$0xff] %v416_v53 }
  0x52   : > { %419 = vst [vmem:[%s3747_s5 + $0x3b0] sm:$0xff] %v418_v54  ;;  %421 = vst [vmem:[%s3747_s5 + $0x3b8] sm:$0xff] %v420_v55  ;;  %v422_v56 = vld [vmem:[%s3742_s4 + $0xf00] sm:$0xff]  ;;  %v424_v57 = vld [vmem:[%s3742_s4 + $0xf08] sm:$0xff] }
  0x53   : > { %v426_v58 = vld [vmem:[%s3742_s4 + $0xf40] sm:$0xff]  ;;  %423 = vst [vmem:[%s3747_s5 + $0x3c0] sm:$0xff] %v422_v56  ;;  %425 = vst [vmem:[%s3747_s5 + $0x3c8] sm:$0xff] %v424_v57  ;;  %v428_v59 = vld [vmem:[%s3742_s4 + $0xf48] sm:$0xff] }
  0x54   : > { %427 = vst [vmem:[%s3747_s5 + $0x3d0] sm:$0xff] %v426_v58  ;;  %v430_v60 = vld [vmem:[%s3742_s4 + $0xf80] sm:$0xff]  ;;  %v432_v61 = vld [vmem:[%s3742_s4 + $0xf88] sm:$0xff]  ;;  %429 = vst [vmem:[%s3747_s5 + $0x3d8] sm:$0xff] %v428_v59 }
  0x55   : > { %431 = vst [vmem:[%s3747_s5 + $0x3e0] sm:$0xff] %v430_v60  ;;  %433 = vst [vmem:[%s3747_s5 + $0x3e8] sm:$0xff] %v432_v61  ;;  %v434_v62 = vld [vmem:[%s3742_s4 + $0xfc0] sm:$0xff]  ;;  %v436_v63 = vld [vmem:[%s3742_s4 + $0xfc8] sm:$0xff] }
  0x56   : > { %v438_v0 = vld [vmem:[%s3742_s4 + $0x1000] sm:$0xff]  ;;  %435 = vst [vmem:[%s3747_s5 + $0x3f0] sm:$0xff] %v434_v62  ;;  %437 = vst [vmem:[%s3747_s5 + $0x3f8] sm:$0xff] %v436_v63  ;;  %v440_v1 = vld [vmem:[%s3742_s4 + $0x1008] sm:$0xff] }
  0x57   : > { %439 = vst [vmem:[%s3747_s5 + $0x400] sm:$0xff] %v438_v0  ;;  %v442_v2 = vld [vmem:[%s3742_s4 + $0x1040] sm:$0xff]  ;;  %v444_v3 = vld [vmem:[%s3742_s4 + $0x1048] sm:$0xff]  ;;  %441 = vst [vmem:[%s3747_s5 + $0x408] sm:$0xff] %v440_v1 }
  0x58   : > { %443 = vst [vmem:[%s3747_s5 + $0x410] sm:$0xff] %v442_v2  ;;  %445 = vst [vmem:[%s3747_s5 + $0x418] sm:$0xff] %v444_v3  ;;  %v446_v4 = vld [vmem:[%s3742_s4 + $0x1080] sm:$0xff]  ;;  %v448_v5 = vld [vmem:[%s3742_s4 + $0x1088] sm:$0xff] }
  0x59   : > { %v450_v6 = vld [vmem:[%s3742_s4 + $0x10c0] sm:$0xff]  ;;  %447 = vst [vmem:[%s3747_s5 + $0x420] sm:$0xff] %v446_v4  ;;  %449 = vst [vmem:[%s3747_s5 + $0x428] sm:$0xff] %v448_v5  ;;  %v452_v7 = vld [vmem:[%s3742_s4 + $0x10c8] sm:$0xff] }
  0x5a   : > { %451 = vst [vmem:[%s3747_s5 + $0x430] sm:$0xff] %v450_v6  ;;  %v454_v8 = vld [vmem:[%s3742_s4 + $0x1100] sm:$0xff]  ;;  %v456_v9 = vld [vmem:[%s3742_s4 + $0x1108] sm:$0xff]  ;;  %453 = vst [vmem:[%s3747_s5 + $0x438] sm:$0xff] %v452_v7 }
  0x5b   : > { %455 = vst [vmem:[%s3747_s5 + $0x440] sm:$0xff] %v454_v8  ;;  %457 = vst [vmem:[%s3747_s5 + $0x448] sm:$0xff] %v456_v9  ;;  %v458_v10 = vld [vmem:[%s3742_s4 + $0x1140] sm:$0xff]  ;;  %v460_v11 = vld [vmem:[%s3742_s4 + $0x1148] sm:$0xff] }
  0x5c   : > { %v462_v12 = vld [vmem:[%s3742_s4 + $0x1180] sm:$0xff]  ;;  %459 = vst [vmem:[%s3747_s5 + $0x450] sm:$0xff] %v458_v10  ;;  %461 = vst [vmem:[%s3747_s5 + $0x458] sm:$0xff] %v460_v11  ;;  %v464_v13 = vld [vmem:[%s3742_s4 + $0x1188] sm:$0xff] }
  0x5d   : > { %463 = vst [vmem:[%s3747_s5 + $0x460] sm:$0xff] %v462_v12  ;;  %v466_v14 = vld [vmem:[%s3742_s4 + $0x11c0] sm:$0xff]  ;;  %v468_v15 = vld [vmem:[%s3742_s4 + $0x11c8] sm:$0xff]  ;;  %465 = vst [vmem:[%s3747_s5 + $0x468] sm:$0xff] %v464_v13 }
  0x5e   : > { %467 = vst [vmem:[%s3747_s5 + $0x470] sm:$0xff] %v466_v14  ;;  %469 = vst [vmem:[%s3747_s5 + $0x478] sm:$0xff] %v468_v15  ;;  %v470_v16 = vld [vmem:[%s3742_s4 + $0x1200] sm:$0xff]  ;;  %v472_v17 = vld [vmem:[%s3742_s4 + $0x1208] sm:$0xff] }
  0x5f   : > { %v474_v18 = vld [vmem:[%s3742_s4 + $0x1240] sm:$0xff]  ;;  %471 = vst [vmem:[%s3747_s5 + $0x480] sm:$0xff] %v470_v16  ;;  %473 = vst [vmem:[%s3747_s5 + $0x488] sm:$0xff] %v472_v17  ;;  %v476_v19 = vld [vmem:[%s3742_s4 + $0x1248] sm:$0xff] }
  0x60   : > { %475 = vst [vmem:[%s3747_s5 + $0x490] sm:$0xff] %v474_v18  ;;  %v478_v20 = vld [vmem:[%s3742_s4 + $0x1280] sm:$0xff]  ;;  %v480_v21 = vld [vmem:[%s3742_s4 + $0x1288] sm:$0xff]  ;;  %477 = vst [vmem:[%s3747_s5 + $0x498] sm:$0xff] %v476_v19 }
  0x61   : > { %479 = vst [vmem:[%s3747_s5 + $0x4a0] sm:$0xff] %v478_v20  ;;  %481 = vst [vmem:[%s3747_s5 + $0x4a8] sm:$0xff] %v480_v21  ;;  %v482_v22 = vld [vmem:[%s3742_s4 + $0x12c0] sm:$0xff]  ;;  %v484_v23 = vld [vmem:[%s3742_s4 + $0x12c8] sm:$0xff] }
  0x62   : > { %v486_v24 = vld [vmem:[%s3742_s4 + $0x1300] sm:$0xff]  ;;  %483 = vst [vmem:[%s3747_s5 + $0x4b0] sm:$0xff] %v482_v22  ;;  %485 = vst [vmem:[%s3747_s5 + $0x4b8] sm:$0xff] %v484_v23  ;;  %v488_v25 = vld [vmem:[%s3742_s4 + $0x1308] sm:$0xff] }
  0x63   : > { %487 = vst [vmem:[%s3747_s5 + $0x4c0] sm:$0xff] %v486_v24  ;;  %v490_v26 = vld [vmem:[%s3742_s4 + $0x1340] sm:$0xff]  ;;  %v492_v27 = vld [vmem:[%s3742_s4 + $0x1348] sm:$0xff]  ;;  %489 = vst [vmem:[%s3747_s5 + $0x4c8] sm:$0xff] %v488_v25 }
  0x64   : > { %491 = vst [vmem:[%s3747_s5 + $0x4d0] sm:$0xff] %v490_v26  ;;  %493 = vst [vmem:[%s3747_s5 + $0x4d8] sm:$0xff] %v492_v27  ;;  %v494_v28 = vld [vmem:[%s3742_s4 + $0x1380] sm:$0xff]  ;;  %v496_v29 = vld [vmem:[%s3742_s4 + $0x1388] sm:$0xff] }
  0x65   : > { %v498_v30 = vld [vmem:[%s3742_s4 + $0x13c0] sm:$0xff]  ;;  %495 = vst [vmem:[%s3747_s5 + $0x4e0] sm:$0xff] %v494_v28  ;;  %497 = vst [vmem:[%s3747_s5 + $0x4e8] sm:$0xff] %v496_v29  ;;  %v500_v31 = vld [vmem:[%s3742_s4 + $0x13c8] sm:$0xff] }
  0x66   : > { %499 = vst [vmem:[%s3747_s5 + $0x4f0] sm:$0xff] %v498_v30  ;;  %v502_v32 = vld [vmem:[%s3742_s4 + $0x1400] sm:$0xff]  ;;  %v504_v33 = vld [vmem:[%s3742_s4 + $0x1408] sm:$0xff]  ;;  %501 = vst [vmem:[%s3747_s5 + $0x4f8] sm:$0xff] %v500_v31 }
  0x67   : > { %503 = vst [vmem:[%s3747_s5 + $0x500] sm:$0xff] %v502_v32  ;;  %505 = vst [vmem:[%s3747_s5 + $0x508] sm:$0xff] %v504_v33  ;;  %v506_v34 = vld [vmem:[%s3742_s4 + $0x1440] sm:$0xff]  ;;  %v508_v35 = vld [vmem:[%s3742_s4 + $0x1448] sm:$0xff] }
  0x68   : > { %v510_v36 = vld [vmem:[%s3742_s4 + $0x1480] sm:$0xff]  ;;  %507 = vst [vmem:[%s3747_s5 + $0x510] sm:$0xff] %v506_v34  ;;  %509 = vst [vmem:[%s3747_s5 + $0x518] sm:$0xff] %v508_v35  ;;  %v512_v37 = vld [vmem:[%s3742_s4 + $0x1488] sm:$0xff] }
  0x69   : > { %511 = vst [vmem:[%s3747_s5 + $0x520] sm:$0xff] %v510_v36  ;;  %v514_v38 = vld [vmem:[%s3742_s4 + $0x14c0] sm:$0xff]  ;;  %v516_v39 = vld [vmem:[%s3742_s4 + $0x14c8] sm:$0xff]  ;;  %513 = vst [vmem:[%s3747_s5 + $0x528] sm:$0xff] %v512_v37 }
  0x6a   : > { %515 = vst [vmem:[%s3747_s5 + $0x530] sm:$0xff] %v514_v38  ;;  %517 = vst [vmem:[%s3747_s5 + $0x538] sm:$0xff] %v516_v39  ;;  %v518_v40 = vld [vmem:[%s3742_s4 + $0x1500] sm:$0xff]  ;;  %v520_v41 = vld [vmem:[%s3742_s4 + $0x1508] sm:$0xff] }
  0x6b   : > { %v522_v42 = vld [vmem:[%s3742_s4 + $0x1540] sm:$0xff]  ;;  %519 = vst [vmem:[%s3747_s5 + $0x540] sm:$0xff] %v518_v40  ;;  %521 = vst [vmem:[%s3747_s5 + $0x548] sm:$0xff] %v520_v41  ;;  %v524_v43 = vld [vmem:[%s3742_s4 + $0x1548] sm:$0xff] }
  0x6c   : > { %523 = vst [vmem:[%s3747_s5 + $0x550] sm:$0xff] %v522_v42  ;;  %v526_v44 = vld [vmem:[%s3742_s4 + $0x1580] sm:$0xff]  ;;  %v528_v45 = vld [vmem:[%s3742_s4 + $0x1588] sm:$0xff]  ;;  %525 = vst [vmem:[%s3747_s5 + $0x558] sm:$0xff] %v524_v43 }
  0x6d   : > { %527 = vst [vmem:[%s3747_s5 + $0x560] sm:$0xff] %v526_v44  ;;  %529 = vst [vmem:[%s3747_s5 + $0x568] sm:$0xff] %v528_v45  ;;  %v530_v46 = vld [vmem:[%s3742_s4 + $0x15c0] sm:$0xff]  ;;  %v532_v47 = vld [vmem:[%s3742_s4 + $0x15c8] sm:$0xff] }
  0x6e   : > { %v534_v48 = vld [vmem:[%s3742_s4 + $0x1600] sm:$0xff]  ;;  %531 = vst [vmem:[%s3747_s5 + $0x570] sm:$0xff] %v530_v46  ;;  %533 = vst [vmem:[%s3747_s5 + $0x578] sm:$0xff] %v532_v47  ;;  %v536_v49 = vld [vmem:[%s3742_s4 + $0x1608] sm:$0xff] }
  0x6f   : > { %535 = vst [vmem:[%s3747_s5 + $0x580] sm:$0xff] %v534_v48  ;;  %v538_v50 = vld [vmem:[%s3742_s4 + $0x1640] sm:$0xff]  ;;  %v540_v51 = vld [vmem:[%s3742_s4 + $0x1648] sm:$0xff]  ;;  %537 = vst [vmem:[%s3747_s5 + $0x588] sm:$0xff] %v536_v49 }
  0x70   : > { %539 = vst [vmem:[%s3747_s5 + $0x590] sm:$0xff] %v538_v50  ;;  %541 = vst [vmem:[%s3747_s5 + $0x598] sm:$0xff] %v540_v51  ;;  %v542_v52 = vld [vmem:[%s3742_s4 + $0x1680] sm:$0xff]  ;;  %v544_v53 = vld [vmem:[%s3742_s4 + $0x1688] sm:$0xff] }
  0x71   : > { %v546_v54 = vld [vmem:[%s3742_s4 + $0x16c0] sm:$0xff]  ;;  %543 = vst [vmem:[%s3747_s5 + $0x5a0] sm:$0xff] %v542_v52  ;;  %545 = vst [vmem:[%s3747_s5 + $0x5a8] sm:$0xff] %v544_v53  ;;  %v548_v55 = vld [vmem:[%s3742_s4 + $0x16c8] sm:$0xff] }
  0x72   : > { %547 = vst [vmem:[%s3747_s5 + $0x5b0] sm:$0xff] %v546_v54  ;;  %v550_v56 = vld [vmem:[%s3742_s4 + $0x1700] sm:$0xff]  ;;  %v552_v57 = vld [vmem:[%s3742_s4 + $0x1708] sm:$0xff]  ;;  %549 = vst [vmem:[%s3747_s5 + $0x5b8] sm:$0xff] %v548_v55 }
  0x73   : > { %551 = vst [vmem:[%s3747_s5 + $0x5c0] sm:$0xff] %v550_v56  ;;  %553 = vst [vmem:[%s3747_s5 + $0x5c8] sm:$0xff] %v552_v57  ;;  %v554_v58 = vld [vmem:[%s3742_s4 + $0x1740] sm:$0xff]  ;;  %v556_v59 = vld [vmem:[%s3742_s4 + $0x1748] sm:$0xff] }
  0x74   : > { %v558_v60 = vld [vmem:[%s3742_s4 + $0x1780] sm:$0xff]  ;;  %555 = vst [vmem:[%s3747_s5 + $0x5d0] sm:$0xff] %v554_v58  ;;  %557 = vst [vmem:[%s3747_s5 + $0x5d8] sm:$0xff] %v556_v59  ;;  %v560_v61 = vld [vmem:[%s3742_s4 + $0x1788] sm:$0xff] }
  0x75   : > { %559 = vst [vmem:[%s3747_s5 + $0x5e0] sm:$0xff] %v558_v60  ;;  %v562_v62 = vld [vmem:[%s3742_s4 + $0x17c0] sm:$0xff]  ;;  %v564_v63 = vld [vmem:[%s3742_s4 + $0x17c8] sm:$0xff]  ;;  %561 = vst [vmem:[%s3747_s5 + $0x5e8] sm:$0xff] %v560_v61 }
  0x76   : > { %563 = vst [vmem:[%s3747_s5 + $0x5f0] sm:$0xff] %v562_v62  ;;  %565 = vst [vmem:[%s3747_s5 + $0x5f8] sm:$0xff] %v564_v63  ;;  %v566_v0 = vld [vmem:[%s3742_s4 + $0x1800] sm:$0xff]  ;;  %v568_v1 = vld [vmem:[%s3742_s4 + $0x1808] sm:$0xff] }
  0x77   : > { %v570_v2 = vld [vmem:[%s3742_s4 + $0x1840] sm:$0xff]  ;;  %567 = vst [vmem:[%s3747_s5 + $0x600] sm:$0xff] %v566_v0  ;;  %569 = vst [vmem:[%s3747_s5 + $0x608] sm:$0xff] %v568_v1  ;;  %v572_v3 = vld [vmem:[%s3742_s4 + $0x1848] sm:$0xff] }
  0x78   : > { %571 = vst [vmem:[%s3747_s5 + $0x610] sm:$0xff] %v570_v2  ;;  %v574_v4 = vld [vmem:[%s3742_s4 + $0x1880] sm:$0xff]  ;;  %v576_v5 = vld [vmem:[%s3742_s4 + $0x1888] sm:$0xff]  ;;  %573 = vst [vmem:[%s3747_s5 + $0x618] sm:$0xff] %v572_v3 }
  0x79   : > { %575 = vst [vmem:[%s3747_s5 + $0x620] sm:$0xff] %v574_v4  ;;  %577 = vst [vmem:[%s3747_s5 + $0x628] sm:$0xff] %v576_v5  ;;  %v578_v6 = vld [vmem:[%s3742_s4 + $0x18c0] sm:$0xff]  ;;  %v580_v7 = vld [vmem:[%s3742_s4 + $0x18c8] sm:$0xff] }
  0x7a   : > { %v582_v8 = vld [vmem:[%s3742_s4 + $0x1900] sm:$0xff]  ;;  %579 = vst [vmem:[%s3747_s5 + $0x630] sm:$0xff] %v578_v6  ;;  %581 = vst [vmem:[%s3747_s5 + $0x638] sm:$0xff] %v580_v7  ;;  %v584_v9 = vld [vmem:[%s3742_s4 + $0x1908] sm:$0xff] }
  0x7b   : > { %583 = vst [vmem:[%s3747_s5 + $0x640] sm:$0xff] %v582_v8  ;;  %v586_v10 = vld [vmem:[%s3742_s4 + $0x1940] sm:$0xff]  ;;  %v588_v11 = vld [vmem:[%s3742_s4 + $0x1948] sm:$0xff]  ;;  %585 = vst [vmem:[%s3747_s5 + $0x648] sm:$0xff] %v584_v9 }
  0x7c   : > { %587 = vst [vmem:[%s3747_s5 + $0x650] sm:$0xff] %v586_v10  ;;  %589 = vst [vmem:[%s3747_s5 + $0x658] sm:$0xff] %v588_v11  ;;  %v590_v12 = vld [vmem:[%s3742_s4 + $0x1980] sm:$0xff]  ;;  %v592_v13 = vld [vmem:[%s3742_s4 + $0x1988] sm:$0xff] }
  0x7d   : > { %v594_v14 = vld [vmem:[%s3742_s4 + $0x19c0] sm:$0xff]  ;;  %591 = vst [vmem:[%s3747_s5 + $0x660] sm:$0xff] %v590_v12  ;;  %593 = vst [vmem:[%s3747_s5 + $0x668] sm:$0xff] %v592_v13  ;;  %v596_v15 = vld [vmem:[%s3742_s4 + $0x19c8] sm:$0xff] }
  0x7e   : > { %595 = vst [vmem:[%s3747_s5 + $0x670] sm:$0xff] %v594_v14  ;;  %v598_v16 = vld [vmem:[%s3742_s4 + $0x1a00] sm:$0xff]  ;;  %v600_v17 = vld [vmem:[%s3742_s4 + $0x1a08] sm:$0xff]  ;;  %597 = vst [vmem:[%s3747_s5 + $0x678] sm:$0xff] %v596_v15 }
  0x7f   : > { %599 = vst [vmem:[%s3747_s5 + $0x680] sm:$0xff] %v598_v16  ;;  %601 = vst [vmem:[%s3747_s5 + $0x688] sm:$0xff] %v600_v17  ;;  %v602_v18 = vld [vmem:[%s3742_s4 + $0x1a40] sm:$0xff]  ;;  %v604_v19 = vld [vmem:[%s3742_s4 + $0x1a48] sm:$0xff] }
  0x80   : > { %v606_v20 = vld [vmem:[%s3742_s4 + $0x1a80] sm:$0xff]  ;;  %603 = vst [vmem:[%s3747_s5 + $0x690] sm:$0xff] %v602_v18  ;;  %605 = vst [vmem:[%s3747_s5 + $0x698] sm:$0xff] %v604_v19  ;;  %v608_v21 = vld [vmem:[%s3742_s4 + $0x1a88] sm:$0xff] }
  0x81   : > { %607 = vst [vmem:[%s3747_s5 + $0x6a0] sm:$0xff] %v606_v20  ;;  %v610_v22 = vld [vmem:[%s3742_s4 + $0x1ac0] sm:$0xff]  ;;  %v612_v23 = vld [vmem:[%s3742_s4 + $0x1ac8] sm:$0xff]  ;;  %609 = vst [vmem:[%s3747_s5 + $0x6a8] sm:$0xff] %v608_v21 }
  0x82   : > { %611 = vst [vmem:[%s3747_s5 + $0x6b0] sm:$0xff] %v610_v22  ;;  %613 = vst [vmem:[%s3747_s5 + $0x6b8] sm:$0xff] %v612_v23  ;;  %v614_v24 = vld [vmem:[%s3742_s4 + $0x1b00] sm:$0xff]  ;;  %v616_v25 = vld [vmem:[%s3742_s4 + $0x1b08] sm:$0xff] }
  0x83   : > { %v618_v26 = vld [vmem:[%s3742_s4 + $0x1b40] sm:$0xff]  ;;  %615 = vst [vmem:[%s3747_s5 + $0x6c0] sm:$0xff] %v614_v24  ;;  %617 = vst [vmem:[%s3747_s5 + $0x6c8] sm:$0xff] %v616_v25  ;;  %v620_v27 = vld [vmem:[%s3742_s4 + $0x1b48] sm:$0xff] }
  0x84   : > { %619 = vst [vmem:[%s3747_s5 + $0x6d0] sm:$0xff] %v618_v26  ;;  %v622_v28 = vld [vmem:[%s3742_s4 + $0x1b80] sm:$0xff]  ;;  %v624_v29 = vld [vmem:[%s3742_s4 + $0x1b88] sm:$0xff]  ;;  %621 = vst [vmem:[%s3747_s5 + $0x6d8] sm:$0xff] %v620_v27 }
  0x85   : > { %623 = vst [vmem:[%s3747_s5 + $0x6e0] sm:$0xff] %v622_v28  ;;  %625 = vst [vmem:[%s3747_s5 + $0x6e8] sm:$0xff] %v624_v29  ;;  %v626_v30 = vld [vmem:[%s3742_s4 + $0x1bc0] sm:$0xff]  ;;  %v628_v31 = vld [vmem:[%s3742_s4 + $0x1bc8] sm:$0xff] }
  0x86   : > { %v630_v32 = vld [vmem:[%s3742_s4 + $0x1c00] sm:$0xff]  ;;  %627 = vst [vmem:[%s3747_s5 + $0x6f0] sm:$0xff] %v626_v30  ;;  %629 = vst [vmem:[%s3747_s5 + $0x6f8] sm:$0xff] %v628_v31  ;;  %v632_v33 = vld [vmem:[%s3742_s4 + $0x1c08] sm:$0xff] }
  0x87   : > { %631 = vst [vmem:[%s3747_s5 + $0x700] sm:$0xff] %v630_v32  ;;  %v634_v34 = vld [vmem:[%s3742_s4 + $0x1c40] sm:$0xff]  ;;  %v636_v35 = vld [vmem:[%s3742_s4 + $0x1c48] sm:$0xff]  ;;  %633 = vst [vmem:[%s3747_s5 + $0x708] sm:$0xff] %v632_v33 }
  0x88   : > { %635 = vst [vmem:[%s3747_s5 + $0x710] sm:$0xff] %v634_v34  ;;  %637 = vst [vmem:[%s3747_s5 + $0x718] sm:$0xff] %v636_v35  ;;  %v638_v36 = vld [vmem:[%s3742_s4 + $0x1c80] sm:$0xff]  ;;  %v640_v37 = vld [vmem:[%s3742_s4 + $0x1c88] sm:$0xff] }
  0x89   : > { %v642_v38 = vld [vmem:[%s3742_s4 + $0x1cc0] sm:$0xff]  ;;  %639 = vst [vmem:[%s3747_s5 + $0x720] sm:$0xff] %v638_v36  ;;  %641 = vst [vmem:[%s3747_s5 + $0x728] sm:$0xff] %v640_v37  ;;  %v644_v39 = vld [vmem:[%s3742_s4 + $0x1cc8] sm:$0xff] }
  0x8a   : > { %643 = vst [vmem:[%s3747_s5 + $0x730] sm:$0xff] %v642_v38  ;;  %v646_v40 = vld [vmem:[%s3742_s4 + $0x1d00] sm:$0xff]  ;;  %v648_v41 = vld [vmem:[%s3742_s4 + $0x1d08] sm:$0xff]  ;;  %645 = vst [vmem:[%s3747_s5 + $0x738] sm:$0xff] %v644_v39 }
  0x8b   : > { %647 = vst [vmem:[%s3747_s5 + $0x740] sm:$0xff] %v646_v40  ;;  %649 = vst [vmem:[%s3747_s5 + $0x748] sm:$0xff] %v648_v41  ;;  %v650_v42 = vld [vmem:[%s3742_s4 + $0x1d40] sm:$0xff]  ;;  %v652_v43 = vld [vmem:[%s3742_s4 + $0x1d48] sm:$0xff] }
  0x8c   : > { %v654_v44 = vld [vmem:[%s3742_s4 + $0x1d80] sm:$0xff]  ;;  %651 = vst [vmem:[%s3747_s5 + $0x750] sm:$0xff] %v650_v42  ;;  %653 = vst [vmem:[%s3747_s5 + $0x758] sm:$0xff] %v652_v43  ;;  %v656_v45 = vld [vmem:[%s3742_s4 + $0x1d88] sm:$0xff] }
  0x8d   : > { %655 = vst [vmem:[%s3747_s5 + $0x760] sm:$0xff] %v654_v44  ;;  %v658_v46 = vld [vmem:[%s3742_s4 + $0x1dc0] sm:$0xff]  ;;  %v660_v47 = vld [vmem:[%s3742_s4 + $0x1dc8] sm:$0xff]  ;;  %657 = vst [vmem:[%s3747_s5 + $0x768] sm:$0xff] %v656_v45 }
  0x8e   : > { %659 = vst [vmem:[%s3747_s5 + $0x770] sm:$0xff] %v658_v46  ;;  %661 = vst [vmem:[%s3747_s5 + $0x778] sm:$0xff] %v660_v47  ;;  %v662_v48 = vld [vmem:[%s3742_s4 + $0x1e00] sm:$0xff]  ;;  %v664_v49 = vld [vmem:[%s3742_s4 + $0x1e08] sm:$0xff] }
  0x8f   : > { %v666_v50 = vld [vmem:[%s3742_s4 + $0x1e40] sm:$0xff]  ;;  %663 = vst [vmem:[%s3747_s5 + $0x780] sm:$0xff] %v662_v48  ;;  %665 = vst [vmem:[%s3747_s5 + $0x788] sm:$0xff] %v664_v49  ;;  %v668_v51 = vld [vmem:[%s3742_s4 + $0x1e48] sm:$0xff] }
  0x90   : > { %667 = vst [vmem:[%s3747_s5 + $0x790] sm:$0xff] %v666_v50  ;;  %v670_v52 = vld [vmem:[%s3742_s4 + $0x1e80] sm:$0xff]  ;;  %v672_v53 = vld [vmem:[%s3742_s4 + $0x1e88] sm:$0xff]  ;;  %669 = vst [vmem:[%s3747_s5 + $0x798] sm:$0xff] %v668_v51 }
  0x91   : > { %671 = vst [vmem:[%s3747_s5 + $0x7a0] sm:$0xff] %v670_v52  ;;  %673 = vst [vmem:[%s3747_s5 + $0x7a8] sm:$0xff] %v672_v53  ;;  %v674_v54 = vld [vmem:[%s3742_s4 + $0x1ec0] sm:$0xff]  ;;  %v676_v55 = vld [vmem:[%s3742_s4 + $0x1ec8] sm:$0xff] }
  0x92   : > { %v678_v56 = vld [vmem:[%s3742_s4 + $0x1f00] sm:$0xff]  ;;  %675 = vst [vmem:[%s3747_s5 + $0x7b0] sm:$0xff] %v674_v54  ;;  %677 = vst [vmem:[%s3747_s5 + $0x7b8] sm:$0xff] %v676_v55  ;;  %v680_v57 = vld [vmem:[%s3742_s4 + $0x1f08] sm:$0xff] }
  0x93   : > { %679 = vst [vmem:[%s3747_s5 + $0x7c0] sm:$0xff] %v678_v56  ;;  %v682_v58 = vld [vmem:[%s3742_s4 + $0x1f40] sm:$0xff]  ;;  %v684_v59 = vld [vmem:[%s3742_s4 + $0x1f48] sm:$0xff]  ;;  %681 = vst [vmem:[%s3747_s5 + $0x7c8] sm:$0xff] %v680_v57 }
  0x94   : > { %683 = vst [vmem:[%s3747_s5 + $0x7d0] sm:$0xff] %v682_v58  ;;  %685 = vst [vmem:[%s3747_s5 + $0x7d8] sm:$0xff] %v684_v59  ;;  %v686_v60 = vld [vmem:[%s3742_s4 + $0x1f80] sm:$0xff]  ;;  %v688_v61 = vld [vmem:[%s3742_s4 + $0x1f88] sm:$0xff] }
  0x95   : > { %v690_v62 = vld [vmem:[%s3742_s4 + $0x1fc0] sm:$0xff]  ;;  %687 = vst [vmem:[%s3747_s5 + $0x7e0] sm:$0xff] %v686_v60  ;;  %689 = vst [vmem:[%s3747_s5 + $0x7e8] sm:$0xff] %v688_v61  ;;  %v692_v63 = vld [vmem:[%s3742_s4 + $0x1fc8] sm:$0xff] }
  0x96   : > { %691 = vst [vmem:[%s3747_s5 + $0x7f0] sm:$0xff] %v690_v62  ;;  %693 = vst [vmem:[%s3747_s5 + $0x7f8] sm:$0xff] %v692_v63 }
  0x97 PF: > { %p2872_p11 = scmp.ge.s32.totalorder %s3657_s17, 1  ;;  %p706_p12 = scmp.lt.s32.totalorder %s3657_s17, 5 }
  0x99   : > { %p707_p13 = pnand %p2872_p11, %p706_p12 }
  0x9a   : > { %s4261_s6 = sand.u32 (!%p707_p13), 1, %s3641_s13   ;;  %s2875_s11 = sshll.u32 (!%p707_p13), %s3649_s15, 2 }
  0x9b   : > { %710 = sbr.rel (%p707_p13) target bundleno = 638 (0x27e), region = 51  ;;  %s2873_s7 = sshll.u32 (!%p707_p13), %s4261_s6, 11 }
  0x9c   : > { %s4269_s10 = scalar_lea.vmem (!%p707_p13), [#allocation3], %s2873_s7  ;;  %p752_p0 = scmp.lt.s32.totalorder (!%p707_p13), %s2875_s11, 15 }
  0x9d   : > { %s2874_s23 = sshll.u32 (!%p707_p13), %s4261_s6, 3  ;;  %s3138_s26 = sshll.u32 (!%p707_p13), %s3649_s15, 7 }
  0x9e   : > { %s743_s27 = scalar_lea.vmem (!%p707_p13), [#allocation4], %s2874_s23  ;;  %s2765_s4 = scalar_lea.hbm (!%p707_p13), %s4638_s3, %s3138_s26 }
  0x9f   : > { %s2767_s28 = sshll.u32 (!%p707_p13), %s743_s27, 4  ;;  %s2753_s5 = scalar_lea.sflag (!%p707_p13), [#allocation5], %s4261_s6  ;;  %s2768_s28 = int_to_ptr.vmem [resolvable:$true] %s2767_s28 }
  0xa0   : > { %v1025_v0 = vlaneseq  ;;  %v3659_v1 = vmov 1966171168   ;;  %v763_v3 = vld [vmem:[%s4635_s0] sm:$0xff]  ;;  %s4649_s11 = smov (!%p752_p0, %s2875_s11), 15  ;;  %s3581_s7 = scalar_lea.vmem %s2768_s28, 128 }
  0xa1   : > { %v1023_v2 = vunpack.c.l.s4 %v3659_v1  ;;  %v3196_v5 = vld [vmem:[%s4269_s10 + $0xe4] ss:$16 sps:$4 sm:$0xff]   ;;  %v1021_v7 = vcombine.high %v763_v3, %v763_v3  ;;  %v3200_v9 = vld [vmem:[%s4269_s10 + $0xe0] ss:$16 sps:$4 sm:$0xff]   ;;  %s754_s21 = scalar_lea.vmem %s4637_s2, %s4649_s11  ;;  %p3582_p1 = scmp.ne.s32.totalorder %s2768_s28, %s3581_s7 }
  0xa2   : > { %v4267_v4 = vshrl.u32 %v1025_v0, 7  ;;  %v3198_v8 = vld [vmem:[%s4269_s10 + $0x2e4] ss:$16 sps:$4 sm:$0xff]   ;;  %2358 = vmatprep.subr.bf16.mxu0 %v3196_v5  ;;  %v3201_v10 = vld [vmem:[%s4269_s10 + $0x2e0] ss:$16 sps:$4 sm:$0xff]   ;;  %s3661_s8 = smov [#allocation4]  }
  0xa3   : > { %v1024_v6 = vunpack.c.0.s8 %v1023_v2  ;;  %2399 = vmatprep.subr.bf16.mxu1 %v3198_v8  ;;  %v3202_v12 = vld [vmem:[%s4269_s10 + $0xc4] ss:$16 sps:$4 sm:$0xff]   ;;  %2359 = vmatpush1.bf16.msra.mxu0 %v3200_v9  ;;  %v3206_v14 = vld [vmem:[%s4269_s10 + $0xc0] ss:$16 sps:$4 sm:$0xff]   ;;  %p3583_p2 = pnand %p3582_p1, %p3721_p5  ;;  %s3585_s9 = sshll.u32 %s3661_s8, 4  ;;  %s3586_s9 = int_to_ptr.vmem [resolvable:$false] %s3585_s9 }
  0xa4   : > { %2400 = vmatpush1.bf16.msra.mxu1 %v3201_v10  ;;  %v3204_v13 = vld [vmem:[%s4269_s10 + $0x2c4] ss:$16 sps:$4 sm:$0xff]   ;;  %2360 = vmatprep.subr.bf16.mxu0 %v3202_v12  ;;  %v3207_v17 = vld [vmem:[%s4269_s10 + $0x2c0] ss:$16 sps:$4 sm:$0xff]   ;;  %s3587_s15 = scalar_lea.vmem %s3586_s9, 256  ;;  %p3588_p4 = scmp.lt.s32.totalorder %s2768_s28, %s3586_s9 }
  0xa5   : > { %v4276_v11 = vsub.s32 %v1024_v6, %v4267_v4  ;;  %2401 = vmatprep.subr.bf16.mxu1 %v3204_v13  ;;  %v3208_v18 = vld [vmem:[%s4269_s10 + $0xa4] ss:$16 sps:$4 sm:$0xff]   ;;  %v3212_v22 = vld [vmem:[%s4269_s10 + $0xa0] ss:$16 sps:$4 sm:$0xff]   ;;  %p3584_p3 = pneg %p3583_p2  ;;  %p3589_p6 = scmp.lt.s32.totalorder %s3587_s15, %s3581_s7 }
  0xa6   : > { %v3210_v21 = vld [vmem:[%s4269_s10 + $0x2a4] ss:$16 sps:$4 sm:$0xff]   ;;  %v3213_v23 = vld [vmem:[%s4269_s10 + $0x2a0] ss:$16 sps:$4 sm:$0xff]  }
  0xa7   : > { %v4282_v15 = vrot.slane %v763_v3, %v4276_v11  ;;  %v4285_v16 = vrot.slane %v1021_v7, %v4276_v11  ;;  %2361 = vmatpush1.bf16.msra.mxu0 %v3206_v14  ;;  %v3214_v24 = vld [vmem:[%s4269_s10 + $0x84] ss:$16 sps:$4 sm:$0xff]   ;;  %v3218_v28 = vld [vmem:[%s4269_s10 + $0x80] ss:$16 sps:$4 sm:$0xff]   ;;  %p3590_p7 = por %p3589_p6, %p3588_p4 }
  0xa8   : > { %2402 = vmatpush1.bf16.msra.mxu1 %v3207_v17  ;;  %2362 = vmatprep.subr.bf16.mxu0 %v3208_v18  ;;  %v3216_v26 = vld [vmem:[%s4269_s10 + $0x284] ss:$16 sps:$4 sm:$0xff]   ;;  %v3219_v29 = vld [vmem:[%s4269_s10 + $0x280] ss:$16 sps:$4 sm:$0xff]  }
  0xa9   : > { %v1036_v19 = vcombine.high %v4282_v15, %v4282_v15  ;;  %v4293_v20 = vrot.slane %v4285_v16, %v4276_v11  ;;  %2403 = vmatprep.subr.bf16.mxu1 %v3210_v21  ;;  %v3220_v30 = vld [vmem:[%s4269_s10 + $0x64] ss:$16 sps:$4 sm:$0xff]   ;;  %v3224_v32 = vld [vmem:[%s4269_s10 + $0x60] ss:$16 sps:$4 sm:$0xff]   ;;  %v1037_v14 = vcombine.high %v4285_v16, %v4285_v16  ;;  %p3591_p8 = pnand %p3590_p7, %p3584_p3 }
  0xaa   : > { %v3222_v31 = vld [vmem:[%s4269_s10 + $0x264] ss:$16 sps:$4 sm:$0xff]   ;;  %v3225_v33 = vld [vmem:[%s4269_s10 + $0x260] ss:$16 sps:$4 sm:$0xff]  }
  0xab   : > { %v4300_v25 = vrot.slane %v1036_v19, %v4276_v11  ;;  %2363 = vmatpush1.bf16.msra.mxu0 %v3212_v22  ;;  %v3226_v34 = vld [vmem:[%s4269_s10 + $0x44] ss:$16 sps:$4 sm:$0xff]   ;;  %v3230_v36 = vld [vmem:[%s4269_s10 + $0x40] ss:$16 sps:$4 sm:$0xff]   ;;  %v4363_v19 = vrot.slane %v4282_v15, %v4276_v11 }
  0xac   : > { %2404 = vmatpush1.bf16.msra.mxu1 %v3213_v23  ;;  %2364 = vmatprep.subr.bf16.mxu0 %v3214_v24  ;;  %v3228_v35 = vld [vmem:[%s4269_s10 + $0x244] ss:$16 sps:$4 sm:$0xff]   ;;  %v3231_v37 = vld [vmem:[%s4269_s10 + $0x240] ss:$16 sps:$4 sm:$0xff]   ;;  %v4368_v23 = vrot.slane %v1037_v14, %v4276_v11 }
  0xad   : > { %2390 = vmatprep.mubr.bf16.mxu0 %v4300_v25  ;;  %v4306_v27 = vcombine.high %v4300_v25, %v4300_v25  ;;  %2405 = vmatprep.subr.bf16.mxu1 %v3216_v26  ;;  %v3232_v38 = vld [vmem:[%s4269_s10 + $0x24] ss:$16 sps:$4 sm:$0xff]   ;;  %v3236_v40 = vld [vmem:[%s4269_s10 + $0x20] ss:$16 sps:$4 sm:$0xff]   ;;  %v4372_v16 = vcombine.high %v4363_v19, %v4363_v19 }
  0xae   : > { %v3234_v39 = vld [vmem:[%s4269_s10 + $0x224] ss:$16 sps:$4 sm:$0xff]   ;;  %v3237_v41 = vld [vmem:[%s4269_s10 + $0x220] ss:$16 sps:$4 sm:$0xff]   ;;  %v4380_v11 = vcombine.high %v4368_v23, %v4368_v23 }
  0xaf   : > { %2431 = vmatprep.mubr.bf16.mxu1 %v4306_v27  ;;  %2365 = vmatpush1.bf16.msra.mxu0 %v3218_v28  ;;  %v3238_v42 = vld [vmem:[%s4269_s10 + $0x4] ss:$16 sps:$4 sm:$0xff]   ;;  %v3242_v44 = vld [vmem:[%s4269_s10] ss:$16 sps:$4 sm:$0xff]  }
  0xb0   : > { %2406 = vmatpush1.bf16.msra.mxu1 %v3219_v29  ;;  %2366 = vmatprep.subr.bf16.mxu0 %v3220_v30  ;;  %v3240_v43 = vld [vmem:[%s4269_s10 + $0x204] ss:$16 sps:$4 sm:$0xff]   ;;  %v3243_v45 = vld [vmem:[%s4269_s10 + $0x200] ss:$16 sps:$4 sm:$0xff]  }
  0xb1   : > { %2407 = vmatprep.subr.bf16.mxu1 %v3222_v31  ;;  %v3244_v46 = vld [vmem:[%s4269_s10 + $0x1e4] ss:$16 sps:$4 sm:$0xff]   ;;  %v3248_v48 = vld [vmem:[%s4269_s10 + $0x1e0] ss:$16 sps:$4 sm:$0xff]  }
  0xb2   : > { %v3246_v47 = vld [vmem:[%s4269_s10 + $0x3e4] ss:$16 sps:$4 sm:$0xff]   ;;  %v3249_v49 = vld [vmem:[%s4269_s10 + $0x3e0] ss:$16 sps:$4 sm:$0xff]  }
  0xb3   : > { %2367 = vmatpush1.bf16.msra.mxu0 %v3224_v32  ;;  %v3250_v50 = vld [vmem:[%s4269_s10 + $0x1c4] ss:$16 sps:$4 sm:$0xff]   ;;  %v3254_v52 = vld [vmem:[%s4269_s10 + $0x1c0] ss:$16 sps:$4 sm:$0xff]  }
  0xb4   : > { %2408 = vmatpush1.bf16.msra.mxu1 %v3225_v33  ;;  %2368 = vmatprep.subr.bf16.mxu0 %v3226_v34  ;;  %v3252_v51 = vld [vmem:[%s4269_s10 + $0x3c4] ss:$16 sps:$4 sm:$0xff]   ;;  %v3255_v53 = vld [vmem:[%s4269_s10 + $0x3c0] ss:$16 sps:$4 sm:$0xff]  }
  0xb5   : > { %2409 = vmatprep.subr.bf16.mxu1 %v3228_v35  ;;  %v3256_v54 = vld [vmem:[%s4269_s10 + $0x1a4] ss:$16 sps:$4 sm:$0xff]   ;;  %v3260_v56 = vld [vmem:[%s4269_s10 + $0x1a0] ss:$16 sps:$4 sm:$0xff]  }
  0xb6   : > { %v3258_v55 = vld [vmem:[%s4269_s10 + $0x3a4] ss:$16 sps:$4 sm:$0xff]   ;;  %v3261_v57 = vld [vmem:[%s4269_s10 + $0x3a0] ss:$16 sps:$4 sm:$0xff]  }
  0xb7   : > { %2369 = vmatpush1.bf16.msra.mxu0 %v3230_v36  ;;  %v3262_v58 = vld [vmem:[%s4269_s10 + $0x184] ss:$16 sps:$4 sm:$0xff]   ;;  %v3266_v60 = vld [vmem:[%s4269_s10 + $0x180] ss:$16 sps:$4 sm:$0xff]  }
  0xb8   : > { %2410 = vmatpush1.bf16.msra.mxu1 %v3231_v37  ;;  %2370 = vmatprep.subr.bf16.mxu0 %v3232_v38  ;;  %v3264_v59 = vld [vmem:[%s4269_s10 + $0x384] ss:$16 sps:$4 sm:$0xff]   ;;  %v3267_v61 = vld [vmem:[%s4269_s10 + $0x380] ss:$16 sps:$4 sm:$0xff]  }
  0xb9   : > { %2411 = vmatprep.subr.bf16.mxu1 %v3234_v39  ;;  %v3268_v62 = vld [vmem:[%s4269_s10 + $0x164] ss:$16 sps:$4 sm:$0xff]   ;;  %v3272_v0 = vld [vmem:[%s4269_s10 + $0x160] ss:$16 sps:$4 sm:$0xff]  }
  0xba   : > { %v3270_v63 = vld [vmem:[%s4269_s10 + $0x364] ss:$16 sps:$4 sm:$0xff]   ;;  %v3273_v1 = vld [vmem:[%s4269_s10 + $0x360] ss:$16 sps:$4 sm:$0xff]  }
  0xbb   : > { %2371 = vmatpush1.bf16.msra.mxu0 %v3236_v40  ;;  %v3274_v2 = vld [vmem:[%s4269_s10 + $0x144] ss:$16 sps:$4 sm:$0xff]   ;;  %v3278_v5 = vld [vmem:[%s4269_s10 + $0x140] ss:$16 sps:$4 sm:$0xff]  }
  0xbc   : > { %2412 = vmatpush1.bf16.msra.mxu1 %v3237_v41  ;;  %2372 = vmatprep.subr.bf16.mxu0 %v3238_v42  ;;  %v3276_v3 = vld [vmem:[%s4269_s10 + $0x344] ss:$16 sps:$4 sm:$0xff]   ;;  %v3279_v6 = vld [vmem:[%s4269_s10 + $0x340] ss:$16 sps:$4 sm:$0xff]  }
  0xbd   : > { %2413 = vmatprep.subr.bf16.mxu1 %v3240_v43  ;;  %v3280_v7 = vld [vmem:[%s4269_s10 + $0x124] ss:$16 sps:$4 sm:$0xff]   ;;  %v3284_v9 = vld [vmem:[%s4269_s10 + $0x120] ss:$16 sps:$4 sm:$0xff]  }
  0xbe   : > { %v3282_v8 = vld [vmem:[%s4269_s10 + $0x324] ss:$16 sps:$4 sm:$0xff]   ;;  %v3285_v10 = vld [vmem:[%s4269_s10 + $0x320] ss:$16 sps:$4 sm:$0xff]  }
  0xbf   : > { %2373 = vmatpush1.bf16.msra.mxu0 %v3242_v44  ;;  %v3286_v12 = vld [vmem:[%s4269_s10 + $0x104] ss:$16 sps:$4 sm:$0xff]   ;;  %v3290_v17 = vld [vmem:[%s4269_s10 + $0x100] ss:$16 sps:$4 sm:$0xff]  }
  0xc0   : > { %2414 = vmatpush1.bf16.msra.mxu1 %v3243_v45  ;;  %2374 = vmatprep.subr.bf16.mxu0 %v3244_v46  ;;  %v3288_v13 = vld [vmem:[%s4269_s10 + $0x304] ss:$16 sps:$4 sm:$0xff]   ;;  %v3291_v18 = vld [vmem:[%s4269_s10 + $0x300] ss:$16 sps:$4 sm:$0xff]  }
  0xc1   : > { %2415 = vmatprep.subr.bf16.mxu1 %v3246_v47  ;;  %v3294_v21 = vld [vmem:[%s4269_s10 + $0x4e4] ss:$16 sps:$4 sm:$0xff]   ;;  %v3292_v24 = vld [vmem:[%s4269_s10 + $0x4e0] ss:$16 sps:$4 sm:$0xff]  }
  0xc2   : > { %v3297_v22 = vld [vmem:[%s4269_s10 + $0x6e4] ss:$16 sps:$4 sm:$0xff]   ;;  %v3295_v15 = vld [vmem:[%s4269_s10 + $0x6e0] ss:$16 sps:$4 sm:$0xff]  }
  0xc3   : > { %2375 = vmatpush2.bf16.msra.mxu0 %v3248_v48  ;;  %v3300_v26 = vld [vmem:[%s4269_s10 + $0x4c4] ss:$16 sps:$4 sm:$0xff]   ;;  %v3298_v29 = vld [vmem:[%s4269_s10 + $0x4c0] ss:$16 sps:$4 sm:$0xff]  }
  0xc4   : > { %2416 = vmatpush2.bf16.msra.mxu1 %v3249_v49  ;;  %2376 = vmatprep.subr.bf16.mxu0 %v3250_v50  ;;  %v3303_v28 = vld [vmem:[%s4269_s10 + $0x6c4] ss:$16 sps:$4 sm:$0xff]   ;;  %v3301_v30 = vld [vmem:[%s4269_s10 + $0x6c0] ss:$16 sps:$4 sm:$0xff]  }
  0xc5   : > { %2417 = vmatprep.subr.bf16.mxu1 %v3252_v51  ;;  %v3306_v31 = vld [vmem:[%s4269_s10 + $0x4a4] ss:$16 sps:$4 sm:$0xff]   ;;  %v3304_v33 = vld [vmem:[%s4269_s10 + $0x4a0] ss:$16 sps:$4 sm:$0xff]  }
  0xc6   : > { %v3309_v32 = vld [vmem:[%s4269_s10 + $0x6a4] ss:$16 sps:$4 sm:$0xff]   ;;  %v3307_v34 = vld [vmem:[%s4269_s10 + $0x6a0] ss:$16 sps:$4 sm:$0xff]  }
  0xc7   : > { %2377 = vmatpush2.bf16.msra.mxu0 %v3254_v52  ;;  %v3312_v35 = vld [vmem:[%s4269_s10 + $0x484] ss:$16 sps:$4 sm:$0xff]   ;;  %v3310_v37 = vld [vmem:[%s4269_s10 + $0x480] ss:$16 sps:$4 sm:$0xff]  }
  0xc8   : > { %2418 = vmatpush2.bf16.msra.mxu1 %v3255_v53  ;;  %2378 = vmatprep.subr.bf16.mxu0 %v3256_v54  ;;  %v3315_v36 = vld [vmem:[%s4269_s10 + $0x684] ss:$16 sps:$4 sm:$0xff]   ;;  %v3313_v38 = vld [vmem:[%s4269_s10 + $0x680] ss:$16 sps:$4 sm:$0xff]  }
  0xc9   : > { %2419 = vmatprep.subr.bf16.mxu1 %v3258_v55  ;;  %v3318_v39 = vld [vmem:[%s4269_s10 + $0x464] ss:$16 sps:$4 sm:$0xff]   ;;  %v3316_v41 = vld [vmem:[%s4269_s10 + $0x460] ss:$16 sps:$4 sm:$0xff]  }
  0xca   : > { %v3321_v40 = vld [vmem:[%s4269_s10 + $0x664] ss:$16 sps:$4 sm:$0xff]   ;;  %v3319_v42 = vld [vmem:[%s4269_s10 + $0x660] ss:$16 sps:$4 sm:$0xff]  }
  0xcb   : > { %2379 = vmatpush2.bf16.msra.mxu0 %v3260_v56  ;;  %v3324_v43 = vld [vmem:[%s4269_s10 + $0x444] ss:$16 sps:$4 sm:$0xff]   ;;  %v3322_v45 = vld [vmem:[%s4269_s10 + $0x440] ss:$16 sps:$4 sm:$0xff]  }
  0xcc   : > { %2420 = vmatpush2.bf16.msra.mxu1 %v3261_v57  ;;  %2380 = vmatprep.subr.bf16.mxu0 %v3262_v58  ;;  %v3327_v44 = vld [vmem:[%s4269_s10 + $0x644] ss:$16 sps:$4 sm:$0xff]   ;;  %v3325_v46 = vld [vmem:[%s4269_s10 + $0x640] ss:$16 sps:$4 sm:$0xff]  }
  0xcd   : > { %2421 = vmatprep.subr.bf16.mxu1 %v3264_v59  ;;  %v3330_v47 = vld [vmem:[%s4269_s10 + $0x424] ss:$16 sps:$4 sm:$0xff]   ;;  %v3328_v49 = vld [vmem:[%s4269_s10 + $0x420] ss:$16 sps:$4 sm:$0xff]  }
  0xce   : > { %v3333_v48 = vld [vmem:[%s4269_s10 + $0x624] ss:$16 sps:$4 sm:$0xff]   ;;  %v3331_v50 = vld [vmem:[%s4269_s10 + $0x620] ss:$16 sps:$4 sm:$0xff]  }
  0xcf   : > { %2381 = vmatpush2.bf16.msra.mxu0 %v3266_v60  ;;  %v3336_v51 = vld [vmem:[%s4269_s10 + $0x404] ss:$16 sps:$4 sm:$0xff]   ;;  %v3334_v53 = vld [vmem:[%s4269_s10 + $0x400] ss:$16 sps:$4 sm:$0xff]  }
  0xd0   : > { %2422 = vmatpush2.bf16.msra.mxu1 %v3267_v61  ;;  %2382 = vmatprep.subr.bf16.mxu0 %v3268_v62  ;;  %v3339_v52 = vld [vmem:[%s4269_s10 + $0x604] ss:$16 sps:$4 sm:$0xff]   ;;  %v3337_v54 = vld [vmem:[%s4269_s10 + $0x600] ss:$16 sps:$4 sm:$0xff]  }
  0xd1   : > { %2423 = vmatprep.subr.bf16.mxu1 %v3270_v63  ;;  %v3342_v55 = vld [vmem:[%s4269_s10 + $0x5e4] ss:$16 sps:$4 sm:$0xff]   ;;  %v3340_v57 = vld [vmem:[%s4269_s10 + $0x5e0] ss:$16 sps:$4 sm:$0xff]  }
  0xd2   : > { %v3345_v56 = vld [vmem:[%s4269_s10 + $0x7e4] ss:$16 sps:$4 sm:$0xff]   ;;  %v3343_v58 = vld [vmem:[%s4269_s10 + $0x7e0] ss:$16 sps:$4 sm:$0xff]  }
  0xd3   : > { %2383 = vmatpush2.bf16.msra.mxu0 %v3272_v0  ;;  %v3348_v59 = vld [vmem:[%s4269_s10 + $0x5c4] ss:$16 sps:$4 sm:$0xff]   ;;  %v3346_v61 = vld [vmem:[%s4269_s10 + $0x5c0] ss:$16 sps:$4 sm:$0xff]  }
  0xd4   : > { %2424 = vmatpush2.bf16.msra.mxu1 %v3273_v1  ;;  %2384 = vmatprep.subr.bf16.mxu0 %v3274_v2  ;;  %v3351_v60 = vld [vmem:[%s4269_s10 + $0x7c4] ss:$16 sps:$4 sm:$0xff]   ;;  %v3349_v62 = vld [vmem:[%s4269_s10 + $0x7c0] ss:$16 sps:$4 sm:$0xff]  }
  0xd5   : > { %2425 = vmatprep.subr.bf16.mxu1 %v3276_v3  ;;  %v3354_v63 = vld [vmem:[%s4269_s10 + $0x5a4] ss:$16 sps:$4 sm:$0xff]   ;;  %v3352_v1 = vld [vmem:[%s4269_s10 + $0x5a0] ss:$16 sps:$4 sm:$0xff]  }
  0xd6   : > { %v3357_v0 = vld [vmem:[%s4269_s10 + $0x7a4] ss:$16 sps:$4 sm:$0xff]   ;;  %v3355_v2 = vld [vmem:[%s4269_s10 + $0x7a0] ss:$16 sps:$4 sm:$0xff]  }
  0xd7   : > { %2385 = vmatpush2.bf16.msra.mxu0 %v3278_v5  ;;  %v3360_v3 = vld [vmem:[%s4269_s10 + $0x584] ss:$16 sps:$4 sm:$0xff]  }
  0xd8   : > { %2426 = vmatpush2.bf16.msra.mxu1 %v3279_v6  ;;  %2386 = vmatprep.subr.bf16.mxu0 %v3280_v7  ;;  %v3363_v5 = vld [vmem:[%s4269_s10 + $0x784] ss:$16 sps:$4 sm:$0xff]   ;;  %v3358_v6 = vld [vmem:[%s4269_s10 + $0x580] ss:$16 sps:$4 sm:$0xff]  }
  0xd9   : > { %2427 = vmatprep.subr.bf16.mxu1 %v3282_v8  ;;  %v3361_v7 = vld [vmem:[%s4269_s10 + $0x780] ss:$16 sps:$4 sm:$0xff]   ;;  %v3366_v8 = vld [vmem:[%s4269_s10 + $0x564] ss:$16 sps:$4 sm:$0xff]  }
  0xda   : > { %v3375_v14 = vld [vmem:[%s4269_s10 + $0x744] ss:$16 sps:$4 sm:$0xff]  }
  0xdb   : > { %2387 = vmatpush2.bf16.msra.mxu0 %v3284_v9  ;;  %v3369_v9 = vld [vmem:[%s4269_s10 + $0x764] ss:$16 sps:$4 sm:$0xff]  }
  0xdc   : > { %2428 = vmatpush2.bf16.msra.mxu1 %v3285_v10  ;;  %2388 = vmatprep.subr.bf16.mxu0 %v3286_v12  ;;  %v3364_v10 = vld [vmem:[%s4269_s10 + $0x560] ss:$16 sps:$4 sm:$0xff]  }
  0xdd   : > { %2429 = vmatprep.subr.bf16.mxu1 %v3288_v13  ;;  %v3367_v12 = vld [vmem:[%s4269_s10 + $0x760] ss:$16 sps:$4 sm:$0xff]   ;;  %v3372_v13 = vld [vmem:[%s4269_s10 + $0x544] ss:$16 sps:$4 sm:$0xff]  }
  0xdf   : > { %2389 = vmatpush2.bf16.msra.mxu0 %v3290_v17  ;;  %v3370_v17 = vld [vmem:[%s4269_s10 + $0x540] ss:$16 sps:$4 sm:$0xff]  }
  0xe0   : > { %2430 = vmatpush2.bf16.msra.mxu1 %v3291_v18  ;;  %2440 = vmatprep.subr.bf16.mxu0 %v3294_v21  ;;  %v3373_v18 = vld [vmem:[%s4269_s10 + $0x740] ss:$16 sps:$4 sm:$0xff]   ;;  %v3378_v21 = vld [vmem:[%s4269_s10 + $0x524] ss:$16 sps:$4 sm:$0xff]  }
  0xe1   : > { %2481 = vmatprep.subr.bf16.mxu1 %v3297_v22  ;;  %v3381_v22 = vld [vmem:[%s4269_s10 + $0x724] ss:$16 sps:$4 sm:$0xff]  }
  0xe2   : > { %2391 = vmatmul.mubr.bf16.vlgmr.msra.gmra.mxu0 %v4363_v19 }
  0xe3   : > { %2432 = vmatmul.mubr.bf16.vlgmr.msra.gmra.mxu1 %v4372_v16  ;;  %2441 = vmatpush1.bf16.msra.mxu0 %v3292_v24  ;;  %v3376_v24 = vld [vmem:[%s4269_s10 + $0x520] ss:$16 sps:$4 sm:$0xff]  }
  0xe4   : > { %2482 = vmatpush1.bf16.msra.mxu1 %v3295_v15  ;;  %2442 = vmatprep.subr.bf16.mxu0 %v3300_v26  ;;  %v3379_v15 = vld [vmem:[%s4269_s10 + $0x720] ss:$16 sps:$4 sm:$0xff]   ;;  %v3384_v26 = vld [vmem:[%s4269_s10 + $0x504] ss:$16 sps:$4 sm:$0xff]  }
  0xe5   : > { %2483 = vmatprep.subr.bf16.mxu1 %v3303_v28  ;;  %2472 = vmatprep.mubr.bf16.mxu0 %v4368_v23  ;;  %v3387_v28 = vld [vmem:[%s4269_s10 + $0x704] ss:$16 sps:$4 sm:$0xff]  }
  0xe6   : > { %2513 = vmatprep.mubr.bf16.mxu1 %v4380_v11 }
  0xe7   : > { %2443 = vmatpush1.bf16.msra.mxu0 %v3298_v29  ;;  %v3382_v29 = vld [vmem:[%s4269_s10 + $0x500] ss:$16 sps:$4 sm:$0xff]  }
  0xe8   : > { %2484 = vmatpush1.bf16.msra.mxu1 %v3301_v30  ;;  %2444 = vmatprep.subr.bf16.mxu0 %v3306_v31  ;;  %v3385_v30 = vld [vmem:[%s4269_s10 + $0x700] ss:$16 sps:$4 sm:$0xff]   ;;  %v3391_v31 = vld [vmem:[%s4269_s10 + $0xec] ss:$16 sps:$4 sm:$0xff]  }
  0xe9   : > { %2485 = vmatprep.subr.bf16.mxu1 %v3309_v32  ;;  %v3394_v32 = vld [vmem:[%s4269_s10 + $0x2ec] ss:$16 sps:$4 sm:$0xff]  }
  0xeb   : > { %2445 = vmatpush1.bf16.msra.mxu0 %v3304_v33  ;;  %v4448_v33 = vcombine.high %v4293_v20, %v4293_v20 }
  0xec   : > { %2486 = vmatpush1.bf16.msra.mxu1 %v3307_v34  ;;  %2446 = vmatprep.subr.bf16.mxu0 %v3312_v35  ;;  %v3389_v34 = vld [vmem:[%s4269_s10 + $0xe8] ss:$16 sps:$4 sm:$0xff]  }
  0xed   : > { %2487 = vmatprep.subr.bf16.mxu1 %v3315_v36  ;;  %v3392_v35 = vld [vmem:[%s4269_s10 + $0x2e8] ss:$16 sps:$4 sm:$0xff]   ;;  %v3397_v36 = vld [vmem:[%s4269_s10 + $0xcc] ss:$16 sps:$4 sm:$0xff]  }
  0xef   : > { %2447 = vmatpush1.bf16.msra.mxu0 %v3310_v37  ;;  %v3400_v37 = vld [vmem:[%s4269_s10 + $0x2cc] ss:$16 sps:$4 sm:$0xff]  }
  0xf0   : > { %2488 = vmatpush1.bf16.msra.mxu1 %v3313_v38  ;;  %2448 = vmatprep.subr.bf16.mxu0 %v3318_v39  ;;  %v3395_v38 = vld [vmem:[%s4269_s10 + $0xc8] ss:$16 sps:$4 sm:$0xff]  }
  0xf1   : > { %2489 = vmatprep.subr.bf16.mxu1 %v3321_v40  ;;  %v3398_v39 = vld [vmem:[%s4269_s10 + $0x2c8] ss:$16 sps:$4 sm:$0xff]   ;;  %v3403_v40 = vld [vmem:[%s4269_s10 + $0xac] ss:$16 sps:$4 sm:$0xff]  }
  0xf3   : > { %2449 = vmatpush1.bf16.msra.mxu0 %v3316_v41  ;;  %v3406_v41 = vld [vmem:[%s4269_s10 + $0x2ac] ss:$16 sps:$4 sm:$0xff]  }
  0xf4   : > { %2490 = vmatpush1.bf16.msra.mxu1 %v3319_v42  ;;  %2450 = vmatprep.subr.bf16.mxu0 %v3324_v43  ;;  %v3401_v42 = vld [vmem:[%s4269_s10 + $0xa8] ss:$16 sps:$4 sm:$0xff]  }
  0xf5   : > { %2491 = vmatprep.subr.bf16.mxu1 %v3327_v44  ;;  %v3404_v43 = vld [vmem:[%s4269_s10 + $0x2a8] ss:$16 sps:$4 sm:$0xff]   ;;  %v3409_v44 = vld [vmem:[%s4269_s10 + $0x8c] ss:$16 sps:$4 sm:$0xff]  }
  0xf7   : > { %2451 = vmatpush1.bf16.msra.mxu0 %v3322_v45  ;;  %v3412_v45 = vld [vmem:[%s4269_s10 + $0x28c] ss:$16 sps:$4 sm:$0xff]  }
  0xf8   : > { %2492 = vmatpush1.bf16.msra.mxu1 %v3325_v46  ;;  %2452 = vmatprep.subr.bf16.mxu0 %v3330_v47  ;;  %v3407_v46 = vld [vmem:[%s4269_s10 + $0x88] ss:$16 sps:$4 sm:$0xff]  }
  0xf9   : > { %2493 = vmatprep.subr.bf16.mxu1 %v3333_v48  ;;  %v3410_v47 = vld [vmem:[%s4269_s10 + $0x288] ss:$16 sps:$4 sm:$0xff]  }
  0xfa   : > { %v3413_v48 = vld [vmem:[%s4269_s10 + $0x68] ss:$16 sps:$4 sm:$0xff]  }
  0xfb   : > { %2453 = vmatpush1.bf16.msra.mxu0 %v3328_v49  ;;  %v3416_v49 = vld [vmem:[%s4269_s10 + $0x268] ss:$16 sps:$4 sm:$0xff]  }
  0xfc   : > { %2494 = vmatpush1.bf16.msra.mxu1 %v3331_v50  ;;  %2454 = vmatprep.subr.bf16.mxu0 %v3336_v51  ;;  %v3421_v50 = vld [vmem:[%s4269_s10 + $0x4c] ss:$16 sps:$4 sm:$0xff]  }
  0xfd   : > { %2495 = vmatprep.subr.bf16.mxu1 %v3339_v52  ;;  %v3424_v51 = vld [vmem:[%s4269_s10 + $0x24c] ss:$16 sps:$4 sm:$0xff]   ;;  %v3419_v52 = vld [vmem:[%s4269_s10 + $0x48] ss:$16 sps:$4 sm:$0xff]  }
  0xff   : > { %2455 = vmatpush1.bf16.msra.mxu0 %v3334_v53  ;;  %v3422_v53 = vld [vmem:[%s4269_s10 + $0x248] ss:$16 sps:$4 sm:$0xff]  }
 0x100   : > { %2496 = vmatpush1.bf16.msra.mxu1 %v3337_v54  ;;  %2456 = vmatprep.subr.bf16.mxu0 %v3342_v55  ;;  %v3427_v54 = vld [vmem:[%s4269_s10 + $0x2c] ss:$16 sps:$4 sm:$0xff]  }
 0x101   : > { %2497 = vmatprep.subr.bf16.mxu1 %v3345_v56  ;;  %v3430_v55 = vld [vmem:[%s4269_s10 + $0x22c] ss:$16 sps:$4 sm:$0xff]   ;;  %v3425_v56 = vld [vmem:[%s4269_s10 + $0x28] ss:$16 sps:$4 sm:$0xff]  }
 0x103   : > { %2457 = vmatpush2.bf16.msra.mxu0 %v3340_v57  ;;  %v3428_v57 = vld [vmem:[%s4269_s10 + $0x228] ss:$16 sps:$4 sm:$0xff]  }
 0x104   : > { %2498 = vmatpush2.bf16.msra.mxu1 %v3343_v58  ;;  %2458 = vmatprep.subr.bf16.mxu0 %v3348_v59  ;;  %v3433_v58 = vld [vmem:[%s4269_s10 + $0xc] ss:$16 sps:$4 sm:$0xff]  }
 0x105   : > { %2499 = vmatprep.subr.bf16.mxu1 %v3351_v60  ;;  %v3436_v59 = vld [vmem:[%s4269_s10 + $0x20c] ss:$16 sps:$4 sm:$0xff]   ;;  %v3431_v60 = vld [vmem:[%s4269_s10 + $0x8] ss:$16 sps:$4 sm:$0xff]  }
 0x107   : > { %2459 = vmatpush2.bf16.msra.mxu0 %v3346_v61  ;;  %v3434_v61 = vld [vmem:[%s4269_s10 + $0x208] ss:$16 sps:$4 sm:$0xff]  }
 0x108   : > { %2500 = vmatpush2.bf16.msra.mxu1 %v3349_v62  ;;  %2460 = vmatprep.subr.bf16.mxu0 %v3354_v63  ;;  %v3439_v62 = vld [vmem:[%s4269_s10 + $0x1ec] ss:$16 sps:$4 sm:$0xff]  }
 0x109   : > { %2501 = vmatprep.subr.bf16.mxu1 %v3357_v0  ;;  %v3442_v63 = vld [vmem:[%s4269_s10 + $0x3ec] ss:$16 sps:$4 sm:$0xff]   ;;  %v3437_v0 = vld [vmem:[%s4269_s10 + $0x1e8] ss:$16 sps:$4 sm:$0xff]  }
 0x10b   : > { %2461 = vmatpush2.bf16.msra.mxu0 %v3352_v1  ;;  %v3440_v1 = vld [vmem:[%s4269_s10 + $0x3e8] ss:$16 sps:$4 sm:$0xff]  }
 0x10c   : > { %2502 = vmatpush2.bf16.msra.mxu1 %v3355_v2  ;;  %2462 = vmatprep.subr.bf16.mxu0 %v3360_v3  ;;  %v3445_v2 = vld [vmem:[%s4269_s10 + $0x1cc] ss:$16 sps:$4 sm:$0xff]  }
 0x10d   : > { %2503 = vmatprep.subr.bf16.mxu1 %v3363_v5  ;;  %v3448_v3 = vld [vmem:[%s4269_s10 + $0x3cc] ss:$16 sps:$4 sm:$0xff]   ;;  %v3443_v5 = vld [vmem:[%s4269_s10 + $0x1c8] ss:$16 sps:$4 sm:$0xff]  }
 0x10f   : > { %2463 = vmatpush2.bf16.msra.mxu0 %v3358_v6  ;;  %v3446_v6 = vld [vmem:[%s4269_s10 + $0x3c8] ss:$16 sps:$4 sm:$0xff]  }
 0x110   : > { %2504 = vmatpush2.bf16.msra.mxu1 %v3361_v7  ;;  %2464 = vmatprep.subr.bf16.mxu0 %v3366_v8  ;;  %v3451_v7 = vld [vmem:[%s4269_s10 + $0x1ac] ss:$16 sps:$4 sm:$0xff]  }
 0x111   : > { %2505 = vmatprep.subr.bf16.mxu1 %v3369_v9  ;;  %v3454_v8 = vld [vmem:[%s4269_s10 + $0x3ac] ss:$16 sps:$4 sm:$0xff]   ;;  %v3449_v9 = vld [vmem:[%s4269_s10 + $0x1a8] ss:$16 sps:$4 sm:$0xff]  }
 0x113   : > { %2465 = vmatpush2.bf16.msra.mxu0 %v3364_v10  ;;  %v3452_v10 = vld [vmem:[%s4269_s10 + $0x3a8] ss:$16 sps:$4 sm:$0xff]  }
 0x114   : > { %2506 = vmatpush2.bf16.msra.mxu1 %v3367_v12  ;;  %2466 = vmatprep.subr.bf16.mxu0 %v3372_v13  ;;  %v3457_v12 = vld [vmem:[%s4269_s10 + $0x18c] ss:$16 sps:$4 sm:$0xff]  }
 0x115   : > { %2507 = vmatprep.subr.bf16.mxu1 %v3375_v14  ;;  %v3460_v13 = vld [vmem:[%s4269_s10 + $0x38c] ss:$16 sps:$4 sm:$0xff]   ;;  %v3455_v14 = vld [vmem:[%s4269_s10 + $0x188] ss:$16 sps:$4 sm:$0xff]  }
 0x117   : > { %2467 = vmatpush2.bf16.msra.mxu0 %v3370_v17  ;;  %v3458_v17 = vld [vmem:[%s4269_s10 + $0x388] ss:$16 sps:$4 sm:$0xff]  }
 0x118   : > { %2508 = vmatpush2.bf16.msra.mxu1 %v3373_v18  ;;  %2468 = vmatprep.subr.bf16.mxu0 %v3378_v21  ;;  %v3463_v18 = vld [vmem:[%s4269_s10 + $0x16c] ss:$16 sps:$4 sm:$0xff]  }
 0x119   : > { %2509 = vmatprep.subr.bf16.mxu1 %v3381_v22  ;;  %v3466_v21 = vld [vmem:[%s4269_s10 + $0x36c] ss:$16 sps:$4 sm:$0xff]   ;;  %v3461_v22 = vld [vmem:[%s4269_s10 + $0x168] ss:$16 sps:$4 sm:$0xff]  }
 0x11b   : > { %2469 = vmatpush2.bf16.msra.mxu0 %v3376_v24  ;;  %v3464_v24 = vld [vmem:[%s4269_s10 + $0x368] ss:$16 sps:$4 sm:$0xff]  }
 0x11c   : > { %2510 = vmatpush2.bf16.msra.mxu1 %v3379_v15  ;;  %2470 = vmatprep.subr.bf16.mxu0 %v3384_v26  ;;  %v3469_v15 = vld [vmem:[%s4269_s10 + $0x14c] ss:$16 sps:$4 sm:$0xff]  }
 0x11d   : > { %2511 = vmatprep.subr.bf16.mxu1 %v3387_v28  ;;  %v3472_v26 = vld [vmem:[%s4269_s10 + $0x34c] ss:$16 sps:$4 sm:$0xff]   ;;  %v3467_v28 = vld [vmem:[%s4269_s10 + $0x148] ss:$16 sps:$4 sm:$0xff]  }
 0x11f   : > { %2471 = vmatpush2.bf16.msra.mxu0 %v3382_v29  ;;  %v3470_v29 = vld [vmem:[%s4269_s10 + $0x348] ss:$16 sps:$4 sm:$0xff]  }
 0x120   : > { %2512 = vmatpush2.bf16.msra.mxu1 %v3385_v30  ;;  %2522 = vmatprep.subr.bf16.mxu0 %v3391_v31  ;;  %v3475_v30 = vld [vmem:[%s4269_s10 + $0x12c] ss:$16 sps:$4 sm:$0xff]  }
 0x121   : > { %2563 = vmatprep.subr.bf16.mxu1 %v3394_v32  ;;  %v3478_v31 = vld [vmem:[%s4269_s10 + $0x32c] ss:$16 sps:$4 sm:$0xff]   ;;  %v3473_v32 = vld [vmem:[%s4269_s10 + $0x128] ss:$16 sps:$4 sm:$0xff]  }
 0x122   : > { %2473 = vmatmul.mubr.bf16.vlgmr.msra.gmra.mxu0 %v4293_v20 }
 0x123   : > { %2514 = vmatmul.mubr.bf16.vlgmr.msra.gmra.mxu1 %v4448_v33  ;;  %2523 = vmatpush1.bf16.msra.mxu0 %v3389_v34  ;;  %v3476_v34 = vld [vmem:[%s4269_s10 + $0x328] ss:$16 sps:$4 sm:$0xff]  }
 0x124   : > { %2564 = vmatpush1.bf16.msra.mxu1 %v3392_v35  ;;  %2524 = vmatprep.subr.bf16.mxu0 %v3397_v36  ;;  %v3481_v35 = vld [vmem:[%s4269_s10 + $0x10c] ss:$16 sps:$4 sm:$0xff]  }
 0x125   : > { %2565 = vmatprep.subr.bf16.mxu1 %v3400_v37  ;;  %2554 = vmatprep.mubr.bf16.mxu0 %v4300_v25  ;;  %v3415_v25 = vld [vmem:[%s4269_s10 + $0x6c] ss:$16 sps:$4 sm:$0xff]   ;;  %v3479_v37 = vld [vmem:[%s4269_s10 + $0x108] ss:$16 sps:$4 sm:$0xff]  }
 0x126   : > { %2595 = vmatprep.mubr.bf16.mxu1 %v4306_v27  ;;  %v3418_v27 = vld [vmem:[%s4269_s10 + $0x26c] ss:$16 sps:$4 sm:$0xff]  }
 0x127   : > { %2525 = vmatpush1.bf16.msra.mxu0 %v3395_v38  ;;  %v3484_v36 = vld [vmem:[%s4269_s10 + $0x30c] ss:$16 sps:$4 sm:$0xff]   ;;  %v3482_v38 = vld [vmem:[%s4269_s10 + $0x308] ss:$16 sps:$4 sm:$0xff]  }
 0x128   : > { %2566 = vmatpush1.bf16.msra.mxu1 %v3398_v39  ;;  %2526 = vmatprep.subr.bf16.mxu0 %v3403_v40  ;;  %v3487_v39 = vld [vmem:[%s4269_s10 + $0x4ec] ss:$16 sps:$4 sm:$0xff]  }
 0x129   : > { %2567 = vmatprep.subr.bf16.mxu1 %v3406_v41  ;;  %v3490_v40 = vld [vmem:[%s4269_s10 + $0x6ec] ss:$16 sps:$4 sm:$0xff]   ;;  %v3485_v41 = vld [vmem:[%s4269_s10 + $0x4e8] ss:$16 sps:$4 sm:$0xff]  }
 0x12b   : > { %2527 = vmatpush1.bf16.msra.mxu0 %v3401_v42  ;;  %v3488_v42 = vld [vmem:[%s4269_s10 + $0x6e8] ss:$16 sps:$4 sm:$0xff]  }
 0x12c   : > { %2568 = vmatpush1.bf16.msra.mxu1 %v3404_v43  ;;  %2528 = vmatprep.subr.bf16.mxu0 %v3409_v44  ;;  %v3493_v43 = vld [vmem:[%s4269_s10 + $0x4cc] ss:$16 sps:$4 sm:$0xff]  }
 0x12d   : > { %2569 = vmatprep.subr.bf16.mxu1 %v3412_v45  ;;  %v3496_v44 = vld [vmem:[%s4269_s10 + $0x6cc] ss:$16 sps:$4 sm:$0xff]   ;;  %v3491_v45 = vld [vmem:[%s4269_s10 + $0x4c8] ss:$16 sps:$4 sm:$0xff]  }
 0x12f   : > { %2529 = vmatpush1.bf16.msra.mxu0 %v3407_v46  ;;  %v3494_v46 = vld [vmem:[%s4269_s10 + $0x6c8] ss:$16 sps:$4 sm:$0xff]  }
 0x130   : > { %2570 = vmatpush1.bf16.msra.mxu1 %v3410_v47  ;;  %2530 = vmatprep.subr.bf16.mxu0 %v3415_v25  ;;  %v3499_v47 = vld [vmem:[%s4269_s10 + $0x4ac] ss:$16 sps:$4 sm:$0xff]  }
 0x131   : > { %2571 = vmatprep.subr.bf16.mxu1 %v3418_v27  ;;  %v3502_v25 = vld [vmem:[%s4269_s10 + $0x6ac] ss:$16 sps:$4 sm:$0xff]  }
 0x132   : > { %v3505_v27 = vld [vmem:[%s4269_s10 + $0x48c] ss:$16 sps:$4 sm:$0xff]  }
 0x133   : > { %2531 = vmatpush1.bf16.msra.mxu0 %v3413_v48  ;;  %v3508_v48 = vld [vmem:[%s4269_s10 + $0x68c] ss:$16 sps:$4 sm:$0xff]  }
 0x134   : > { %2572 = vmatpush1.bf16.msra.mxu1 %v3416_v49  ;;  %2532 = vmatprep.subr.bf16.mxu0 %v3421_v50  ;;  %v3503_v49 = vld [vmem:[%s4269_s10 + $0x488] ss:$16 sps:$4 sm:$0xff]   ;;  %v3514_v50 = vld [vmem:[%s4269_s10 + $0x66c] ss:$16 sps:$4 sm:$0xff]  }
 0x135   : > { %2573 = vmatprep.subr.bf16.mxu1 %v3424_v51  ;;  %v3509_v51 = vld [vmem:[%s4269_s10 + $0x468] ss:$16 sps:$4 sm:$0xff]  }
 0x137   : > { %2533 = vmatpush1.bf16.msra.mxu0 %v3419_v52  ;;  %v3512_v52 = vld [vmem:[%s4269_s10 + $0x668] ss:$16 sps:$4 sm:$0xff]  }
 0x138   : > { %2574 = vmatpush1.bf16.msra.mxu1 %v3422_v53  ;;  %2534 = vmatprep.subr.bf16.mxu0 %v3427_v54  ;;  %v3517_v53 = vld [vmem:[%s4269_s10 + $0x44c] ss:$16 sps:$4 sm:$0xff]  }
 0x139   : > { %2575 = vmatprep.subr.bf16.mxu1 %v3430_v55  ;;  %v3520_v54 = vld [vmem:[%s4269_s10 + $0x64c] ss:$16 sps:$4 sm:$0xff]   ;;  %v3515_v55 = vld [vmem:[%s4269_s10 + $0x448] ss:$16 sps:$4 sm:$0xff]  }
 0x13b   : > { %2535 = vmatpush1.bf16.msra.mxu0 %v3425_v56  ;;  %v3518_v56 = vld [vmem:[%s4269_s10 + $0x648] ss:$16 sps:$4 sm:$0xff]  }
 0x13c   : > { %2576 = vmatpush1.bf16.msra.mxu1 %v3428_v57  ;;  %2536 = vmatprep.subr.bf16.mxu0 %v3433_v58  ;;  %v3523_v57 = vld [vmem:[%s4269_s10 + $0x42c] ss:$16 sps:$4 sm:$0xff]  }
 0x13d   : > { %2577 = vmatprep.subr.bf16.mxu1 %v3436_v59  ;;  %v3526_v58 = vld [vmem:[%s4269_s10 + $0x62c] ss:$16 sps:$4 sm:$0xff]   ;;  %v3521_v59 = vld [vmem:[%s4269_s10 + $0x428] ss:$16 sps:$4 sm:$0xff]  }
 0x13f   : > { %2537 = vmatpush1.bf16.msra.mxu0 %v3431_v60  ;;  %v3524_v60 = vld [vmem:[%s4269_s10 + $0x628] ss:$16 sps:$4 sm:$0xff]  }
 0x140   : > { %2578 = vmatpush1.bf16.msra.mxu1 %v3434_v61  ;;  %2538 = vmatprep.subr.bf16.mxu0 %v3439_v62  ;;  %v3529_v61 = vld [vmem:[%s4269_s10 + $0x40c] ss:$16 sps:$4 sm:$0xff]  }
 0x141   : > { %2579 = vmatprep.subr.bf16.mxu1 %v3442_v63  ;;  %v3532_v62 = vld [vmem:[%s4269_s10 + $0x60c] ss:$16 sps:$4 sm:$0xff]   ;;  %v3527_v63 = vld [vmem:[%s4269_s10 + $0x408] ss:$16 sps:$4 sm:$0xff]  }
 0x143   : > { %2539 = vmatpush2.bf16.msra.mxu0 %v3437_v0  ;;  %v3530_v0 = vld [vmem:[%s4269_s10 + $0x608] ss:$16 sps:$4 sm:$0xff]  }
 0x144   : > { %2580 = vmatpush2.bf16.msra.mxu1 %v3440_v1  ;;  %2540 = vmatprep.subr.bf16.mxu0 %v3445_v2  ;;  %v3535_v1 = vld [vmem:[%s4269_s10 + $0x5ec] ss:$16 sps:$4 sm:$0xff]  }
 0x145   : > { %2581 = vmatprep.subr.bf16.mxu1 %v3448_v3  ;;  %v3538_v2 = vld [vmem:[%s4269_s10 + $0x7ec] ss:$16 sps:$4 sm:$0xff]   ;;  %v3533_v3 = vld [vmem:[%s4269_s10 + $0x5e8] ss:$16 sps:$4 sm:$0xff]  }
 0x147   : > { %2541 = vmatpush2.bf16.msra.mxu0 %v3443_v5  ;;  %v3536_v5 = vld [vmem:[%s4269_s10 + $0x7e8] ss:$16 sps:$4 sm:$0xff]  }
 0x148   : > { %2582 = vmatpush2.bf16.msra.mxu1 %v3446_v6  ;;  %2542 = vmatprep.subr.bf16.mxu0 %v3451_v7  ;;  %v3541_v6 = vld [vmem:[%s4269_s10 + $0x5cc] ss:$16 sps:$4 sm:$0xff]  }
 0x149   : > { %2583 = vmatprep.subr.bf16.mxu1 %v3454_v8  ;;  %v3544_v7 = vld [vmem:[%s4269_s10 + $0x7cc] ss:$16 sps:$4 sm:$0xff]   ;;  %v3539_v8 = vld [vmem:[%s4269_s10 + $0x5c8] ss:$16 sps:$4 sm:$0xff]  }
 0x14b   : > { %2543 = vmatpush2.bf16.msra.mxu0 %v3449_v9  ;;  %v3542_v9 = vld [vmem:[%s4269_s10 + $0x7c8] ss:$16 sps:$4 sm:$0xff]  }
 0x14c   : > { %2584 = vmatpush2.bf16.msra.mxu1 %v3452_v10  ;;  %2544 = vmatprep.subr.bf16.mxu0 %v3457_v12  ;;  %v3547_v10 = vld [vmem:[%s4269_s10 + $0x5ac] ss:$16 sps:$4 sm:$0xff]  }
 0x14d   : > { %2585 = vmatprep.subr.bf16.mxu1 %v3460_v13  ;;  %v3550_v12 = vld [vmem:[%s4269_s10 + $0x7ac] ss:$16 sps:$4 sm:$0xff]   ;;  %v3545_v13 = vld [vmem:[%s4269_s10 + $0x5a8] ss:$16 sps:$4 sm:$0xff]  }
 0x14f   : > { %2545 = vmatpush2.bf16.msra.mxu0 %v3455_v14  ;;  %v3548_v14 = vld [vmem:[%s4269_s10 + $0x7a8] ss:$16 sps:$4 sm:$0xff]  }
 0x150   : > { %2586 = vmatpush2.bf16.msra.mxu1 %v3458_v17  ;;  %2546 = vmatprep.subr.bf16.mxu0 %v3463_v18  ;;  %v3553_v17 = vld [vmem:[%s4269_s10 + $0x58c] ss:$16 sps:$4 sm:$0xff]  }
 0x151   : > { %2587 = vmatprep.subr.bf16.mxu1 %v3466_v21  ;;  %v3556_v18 = vld [vmem:[%s4269_s10 + $0x78c] ss:$16 sps:$4 sm:$0xff]   ;;  %v3551_v21 = vld [vmem:[%s4269_s10 + $0x588] ss:$16 sps:$4 sm:$0xff]  }
 0x153   : > { %2547 = vmatpush2.bf16.msra.mxu0 %v3461_v22  ;;  %v3554_v22 = vld [vmem:[%s4269_s10 + $0x788] ss:$16 sps:$4 sm:$0xff]  }
 0x154   : > { %2588 = vmatpush2.bf16.msra.mxu1 %v3464_v24  ;;  %2548 = vmatprep.subr.bf16.mxu0 %v3469_v15  ;;  %v3559_v24 = vld [vmem:[%s4269_s10 + $0x56c] ss:$16 sps:$4 sm:$0xff]  }
 0x155   : > { %2589 = vmatprep.subr.bf16.mxu1 %v3472_v26  ;;  %v3562_v15 = vld [vmem:[%s4269_s10 + $0x76c] ss:$16 sps:$4 sm:$0xff]   ;;  %v3557_v26 = vld [vmem:[%s4269_s10 + $0x568] ss:$16 sps:$4 sm:$0xff]  }
 0x157   : > { %2549 = vmatpush2.bf16.msra.mxu0 %v3467_v28  ;;  %v3560_v28 = vld [vmem:[%s4269_s10 + $0x768] ss:$16 sps:$4 sm:$0xff]  }
 0x158   : > { %2590 = vmatpush2.bf16.msra.mxu1 %v3470_v29  ;;  %2550 = vmatprep.subr.bf16.mxu0 %v3475_v30  ;;  %v3565_v29 = vld [vmem:[%s4269_s10 + $0x54c] ss:$16 sps:$4 sm:$0xff]  }
 0x159   : > { %2591 = vmatprep.subr.bf16.mxu1 %v3478_v31  ;;  %v3568_v30 = vld [vmem:[%s4269_s10 + $0x74c] ss:$16 sps:$4 sm:$0xff]   ;;  %v3563_v31 = vld [vmem:[%s4269_s10 + $0x548] ss:$16 sps:$4 sm:$0xff]  }
 0x15b   : > { %2551 = vmatpush2.bf16.msra.mxu0 %v3473_v32  ;;  %v3566_v32 = vld [vmem:[%s4269_s10 + $0x748] ss:$16 sps:$4 sm:$0xff]  }
 0x15c   : > { %2592 = vmatpush2.bf16.msra.mxu1 %v3476_v34  ;;  %2552 = vmatprep.subr.bf16.mxu0 %v3481_v35  ;;  %v3571_v34 = vld [vmem:[%s4269_s10 + $0x52c] ss:$16 sps:$4 sm:$0xff]  }
 0x15d   : > { %2593 = vmatprep.subr.bf16.mxu1 %v3484_v36  ;;  %v3574_v35 = vld [vmem:[%s4269_s10 + $0x72c] ss:$16 sps:$4 sm:$0xff]   ;;  %v3569_v36 = vld [vmem:[%s4269_s10 + $0x528] ss:$16 sps:$4 sm:$0xff]  }
 0x15f   : > { %2553 = vmatpush2.bf16.msra.mxu0 %v3479_v37  ;;  %v3572_v37 = vld [vmem:[%s4269_s10 + $0x728] ss:$16 sps:$4 sm:$0xff]  }
 0x160   : > { %2594 = vmatpush2.bf16.msra.mxu1 %v3482_v38  ;;  %2604 = vmatprep.subr.bf16.mxu0 %v3487_v39  ;;  %v3577_v38 = vld [vmem:[%s4269_s10 + $0x50c] ss:$16 sps:$4 sm:$0xff]  }
 0x161   : > { %2645 = vmatprep.subr.bf16.mxu1 %v3490_v40  ;;  %v3580_v39 = vld [vmem:[%s4269_s10 + $0x70c] ss:$16 sps:$4 sm:$0xff]   ;;  %v3575_v40 = vld [vmem:[%s4269_s10 + $0x508] ss:$16 sps:$4 sm:$0xff]  }
 0x162   : > { %2555 = vmatmul.mubr.bf16.vlgmr.msra.gmra.mxu0 %v4363_v19  ;;  %v3497_v19 = vld [vmem:[%s4269_s10 + $0x4a8] ss:$16 sps:$4 sm:$0xff]  }
 0x163   : > { %2596 = vmatmul.mubr.bf16.vlgmr.msra.gmra.mxu1 %v4372_v16  ;;  %2605 = vmatpush1.bf16.msra.mxu0 %v3485_v41  ;;  %v3500_v16 = vld [vmem:[%s4269_s10 + $0x6a8] ss:$16 sps:$4 sm:$0xff]  }
 0x164   : > { %2646 = vmatpush1.bf16.msra.mxu1 %v3488_v42  ;;  %2606 = vmatprep.subr.bf16.mxu0 %v3493_v43  ;;  %v3578_v41 = vld [vmem:[%s4269_s10 + $0x708] ss:$16 sps:$4 sm:$0xff]  }
 0x165   : > { %2647 = vmatprep.subr.bf16.mxu1 %v3496_v44  ;;  %2636 = vmatprep.mubr.bf16.mxu0 %v4368_v23  ;;  %v3506_v23 = vld [vmem:[%s4269_s10 + $0x688] ss:$16 sps:$4 sm:$0xff]  }
 0x166   : > { %2677 = vmatprep.mubr.bf16.mxu1 %v4380_v11  ;;  %v3511_v11 = vld [vmem:[%s4269_s10 + $0x46c] ss:$16 sps:$4 sm:$0xff]  }
 0x167   : > { %2607 = vmatpush1.bf16.msra.mxu0 %v3491_v45 }
 0x168   : > { %2648 = vmatpush1.bf16.msra.mxu1 %v3494_v46  ;;  %2608 = vmatprep.subr.bf16.mxu0 %v3499_v47 }
 0x169   : > { %2649 = vmatprep.subr.bf16.mxu1 %v3502_v25 }
 0x16b   : > { %2609 = vmatpush1.bf16.msra.mxu0 %v3497_v19 }
 0x16c   : > { %2650 = vmatpush1.bf16.msra.mxu1 %v3500_v16  ;;  %2610 = vmatprep.subr.bf16.mxu0 %v3505_v27 }
 0x16d   : > { %2651 = vmatprep.subr.bf16.mxu1 %v3508_v48 }
 0x16f   : > { %2611 = vmatpush1.bf16.msra.mxu0 %v3503_v49 }
 0x170   : > { %2652 = vmatpush1.bf16.msra.mxu1 %v3506_v23  ;;  %2612 = vmatprep.subr.bf16.mxu0 %v3511_v11 }
 0x171   : > { %2653 = vmatprep.subr.bf16.mxu1 %v3514_v50 }
 0x173   : > { %2613 = vmatpush1.bf16.msra.mxu0 %v3509_v51 }
 0x174   : > { %2654 = vmatpush1.bf16.msra.mxu1 %v3512_v52  ;;  %2614 = vmatprep.subr.bf16.mxu0 %v3517_v53 }
 0x175   : > { %2655 = vmatprep.subr.bf16.mxu1 %v3520_v54 }
 0x177   : > { %2615 = vmatpush1.bf16.msra.mxu0 %v3515_v55 }
 0x178   : > { %2656 = vmatpush1.bf16.msra.mxu1 %v3518_v56  ;;  %2616 = vmatprep.subr.bf16.mxu0 %v3523_v57 }
 0x179   : > { %2657 = vmatprep.subr.bf16.mxu1 %v3526_v58 }
 0x17b   : > { %2617 = vmatpush1.bf16.msra.mxu0 %v3521_v59 }
 0x17c   : > { %2658 = vmatpush1.bf16.msra.mxu1 %v3524_v60  ;;  %2618 = vmatprep.subr.bf16.mxu0 %v3529_v61 }
 0x17d   : > { %2659 = vmatprep.subr.bf16.mxu1 %v3532_v62 }
 0x17f   : > { %2619 = vmatpush1.bf16.msra.mxu0 %v3527_v63 }
 0x180   : > { %2660 = vmatpush1.bf16.msra.mxu1 %v3530_v0  ;;  %2620 = vmatprep.subr.bf16.mxu0 %v3535_v1 }
 0x181   : > { %2661 = vmatprep.subr.bf16.mxu1 %v3538_v2  ;;  %v2718_v2 = vsub.s32 0, %v4267_v4 }
 0x183   : > { %2621 = vmatpush2.bf16.msra.mxu0 %v3533_v3  ;;  %v2722_v3 = vsub.s32 1, %v4267_v4 }
 0x184   : > { %2662 = vmatpush2.bf16.msra.mxu1 %v3536_v5  ;;  %2622 = vmatprep.subr.bf16.mxu0 %v3541_v6  ;;  %v2726_v5 = vsub.s32 2, %v4267_v4  ;;  %v2730_v6 = vsub.s32 3, %v4267_v4 }
 0x185   : > { %2663 = vmatprep.subr.bf16.mxu1 %v3544_v7  ;;  %v2714_v7 = vld [vmem:[%s754_s21] sm:$0xf] }
 0x187   : > { %2623 = vmatpush2.bf16.msra.mxu0 %v3539_v8  ;;  %v3660_v8 = vmov 1983009808  }
 0x188   : > { %2664 = vmatpush2.bf16.msra.mxu1 %v3542_v9  ;;  %2624 = vmatprep.subr.bf16.mxu0 %v3547_v10  ;;  %v2693_v9 = vunpack.c.l.s4 %v3660_v8  ;;  %v2719_v10 = vrot.slane %v2714_v7, %v2718_v2 }
 0x189   : > { %2665 = vmatprep.subr.bf16.mxu1 %v3550_v12  ;;  %v2723_v12 = vrot.slane %v2714_v7, %v2722_v3 }
 0x18b   : > { %2625 = vmatpush2.bf16.msra.mxu0 %v3545_v13  ;;  %v2727_v13 = vrot.slane %v2714_v7, %v2726_v5 }
 0x18c   : > { %2666 = vmatpush2.bf16.msra.mxu1 %v3548_v14  ;;  %2626 = vmatprep.subr.bf16.mxu0 %v3553_v17  ;;  %v2731_v14 = vrot.slane %v2714_v7, %v2730_v6  ;;  %v2694_v17 = vunpack.c.0.s8 %v2693_v9 }
 0x18d   : > { %2667 = vmatprep.subr.bf16.mxu1 %v3556_v18 }
 0x18f   : > { %2627 = vmatpush2.bf16.msra.mxu0 %v3551_v21 }
 0x190   : > { %2668 = vmatpush2.bf16.msra.mxu1 %v3554_v22  ;;  %2628 = vmatprep.subr.bf16.mxu0 %v3559_v24 }
 0x191   : > { %2669 = vmatprep.subr.bf16.mxu1 %v3562_v15  ;;  %v2732_v15 = vcombine.low %v2719_v10, %v2723_v12 }
 0x193   : > { %2629 = vmatpush2.bf16.msra.mxu0 %v3557_v26  ;;  %v2733_v26 = vcombine.low %v2727_v13, %v2731_v14 }
 0x194   : > { %2670 = vmatpush2.bf16.msra.mxu1 %v3560_v28  ;;  %2630 = vmatprep.subr.bf16.mxu0 %v3565_v29 }
 0x195   : > { %2671 = vmatprep.subr.bf16.mxu1 %v3568_v30  ;;  %v2697_v30 = vsub.s32 %v2694_v17, %v4267_v4 }
 0x197   : > { %2631 = vmatpush2.bf16.msra.mxu0 %v3563_v31 }
 0x198   : > { %2672 = vmatpush2.bf16.msra.mxu1 %v3566_v32  ;;  %2632 = vmatprep.subr.bf16.mxu0 %v3571_v34 }
 0x199   : > { %2673 = vmatprep.subr.bf16.mxu1 %v3574_v35 }
 0x19b   : > { %2633 = vmatpush2.bf16.msra.mxu0 %v3569_v36 }
 0x19c   : > { %2674 = vmatpush2.bf16.msra.mxu1 %v3572_v37  ;;  %2634 = vmatprep.subr.bf16.mxu0 %v3577_v38  ;;  %v2740_v37 = vrot.slane %v2732_v15, %v2697_v30  ;;  %v2747_v38 = vrot.slane %v2733_v26, %v2697_v30 }
 0x19d   : > { %2675 = vmatprep.subr.bf16.mxu1 %v3580_v39 }
 0x19f   : > { %2635 = vmatpush2.bf16.msra.mxu0 %v3575_v40 }
 0x1a0   : > { %2676 = vmatpush2.bf16.msra.mxu1 %v3578_v41 }
 0x1a2   : > { %v2392_v42 = vpop.f32.mrf.mxu0  ;;  %2637 = vmatmul.mubr.bf16.vlgmr.msra.gmra.mxu0 %v4293_v20 }
 0x1a3   : > { %v2433_v43 = vpop.f32.mrf.mxu1  ;;  %2678 = vmatmul.mubr.bf16.vlgmr.msra.gmra.mxu1 %v4448_v33 }
 0x1a4   : > { %v2434_v44 = vadd.f32 %v2433_v43, %v2392_v42  ;;  %v2394_v45 = vpop.f32.mrf.mxu0 }
 0x1a5   : > { %v2435_v46 = vpop.f32.mrf.mxu1 }
 0x1a6   : > { %v2436_v47 = vadd.f32 %v2435_v46, %v2394_v45  ;;  %v2396_v25 = vpop.f32.mrf.mxu0 }
 0x1a7   : > { %v2437_v19 = vpop.f32.mrf.mxu1 }
 0x1a8   : > { %v2397_v16 = vpop.f32.mrf.mxu0 }
 0x1a9   : > { %v2438_v27 = vpop.f32.mrf.mxu1 }
 0x1e2   : > { %v2474_v48 = vpop.f32.mrf.mxu0 }
 0x1e3   : > { %v2515_v49 = vpop.f32.mrf.mxu1  ;;  %v2475_v23 = vadd.f32 %v2474_v48, %v2434_v44  ;;  %v2748_v44 = vcombine.low %v2740_v37, %v2747_v38 }
 0x1e4   : > { %v2476_v11 = vpop.f32.mrf.mxu0 }
 0x1e5   : > { %v2517_v50 = vpop.f32.mrf.mxu1  ;;  %v2516_v51 = vadd.f32 %v2515_v49, %v2475_v23  ;;  %v2477_v52 = vadd.f32 %v2476_v11, %v2436_v47 }
 0x1e6   : > { %v2478_v53 = vpop.f32.mrf.mxu0 }
 0x1e7   : > { %v2519_v20 = vpop.f32.mrf.mxu1  ;;  %v2518_v54 = vadd.f32 %v2517_v50, %v2477_v52 }
 0x1e8   : > { %v2479_v33 = vpop.f32.mrf.mxu0 }
 0x1e9   : > { %v2520_v55 = vpop.f32.mrf.mxu1  ;;  %v2690_v56 = vcombine.low %v2516_v51, %v2518_v54 }
 0x1eb   : > { %v2698_v42 = vrot.slane %v2690_v56, %v2697_v30 }
 0x222   : > { %v2556_v57 = vpop.f32.mrf.mxu0 }
 0x223   : > { %v2597_v58 = vpop.f32.mrf.mxu1 }
 0x224   : > { %v2598_v59 = vadd.f32 %v2597_v58, %v2556_v57  ;;  %v2558_v60 = vpop.f32.mrf.mxu0 }
 0x225   : > { %v2599_v61 = vpop.f32.mrf.mxu1 }
 0x226   : > { %v2560_v62 = vpop.f32.mrf.mxu0  ;;  %v2600_v22 = vadd.f32 %v2599_v61, %v2558_v60 }
 0x227   : > { %v2601_v63 = vpop.f32.mrf.mxu1 }
 0x228   : > { %v2561_v0 = vpop.f32.mrf.mxu0 }
 0x229   : > { %v2602_v1 = vpop.f32.mrf.mxu1 }
 0x262   : > { %v2638_v18 = vpop.f32.mrf.mxu0 }
 0x263   : > { %v2679_v21 = vpop.f32.mrf.mxu1  ;;  %v2639_v24 = vadd.f32 %v2638_v18, %v2598_v59 }
 0x264   : > { %v2640_v28 = vpop.f32.mrf.mxu0 }
 0x265   : > { %v2681_v29 = vpop.f32.mrf.mxu1  ;;  %v2641_v31 = vadd.f32 %v2640_v28, %v2600_v22  ;;  %v2680_v35 = vadd.f32 %v2679_v21, %v2639_v24 }
 0x266   : > { %v2642_v32 = vpop.f32.mrf.mxu0 }
 0x267   : > { %v2683_v34 = vpop.f32.mrf.mxu1  ;;  %v2682_v36 = vadd.f32 %v2681_v29, %v2641_v31 }
 0x268   : > { %v2643_v39 = vpop.f32.mrf.mxu0 }
 0x269   : > { %v2684_v40 = vpop.f32.mrf.mxu1  ;;  %v2691_v41 = vcombine.low %v2680_v35, %v2682_v36 }
 0x26b   : > { %v2705_v43 = vrot.slane %v2691_v41, %v2697_v30 }
 0x26d   : > { %v2706_v4 = vcombine.low %v2698_v42, %v2705_v43 }
 0x26f   : > { %v2750_v45 = vadd.f32 %v2748_v44, %v2706_v4 }
 0x271   : > { %2751 = vst [vmem:[%s743_s27] sm:$0xff] %v2750_v45 }
 0x272   : > { %3594 = shalt.err (!%p3591_p8)
}
 0x273   : > { %s3595_s10 = scalar_lea.hbm %s2765_s4, 128  ;;  %s3599_s18 = scalar_lea.hbm %s4638_s3, 512 }
 0x274   : > { %p3596_p10 = scmp.ne.s32.totalorder %s2765_s4, %s3595_s10  ;;  %p3600_p13 = scmp.lt.s32.totalorder %s2765_s4, %s4638_s3 }
 0x275   : > { %p3601_p0 = scmp.lt.s32.totalorder %s3599_s18, %s3595_s10 }
 0x276   : > { %p3597_p11 = pnand %p3596_p10, %p3721_p5 }
 0x277   : > { %p3602_p1 = por %p3601_p0, %p3600_p13 }
 0x278   : > { %p3598_p12 = pneg %p3597_p11 }
 0x27a   : > { %p3603_p2 = pnand %p3602_p1, %p3598_p12 }
 0x27c   : > { %3606 = shalt.err (!%p3603_p2)
}
 0x27d   : > { %3139 = dma.vmem_to_hbm [thread:$0]  (%p3721_p5), %s2768_s28, 128, %s2765_s4, %s2753_s5  }
 0x27e PF: > { %p3145_p3 = scmp.ge.s32.totalorder %s3657_s17, 2  ;;  %s2779_s23 = sand.u32 1, %s3637_s12  }
 0x27f   : > { %s2780_s26 = scalar_lea.sflag [#allocation5], %s2779_s23 }
 0x280   : > { %p3142_p4 = pnand %p3145_p3, %p3732_p9 }
 0x282   : > { %p3143_p6 = pneg %p3142_p4 }
 0x284   : > { %3632 = dma.done.wait (%p3143_p6), %s2780_s26, 128  }
 0x285   : > { %3634 = vsyncadd (%p3143_p6), %s2780_s26, 4294967168  ;;  %s16_s17 = sadd.s32 1, %s3657_s17   ;;  %s4641_s12 = smov %s3641_s13 }
 0x286   : > { %p13_p7 = scmp.ge.s32.totalorder %s16_s17, 6   ;;  %s4642_s13 = smov %s3645_s14 }
 0x287   : > { %s4643_s14 = smov %s3730_s24  ;;  %s4644_s15 = smov %s3653_s16 }
 0x288   : > { %s4645_s16 = smov %s4647_s20  ;;  %15 = sbr.rel (!%p13_p7) target bundleno = 4 (0x4), region = 109 }
 0x28d   :  { %2785 = vsyncpa [#allocation5], 1 }
 0x28e   :  { %2787 = vsyncpa [#allocation5 + $0x1], 1 }

</bundles_post_ra>
